<compile_context>
chip_gen: v6e
topology: v6e:2x2x1
jax: 0.10.0
libtpu: 0.0.40
codegen_flags: <defaults>
</compile_context>

<pallas_src>
import jax
import jax.numpy as jnp
from jax.experimental import pallas as pl
from jax.experimental.pallas import tpu as pltpu


# ----------------------------------------------------------------------------
# In-kernel helpers (gate order in packed weights is [i, f, o, g]).
# ----------------------------------------------------------------------------
def _dual_lstm_nonlin(gates_f, gates_b, cf, cb, H):
    """Nonlinearity block for the two independent direction chains (interleaved)."""
    sf = jax.nn.sigmoid(gates_f[:, :3 * H])
    sb = jax.nn.sigmoid(gates_b[:, :3 * H])
    gf = jnp.tanh(gates_f[:, 3 * H:])
    gb = jnp.tanh(gates_b[:, 3 * H:])
    cf = sf[:, H:2 * H] * cf + sf[:, :H] * gf
    cb = sb[:, H:2 * H] * cb + sb[:, :H] * gb
    hf = sf[:, 2 * H:] * jnp.tanh(cf)
    hb = sb[:, 2 * H:] * jnp.tanh(cb)
    return hf, cf, hb, cb


def _run_bilstm_layer(x2d_bf16, T, B, wih, b, whh_f, whh_b, xg_sc, y_ref):
    """Hoisted input projection (one (T*B,D)x(D,8H) MXU matmul for both directions)
    + fused-direction recurrence with static time indices.  Writes (T,B,2H) to y_ref."""
    H4 = whh_f.shape[1]
    H = H4 // 4
    xg_sc[...] = (jnp.dot(x2d_bf16, wih, preferred_element_type=jnp.float32)
                  + b).reshape(T, B, 2 * H4)
    hf = jnp.zeros((B, H), jnp.float32)
    cf = hf
    hb = hf
    cb = hf
    for t in range(T):                          # static indices: zero-cost addressing
        tb = T - 1 - t                          # backward direction walks reversed
        gf = xg_sc[t, :, :H4] + jnp.dot(hf.astype(jnp.bfloat16), whh_f,
                                        preferred_element_type=jnp.float32)
        gb = xg_sc[tb, :, H4:] + jnp.dot(hb.astype(jnp.bfloat16), whh_b,
                                         preferred_element_type=jnp.float32)
        hf, cf, hb, cb = _dual_lstm_nonlin(gf, gb, cf, cb, H)
        y_ref[t, :, :H] = hf.astype(y_ref.dtype)
        y_ref[tb, :, H:] = hb.astype(y_ref.dtype)


# ----------------------------------------------------------------------------
# Kernel A (only used when h_RNN_layers > 2): one standalone bidirectional layer.
# Emits the inter-layer activation to HBM in bf16.
# ----------------------------------------------------------------------------
def _bilstm_layer_kernel(x_ref, wih_ref, b_ref, whhf_ref, whhb_ref, y_ref,
                         xg_sc, y_sc):
    T, B, D = x_ref.shape
    _run_bilstm_layer(x_ref[...].reshape(T * B, D), T, B,
                      wih_ref[...], b_ref[...], whhf_ref[...], whhb_ref[...],
                      xg_sc, y_sc)
    y_ref[...] = y_sc[...].astype(y_ref.dtype)


def bilstm_layer(x_tbd, lp):
    """x_tbd: (T, B, D) bf16 -> (T, B, 2H) bf16.  lp: packed layer params."""
    T, B, D = x_tbd.shape
    H4 = lp["whh_f"].shape[1]
    H = H4 // 4
    return pl.pallas_call(
        _bilstm_layer_kernel,
        out_shape=jax.ShapeDtypeStruct((T, B, 2 * H), jnp.bfloat16),
        grid=(1,),
        in_specs=[
            pl.BlockSpec((T, B, D), lambda i: (0, 0, 0)),
            pl.BlockSpec((D, 2 * H4), lambda i: (0, 0)),
            pl.BlockSpec((1, 2 * H4), lambda i: (0, 0)),
            pl.BlockSpec((H, H4), lambda i: (0, 0)),
            pl.BlockSpec((H, H4), lambda i: (0, 0)),
        ],
        out_specs=pl.BlockSpec((T, B, 2 * H), lambda i: (0, 0, 0)),
        scratch_shapes=[pltpu.VMEM((T, B, 2 * H4), jnp.float32),
                        pltpu.VMEM((T, B, 2 * H), jnp.float32)],
        compiler_params=pltpu.CompilerParams(dimension_semantics=("arbitrary",)),
    )(x_tbd, lp["wih"], lp["b"], lp["whh_f"], lp["whh_b"])


# ----------------------------------------------------------------------------
# Kernel B: fused tail -- penultimate layer + final layer + FC head in one call.
# Only (B, C_pad) leaves VMEM.
# ----------------------------------------------------------------------------
def _fused_tail_kernel(x_ref,
                       wih0_ref, b0_ref, whh0f_ref, whh0b_ref,
                       wih1_ref, b1_ref, whh1f_ref,
                       fc1w_ref, fc1b_ref, fc2w_ref, fc2b_ref,
                       out_ref,
                       xg0_sc, y0_sc, xg1_sc):
    T, B, D = x_ref.shape
    H4 = whh0f_ref.shape[1]
    H = H4 // 4
    H2 = 2 * H

    # ---- penultimate layer: fused-direction bidirectional LSTM, stays in VMEM ----
    _run_bilstm_layer(x_ref[...].reshape(T * B, D), T, B,
                      wih0_ref[...], b0_ref[...], whh0f_ref[...], whh0b_ref[...],
                      xg0_sc, y0_sc)

    # ---- final layer: only RNN_out[:, -1, :] feeds the head ----
    # Split projection: full-T matmul for the forward direction only...
    y0_2d = y0_sc[...].reshape(T * B, H2).astype(jnp.bfloat16)
    xg1_sc[...] = (jnp.dot(y0_2d, wih1_ref[:, :H4],
                           preferred_element_type=jnp.float32)
                   + b1_ref[:, :H4]).reshape(T, B, H4)
    # ...and a single-row matmul for the backward direction (it only needs t = T-1).
    y0_last = y0_sc[T - 1].astype(jnp.bfloat16)                       # (B, 2H)
    xg1b = (jnp.dot(y0_last, wih1_ref[:, H4:],
                    preferred_element_type=jnp.float32) + b1_ref[:, H4:])

    # Forward recurrence over all T steps (state in registers).
    whh1f = whh1f_ref[...]
    hf = jnp.zeros((B, H), jnp.float32)
    cf = hf
    for t in range(T):
        gates = xg1_sc[t] + jnp.dot(hf.astype(jnp.bfloat16), whh1f,
                                    preferred_element_type=jnp.float32)
        s = jax.nn.sigmoid(gates[:, :3 * H])
        g = jnp.tanh(gates[:, 3 * H:])
        cf = s[:, H:2 * H] * cf + s[:, :H] * g
        hf = s[:, 2 * H:] * jnp.tanh(cf)

    # Backward half of the last timestep: one cell step from ZERO state on y0[T-1];
    # its h @ W_hh term is exactly zero, so no matmul is needed at all.
    sb = jax.nn.sigmoid(xg1b[:, :3 * H])
    gb = jnp.tanh(xg1b[:, 3 * H:])
    cb = sb[:, :H] * gb                          # f_gate * c_prev == 0
    hb = sb[:, 2 * H:] * jnp.tanh(cb)

    # ---- FC head (dropout is identity in eval mode) ----
    last = jnp.concatenate([hf, hb], axis=-1).astype(jnp.bfloat16)    # (B, 2H)
    h1 = jnp.dot(last, fc1w_ref[...], preferred_element_type=jnp.float32) + fc1b_ref[...]
    h1 = jnp.maximum(h1, 0.0)
    out = jnp.dot(h1.astype(jnp.bfloat16), fc2w_ref[...],
                  preferred_element_type=jnp.float32) + fc2b_ref[...]
    out_ref[...] = out                           # (B, C_pad): lane-dense, unmasked store


def fused_tail_and_head(x_tbd, l0, l1, pk):
    """Last two LSTM layers + FC head in one pallas_call.  Returns (B, C_pad) f32."""
    T, B, D = x_tbd.shape
    H = pk["H"]
    H4 = 4 * H
    H2 = 2 * H
    F_hid = pk["fc1_w"].shape[1]
    Cp = pk["fc2_w"].shape[1]
    return pl.pallas_call(
        _fused_tail_kernel,
        out_shape=jax.ShapeDtypeStruct((B, Cp), jnp.float32),
        grid=(1,),
        in_specs=[
            pl.BlockSpec((T, B, D), lambda i: (0, 0, 0)),
            pl.BlockSpec((D, 2 * H4), lambda i: (0, 0)),
            pl.BlockSpec((1, 2 * H4), lambda i: (0, 0)),
            pl.BlockSpec((H, H4), lambda i: (0, 0)),
            pl.BlockSpec((H, H4), lambda i: (0, 0)),
            pl.BlockSpec((H2, 2 * H4), lambda i: (0, 0)),
            pl.BlockSpec((1, 2 * H4), lambda i: (0, 0)),
            pl.BlockSpec((H, H4), lambda i: (0, 0)),
            pl.BlockSpec((H2, F_hid), lambda i: (0, 0)),
            pl.BlockSpec((1, F_hid), lambda i: (0, 0)),
            pl.BlockSpec((F_hid, Cp), lambda i: (0, 0)),
            pl.BlockSpec((1, Cp), lambda i: (0, 0)),
        ],
        out_specs=pl.BlockSpec((B, Cp), lambda i: (0, 0)),
        scratch_shapes=[
            pltpu.VMEM((T, B, 2 * H4), jnp.float32),   # layer-0 xg (both directions)
            pltpu.VMEM((T, B, H2), jnp.float32),       # layer-0 output (VMEM-resident)
            pltpu.VMEM((T, B, H4), jnp.float32),       # final-layer fwd xg only
        ],
        compiler_params=pltpu.CompilerParams(dimension_semantics=("arbitrary",)),
    )(x_tbd,
      l0["wih"], l0["b"], l0["whh_f"], l0["whh_b"],
      l1["wih"], l1["b"], l1["whh_f"],
      pk["fc1_w"], pk["fc1_b"], pk["fc2_w"], pk["fc2_b"])


# ----------------------------------------------------------------------------
# One-time parameter packing (done at init/load time, NOT per forward call).
# ----------------------------------------------------------------------------
def _permute_gates_ifog(w, H):
    """PyTorch gate order [i, f, g, o] -> packed order [i, f, o, g] along axis 0."""
    return jnp.concatenate([w[:2 * H], w[3 * H:4 * H], w[2 * H:3 * H]], axis=0)


def pack_params(params, lane=128):
    lstm = params["lstm"]
    H = lstm[0]["w_hh"].shape[1]

    def pack_layer(p):
        wih = jnp.concatenate(
            [_permute_gates_ifog(p["w_ih"], H).T,
             _permute_gates_ifog(p["w_ih_r"], H).T], axis=1).astype(jnp.bfloat16)
        b = jnp.concatenate(
            [_permute_gates_ifog(p["b_ih"] + p["b_hh"], H),
             _permute_gates_ifog(p["b_ih_r"] + p["b_hh_r"], H)]
        ).reshape(1, 8 * H).astype(jnp.float32)
        return {"wih": wih, "b": b,
                "whh_f": _permute_gates_ifog(p["w_hh"], H).T.astype(jnp.bfloat16),
                "whh_b": _permute_gates_ifog(p["w_hh_r"], H).T.astype(jnp.bfloat16)}

    F_hid = params["fc1_w"].shape[0]
    C = params["fc2_w"].shape[0]
    Cp = ((C + lane - 1) // lane) * lane                 # pad fc2 lanes to 128
    fc2_w = jnp.zeros((F_hid, Cp), jnp.float32).at[:, :C].set(params["fc2_w"].T)
    fc2_b = jnp.zeros((1, Cp), jnp.float32).at[:, :C].set(params["fc2_b"])

    return {
        "H": H,
        "num_classes": C,
        "layers": [pack_layer(p) for p in lstm],
        "fc1_w": params["fc1_w"].T.astype(jnp.bfloat16),
        "fc1_b": params["fc1_b"].reshape(1, F_hid).astype(jnp.float32),
        "fc2_w": fc2_w.astype(jnp.bfloat16),
        "fc2_b": fc2_b,
    }


# ----------------------------------------------------------------------------
# Full DecoderRNN forward (eval mode)
# ----------------------------------------------------------------------------
def decoder_rnn_forward(x_btd, packed):
    """x_btd: (B, T, D) batch-first, like the PyTorch module.  packed: pack_params(...)."""
    layers = packed["layers"]
    assert len(layers) >= 2  # TODO(synk): h_RNN_layers == 1 path not implemented.
    # Single fused transpose + bf16 cast (halves the input DMA; MXU operands are bf16).
    x = jnp.transpose(x_btd, (1, 0, 2)).astype(jnp.bfloat16)
    for lp in layers[:-2]:                     # only when h_RNN_layers > 2
        x = bilstm_layer(x, lp)
    out_p = fused_tail_and_head(x, layers[-2], layers[-1], packed)
    return out_p[:, :packed["num_classes"]]


# ----------------------------------------------------------------------------
# Pure-JAX reference (lax.scan LSTM, same bf16-operand / f32-accum convention)
# ----------------------------------------------------------------------------
def _ref_lstm_dir(x_tbd, w_ih, w_hh, b_ih, b_hh):
    B = x_tbd.shape[1]
    wih_b = w_ih.T.astype(jnp.bfloat16)
    whh_b = w_hh.T.astype(jnp.bfloat16)
    b = (b_ih + b_hh).astype(jnp.float32)
    H = w_hh.shape[1]

    def step(carry, x_t):
        h, c = carry
        gates = (jnp.dot(x_t.astype(jnp.bfloat16), wih_b,
                         preferred_element_type=jnp.float32)
                 + jnp.dot(h.astype(jnp.bfloat16), whh_b,
                           preferred_element_type=jnp.float32) + b)
        i, f, g, o = jnp.split(gates, 4, axis=-1)
        c = jax.nn.sigmoid(f) * c + jax.nn.sigmoid(i) * jnp.tanh(g)
        h = jax.nn.sigmoid(o) * jnp.tanh(c)
        return (h, c), h

    init = (jnp.zeros((B, H), jnp.float32), jnp.zeros((B, H), jnp.float32))
    _, ys = jax.lax.scan(step, init, x_tbd)
    return ys


def decoder_rnn_reference(x_btd, params):
    x = jnp.transpose(x_btd, (1, 0, 2)).astype(jnp.float32)
    for p in params["lstm"]:
        y_f = _ref_lstm_dir(x, p["w_ih"], p["w_hh"], p["b_ih"], p["b_hh"])
        y_b = _ref_lstm_dir(x[::-1], p["w_ih_r"], p["w_hh_r"],
                            p["b_ih_r"], p["b_hh_r"])[::-1]
        x = jnp.concatenate([y_f, y_b], axis=-1)
    last = x[-1]
    h = jnp.maximum(jnp.dot(last.astype(jnp.bfloat16),
                            params["fc1_w"].T.astype(jnp.bfloat16),
                            preferred_element_type=jnp.float32)
                    + params["fc1_b"], 0.0)
    return (jnp.dot(h.astype(jnp.bfloat16),
                    params["fc2_w"].T.astype(jnp.bfloat16),
                    preferred_element_type=jnp.float32)
            + params["fc2_b"])


# ----------------------------------------------------------------------------
# Deterministic parameter init (PyTorch-style uniform(-1/sqrt(H), 1/sqrt(H)))
# ----------------------------------------------------------------------------
def init_params(key, d_in, h_rnn, n_layers, h_fc, n_classes):
    def u(k, shape, bound):
        return jax.random.uniform(k, shape, jnp.float32, -bound, bound)

    params = {"lstm": []}
    bound = 1.0 / float(jnp.sqrt(h_rnn))
    for li in range(n_layers):
        in_dim = d_in if li == 0 else 2 * h_rnn
        key, *ks = jax.random.split(key, 9)
        params["lstm"].append({
            "w_ih":   u(ks[0], (4 * h_rnn, in_dim), bound),
            "w_hh":   u(ks[1], (4 * h_rnn, h_rnn), bound),
            "b_ih":   u(ks[2], (4 * h_rnn,), bound),
            "b_hh":   u(ks[3], (4 * h_rnn,), bound),
            "w_ih_r": u(ks[4], (4 * h_rnn, in_dim), bound),
            "w_hh_r": u(ks[5], (4 * h_rnn, h_rnn), bound),
            "b_ih_r": u(ks[6], (4 * h_rnn,), bound),
            "b_hh_r": u(ks[7], (4 * h_rnn,), bound),
        })
    key, k1, k2, k3, k4 = jax.random.split(key, 5)
    b1 = 1.0 / float(jnp.sqrt(2 * h_rnn))
    b2 = 1.0 / float(jnp.sqrt(h_fc))
    params["fc1_w"] = u(k1, (h_fc, 2 * h_rnn), b1)
    params["fc1_b"] = u(k2, (h_fc,), b1)
    params["fc2_w"] = u(k3, (n_classes, h_fc), b2)
    params["fc2_b"] = u(k4, (n_classes,), b2)
    return params


if __name__ == "__main__":
    # Small TPU-friendly shapes consistent with the module: batch=8 (full sublanes),
    # time=8, feature=128, hidden=128 (bidir -> 256), fc=128, 32 classes, 2 layers.
    B, T, D = 8, 8, 128
    H_RNN, N_LAYERS, H_FC, N_CLASSES = 128, 2, 128, 32

    key = jax.random.PRNGKey(0)
    k_x, k_p = jax.random.split(key)
    x = jax.random.normal(k_x, (B, T, D), jnp.float32)
    params = init_params(k_p, D, H_RNN, N_LAYERS, H_FC, N_CLASSES)

    packed = pack_params(params)                 # one-time weight packing
    fwd = jax.jit(lambda xb: decoder_rnn_forward(xb, packed))

    out = jax.block_until_ready(fwd(x))
    assert out.shape == (B, N_CLASSES)

    ref = jax.block_until_ready(decoder_rnn_reference(x, params))
    assert jnp.allclose(out, ref, rtol=2e-3, atol=2e-3), "mismatch vs reference"

    print("KERNEL_OK")
</pallas_src>

<mosaic_0001>
module attributes {stable_mosaic.version = 11 : i64} {
  func.func @_fused_tail_kernel(%arg0: i32, %arg1: memref<8x8x128xbf16, #tpu.memory_space<vmem>>, %arg2: memref<128x1024xbf16, #tpu.memory_space<vmem>>, %arg3: memref<1x1024xf32, #tpu.memory_space<vmem>>, %arg4: memref<128x512xbf16, #tpu.memory_space<vmem>>, %arg5: memref<128x512xbf16, #tpu.memory_space<vmem>>, %arg6: memref<256x1024xbf16, #tpu.memory_space<vmem>>, %arg7: memref<1x1024xf32, #tpu.memory_space<vmem>>, %arg8: memref<128x512xbf16, #tpu.memory_space<vmem>>, %arg9: memref<256x128xbf16, #tpu.memory_space<vmem>>, %arg10: memref<1x128xf32, #tpu.memory_space<vmem>>, %arg11: memref<128x128xbf16, #tpu.memory_space<vmem>>, %arg12: memref<1x128xf32, #tpu.memory_space<vmem>>, %arg13: memref<8x128xf32, #tpu.memory_space<vmem>>, %arg14: memref<8x8x1024xf32, #tpu.memory_space<vmem>>, %arg15: memref<8x8x256xf32, #tpu.memory_space<vmem>>, %arg16: memref<8x8x512xf32, #tpu.memory_space<vmem>>) attributes {dimension_semantics = [#tpu.dimension_semantics<arbitrary>], iteration_bounds = array<i64: 1>, scalar_prefetch = 0 : i64, scratch_operands = 3 : i64, tpu.core_type = #tpu.core_type<tc>, window_params = [{pipeline_mode = #tpu.pipeline_mode<synchronous>, transform_indices = @transform_0, window_bounds = array<i64: 8, 8, 128>}, {pipeline_mode = #tpu.pipeline_mode<synchronous>, transform_indices = @transform_1, window_bounds = array<i64: 128, 1024>}, {pipeline_mode = #tpu.pipeline_mode<synchronous>, transform_indices = @transform_2, window_bounds = array<i64: 1, 1024>}, {pipeline_mode = #tpu.pipeline_mode<synchronous>, transform_indices = @transform_3, window_bounds = array<i64: 128, 512>}, {pipeline_mode = #tpu.pipeline_mode<synchronous>, transform_indices = @transform_4, window_bounds = array<i64: 128, 512>}, {pipeline_mode = #tpu.pipeline_mode<synchronous>, transform_indices = @transform_5, window_bounds = array<i64: 256, 1024>}, {pipeline_mode = #tpu.pipeline_mode<synchronous>, transform_indices = @transform_6, window_bounds = array<i64: 1, 1024>}, {pipeline_mode = #tpu.pipeline_mode<synchronous>, transform_indices = @transform_7, window_bounds = array<i64: 128, 512>}, {pipeline_mode = #tpu.pipeline_mode<synchronous>, transform_indices = @transform_8, window_bounds = array<i64: 256, 128>}, {pipeline_mode = #tpu.pipeline_mode<synchronous>, transform_indices = @transform_9, window_bounds = array<i64: 1, 128>}, {pipeline_mode = #tpu.pipeline_mode<synchronous>, transform_indices = @transform_10, window_bounds = array<i64: 128, 128>}, {pipeline_mode = #tpu.pipeline_mode<synchronous>, transform_indices = @transform_11, window_bounds = array<i64: 1, 128>}, {pipeline_mode = #tpu.pipeline_mode<synchronous>, transform_indices = @transform_12, window_bounds = array<i64: 8, 128>}]} {
    %c0 = arith.constant 0 : index
    %c0_0 = arith.constant 0 : index
    %c0_1 = arith.constant 0 : index
    %0 = vector.load %arg1[%c0, %c0_0, %c0_1] : memref<8x8x128xbf16, #tpu.memory_space<vmem>>, vector<8x8x128xbf16>
    %1 = vector.shape_cast %0 : vector<8x8x128xbf16> to vector<64x128xbf16>
    %c0_2 = arith.constant 0 : index
    %c0_3 = arith.constant 0 : index
    %2 = vector.load %arg2[%c0_2, %c0_3] : memref<128x1024xbf16, #tpu.memory_space<vmem>>, vector<128x1024xbf16>
    %c0_4 = arith.constant 0 : index
    %c0_5 = arith.constant 0 : index
    %3 = vector.load %arg3[%c0_4, %c0_5] : memref<1x1024xf32, #tpu.memory_space<vmem>>, vector<1x1024xf32>
    %c0_6 = arith.constant 0 : index
    %c0_7 = arith.constant 0 : index
    %4 = vector.load %arg4[%c0_6, %c0_7] : memref<128x512xbf16, #tpu.memory_space<vmem>>, vector<128x512xbf16>
    %c0_8 = arith.constant 0 : index
    %c0_9 = arith.constant 0 : index
    %5 = vector.load %arg5[%c0_8, %c0_9] : memref<128x512xbf16, #tpu.memory_space<vmem>>, vector<128x512xbf16>
    %cst = arith.constant dense<0.000000e+00> : vector<64x1024xf32>
    %6 = tpu.matmul %1, %2, %cst {dimension_numbers = #tpu.dot_dimension_numbers<[1], [0], [0], [1], [0, 0, 1, 1], [], []>} : vector<64x128xbf16>, vector<128x1024xbf16>, vector<64x1024xf32> -> vector<64x1024xf32>
    %7 = vector.broadcast %3 : vector<1x1024xf32> to vector<64x1024xf32>
    %8 = arith.addf %6, %7 : vector<64x1024xf32>
    %9 = vector.shape_cast %8 : vector<64x1024xf32> to vector<8x8x1024xf32>
    %c0_10 = arith.constant 0 : index
    %c0_11 = arith.constant 0 : index
    %c0_12 = arith.constant 0 : index
    %10 = vector.load %arg14[%c0_10, %c0_11, %c0_12] : memref<8x8x1024xf32, #tpu.memory_space<vmem>>, vector<8x8x1024xf32>
    tpu.vector_store %arg14[%c0_10, %c0_11, %c0_12], %9 {strides = array<i32>} : memref<8x8x1024xf32, #tpu.memory_space<vmem>>, vector<8x8x1024xf32>,
    %cst_13 = arith.constant 0.000000e+00 : f32
    %11 = vector.broadcast %cst_13 : f32 to vector<8x128xf32>
    %c0_14 = arith.constant 0 : index
    %c0_15 = arith.constant 0 : index
    %c0_16 = arith.constant 0 : index
    %12 = vector.load %arg14[%c0_14, %c0_15, %c0_16] : memref<8x8x1024xf32, #tpu.memory_space<vmem>>, vector<1x8x512xf32>
    %13 = vector.shape_cast %12 : vector<1x8x512xf32> to vector<8x512xf32>
    %14 = arith.truncf %11 : vector<8x128xf32> to vector<8x128xbf16>
    %cst_17 = arith.constant dense<0.000000e+00> : vector<8x512xf32>
    %15 = tpu.matmul %14, %4, %cst_17 {dimension_numbers = #tpu.dot_dimension_numbers<[1], [0], [0], [1], [0, 0, 1, 1], [], []>} : vector<8x128xbf16>, vector<128x512xbf16>, vector<8x512xf32> -> vector<8x512xf32>
    %16 = arith.addf %13, %15 : vector<8x512xf32>
    %c7 = arith.constant 7 : index
    %c0_18 = arith.constant 0 : index
    %c512 = arith.constant 512 : index
    %17 = vector.load %arg14[%c7, %c0_18, %c512] : memref<8x8x1024xf32, #tpu.memory_space<vmem>>, vector<1x8x512xf32>
    %18 = vector.shape_cast %17 : vector<1x8x512xf32> to vector<8x512xf32>
    %19 = arith.truncf %11 : vector<8x128xf32> to vector<8x128xbf16>
    %cst_19 = arith.constant dense<0.000000e+00> : vector<8x512xf32>
    %20 = tpu.matmul %19, %5, %cst_19 {dimension_numbers = #tpu.dot_dimension_numbers<[1], [0], [0], [1], [0, 0, 1, 1], [], []>} : vector<8x128xbf16>, vector<128x512xbf16>, vector<8x512xf32> -> vector<8x512xf32>
    %21 = arith.addf %18, %20 : vector<8x512xf32>
    %22 = vector.extract_strided_slice %16 {offsets = [0, 0], sizes = [8, 384], strides = [1, 1]} : vector<8x512xf32> to vector<8x384xf32>
    %23 = arith.negf %22 : vector<8x384xf32>
    %24 = math.exp %23 : vector<8x384xf32>
    %cst_20 = arith.constant 1.000000e+00 : f32
    %25 = vector.broadcast %cst_20 : f32 to vector<8x384xf32>
    %26 = arith.addf %25, %24 : vector<8x384xf32>
    %27 = arith.divf %25, %26 : vector<8x384xf32>
    %28 = vector.extract_strided_slice %21 {offsets = [0, 0], sizes = [8, 384], strides = [1, 1]} : vector<8x512xf32> to vector<8x384xf32>
    %29 = arith.negf %28 : vector<8x384xf32>
    %30 = math.exp %29 : vector<8x384xf32>
    %cst_21 = arith.constant 1.000000e+00 : f32
    %31 = vector.broadcast %cst_21 : f32 to vector<8x384xf32>
    %32 = arith.addf %31, %30 : vector<8x384xf32>
    %33 = arith.divf %31, %32 : vector<8x384xf32>
    %34 = vector.extract_strided_slice %16 {offsets = [0, 384], sizes = [8, 128], strides = [1, 1]} : vector<8x512xf32> to vector<8x128xf32>
    %35 = math.tanh %34 : vector<8x128xf32>
    %36 = vector.extract_strided_slice %21 {offsets = [0, 384], sizes = [8, 128], strides = [1, 1]} : vector<8x512xf32> to vector<8x128xf32>
    %37 = math.tanh %36 : vector<8x128xf32>
    %38 = vector.extract_strided_slice %27 {offsets = [0, 128], sizes = [8, 128], strides = [1, 1]} : vector<8x384xf32> to vector<8x128xf32>
    %39 = arith.mulf %38, %11 : vector<8x128xf32>
    %40 = vector.extract_strided_slice %27 {offsets = [0, 0], sizes = [8, 128], strides = [1, 1]} : vector<8x384xf32> to vector<8x128xf32>
    %41 = arith.mulf %40, %35 : vector<8x128xf32>
    %42 = arith.addf %39, %41 : vector<8x128xf32>
    %43 = vector.extract_strided_slice %33 {offsets = [0, 128], sizes = [8, 128], strides = [1, 1]} : vector<8x384xf32> to vector<8x128xf32>
    %44 = arith.mulf %43, %11 : vector<8x128xf32>
    %45 = vector.extract_strided_slice %33 {offsets = [0, 0], sizes = [8, 128], strides = [1, 1]} : vector<8x384xf32> to vector<8x128xf32>
    %46 = arith.mulf %45, %37 : vector<8x128xf32>
    %47 = arith.addf %44, %46 : vector<8x128xf32>
    %48 = vector.extract_strided_slice %27 {offsets = [0, 256], sizes = [8, 128], strides = [1, 1]} : vector<8x384xf32> to vector<8x128xf32>
    %49 = math.tanh %42 : vector<8x128xf32>
    %50 = arith.mulf %48, %49 : vector<8x128xf32>
    %51 = vector.extract_strided_slice %33 {offsets = [0, 256], sizes = [8, 128], strides = [1, 1]} : vector<8x384xf32> to vector<8x128xf32>
    %52 = math.tanh %47 : vector<8x128xf32>
    %53 = arith.mulf %51, %52 : vector<8x128xf32>
    %c0_22 = arith.constant 0 : index
    %c0_23 = arith.constant 0 : index
    %c0_24 = arith.constant 0 : index
    %54 = vector.load %arg15[%c0_22, %c0_23, %c0_24] : memref<8x8x256xf32, #tpu.memory_space<vmem>>, vector<1x8x128xf32>
    %55 = vector.shape_cast %54 : vector<1x8x128xf32> to vector<8x128xf32>
    %56 = vector.shape_cast %50 : vector<8x128xf32> to vector<1x8x128xf32>
    tpu.vector_store %arg15[%c0_22, %c0_23, %c0_24], %56 {strides = array<i32>} : memref<8x8x256xf32, #tpu.memory_space<vmem>>, vector<1x8x128xf32>,
    %c7_25 = arith.constant 7 : index
    %c0_26 = arith.constant 0 : index
    %c128 = arith.constant 128 : index
    %57 = vector.load %arg15[%c7_25, %c0_26, %c128] : memref<8x8x256xf32, #tpu.memory_space<vmem>>, vector<1x8x128xf32>
    %58 = vector.shape_cast %57 : vector<1x8x128xf32> to vector<8x128xf32>
    %59 = vector.shape_cast %53 : vector<8x128xf32> to vector<1x8x128xf32>
    tpu.vector_store %arg15[%c7_25, %c0_26, %c128], %59 {strides = array<i32>} : memref<8x8x256xf32, #tpu.memory_space<vmem>>, vector<1x8x128xf32>,
    %c1 = arith.constant 1 : index
    %c0_27 = arith.constant 0 : index
    %c0_28 = arith.constant 0 : index
    %60 = vector.load %arg14[%c1, %c0_27, %c0_28] : memref<8x8x1024xf32, #tpu.memory_space<vmem>>, vector<1x8x512xf32>
    %61 = vector.shape_cast %60 : vector<1x8x512xf32> to vector<8x512xf32>
    %62 = arith.truncf %50 : vector<8x128xf32> to vector<8x128xbf16>
    %cst_29 = arith.constant dense<0.000000e+00> : vector<8x512xf32>
    %63 = tpu.matmul %62, %4, %cst_29 {dimension_numbers = #tpu.dot_dimension_numbers<[1], [0], [0], [1], [0, 0, 1, 1], [], []>} : vector<8x128xbf16>, vector<128x512xbf16>, vector<8x512xf32> -> vector<8x512xf32>
    %64 = arith.addf %61, %63 : vector<8x512xf32>
    %c6 = arith.constant 6 : index
    %c0_30 = arith.constant 0 : index
    %c512_31 = arith.constant 512 : index
    %65 = vector.load %arg14[%c6, %c0_30, %c512_31] : memref<8x8x1024xf32, #tpu.memory_space<vmem>>, vector<1x8x512xf32>
    %66 = vector.shape_cast %65 : vector<1x8x512xf32> to vector<8x512xf32>
    %67 = arith.truncf %53 : vector<8x128xf32> to vector<8x128xbf16>
    %cst_32 = arith.constant dense<0.000000e+00> : vector<8x512xf32>
    %68 = tpu.matmul %67, %5, %cst_32 {dimension_numbers = #tpu.dot_dimension_numbers<[1], [0], [0], [1], [0, 0, 1, 1], [], []>} : vector<8x128xbf16>, vector<128x512xbf16>, vector<8x512xf32> -> vector<8x512xf32>
    %69 = arith.addf %66, %68 : vector<8x512xf32>
    %70 = vector.extract_strided_slice %64 {offsets = [0, 0], sizes = [8, 384], strides = [1, 1]} : vector<8x512xf32> to vector<8x384xf32>
    %71 = arith.negf %70 : vector<8x384xf32>
    %72 = math.exp %71 : vector<8x384xf32>
    %cst_33 = arith.constant 1.000000e+00 : f32
    %73 = vector.broadcast %cst_33 : f32 to vector<8x384xf32>
    %74 = arith.addf %73, %72 : vector<8x384xf32>
    %75 = arith.divf %73, %74 : vector<8x384xf32>
    %76 = vector.extract_strided_slice %69 {offsets = [0, 0], sizes = [8, 384], strides = [1, 1]} : vector<8x512xf32> to vector<8x384xf32>
    %77 = arith.negf %76 : vector<8x384xf32>
    %78 = math.exp %77 : vector<8x384xf32>
    %cst_34 = arith.constant 1.000000e+00 : f32
    %79 = vector.broadcast %cst_34 : f32 to vector<8x384xf32>
    %80 = arith.addf %79, %78 : vector<8x384xf32>
    %81 = arith.divf %79, %80 : vector<8x384xf32>
    %82 = vector.extract_strided_slice %64 {offsets = [0, 384], sizes = [8, 128], strides = [1, 1]} : vector<8x512xf32> to vector<8x128xf32>
    %83 = math.tanh %82 : vector<8x128xf32>
    %84 = vector.extract_strided_slice %69 {offsets = [0, 384], sizes = [8, 128], strides = [1, 1]} : vector<8x512xf32> to vector<8x128xf32>
    %85 = math.tanh %84 : vector<8x128xf32>
    %86 = vector.extract_strided_slice %75 {offsets = [0, 128], sizes = [8, 128], strides = [1, 1]} : vector<8x384xf32> to vector<8x128xf32>
    %87 = arith.mulf %86, %42 : vector<8x128xf32>
    %88 = vector.extract_strided_slice %75 {offsets = [0, 0], sizes = [8, 128], strides = [1, 1]} : vector<8x384xf32> to vector<8x128xf32>
    %89 = arith.mulf %88, %83 : vector<8x128xf32>
    %90 = arith.addf %87, %89 : vector<8x128xf32>
    %91 = vector.extract_strided_slice %81 {offsets = [0, 128], sizes = [8, 128], strides = [1, 1]} : vector<8x384xf32> to vector<8x128xf32>
    %92 = arith.mulf %91, %47 : vector<8x128xf32>
    %93 = vector.extract_strided_slice %81 {offsets = [0, 0], sizes = [8, 128], strides = [1, 1]} : vector<8x384xf32> to vector<8x128xf32>
    %94 = arith.mulf %93, %85 : vector<8x128xf32>
    %95 = arith.addf %92, %94 : vector<8x128xf32>
    %96 = vector.extract_strided_slice %75 {offsets = [0, 256], sizes = [8, 128], strides = [1, 1]} : vector<8x384xf32> to vector<8x128xf32>
    %97 = math.tanh %90 : vector<8x128xf32>
    %98 = arith.mulf %96, %97 : vector<8x128xf32>
    %99 = vector.extract_strided_slice %81 {offsets = [0, 256], sizes = [8, 128], strides = [1, 1]} : vector<8x384xf32> to vector<8x128xf32>
    %100 = math.tanh %95 : vector<8x128xf32>
    %101 = arith.mulf %99, %100 : vector<8x128xf32>
    %c1_35 = arith.constant 1 : index
    %c0_36 = arith.constant 0 : index
    %c0_37 = arith.constant 0 : index
    %102 = vector.load %arg15[%c1_35, %c0_36, %c0_37] : memref<8x8x256xf32, #tpu.memory_space<vmem>>, vector<1x8x128xf32>
    %103 = vector.shape_cast %102 : vector<1x8x128xf32> to vector<8x128xf32>
    %104 = vector.shape_cast %98 : vector<8x128xf32> to vector<1x8x128xf32>
    tpu.vector_store %arg15[%c1_35, %c0_36, %c0_37], %104 {strides = array<i32>} : memref<8x8x256xf32, #tpu.memory_space<vmem>>, vector<1x8x128xf32>,
    %c6_38 = arith.constant 6 : index
    %c0_39 = arith.constant 0 : index
    %c128_40 = arith.constant 128 : index
    %105 = vector.load %arg15[%c6_38, %c0_39, %c128_40] : memref<8x8x256xf32, #tpu.memory_space<vmem>>, vector<1x8x128xf32>
    %106 = vector.shape_cast %105 : vector<1x8x128xf32> to vector<8x128xf32>
    %107 = vector.shape_cast %101 : vector<8x128xf32> to vector<1x8x128xf32>
    tpu.vector_store %arg15[%c6_38, %c0_39, %c128_40], %107 {strides = array<i32>} : memref<8x8x256xf32, #tpu.memory_space<vmem>>, vector<1x8x128xf32>,
    %c2 = arith.constant 2 : index
    %c0_41 = arith.constant 0 : index
    %c0_42 = arith.constant 0 : index
    %108 = vector.load %arg14[%c2, %c0_41, %c0_42] : memref<8x8x1024xf32, #tpu.memory_space<vmem>>, vector<1x8x512xf32>
    %109 = vector.shape_cast %108 : vector<1x8x512xf32> to vector<8x512xf32>
    %110 = arith.truncf %98 : vector<8x128xf32> to vector<8x128xbf16>
    %cst_43 = arith.constant dense<0.000000e+00> : vector<8x512xf32>
    %111 = tpu.matmul %110, %4, %cst_43 {dimension_numbers = #tpu.dot_dimension_numbers<[1], [0], [0], [1], [0, 0, 1, 1], [], []>} : vector<8x128xbf16>, vector<128x512xbf16>, vector<8x512xf32> -> vector<8x512xf32>
    %112 = arith.addf %109, %111 : vector<8x512xf32>
    %c5 = arith.constant 5 : index
    %c0_44 = arith.constant 0 : index
    %c512_45 = arith.constant 512 : index
    %113 = vector.load %arg14[%c5, %c0_44, %c512_45] : memref<8x8x1024xf32, #tpu.memory_space<vmem>>, vector<1x8x512xf32>
    %114 = vector.shape_cast %113 : vector<1x8x512xf32> to vector<8x512xf32>
    %115 = arith.truncf %101 : vector<8x128xf32> to vector<8x128xbf16>
    %cst_46 = arith.constant dense<0.000000e+00> : vector<8x512xf32>
    %116 = tpu.matmul %115, %5, %cst_46 {dimension_numbers = #tpu.dot_dimension_numbers<[1], [0], [0], [1], [0, 0, 1, 1], [], []>} : vector<8x128xbf16>, vector<128x512xbf16>, vector<8x512xf32> -> vector<8x512xf32>
    %117 = arith.addf %114, %116 : vector<8x512xf32>
    %118 = vector.extract_strided_slice %112 {offsets = [0, 0], sizes = [8, 384], strides = [1, 1]} : vector<8x512xf32> to vector<8x384xf32>
    %119 = arith.negf %118 : vector<8x384xf32>
    %120 = math.exp %119 : vector<8x384xf32>
    %cst_47 = arith.constant 1.000000e+00 : f32
    %121 = vector.broadcast %cst_47 : f32 to vector<8x384xf32>
    %122 = arith.addf %121, %120 : vector<8x384xf32>
    %123 = arith.divf %121, %122 : vector<8x384xf32>
    %124 = vector.extract_strided_slice %117 {offsets = [0, 0], sizes = [8, 384], strides = [1, 1]} : vector<8x512xf32> to vector<8x384xf32>
    %125 = arith.negf %124 : vector<8x384xf32>
    %126 = math.exp %125 : vector<8x384xf32>
    %cst_48 = arith.constant 1.000000e+00 : f32
    %127 = vector.broadcast %cst_48 : f32 to vector<8x384xf32>
    %128 = arith.addf %127, %126 : vector<8x384xf32>
    %129 = arith.divf %127, %128 : vector<8x384xf32>
    %130 = vector.extract_strided_slice %112 {offsets = [0, 384], sizes = [8, 128], strides = [1, 1]} : vector<8x512xf32> to vector<8x128xf32>
    %131 = math.tanh %130 : vector<8x128xf32>
    %132 = vector.extract_strided_slice %117 {offsets = [0, 384], sizes = [8, 128], strides = [1, 1]} : vector<8x512xf32> to vector<8x128xf32>
    %133 = math.tanh %132 : vector<8x128xf32>
    %134 = vector.extract_strided_slice %123 {offsets = [0, 128], sizes = [8, 128], strides = [1, 1]} : vector<8x384xf32> to vector<8x128xf32>
    %135 = arith.mulf %134, %90 : vector<8x128xf32>
    %136 = vector.extract_strided_slice %123 {offsets = [0, 0], sizes = [8, 128], strides = [1, 1]} : vector<8x384xf32> to vector<8x128xf32>
    %137 = arith.mulf %136, %131 : vector<8x128xf32>
    %138 = arith.addf %135, %137 : vector<8x128xf32>
    %139 = vector.extract_strided_slice %129 {offsets = [0, 128], sizes = [8, 128], strides = [1, 1]} : vector<8x384xf32> to vector<8x128xf32>
    %140 = arith.mulf %139, %95 : vector<8x128xf32>
    %141 = vector.extract_strided_slice %129 {offsets = [0, 0], sizes = [8, 128], strides = [1, 1]} : vector<8x384xf32> to vector<8x128xf32>
    %142 = arith.mulf %141, %133 : vector<8x128xf32>
    %143 = arith.addf %140, %142 : vector<8x128xf32>
    %144 = vector.extract_strided_slice %123 {offsets = [0, 256], sizes = [8, 128], strides = [1, 1]} : vector<8x384xf32> to vector<8x128xf32>
    %145 = math.tanh %138 : vector<8x128xf32>
    %146 = arith.mulf %144, %145 : vector<8x128xf32>
    %147 = vector.extract_strided_slice %129 {offsets = [0, 256], sizes = [8, 128], strides = [1, 1]} : vector<8x384xf32> to vector<8x128xf32>
    %148 = math.tanh %143 : vector<8x128xf32>
    %149 = arith.mulf %147, %148 : vector<8x128xf32>
    %c2_49 = arith.constant 2 : index
    %c0_50 = arith.constant 0 : index
    %c0_51 = arith.constant 0 : index
    %150 = vector.load %arg15[%c2_49, %c0_50, %c0_51] : memref<8x8x256xf32, #tpu.memory_space<vmem>>, vector<1x8x128xf32>
    %151 = vector.shape_cast %150 : vector<1x8x128xf32> to vector<8x128xf32>
    %152 = vector.shape_cast %146 : vector<8x128xf32> to vector<1x8x128xf32>
    tpu.vector_store %arg15[%c2_49, %c0_50, %c0_51], %152 {strides = array<i32>} : memref<8x8x256xf32, #tpu.memory_space<vmem>>, vector<1x8x128xf32>,
    %c5_52 = arith.constant 5 : index
    %c0_53 = arith.constant 0 : index
    %c128_54 = arith.constant 128 : index
    %153 = vector.load %arg15[%c5_52, %c0_53, %c128_54] : memref<8x8x256xf32, #tpu.memory_space<vmem>>, vector<1x8x128xf32>
    %154 = vector.shape_cast %153 : vector<1x8x128xf32> to vector<8x128xf32>
    %155 = vector.shape_cast %149 : vector<8x128xf32> to vector<1x8x128xf32>
    tpu.vector_store %arg15[%c5_52, %c0_53, %c128_54], %155 {strides = array<i32>} : memref<8x8x256xf32, #tpu.memory_space<vmem>>, vector<1x8x128xf32>,
    %c3 = arith.constant 3 : index
    %c0_55 = arith.constant 0 : index
    %c0_56 = arith.constant 0 : index
    %156 = vector.load %arg14[%c3, %c0_55, %c0_56] : memref<8x8x1024xf32, #tpu.memory_space<vmem>>, vector<1x8x512xf32>
    %157 = vector.shape_cast %156 : vector<1x8x512xf32> to vector<8x512xf32>
    %158 = arith.truncf %146 : vector<8x128xf32> to vector<8x128xbf16>
    %cst_57 = arith.constant dense<0.000000e+00> : vector<8x512xf32>
    %159 = tpu.matmul %158, %4, %cst_57 {dimension_numbers = #tpu.dot_dimension_numbers<[1], [0], [0], [1], [0, 0, 1, 1], [], []>} : vector<8x128xbf16>, vector<128x512xbf16>, vector<8x512xf32> -> vector<8x512xf32>
    %160 = arith.addf %157, %159 : vector<8x512xf32>
    %c4 = arith.constant 4 : index
    %c0_58 = arith.constant 0 : index
    %c512_59 = arith.constant 512 : index
    %161 = vector.load %arg14[%c4, %c0_58, %c512_59] : memref<8x8x1024xf32, #tpu.memory_space<vmem>>, vector<1x8x512xf32>
    %162 = vector.shape_cast %161 : vector<1x8x512xf32> to vector<8x512xf32>
    %163 = arith.truncf %149 : vector<8x128xf32> to vector<8x128xbf16>
    %cst_60 = arith.constant dense<0.000000e+00> : vector<8x512xf32>
    %164 = tpu.matmul %163, %5, %cst_60 {dimension_numbers = #tpu.dot_dimension_numbers<[1], [0], [0], [1], [0, 0, 1, 1], [], []>} : vector<8x128xbf16>, vector<128x512xbf16>, vector<8x512xf32> -> vector<8x512xf32>
    %165 = arith.addf %162, %164 : vector<8x512xf32>
    %166 = vector.extract_strided_slice %160 {offsets = [0, 0], sizes = [8, 384], strides = [1, 1]} : vector<8x512xf32> to vector<8x384xf32>
    %167 = arith.negf %166 : vector<8x384xf32>
    %168 = math.exp %167 : vector<8x384xf32>
    %cst_61 = arith.constant 1.000000e+00 : f32
    %169 = vector.broadcast %cst_61 : f32 to vector<8x384xf32>
    %170 = arith.addf %169, %168 : vector<8x384xf32>
    %171 = arith.divf %169, %170 : vector<8x384xf32>
    %172 = vector.extract_strided_slice %165 {offsets = [0, 0], sizes = [8, 384], strides = [1, 1]} : vector<8x512xf32> to vector<8x384xf32>
    %173 = arith.negf %172 : vector<8x384xf32>
    %174 = math.exp %173 : vector<8x384xf32>
    %cst_62 = arith.constant 1.000000e+00 : f32
    %175 = vector.broadcast %cst_62 : f32 to vector<8x384xf32>
    %176 = arith.addf %175, %174 : vector<8x384xf32>
    %177 = arith.divf %175, %176 : vector<8x384xf32>
    %178 = vector.extract_strided_slice %160 {offsets = [0, 384], sizes = [8, 128], strides = [1, 1]} : vector<8x512xf32> to vector<8x128xf32>
    %179 = math.tanh %178 : vector<8x128xf32>
    %180 = vector.extract_strided_slice %165 {offsets = [0, 384], sizes = [8, 128], strides = [1, 1]} : vector<8x512xf32> to vector<8x128xf32>
    %181 = math.tanh %180 : vector<8x128xf32>
    %182 = vector.extract_strided_slice %171 {offsets = [0, 128], sizes = [8, 128], strides = [1, 1]} : vector<8x384xf32> to vector<8x128xf32>
    %183 = arith.mulf %182, %138 : vector<8x128xf32>
    %184 = vector.extract_strided_slice %171 {offsets = [0, 0], sizes = [8, 128], strides = [1, 1]} : vector<8x384xf32> to vector<8x128xf32>
    %185 = arith.mulf %184, %179 : vector<8x128xf32>
    %186 = arith.addf %183, %185 : vector<8x128xf32>
    %187 = vector.extract_strided_slice %177 {offsets = [0, 128], sizes = [8, 128], strides = [1, 1]} : vector<8x384xf32> to vector<8x128xf32>
    %188 = arith.mulf %187, %143 : vector<8x128xf32>
    %189 = vector.extract_strided_slice %177 {offsets = [0, 0], sizes = [8, 128], strides = [1, 1]} : vector<8x384xf32> to vector<8x128xf32>
    %190 = arith.mulf %189, %181 : vector<8x128xf32>
    %191 = arith.addf %188, %190 : vector<8x128xf32>
    %192 = vector.extract_strided_slice %171 {offsets = [0, 256], sizes = [8, 128], strides = [1, 1]} : vector<8x384xf32> to vector<8x128xf32>
    %193 = math.tanh %186 : vector<8x128xf32>
    %194 = arith.mulf %192, %193 : vector<8x128xf32>
    %195 = vector.extract_strided_slice %177 {offsets = [0, 256], sizes = [8, 128], strides = [1, 1]} : vector<8x384xf32> to vector<8x128xf32>
    %196 = math.tanh %191 : vector<8x128xf32>
    %197 = arith.mulf %195, %196 : vector<8x128xf32>
    %c3_63 = arith.constant 3 : index
    %c0_64 = arith.constant 0 : index
    %c0_65 = arith.constant 0 : index
    %198 = vector.load %arg15[%c3_63, %c0_64, %c0_65] : memref<8x8x256xf32, #tpu.memory_space<vmem>>, vector<1x8x128xf32>
    %199 = vector.shape_cast %198 : vector<1x8x128xf32> to vector<8x128xf32>
    %200 = vector.shape_cast %194 : vector<8x128xf32> to vector<1x8x128xf32>
    tpu.vector_store %arg15[%c3_63, %c0_64, %c0_65], %200 {strides = array<i32>} : memref<8x8x256xf32, #tpu.memory_space<vmem>>, vector<1x8x128xf32>,
    %c4_66 = arith.constant 4 : index
    %c0_67 = arith.constant 0 : index
    %c128_68 = arith.constant 128 : index
    %201 = vector.load %arg15[%c4_66, %c0_67, %c128_68] : memref<8x8x256xf32, #tpu.memory_space<vmem>>, vector<1x8x128xf32>
    %202 = vector.shape_cast %201 : vector<1x8x128xf32> to vector<8x128xf32>
    %203 = vector.shape_cast %197 : vector<8x128xf32> to vector<1x8x128xf32>
    tpu.vector_store %arg15[%c4_66, %c0_67, %c128_68], %203 {strides = array<i32>} : memref<8x8x256xf32, #tpu.memory_space<vmem>>, vector<1x8x128xf32>,
    %c4_69 = arith.constant 4 : index
    %c0_70 = arith.constant 0 : index
    %c0_71 = arith.constant 0 : index
    %204 = vector.load %arg14[%c4_69, %c0_70, %c0_71] : memref<8x8x1024xf32, #tpu.memory_space<vmem>>, vector<1x8x512xf32>
    %205 = vector.shape_cast %204 : vector<1x8x512xf32> to vector<8x512xf32>
    %206 = arith.truncf %194 : vector<8x128xf32> to vector<8x128xbf16>
    %cst_72 = arith.constant dense<0.000000e+00> : vector<8x512xf32>
    %207 = tpu.matmul %206, %4, %cst_72 {dimension_numbers = #tpu.dot_dimension_numbers<[1], [0], [0], [1], [0, 0, 1, 1], [], []>} : vector<8x128xbf16>, vector<128x512xbf16>, vector<8x512xf32> -> vector<8x512xf32>
    %208 = arith.addf %205, %207 : vector<8x512xf32>
    %c3_73 = arith.constant 3 : index
    %c0_74 = arith.constant 0 : index
    %c512_75 = arith.constant 512 : index
    %209 = vector.load %arg14[%c3_73, %c0_74, %c512_75] : memref<8x8x1024xf32, #tpu.memory_space<vmem>>, vector<1x8x512xf32>
    %210 = vector.shape_cast %209 : vector<1x8x512xf32> to vector<8x512xf32>
    %211 = arith.truncf %197 : vector<8x128xf32> to vector<8x128xbf16>
    %cst_76 = arith.constant dense<0.000000e+00> : vector<8x512xf32>
    %212 = tpu.matmul %211, %5, %cst_76 {dimension_numbers = #tpu.dot_dimension_numbers<[1], [0], [0], [1], [0, 0, 1, 1], [], []>} : vector<8x128xbf16>, vector<128x512xbf16>, vector<8x512xf32> -> vector<8x512xf32>
    %213 = arith.addf %210, %212 : vector<8x512xf32>
    %214 = vector.extract_strided_slice %208 {offsets = [0, 0], sizes = [8, 384], strides = [1, 1]} : vector<8x512xf32> to vector<8x384xf32>
    %215 = arith.negf %214 : vector<8x384xf32>
    %216 = math.exp %215 : vector<8x384xf32>
    %cst_77 = arith.constant 1.000000e+00 : f32
    %217 = vector.broadcast %cst_77 : f32 to vector<8x384xf32>
    %218 = arith.addf %217, %216 : vector<8x384xf32>
    %219 = arith.divf %217, %218 : vector<8x384xf32>
    %220 = vector.extract_strided_slice %213 {offsets = [0, 0], sizes = [8, 384], strides = [1, 1]} : vector<8x512xf32> to vector<8x384xf32>
    %221 = arith.negf %220 : vector<8x384xf32>
    %222 = math.exp %221 : vector<8x384xf32>
    %cst_78 = arith.constant 1.000000e+00 : f32
    %223 = vector.broadcast %cst_78 : f32 to vector<8x384xf32>
    %224 = arith.addf %223, %222 : vector<8x384xf32>
    %225 = arith.divf %223, %224 : vector<8x384xf32>
    %226 = vector.extract_strided_slice %208 {offsets = [0, 384], sizes = [8, 128], strides = [1, 1]} : vector<8x512xf32> to vector<8x128xf32>
    %227 = math.tanh %226 : vector<8x128xf32>
    %228 = vector.extract_strided_slice %213 {offsets = [0, 384], sizes = [8, 128], strides = [1, 1]} : vector<8x512xf32> to vector<8x128xf32>
    %229 = math.tanh %228 : vector<8x128xf32>
    %230 = vector.extract_strided_slice %219 {offsets = [0, 128], sizes = [8, 128], strides = [1, 1]} : vector<8x384xf32> to vector<8x128xf32>
    %231 = arith.mulf %230, %186 : vector<8x128xf32>
    %232 = vector.extract_strided_slice %219 {offsets = [0, 0], sizes = [8, 128], strides = [1, 1]} : vector<8x384xf32> to vector<8x128xf32>
    %233 = arith.mulf %232, %227 : vector<8x128xf32>
    %234 = arith.addf %231, %233 : vector<8x128xf32>
    %235 = vector.extract_strided_slice %225 {offsets = [0, 128], sizes = [8, 128], strides = [1, 1]} : vector<8x384xf32> to vector<8x128xf32>
    %236 = arith.mulf %235, %191 : vector<8x128xf32>
    %237 = vector.extract_strided_slice %225 {offsets = [0, 0], sizes = [8, 128], strides = [1, 1]} : vector<8x384xf32> to vector<8x128xf32>
    %238 = arith.mulf %237, %229 : vector<8x128xf32>
    %239 = arith.addf %236, %238 : vector<8x128xf32>
    %240 = vector.extract_strided_slice %219 {offsets = [0, 256], sizes = [8, 128], strides = [1, 1]} : vector<8x384xf32> to vector<8x128xf32>
    %241 = math.tanh %234 : vector<8x128xf32>
    %242 = arith.mulf %240, %241 : vector<8x128xf32>
    %243 = vector.extract_strided_slice %225 {offsets = [0, 256], sizes = [8, 128], strides = [1, 1]} : vector<8x384xf32> to vector<8x128xf32>
    %244 = math.tanh %239 : vector<8x128xf32>
    %245 = arith.mulf %243, %244 : vector<8x128xf32>
    %c4_79 = arith.constant 4 : index
    %c0_80 = arith.constant 0 : index
    %c0_81 = arith.constant 0 : index
    %246 = vector.load %arg15[%c4_79, %c0_80, %c0_81] : memref<8x8x256xf32, #tpu.memory_space<vmem>>, vector<1x8x128xf32>
    %247 = vector.shape_cast %246 : vector<1x8x128xf32> to vector<8x128xf32>
    %248 = vector.shape_cast %242 : vector<8x128xf32> to vector<1x8x128xf32>
    tpu.vector_store %arg15[%c4_79, %c0_80, %c0_81], %248 {strides = array<i32>} : memref<8x8x256xf32, #tpu.memory_space<vmem>>, vector<1x8x128xf32>,
    %c3_82 = arith.constant 3 : index
    %c0_83 = arith.constant 0 : index
    %c128_84 = arith.constant 128 : index
    %249 = vector.load %arg15[%c3_82, %c0_83, %c128_84] : memref<8x8x256xf32, #tpu.memory_space<vmem>>, vector<1x8x128xf32>
    %250 = vector.shape_cast %249 : vector<1x8x128xf32> to vector<8x128xf32>
    %251 = vector.shape_cast %245 : vector<8x128xf32> to vector<1x8x128xf32>
    tpu.vector_store %arg15[%c3_82, %c0_83, %c128_84], %251 {strides = array<i32>} : memref<8x8x256xf32, #tpu.memory_space<vmem>>, vector<1x8x128xf32>,
    %c5_85 = arith.constant 5 : index
    %c0_86 = arith.constant 0 : index
    %c0_87 = arith.constant 0 : index
    %252 = vector.load %arg14[%c5_85, %c0_86, %c0_87] : memref<8x8x1024xf32, #tpu.memory_space<vmem>>, vector<1x8x512xf32>
    %253 = vector.shape_cast %252 : vector<1x8x512xf32> to vector<8x512xf32>
    %254 = arith.truncf %242 : vector<8x128xf32> to vector<8x128xbf16>
    %cst_88 = arith.constant dense<0.000000e+00> : vector<8x512xf32>
    %255 = tpu.matmul %254, %4, %cst_88 {dimension_numbers = #tpu.dot_dimension_numbers<[1], [0], [0], [1], [0, 0, 1, 1], [], []>} : vector<8x128xbf16>, vector<128x512xbf16>, vector<8x512xf32> -> vector<8x512xf32>
    %256 = arith.addf %253, %255 : vector<8x512xf32>
    %c2_89 = arith.constant 2 : index
    %c0_90 = arith.constant 0 : index
    %c512_91 = arith.constant 512 : index
    %257 = vector.load %arg14[%c2_89, %c0_90, %c512_91] : memref<8x8x1024xf32, #tpu.memory_space<vmem>>, vector<1x8x512xf32>
    %258 = vector.shape_cast %257 : vector<1x8x512xf32> to vector<8x512xf32>
    %259 = arith.truncf %245 : vector<8x128xf32> to vector<8x128xbf16>
    %cst_92 = arith.constant dense<0.000000e+00> : vector<8x512xf32>
    %260 = tpu.matmul %259, %5, %cst_92 {dimension_numbers = #tpu.dot_dimension_numbers<[1], [0], [0], [1], [0, 0, 1, 1], [], []>} : vector<8x128xbf16>, vector<128x512xbf16>, vector<8x512xf32> -> vector<8x512xf32>
    %261 = arith.addf %258, %260 : vector<8x512xf32>
    %262 = vector.extract_strided_slice %256 {offsets = [0, 0], sizes = [8, 384], strides = [1, 1]} : vector<8x512xf32> to vector<8x384xf32>
    %263 = arith.negf %262 : vector<8x384xf32>
    %264 = math.exp %263 : vector<8x384xf32>
    %cst_93 = arith.constant 1.000000e+00 : f32
    %265 = vector.broadcast %cst_93 : f32 to vector<8x384xf32>
    %266 = arith.addf %265, %264 : vector<8x384xf32>
    %267 = arith.divf %265, %266 : vector<8x384xf32>
    %268 = vector.extract_strided_slice %261 {offsets = [0, 0], sizes = [8, 384], strides = [1, 1]} : vector<8x512xf32> to vector<8x384xf32>
    %269 = arith.negf %268 : vector<8x384xf32>
    %270 = math.exp %269 : vector<8x384xf32>
    %cst_94 = arith.constant 1.000000e+00 : f32
    %271 = vector.broadcast %cst_94 : f32 to vector<8x384xf32>
    %272 = arith.addf %271, %270 : vector<8x384xf32>
    %273 = arith.divf %271, %272 : vector<8x384xf32>
    %274 = vector.extract_strided_slice %256 {offsets = [0, 384], sizes = [8, 128], strides = [1, 1]} : vector<8x512xf32> to vector<8x128xf32>
    %275 = math.tanh %274 : vector<8x128xf32>
    %276 = vector.extract_strided_slice %261 {offsets = [0, 384], sizes = [8, 128], strides = [1, 1]} : vector<8x512xf32> to vector<8x128xf32>
    %277 = math.tanh %276 : vector<8x128xf32>
    %278 = vector.extract_strided_slice %267 {offsets = [0, 128], sizes = [8, 128], strides = [1, 1]} : vector<8x384xf32> to vector<8x128xf32>
    %279 = arith.mulf %278, %234 : vector<8x128xf32>
    %280 = vector.extract_strided_slice %267 {offsets = [0, 0], sizes = [8, 128], strides = [1, 1]} : vector<8x384xf32> to vector<8x128xf32>
    %281 = arith.mulf %280, %275 : vector<8x128xf32>
    %282 = arith.addf %279, %281 : vector<8x128xf32>
    %283 = vector.extract_strided_slice %273 {offsets = [0, 128], sizes = [8, 128], strides = [1, 1]} : vector<8x384xf32> to vector<8x128xf32>
    %284 = arith.mulf %283, %239 : vector<8x128xf32>
    %285 = vector.extract_strided_slice %273 {offsets = [0, 0], sizes = [8, 128], strides = [1, 1]} : vector<8x384xf32> to vector<8x128xf32>
    %286 = arith.mulf %285, %277 : vector<8x128xf32>
    %287 = arith.addf %284, %286 : vector<8x128xf32>
    %288 = vector.extract_strided_slice %267 {offsets = [0, 256], sizes = [8, 128], strides = [1, 1]} : vector<8x384xf32> to vector<8x128xf32>
    %289 = math.tanh %282 : vector<8x128xf32>
    %290 = arith.mulf %288, %289 : vector<8x128xf32>
    %291 = vector.extract_strided_slice %273 {offsets = [0, 256], sizes = [8, 128], strides = [1, 1]} : vector<8x384xf32> to vector<8x128xf32>
    %292 = math.tanh %287 : vector<8x128xf32>
    %293 = arith.mulf %291, %292 : vector<8x128xf32>
    %c5_95 = arith.constant 5 : index
    %c0_96 = arith.constant 0 : index
    %c0_97 = arith.constant 0 : index
    %294 = vector.load %arg15[%c5_95, %c0_96, %c0_97] : memref<8x8x256xf32, #tpu.memory_space<vmem>>, vector<1x8x128xf32>
    %295 = vector.shape_cast %294 : vector<1x8x128xf32> to vector<8x128xf32>
    %296 = vector.shape_cast %290 : vector<8x128xf32> to vector<1x8x128xf32>
    tpu.vector_store %arg15[%c5_95, %c0_96, %c0_97], %296 {strides = array<i32>} : memref<8x8x256xf32, #tpu.memory_space<vmem>>, vector<1x8x128xf32>,
    %c2_98 = arith.constant 2 : index
    %c0_99 = arith.constant 0 : index
    %c128_100 = arith.constant 128 : index
    %297 = vector.load %arg15[%c2_98, %c0_99, %c128_100] : memref<8x8x256xf32, #tpu.memory_space<vmem>>, vector<1x8x128xf32>
    %298 = vector.shape_cast %297 : vector<1x8x128xf32> to vector<8x128xf32>
    %299 = vector.shape_cast %293 : vector<8x128xf32> to vector<1x8x128xf32>
    tpu.vector_store %arg15[%c2_98, %c0_99, %c128_100], %299 {strides = array<i32>} : memref<8x8x256xf32, #tpu.memory_space<vmem>>, vector<1x8x128xf32>,
    %c6_101 = arith.constant 6 : index
    %c0_102 = arith.constant 0 : index
    %c0_103 = arith.constant 0 : index
    %300 = vector.load %arg14[%c6_101, %c0_102, %c0_103] : memref<8x8x1024xf32, #tpu.memory_space<vmem>>, vector<1x8x512xf32>
    %301 = vector.shape_cast %300 : vector<1x8x512xf32> to vector<8x512xf32>
    %302 = arith.truncf %290 : vector<8x128xf32> to vector<8x128xbf16>
    %cst_104 = arith.constant dense<0.000000e+00> : vector<8x512xf32>
    %303 = tpu.matmul %302, %4, %cst_104 {dimension_numbers = #tpu.dot_dimension_numbers<[1], [0], [0], [1], [0, 0, 1, 1], [], []>} : vector<8x128xbf16>, vector<128x512xbf16>, vector<8x512xf32> -> vector<8x512xf32>
    %304 = arith.addf %301, %303 : vector<8x512xf32>
    %c1_105 = arith.constant 1 : index
    %c0_106 = arith.constant 0 : index
    %c512_107 = arith.constant 512 : index
    %305 = vector.load %arg14[%c1_105, %c0_106, %c512_107] : memref<8x8x1024xf32, #tpu.memory_space<vmem>>, vector<1x8x512xf32>
    %306 = vector.shape_cast %305 : vector<1x8x512xf32> to vector<8x512xf32>
    %307 = arith.truncf %293 : vector<8x128xf32> to vector<8x128xbf16>
    %cst_108 = arith.constant dense<0.000000e+00> : vector<8x512xf32>
    %308 = tpu.matmul %307, %5, %cst_108 {dimension_numbers = #tpu.dot_dimension_numbers<[1], [0], [0], [1], [0, 0, 1, 1], [], []>} : vector<8x128xbf16>, vector<128x512xbf16>, vector<8x512xf32> -> vector<8x512xf32>
    %309 = arith.addf %306, %308 : vector<8x512xf32>
    %310 = vector.extract_strided_slice %304 {offsets = [0, 0], sizes = [8, 384], strides = [1, 1]} : vector<8x512xf32> to vector<8x384xf32>
    %311 = arith.negf %310 : vector<8x384xf32>
    %312 = math.exp %311 : vector<8x384xf32>
    %cst_109 = arith.constant 1.000000e+00 : f32
    %313 = vector.broadcast %cst_109 : f32 to vector<8x384xf32>
    %314 = arith.addf %313, %312 : vector<8x384xf32>
    %315 = arith.divf %313, %314 : vector<8x384xf32>
    %316 = vector.extract_strided_slice %309 {offsets = [0, 0], sizes = [8, 384], strides = [1, 1]} : vector<8x512xf32> to vector<8x384xf32>
    %317 = arith.negf %316 : vector<8x384xf32>
    %318 = math.exp %317 : vector<8x384xf32>
    %cst_110 = arith.constant 1.000000e+00 : f32
    %319 = vector.broadcast %cst_110 : f32 to vector<8x384xf32>
    %320 = arith.addf %319, %318 : vector<8x384xf32>
    %321 = arith.divf %319, %320 : vector<8x384xf32>
    %322 = vector.extract_strided_slice %304 {offsets = [0, 384], sizes = [8, 128], strides = [1, 1]} : vector<8x512xf32> to vector<8x128xf32>
    %323 = math.tanh %322 : vector<8x128xf32>
    %324 = vector.extract_strided_slice %309 {offsets = [0, 384], sizes = [8, 128], strides = [1, 1]} : vector<8x512xf32> to vector<8x128xf32>
    %325 = math.tanh %324 : vector<8x128xf32>
    %326 = vector.extract_strided_slice %315 {offsets = [0, 128], sizes = [8, 128], strides = [1, 1]} : vector<8x384xf32> to vector<8x128xf32>
    %327 = arith.mulf %326, %282 : vector<8x128xf32>
    %328 = vector.extract_strided_slice %315 {offsets = [0, 0], sizes = [8, 128], strides = [1, 1]} : vector<8x384xf32> to vector<8x128xf32>
    %329 = arith.mulf %328, %323 : vector<8x128xf32>
    %330 = arith.addf %327, %329 : vector<8x128xf32>
    %331 = vector.extract_strided_slice %321 {offsets = [0, 128], sizes = [8, 128], strides = [1, 1]} : vector<8x384xf32> to vector<8x128xf32>
    %332 = arith.mulf %331, %287 : vector<8x128xf32>
    %333 = vector.extract_strided_slice %321 {offsets = [0, 0], sizes = [8, 128], strides = [1, 1]} : vector<8x384xf32> to vector<8x128xf32>
    %334 = arith.mulf %333, %325 : vector<8x128xf32>
    %335 = arith.addf %332, %334 : vector<8x128xf32>
    %336 = vector.extract_strided_slice %315 {offsets = [0, 256], sizes = [8, 128], strides = [1, 1]} : vector<8x384xf32> to vector<8x128xf32>
    %337 = math.tanh %330 : vector<8x128xf32>
    %338 = arith.mulf %336, %337 : vector<8x128xf32>
    %339 = vector.extract_strided_slice %321 {offsets = [0, 256], sizes = [8, 128], strides = [1, 1]} : vector<8x384xf32> to vector<8x128xf32>
    %340 = math.tanh %335 : vector<8x128xf32>
    %341 = arith.mulf %339, %340 : vector<8x128xf32>
    %c6_111 = arith.constant 6 : index
    %c0_112 = arith.constant 0 : index
    %c0_113 = arith.constant 0 : index
    %342 = vector.load %arg15[%c6_111, %c0_112, %c0_113] : memref<8x8x256xf32, #tpu.memory_space<vmem>>, vector<1x8x128xf32>
    %343 = vector.shape_cast %342 : vector<1x8x128xf32> to vector<8x128xf32>
    %344 = vector.shape_cast %338 : vector<8x128xf32> to vector<1x8x128xf32>
    tpu.vector_store %arg15[%c6_111, %c0_112, %c0_113], %344 {strides = array<i32>} : memref<8x8x256xf32, #tpu.memory_space<vmem>>, vector<1x8x128xf32>,
    %c1_114 = arith.constant 1 : index
    %c0_115 = arith.constant 0 : index
    %c128_116 = arith.constant 128 : index
    %345 = vector.load %arg15[%c1_114, %c0_115, %c128_116] : memref<8x8x256xf32, #tpu.memory_space<vmem>>, vector<1x8x128xf32>
    %346 = vector.shape_cast %345 : vector<1x8x128xf32> to vector<8x128xf32>
    %347 = vector.shape_cast %341 : vector<8x128xf32> to vector<1x8x128xf32>
    tpu.vector_store %arg15[%c1_114, %c0_115, %c128_116], %347 {strides = array<i32>} : memref<8x8x256xf32, #tpu.memory_space<vmem>>, vector<1x8x128xf32>,
    %c7_117 = arith.constant 7 : index
    %c0_118 = arith.constant 0 : index
    %c0_119 = arith.constant 0 : index
    %348 = vector.load %arg14[%c7_117, %c0_118, %c0_119] : memref<8x8x1024xf32, #tpu.memory_space<vmem>>, vector<1x8x512xf32>
    %349 = vector.shape_cast %348 : vector<1x8x512xf32> to vector<8x512xf32>
    %350 = arith.truncf %338 : vector<8x128xf32> to vector<8x128xbf16>
    %cst_120 = arith.constant dense<0.000000e+00> : vector<8x512xf32>
    %351 = tpu.matmul %350, %4, %cst_120 {dimension_numbers = #tpu.dot_dimension_numbers<[1], [0], [0], [1], [0, 0, 1, 1], [], []>} : vector<8x128xbf16>, vector<128x512xbf16>, vector<8x512xf32> -> vector<8x512xf32>
    %352 = arith.addf %349, %351 : vector<8x512xf32>
    %c0_121 = arith.constant 0 : index
    %c0_122 = arith.constant 0 : index
    %c512_123 = arith.constant 512 : index
    %353 = vector.load %arg14[%c0_121, %c0_122, %c512_123] : memref<8x8x1024xf32, #tpu.memory_space<vmem>>, vector<1x8x512xf32>
    %354 = vector.shape_cast %353 : vector<1x8x512xf32> to vector<8x512xf32>
    %355 = arith.truncf %341 : vector<8x128xf32> to vector<8x128xbf16>
    %cst_124 = arith.constant dense<0.000000e+00> : vector<8x512xf32>
    %356 = tpu.matmul %355, %5, %cst_124 {dimension_numbers = #tpu.dot_dimension_numbers<[1], [0], [0], [1], [0, 0, 1, 1], [], []>} : vector<8x128xbf16>, vector<128x512xbf16>, vector<8x512xf32> -> vector<8x512xf32>
    %357 = arith.addf %354, %356 : vector<8x512xf32>
    %358 = vector.extract_strided_slice %352 {offsets = [0, 0], sizes = [8, 384], strides = [1, 1]} : vector<8x512xf32> to vector<8x384xf32>
    %359 = arith.negf %358 : vector<8x384xf32>
    %360 = math.exp %359 : vector<8x384xf32>
    %cst_125 = arith.constant 1.000000e+00 : f32
    %361 = vector.broadcast %cst_125 : f32 to vector<8x384xf32>
    %362 = arith.addf %361, %360 : vector<8x384xf32>
    %363 = arith.divf %361, %362 : vector<8x384xf32>
    %364 = vector.extract_strided_slice %357 {offsets = [0, 0], sizes = [8, 384], strides = [1, 1]} : vector<8x512xf32> to vector<8x384xf32>
    %365 = arith.negf %364 : vector<8x384xf32>
    %366 = math.exp %365 : vector<8x384xf32>
    %cst_126 = arith.constant 1.000000e+00 : f32
    %367 = vector.broadcast %cst_126 : f32 to vector<8x384xf32>
    %368 = arith.addf %367, %366 : vector<8x384xf32>
    %369 = arith.divf %367, %368 : vector<8x384xf32>
    %370 = vector.extract_strided_slice %352 {offsets = [0, 384], sizes = [8, 128], strides = [1, 1]} : vector<8x512xf32> to vector<8x128xf32>
    %371 = math.tanh %370 : vector<8x128xf32>
    %372 = vector.extract_strided_slice %357 {offsets = [0, 384], sizes = [8, 128], strides = [1, 1]} : vector<8x512xf32> to vector<8x128xf32>
    %373 = math.tanh %372 : vector<8x128xf32>
    %374 = vector.extract_strided_slice %363 {offsets = [0, 128], sizes = [8, 128], strides = [1, 1]} : vector<8x384xf32> to vector<8x128xf32>
    %375 = arith.mulf %374, %330 : vector<8x128xf32>
    %376 = vector.extract_strided_slice %363 {offsets = [0, 0], sizes = [8, 128], strides = [1, 1]} : vector<8x384xf32> to vector<8x128xf32>
    %377 = arith.mulf %376, %371 : vector<8x128xf32>
    %378 = arith.addf %375, %377 : vector<8x128xf32>
    %379 = vector.extract_strided_slice %369 {offsets = [0, 128], sizes = [8, 128], strides = [1, 1]} : vector<8x384xf32> to vector<8x128xf32>
    %380 = arith.mulf %379, %335 : vector<8x128xf32>
    %381 = vector.extract_strided_slice %369 {offsets = [0, 0], sizes = [8, 128], strides = [1, 1]} : vector<8x384xf32> to vector<8x128xf32>
    %382 = arith.mulf %381, %373 : vector<8x128xf32>
    %383 = arith.addf %380, %382 : vector<8x128xf32>
    %384 = vector.extract_strided_slice %363 {offsets = [0, 256], sizes = [8, 128], strides = [1, 1]} : vector<8x384xf32> to vector<8x128xf32>
    %385 = math.tanh %378 : vector<8x128xf32>
    %386 = arith.mulf %384, %385 : vector<8x128xf32>
    %387 = vector.extract_strided_slice %369 {offsets = [0, 256], sizes = [8, 128], strides = [1, 1]} : vector<8x384xf32> to vector<8x128xf32>
    %388 = math.tanh %383 : vector<8x128xf32>
    %389 = arith.mulf %387, %388 : vector<8x128xf32>
    %c7_127 = arith.constant 7 : index
    %c0_128 = arith.constant 0 : index
    %c0_129 = arith.constant 0 : index
    %390 = vector.load %arg15[%c7_127, %c0_128, %c0_129] : memref<8x8x256xf32, #tpu.memory_space<vmem>>, vector<1x8x128xf32>
    %391 = vector.shape_cast %390 : vector<1x8x128xf32> to vector<8x128xf32>
    %392 = vector.shape_cast %386 : vector<8x128xf32> to vector<1x8x128xf32>
    tpu.vector_store %arg15[%c7_127, %c0_128, %c0_129], %392 {strides = array<i32>} : memref<8x8x256xf32, #tpu.memory_space<vmem>>, vector<1x8x128xf32>,
    %c0_130 = arith.constant 0 : index
    %c0_131 = arith.constant 0 : index
    %c128_132 = arith.constant 128 : index
    %393 = vector.load %arg15[%c0_130, %c0_131, %c128_132] : memref<8x8x256xf32, #tpu.memory_space<vmem>>, vector<1x8x128xf32>
    %394 = vector.shape_cast %393 : vector<1x8x128xf32> to vector<8x128xf32>
    %395 = vector.shape_cast %389 : vector<8x128xf32> to vector<1x8x128xf32>
    tpu.vector_store %arg15[%c0_130, %c0_131, %c128_132], %395 {strides = array<i32>} : memref<8x8x256xf32, #tpu.memory_space<vmem>>, vector<1x8x128xf32>,
    %c0_133 = arith.constant 0 : index
    %c0_134 = arith.constant 0 : index
    %c0_135 = arith.constant 0 : index
    %396 = vector.load %arg15[%c0_133, %c0_134, %c0_135] : memref<8x8x256xf32, #tpu.memory_space<vmem>>, vector<8x8x256xf32>
    %397 = vector.shape_cast %396 : vector<8x8x256xf32> to vector<64x256xf32>
    %398 = arith.truncf %397 : vector<64x256xf32> to vector<64x256xbf16>
    %c0_136 = arith.constant 0 : index
    %c0_137 = arith.constant 0 : index
    %399 = vector.load %arg6[%c0_136, %c0_137] : memref<256x1024xbf16, #tpu.memory_space<vmem>>, vector<256x512xbf16>
    %cst_138 = arith.constant dense<0.000000e+00> : vector<64x512xf32>
    %400 = tpu.matmul %398, %399, %cst_138 {dimension_numbers = #tpu.dot_dimension_numbers<[1], [0], [0], [1], [0, 0, 1, 1], [], []>} : vector<64x256xbf16>, vector<256x512xbf16>, vector<64x512xf32> -> vector<64x512xf32>
    %c0_139 = arith.constant 0 : index
    %c0_140 = arith.constant 0 : index
    %401 = vector.load %arg7[%c0_139, %c0_140] : memref<1x1024xf32, #tpu.memory_space<vmem>>, vector<1x512xf32>
    %402 = vector.broadcast %401 : vector<1x512xf32> to vector<64x512xf32>
    %403 = arith.addf %400, %402 : vector<64x512xf32>
    %404 = vector.shape_cast %403 : vector<64x512xf32> to vector<8x8x512xf32>
    %c0_141 = arith.constant 0 : index
    %c0_142 = arith.constant 0 : index
    %c0_143 = arith.constant 0 : index
    %405 = vector.load %arg16[%c0_141, %c0_142, %c0_143] : memref<8x8x512xf32, #tpu.memory_space<vmem>>, vector<8x8x512xf32>
    tpu.vector_store %arg16[%c0_141, %c0_142, %c0_143], %404 {strides = array<i32>} : memref<8x8x512xf32, #tpu.memory_space<vmem>>, vector<8x8x512xf32>,
    %c7_144 = arith.constant 7 : index
    %c0_145 = arith.constant 0 : index
    %c0_146 = arith.constant 0 : index
    %406 = vector.load %arg15[%c7_144, %c0_145, %c0_146] : memref<8x8x256xf32, #tpu.memory_space<vmem>>, vector<1x8x256xf32>
    %407 = vector.shape_cast %406 : vector<1x8x256xf32> to vector<8x256xf32>
    %408 = arith.truncf %407 : vector<8x256xf32> to vector<8x256xbf16>
    %c0_147 = arith.constant 0 : index
    %c512_148 = arith.constant 512 : index
    %409 = vector.load %arg6[%c0_147, %c512_148] : memref<256x1024xbf16, #tpu.memory_space<vmem>>, vector<256x512xbf16>
    %cst_149 = arith.constant dense<0.000000e+00> : vector<8x512xf32>
    %410 = tpu.matmul %408, %409, %cst_149 {dimension_numbers = #tpu.dot_dimension_numbers<[1], [0], [0], [1], [0, 0, 1, 1], [], []>} : vector<8x256xbf16>, vector<256x512xbf16>, vector<8x512xf32> -> vector<8x512xf32>
    %c0_150 = arith.constant 0 : index
    %c512_151 = arith.constant 512 : index
    %411 = vector.load %arg7[%c0_150, %c512_151] : memref<1x1024xf32, #tpu.memory_space<vmem>>, vector<1x512xf32>
    %412 = vector.broadcast %411 : vector<1x512xf32> to vector<8x512xf32>
    %413 = arith.addf %410, %412 : vector<8x512xf32>
    %c0_152 = arith.constant 0 : index
    %c0_153 = arith.constant 0 : index
    %414 = vector.load %arg8[%c0_152, %c0_153] : memref<128x512xbf16, #tpu.memory_space<vmem>>, vector<128x512xbf16>
    %cst_154 = arith.constant 0.000000e+00 : f32
    %415 = vector.broadcast %cst_154 : f32 to vector<8x128xf32>
    %c0_155 = arith.constant 0 : index
    %c0_156 = arith.constant 0 : index
    %c0_157 = arith.constant 0 : index
    %416 = vector.load %arg16[%c0_155, %c0_156, %c0_157] : memref<8x8x512xf32, #tpu.memory_space<vmem>>, vector<1x8x512xf32>
    %417 = vector.shape_cast %416 : vector<1x8x512xf32> to vector<8x512xf32>
    %418 = arith.truncf %415 : vector<8x128xf32> to vector<8x128xbf16>
    %cst_158 = arith.constant dense<0.000000e+00> : vector<8x512xf32>
    %419 = tpu.matmul %418, %414, %cst_158 {dimension_numbers = #tpu.dot_dimension_numbers<[1], [0], [0], [1], [0, 0, 1, 1], [], []>} : vector<8x128xbf16>, vector<128x512xbf16>, vector<8x512xf32> -> vector<8x512xf32>
    %420 = arith.addf %417, %419 : vector<8x512xf32>
    %421 = vector.extract_strided_slice %420 {offsets = [0, 0], sizes = [8, 384], strides = [1, 1]} : vector<8x512xf32> to vector<8x384xf32>
    %422 = arith.negf %421 : vector<8x384xf32>
    %423 = math.exp %422 : vector<8x384xf32>
    %cst_159 = arith.constant 1.000000e+00 : f32
    %424 = vector.broadcast %cst_159 : f32 to vector<8x384xf32>
    %425 = arith.addf %424, %423 : vector<8x384xf32>
    %426 = arith.divf %424, %425 : vector<8x384xf32>
    %427 = vector.extract_strided_slice %420 {offsets = [0, 384], sizes = [8, 128], strides = [1, 1]} : vector<8x512xf32> to vector<8x128xf32>
    %428 = math.tanh %427 : vector<8x128xf32>
    %429 = vector.extract_strided_slice %426 {offsets = [0, 128], sizes = [8, 128], strides = [1, 1]} : vector<8x384xf32> to vector<8x128xf32>
    %430 = arith.mulf %429, %415 : vector<8x128xf32>
    %431 = vector.extract_strided_slice %426 {offsets = [0, 0], sizes = [8, 128], strides = [1, 1]} : vector<8x384xf32> to vector<8x128xf32>
    %432 = arith.mulf %431, %428 : vector<8x128xf32>
    %433 = arith.addf %430, %432 : vector<8x128xf32>
    %434 = vector.extract_strided_slice %426 {offsets = [0, 256], sizes = [8, 128], strides = [1, 1]} : vector<8x384xf32> to vector<8x128xf32>
    %435 = math.tanh %433 : vector<8x128xf32>
    %436 = arith.mulf %434, %435 : vector<8x128xf32>
    %c1_160 = arith.constant 1 : index
    %c0_161 = arith.constant 0 : index
    %c0_162 = arith.constant 0 : index
    %437 = vector.load %arg16[%c1_160, %c0_161, %c0_162] : memref<8x8x512xf32, #tpu.memory_space<vmem>>, vector<1x8x512xf32>
    %438 = vector.shape_cast %437 : vector<1x8x512xf32> to vector<8x512xf32>
    %439 = arith.truncf %436 : vector<8x128xf32> to vector<8x128xbf16>
    %cst_163 = arith.constant dense<0.000000e+00> : vector<8x512xf32>
    %440 = tpu.matmul %439, %414, %cst_163 {dimension_numbers = #tpu.dot_dimension_numbers<[1], [0], [0], [1], [0, 0, 1, 1], [], []>} : vector<8x128xbf16>, vector<128x512xbf16>, vector<8x512xf32> -> vector<8x512xf32>
    %441 = arith.addf %438, %440 : vector<8x512xf32>
    %442 = vector.extract_strided_slice %441 {offsets = [0, 0], sizes = [8, 384], strides = [1, 1]} : vector<8x512xf32> to vector<8x384xf32>
    %443 = arith.negf %442 : vector<8x384xf32>
    %444 = math.exp %443 : vector<8x384xf32>
    %cst_164 = arith.constant 1.000000e+00 : f32
    %445 = vector.broadcast %cst_164 : f32 to vector<8x384xf32>
    %446 = arith.addf %445, %444 : vector<8x384xf32>
    %447 = arith.divf %445, %446 : vector<8x384xf32>
    %448 = vector.extract_strided_slice %441 {offsets = [0, 384], sizes = [8, 128], strides = [1, 1]} : vector<8x512xf32> to vector<8x128xf32>
    %449 = math.tanh %448 : vector<8x128xf32>
    %450 = vector.extract_strided_slice %447 {offsets = [0, 128], sizes = [8, 128], strides = [1, 1]} : vector<8x384xf32> to vector<8x128xf32>
    %451 = arith.mulf %450, %433 : vector<8x128xf32>
    %452 = vector.extract_strided_slice %447 {offsets = [0, 0], sizes = [8, 128], strides = [1, 1]} : vector<8x384xf32> to vector<8x128xf32>
    %453 = arith.mulf %452, %449 : vector<8x128xf32>
    %454 = arith.addf %451, %453 : vector<8x128xf32>
    %455 = vector.extract_strided_slice %447 {offsets = [0, 256], sizes = [8, 128], strides = [1, 1]} : vector<8x384xf32> to vector<8x128xf32>
    %456 = math.tanh %454 : vector<8x128xf32>
    %457 = arith.mulf %455, %456 : vector<8x128xf32>
    %c2_165 = arith.constant 2 : index
    %c0_166 = arith.constant 0 : index
    %c0_167 = arith.constant 0 : index
    %458 = vector.load %arg16[%c2_165, %c0_166, %c0_167] : memref<8x8x512xf32, #tpu.memory_space<vmem>>, vector<1x8x512xf32>
    %459 = vector.shape_cast %458 : vector<1x8x512xf32> to vector<8x512xf32>
    %460 = arith.truncf %457 : vector<8x128xf32> to vector<8x128xbf16>
    %cst_168 = arith.constant dense<0.000000e+00> : vector<8x512xf32>
    %461 = tpu.matmul %460, %414, %cst_168 {dimension_numbers = #tpu.dot_dimension_numbers<[1], [0], [0], [1], [0, 0, 1, 1], [], []>} : vector<8x128xbf16>, vector<128x512xbf16>, vector<8x512xf32> -> vector<8x512xf32>
    %462 = arith.addf %459, %461 : vector<8x512xf32>
    %463 = vector.extract_strided_slice %462 {offsets = [0, 0], sizes = [8, 384], strides = [1, 1]} : vector<8x512xf32> to vector<8x384xf32>
    %464 = arith.negf %463 : vector<8x384xf32>
    %465 = math.exp %464 : vector<8x384xf32>
    %cst_169 = arith.constant 1.000000e+00 : f32
    %466 = vector.broadcast %cst_169 : f32 to vector<8x384xf32>
    %467 = arith.addf %466, %465 : vector<8x384xf32>
    %468 = arith.divf %466, %467 : vector<8x384xf32>
    %469 = vector.extract_strided_slice %462 {offsets = [0, 384], sizes = [8, 128], strides = [1, 1]} : vector<8x512xf32> to vector<8x128xf32>
    %470 = math.tanh %469 : vector<8x128xf32>
    %471 = vector.extract_strided_slice %468 {offsets = [0, 128], sizes = [8, 128], strides = [1, 1]} : vector<8x384xf32> to vector<8x128xf32>
    %472 = arith.mulf %471, %454 : vector<8x128xf32>
    %473 = vector.extract_strided_slice %468 {offsets = [0, 0], sizes = [8, 128], strides = [1, 1]} : vector<8x384xf32> to vector<8x128xf32>
    %474 = arith.mulf %473, %470 : vector<8x128xf32>
    %475 = arith.addf %472, %474 : vector<8x128xf32>
    %476 = vector.extract_strided_slice %468 {offsets = [0, 256], sizes = [8, 128], strides = [1, 1]} : vector<8x384xf32> to vector<8x128xf32>
    %477 = math.tanh %475 : vector<8x128xf32>
    %478 = arith.mulf %476, %477 : vector<8x128xf32>
    %c3_170 = arith.constant 3 : index
    %c0_171 = arith.constant 0 : index
    %c0_172 = arith.constant 0 : index
    %479 = vector.load %arg16[%c3_170, %c0_171, %c0_172] : memref<8x8x512xf32, #tpu.memory_space<vmem>>, vector<1x8x512xf32>
    %480 = vector.shape_cast %479 : vector<1x8x512xf32> to vector<8x512xf32>
    %481 = arith.truncf %478 : vector<8x128xf32> to vector<8x128xbf16>
    %cst_173 = arith.constant dense<0.000000e+00> : vector<8x512xf32>
    %482 = tpu.matmul %481, %414, %cst_173 {dimension_numbers = #tpu.dot_dimension_numbers<[1], [0], [0], [1], [0, 0, 1, 1], [], []>} : vector<8x128xbf16>, vector<128x512xbf16>, vector<8x512xf32> -> vector<8x512xf32>
    %483 = arith.addf %480, %482 : vector<8x512xf32>
    %484 = vector.extract_strided_slice %483 {offsets = [0, 0], sizes = [8, 384], strides = [1, 1]} : vector<8x512xf32> to vector<8x384xf32>
    %485 = arith.negf %484 : vector<8x384xf32>
    %486 = math.exp %485 : vector<8x384xf32>
    %cst_174 = arith.constant 1.000000e+00 : f32
    %487 = vector.broadcast %cst_174 : f32 to vector<8x384xf32>
    %488 = arith.addf %487, %486 : vector<8x384xf32>
    %489 = arith.divf %487, %488 : vector<8x384xf32>
    %490 = vector.extract_strided_slice %483 {offsets = [0, 384], sizes = [8, 128], strides = [1, 1]} : vector<8x512xf32> to vector<8x128xf32>
    %491 = math.tanh %490 : vector<8x128xf32>
    %492 = vector.extract_strided_slice %489 {offsets = [0, 128], sizes = [8, 128], strides = [1, 1]} : vector<8x384xf32> to vector<8x128xf32>
    %493 = arith.mulf %492, %475 : vector<8x128xf32>
    %494 = vector.extract_strided_slice %489 {offsets = [0, 0], sizes = [8, 128], strides = [1, 1]} : vector<8x384xf32> to vector<8x128xf32>
    %495 = arith.mulf %494, %491 : vector<8x128xf32>
    %496 = arith.addf %493, %495 : vector<8x128xf32>
    %497 = vector.extract_strided_slice %489 {offsets = [0, 256], sizes = [8, 128], strides = [1, 1]} : vector<8x384xf32> to vector<8x128xf32>
    %498 = math.tanh %496 : vector<8x128xf32>
    %499 = arith.mulf %497, %498 : vector<8x128xf32>
    %c4_175 = arith.constant 4 : index
    %c0_176 = arith.constant 0 : index
    %c0_177 = arith.constant 0 : index
    %500 = vector.load %arg16[%c4_175, %c0_176, %c0_177] : memref<8x8x512xf32, #tpu.memory_space<vmem>>, vector<1x8x512xf32>
    %501 = vector.shape_cast %500 : vector<1x8x512xf32> to vector<8x512xf32>
    %502 = arith.truncf %499 : vector<8x128xf32> to vector<8x128xbf16>
    %cst_178 = arith.constant dense<0.000000e+00> : vector<8x512xf32>
    %503 = tpu.matmul %502, %414, %cst_178 {dimension_numbers = #tpu.dot_dimension_numbers<[1], [0], [0], [1], [0, 0, 1, 1], [], []>} : vector<8x128xbf16>, vector<128x512xbf16>, vector<8x512xf32> -> vector<8x512xf32>
    %504 = arith.addf %501, %503 : vector<8x512xf32>
    %505 = vector.extract_strided_slice %504 {offsets = [0, 0], sizes = [8, 384], strides = [1, 1]} : vector<8x512xf32> to vector<8x384xf32>
    %506 = arith.negf %505 : vector<8x384xf32>
    %507 = math.exp %506 : vector<8x384xf32>
    %cst_179 = arith.constant 1.000000e+00 : f32
    %508 = vector.broadcast %cst_179 : f32 to vector<8x384xf32>
    %509 = arith.addf %508, %507 : vector<8x384xf32>
    %510 = arith.divf %508, %509 : vector<8x384xf32>
    %511 = vector.extract_strided_slice %504 {offsets = [0, 384], sizes = [8, 128], strides = [1, 1]} : vector<8x512xf32> to vector<8x128xf32>
    %512 = math.tanh %511 : vector<8x128xf32>
    %513 = vector.extract_strided_slice %510 {offsets = [0, 128], sizes = [8, 128], strides = [1, 1]} : vector<8x384xf32> to vector<8x128xf32>
    %514 = arith.mulf %513, %496 : vector<8x128xf32>
    %515 = vector.extract_strided_slice %510 {offsets = [0, 0], sizes = [8, 128], strides = [1, 1]} : vector<8x384xf32> to vector<8x128xf32>
    %516 = arith.mulf %515, %512 : vector<8x128xf32>
    %517 = arith.addf %514, %516 : vector<8x128xf32>
    %518 = vector.extract_strided_slice %510 {offsets = [0, 256], sizes = [8, 128], strides = [1, 1]} : vector<8x384xf32> to vector<8x128xf32>
    %519 = math.tanh %517 : vector<8x128xf32>
    %520 = arith.mulf %518, %519 : vector<8x128xf32>
    %c5_180 = arith.constant 5 : index
    %c0_181 = arith.constant 0 : index
    %c0_182 = arith.constant 0 : index
    %521 = vector.load %arg16[%c5_180, %c0_181, %c0_182] : memref<8x8x512xf32, #tpu.memory_space<vmem>>, vector<1x8x512xf32>
    %522 = vector.shape_cast %521 : vector<1x8x512xf32> to vector<8x512xf32>
    %523 = arith.truncf %520 : vector<8x128xf32> to vector<8x128xbf16>
    %cst_183 = arith.constant dense<0.000000e+00> : vector<8x512xf32>
    %524 = tpu.matmul %523, %414, %cst_183 {dimension_numbers = #tpu.dot_dimension_numbers<[1], [0], [0], [1], [0, 0, 1, 1], [], []>} : vector<8x128xbf16>, vector<128x512xbf16>, vector<8x512xf32> -> vector<8x512xf32>
    %525 = arith.addf %522, %524 : vector<8x512xf32>
    %526 = vector.extract_strided_slice %525 {offsets = [0, 0], sizes = [8, 384], strides = [1, 1]} : vector<8x512xf32> to vector<8x384xf32>
    %527 = arith.negf %526 : vector<8x384xf32>
    %528 = math.exp %527 : vector<8x384xf32>
    %cst_184 = arith.constant 1.000000e+00 : f32
    %529 = vector.broadcast %cst_184 : f32 to vector<8x384xf32>
    %530 = arith.addf %529, %528 : vector<8x384xf32>
    %531 = arith.divf %529, %530 : vector<8x384xf32>
    %532 = vector.extract_strided_slice %525 {offsets = [0, 384], sizes = [8, 128], strides = [1, 1]} : vector<8x512xf32> to vector<8x128xf32>
    %533 = math.tanh %532 : vector<8x128xf32>
    %534 = vector.extract_strided_slice %531 {offsets = [0, 128], sizes = [8, 128], strides = [1, 1]} : vector<8x384xf32> to vector<8x128xf32>
    %535 = arith.mulf %534, %517 : vector<8x128xf32>
    %536 = vector.extract_strided_slice %531 {offsets = [0, 0], sizes = [8, 128], strides = [1, 1]} : vector<8x384xf32> to vector<8x128xf32>
    %537 = arith.mulf %536, %533 : vector<8x128xf32>
    %538 = arith.addf %535, %537 : vector<8x128xf32>
    %539 = vector.extract_strided_slice %531 {offsets = [0, 256], sizes = [8, 128], strides = [1, 1]} : vector<8x384xf32> to vector<8x128xf32>
    %540 = math.tanh %538 : vector<8x128xf32>
    %541 = arith.mulf %539, %540 : vector<8x128xf32>
    %c6_185 = arith.constant 6 : index
    %c0_186 = arith.constant 0 : index
    %c0_187 = arith.constant 0 : index
    %542 = vector.load %arg16[%c6_185, %c0_186, %c0_187] : memref<8x8x512xf32, #tpu.memory_space<vmem>>, vector<1x8x512xf32>
    %543 = vector.shape_cast %542 : vector<1x8x512xf32> to vector<8x512xf32>
    %544 = arith.truncf %541 : vector<8x128xf32> to vector<8x128xbf16>
    %cst_188 = arith.constant dense<0.000000e+00> : vector<8x512xf32>
    %545 = tpu.matmul %544, %414, %cst_188 {dimension_numbers = #tpu.dot_dimension_numbers<[1], [0], [0], [1], [0, 0, 1, 1], [], []>} : vector<8x128xbf16>, vector<128x512xbf16>, vector<8x512xf32> -> vector<8x512xf32>
    %546 = arith.addf %543, %545 : vector<8x512xf32>
    %547 = vector.extract_strided_slice %546 {offsets = [0, 0], sizes = [8, 384], strides = [1, 1]} : vector<8x512xf32> to vector<8x384xf32>
    %548 = arith.negf %547 : vector<8x384xf32>
    %549 = math.exp %548 : vector<8x384xf32>
    %cst_189 = arith.constant 1.000000e+00 : f32
    %550 = vector.broadcast %cst_189 : f32 to vector<8x384xf32>
    %551 = arith.addf %550, %549 : vector<8x384xf32>
    %552 = arith.divf %550, %551 : vector<8x384xf32>
    %553 = vector.extract_strided_slice %546 {offsets = [0, 384], sizes = [8, 128], strides = [1, 1]} : vector<8x512xf32> to vector<8x128xf32>
    %554 = math.tanh %553 : vector<8x128xf32>
    %555 = vector.extract_strided_slice %552 {offsets = [0, 128], sizes = [8, 128], strides = [1, 1]} : vector<8x384xf32> to vector<8x128xf32>
    %556 = arith.mulf %555, %538 : vector<8x128xf32>
    %557 = vector.extract_strided_slice %552 {offsets = [0, 0], sizes = [8, 128], strides = [1, 1]} : vector<8x384xf32> to vector<8x128xf32>
    %558 = arith.mulf %557, %554 : vector<8x128xf32>
    %559 = arith.addf %556, %558 : vector<8x128xf32>
    %560 = vector.extract_strided_slice %552 {offsets = [0, 256], sizes = [8, 128], strides = [1, 1]} : vector<8x384xf32> to vector<8x128xf32>
    %561 = math.tanh %559 : vector<8x128xf32>
    %562 = arith.mulf %560, %561 : vector<8x128xf32>
    %c7_190 = arith.constant 7 : index
    %c0_191 = arith.constant 0 : index
    %c0_192 = arith.constant 0 : index
    %563 = vector.load %arg16[%c7_190, %c0_191, %c0_192] : memref<8x8x512xf32, #tpu.memory_space<vmem>>, vector<1x8x512xf32>
    %564 = vector.shape_cast %563 : vector<1x8x512xf32> to vector<8x512xf32>
    %565 = arith.truncf %562 : vector<8x128xf32> to vector<8x128xbf16>
    %cst_193 = arith.constant dense<0.000000e+00> : vector<8x512xf32>
    %566 = tpu.matmul %565, %414, %cst_193 {dimension_numbers = #tpu.dot_dimension_numbers<[1], [0], [0], [1], [0, 0, 1, 1], [], []>} : vector<8x128xbf16>, vector<128x512xbf16>, vector<8x512xf32> -> vector<8x512xf32>
    %567 = arith.addf %564, %566 : vector<8x512xf32>
    %568 = vector.extract_strided_slice %567 {offsets = [0, 0], sizes = [8, 384], strides = [1, 1]} : vector<8x512xf32> to vector<8x384xf32>
    %569 = arith.negf %568 : vector<8x384xf32>
    %570 = math.exp %569 : vector<8x384xf32>
    %cst_194 = arith.constant 1.000000e+00 : f32
    %571 = vector.broadcast %cst_194 : f32 to vector<8x384xf32>
    %572 = arith.addf %571, %570 : vector<8x384xf32>
    %573 = arith.divf %571, %572 : vector<8x384xf32>
    %574 = vector.extract_strided_slice %567 {offsets = [0, 384], sizes = [8, 128], strides = [1, 1]} : vector<8x512xf32> to vector<8x128xf32>
    %575 = math.tanh %574 : vector<8x128xf32>
    %576 = vector.extract_strided_slice %573 {offsets = [0, 128], sizes = [8, 128], strides = [1, 1]} : vector<8x384xf32> to vector<8x128xf32>
    %577 = arith.mulf %576, %559 : vector<8x128xf32>
    %578 = vector.extract_strided_slice %573 {offsets = [0, 0], sizes = [8, 128], strides = [1, 1]} : vector<8x384xf32> to vector<8x128xf32>
    %579 = arith.mulf %578, %575 : vector<8x128xf32>
    %580 = arith.addf %577, %579 : vector<8x128xf32>
    %581 = vector.extract_strided_slice %573 {offsets = [0, 256], sizes = [8, 128], strides = [1, 1]} : vector<8x384xf32> to vector<8x128xf32>
    %582 = math.tanh %580 : vector<8x128xf32>
    %583 = arith.mulf %581, %582 : vector<8x128xf32>
    %584 = vector.extract_strided_slice %413 {offsets = [0, 0], sizes = [8, 384], strides = [1, 1]} : vector<8x512xf32> to vector<8x384xf32>
    %585 = arith.negf %584 : vector<8x384xf32>
    %586 = math.exp %585 : vector<8x384xf32>
    %cst_195 = arith.constant 1.000000e+00 : f32
    %587 = vector.broadcast %cst_195 : f32 to vector<8x384xf32>
    %588 = arith.addf %587, %586 : vector<8x384xf32>
    %589 = arith.divf %587, %588 : vector<8x384xf32>
    %590 = vector.extract_strided_slice %413 {offsets = [0, 384], sizes = [8, 128], strides = [1, 1]} : vector<8x512xf32> to vector<8x128xf32>
    %591 = math.tanh %590 : vector<8x128xf32>
    %592 = vector.extract_strided_slice %589 {offsets = [0, 0], sizes = [8, 128], strides = [1, 1]} : vector<8x384xf32> to vector<8x128xf32>
    %593 = arith.mulf %592, %591 : vector<8x128xf32>
    %594 = vector.extract_strided_slice %589 {offsets = [0, 256], sizes = [8, 128], strides = [1, 1]} : vector<8x384xf32> to vector<8x128xf32>
    %595 = math.tanh %593 : vector<8x128xf32>
    %596 = arith.mulf %594, %595 : vector<8x128xf32>
    %597 = tpu.concatenate %583, %596 in 1 : vector<8x128xf32>, vector<8x128xf32> -> vector<8x256xf32>
    %598 = arith.truncf %597 : vector<8x256xf32> to vector<8x256xbf16>
    %c0_196 = arith.constant 0 : index
    %c0_197 = arith.constant 0 : index
    %599 = vector.load %arg9[%c0_196, %c0_197] : memref<256x128xbf16, #tpu.memory_space<vmem>>, vector<256x128xbf16>
    %cst_198 = arith.constant dense<0.000000e+00> : vector<8x128xf32>
    %600 = tpu.matmul %598, %599, %cst_198 {dimension_numbers = #tpu.dot_dimension_numbers<[1], [0], [0], [1], [0, 0, 1, 1], [], []>} : vector<8x256xbf16>, vector<256x128xbf16>, vector<8x128xf32> -> vector<8x128xf32>
    %c0_199 = arith.constant 0 : index
    %c0_200 = arith.constant 0 : index
    %601 = vector.load %arg10[%c0_199, %c0_200] : memref<1x128xf32, #tpu.memory_space<vmem>>, vector<1x128xf32>
    %602 = vector.broadcast %601 : vector<1x128xf32> to vector<8x128xf32>
    %603 = arith.addf %600, %602 : vector<8x128xf32>
    %cst_201 = arith.constant 0.000000e+00 : f32
    %604 = vector.broadcast %cst_201 : f32 to vector<8x128xf32>
    %605 = arith.maximumf %603, %604 : vector<8x128xf32>
    %606 = arith.truncf %605 : vector<8x128xf32> to vector<8x128xbf16>
    %c0_202 = arith.constant 0 : index
    %c0_203 = arith.constant 0 : index
    %607 = vector.load %arg11[%c0_202, %c0_203] : memref<128x128xbf16, #tpu.memory_space<vmem>>, vector<128x128xbf16>
    %cst_204 = arith.constant dense<0.000000e+00> : vector<8x128xf32>
    %608 = tpu.matmul %606, %607, %cst_204 {dimension_numbers = #tpu.dot_dimension_numbers<[1], [0], [0], [1], [0, 0, 1, 1], [], []>} : vector<8x128xbf16>, vector<128x128xbf16>, vector<8x128xf32> -> vector<8x128xf32>
    %c0_205 = arith.constant 0 : index
    %c0_206 = arith.constant 0 : index
    %609 = vector.load %arg12[%c0_205, %c0_206] : memref<1x128xf32, #tpu.memory_space<vmem>>, vector<1x128xf32>
    %610 = vector.broadcast %609 : vector<1x128xf32> to vector<8x128xf32>
    %611 = arith.addf %608, %610 : vector<8x128xf32>
    %c0_207 = arith.constant 0 : index
    %c0_208 = arith.constant 0 : index
    %612 = vector.load %arg13[%c0_207, %c0_208] : memref<8x128xf32, #tpu.memory_space<vmem>>, vector<8x128xf32>
    tpu.vector_store %arg13[%c0_207, %c0_208], %611 {strides = array<i32>} : memref<8x128xf32, #tpu.memory_space<vmem>>, vector<8x128xf32>,
    return
  }
  func.func @transform_0(%arg0: i32) -> (i32, i32, i32) {
    %c0_i32 = arith.constant 0 : i32
    %c0_i32_0 = arith.constant 0 : i32
    %c0_i32_1 = arith.constant 0 : i32
    %c0_i32_2 = arith.constant 0 : i32
    return %c0_i32, %c0_i32_0, %c0_i32_1 : i32, i32, i32
  }
  func.func @transform_1(%arg0: i32) -> (i32, i32) {
    %c0_i32 = arith.constant 0 : i32
    %c0_i32_0 = arith.constant 0 : i32
    %c0_i32_1 = arith.constant 0 : i32
    return %c0_i32, %c0_i32_0 : i32, i32
  }
  func.func @transform_2(%arg0: i32) -> (i32, i32) {
    %c0_i32 = arith.constant 0 : i32
    %c0_i32_0 = arith.constant 0 : i32
    %c0_i32_1 = arith.constant 0 : i32
    return %c0_i32, %c0_i32_0 : i32, i32
  }
  func.func @transform_3(%arg0: i32) -> (i32, i32) {
    %c0_i32 = arith.constant 0 : i32
    %c0_i32_0 = arith.constant 0 : i32
    %c0_i32_1 = arith.constant 0 : i32
    return %c0_i32, %c0_i32_0 : i32, i32
  }
  func.func @transform_4(%arg0: i32) -> (i32, i32) {
    %c0_i32 = arith.constant 0 : i32
    %c0_i32_0 = arith.constant 0 : i32
    %c0_i32_1 = arith.constant 0 : i32
    return %c0_i32, %c0_i32_0 : i32, i32
  }
  func.func @transform_5(%arg0: i32) -> (i32, i32) {
    %c0_i32 = arith.constant 0 : i32
    %c0_i32_0 = arith.constant 0 : i32
    %c0_i32_1 = arith.constant 0 : i32
    return %c0_i32, %c0_i32_0 : i32, i32
  }
  func.func @transform_6(%arg0: i32) -> (i32, i32) {
    %c0_i32 = arith.constant 0 : i32
    %c0_i32_0 = arith.constant 0 : i32
    %c0_i32_1 = arith.constant 0 : i32
    return %c0_i32, %c0_i32_0 : i32, i32
  }
  func.func @transform_7(%arg0: i32) -> (i32, i32) {
    %c0_i32 = arith.constant 0 : i32
    %c0_i32_0 = arith.constant 0 : i32
    %c0_i32_1 = arith.constant 0 : i32
    return %c0_i32, %c0_i32_0 : i32, i32
  }
  func.func @transform_8(%arg0: i32) -> (i32, i32) {
    %c0_i32 = arith.constant 0 : i32
    %c0_i32_0 = arith.constant 0 : i32
    %c0_i32_1 = arith.constant 0 : i32
    return %c0_i32, %c0_i32_0 : i32, i32
  }
  func.func @transform_9(%arg0: i32) -> (i32, i32) {
    %c0_i32 = arith.constant 0 : i32
    %c0_i32_0 = arith.constant 0 : i32
    %c0_i32_1 = arith.constant 0 : i32
    return %c0_i32, %c0_i32_0 : i32, i32
  }
  func.func @transform_10(%arg0: i32) -> (i32, i32) {
    %c0_i32 = arith.constant 0 : i32
    %c0_i32_0 = arith.constant 0 : i32
    %c0_i32_1 = arith.constant 0 : i32
    return %c0_i32, %c0_i32_0 : i32, i32
  }
  func.func @transform_11(%arg0: i32) -> (i32, i32) {
    %c0_i32 = arith.constant 0 : i32
    %c0_i32_0 = arith.constant 0 : i32
    %c0_i32_1 = arith.constant 0 : i32
    return %c0_i32, %c0_i32_0 : i32, i32
  }
  func.func @transform_12(%arg0: i32) -> (i32, i32) {
    %c0_i32 = arith.constant 0 : i32
    %c0_i32_0 = arith.constant 0 : i32
    %c0_i32_1 = arith.constant 0 : i32
    return %c0_i32, %c0_i32_0 : i32, i32
  }
}

</mosaic_0001>

<bundles_post_ra>
// kernel: _lambda_.1
= control target key start
LH: loop header
LB: loop body
LE: loop exit
PB: predicated region body
PF: predicated region fallthrough
CT: control target
= control target key end

     0   :  { %17 = vsyncpa [#allocation6], 0  ;;  %s9065_s0 = inlined_call_operand.vmem [shape: bf16[8,8,128], index: 0, kind: input, shape index: {}]   ;;  %s9066_s1 = inlined_call_operand.hbm [shape: bf16[128,1024], index: 1, kind: input, shape index: {}]   ;;  %s9067_s2 = inlined_call_operand.vmem [shape: f32[1,1024], index: 2, kind: input, shape index: {}]   ;;  %s9068_s3 = inlined_call_operand.hbm [shape: bf16[128,512], index: 3, kind: input, shape index: {}]   ;;  %s9069_s4 = inlined_call_operand.hbm [shape: bf16[128,512], index: 4, kind: input, shape index: {}]   ;;  %s9070_s5 = inlined_call_operand.hbm [shape: bf16[256,1024], index: 5, kind: input, shape index: {}]   ;;  %s9071_s6 = inlined_call_operand.vmem [shape: f32[1,1024], index: 6, kind: input, shape index: {}]   ;;  %s9072_s7 = inlined_call_operand.hbm [shape: bf16[128,512], index: 7, kind: input, shape index: {}]   ;;  %s9073_s8 = inlined_call_operand.hbm [shape: bf16[256,128], index: 8, kind: input, shape index: {}]   ;;  %s9074_s9 = inlined_call_operand.vmem [shape: f32[1,128], index: 9, kind: input, shape index: {}]   ;;  %s9075_s10 = inlined_call_operand.vmem [shape: bf16[128,128], index: 10, kind: input, shape index: {}]   ;;  %s9076_s11 = inlined_call_operand.vmem [shape: f32[1,128], index: 11, kind: input, shape index: {}]   ;;  %s9077_s12 = inlined_call_operand.hbm [shape: f32[8,128], index: 12, kind: output, shape index: {}]  }
   0x1   :  { %18 = vsyncpa [#allocation9], 0 }
   0x2   :  { %19 = vsyncpa [#allocation12], 0 }
   0x3   :  { %20 = vsyncpa [#allocation15], 0 }
   0x4   :  { %21 = vsyncpa [#allocation7], 0  ;;  %s7065_s21 = smov [#allocation8]  }
   0x5   :  { %s43_s22 = sshll.u32 %s7065_s21, 4  ;;  %s44_s22 = int_to_ptr.vmem [resolvable:$true] %s43_s22 }
   0x6   :  { %s6923_s23 = scalar_lea.vmem %s44_s22, 4096  ;;  %p6928_p1 = scmp.lt.s32.totalorder %s44_s22, %s44_s22 }
   0x7   :  { %p6924_p0 = scmp.ne.s32.totalorder %s44_s22, %s6923_s23  ;;  %p6929_p2 = scmp.lt.s32.totalorder %s6923_s23, %s6923_s23 }
   0x9   :  { %p6930_p3 = por %p6929_p2, %p6928_p1 }
   0xb   :  { %p6931_p4 = pnand %p6930_p3, %p6924_p0 }
   0xd   :  { %6934 = shalt.err (!%p6931_p4)
}
   0xe   :  { %s7066_s24 = smov 256   ;;  %s7067_s25 = smov 16  }
   0xf   :  { %49 = dma.hbm_to_vmem [thread:$0]  %s9068_s3, 4096, %s44_s22, [#allocation9], %s7066_s24, %s7066_s24, %s7067_s25  }
  0x10   :  { %s7068_s28 = smov [#allocation11]   ;;  %s7069_s30 = smov [#allocation5]  }
  0x11   :  { %s67_s29 = sshll.u32 %s7068_s28, 4  ;;  %s29_s13 = sshll.u32 %s7069_s30, 4  ;;  %s68_s29 = int_to_ptr.vmem [resolvable:$true] %s67_s29  ;;  %s30_s13 = int_to_ptr.vmem [resolvable:$true] %s29_s13 }
  0x12   :  { %s6943_s14 = scalar_lea.vmem %s68_s29, 16384  ;;  %p6948_p6 = scmp.lt.s32.totalorder %s68_s29, %s68_s29 }
  0x13   :  { %p6944_p5 = scmp.ne.s32.totalorder %s68_s29, %s6943_s14  ;;  %p6949_p7 = scmp.lt.s32.totalorder %s6943_s14, %s6943_s14 }
  0x15   :  { %p6950_p8 = por %p6949_p7, %p6948_p6 }
  0x17   :  { %p6951_p9 = pnand %p6950_p8, %p6944_p5 }
  0x19   :  { %6954 = shalt.err (!%p6951_p9)
}
  0x1a   :  { %s7070_s15 = smov 512   ;;  %s7071_s16 = smov 32  }
  0x1b   :  { %73 = dma.hbm_to_vmem [thread:$0]  %s9070_s5, 16384, %s68_s29, [#allocation12], %s7070_s15, %s7070_s15, %s7071_s16  }
  0x1c   :  { %s6963_s3 = scalar_lea.vmem %s30_s13, 8192  ;;  %p6968_p11 = scmp.lt.s32.totalorder %s30_s13, %s30_s13 }
  0x1d   :  { %p6964_p10 = scmp.ne.s32.totalorder %s30_s13, %s6963_s3  ;;  %p6969_p12 = scmp.lt.s32.totalorder %s6963_s3, %s6963_s3 }
  0x1f   :  { %p6970_p13 = por %p6969_p12, %p6968_p11 }
  0x21   :  { %p6971_p0 = pnand %p6970_p13, %p6964_p10 }
  0x23   :  { %6974 = shalt.err (!%p6971_p0)
}
  0x24   :  { %35 = dma.hbm_to_vmem [thread:$0]  %s9066_s1, 8192, %s30_s13, [#allocation6], %s7070_s15, %s7070_s15, %s7071_s16  }
  0x25   :  { %s7072_s21 = smov [#allocation10]   ;;  %s7073_s23 = smov [#allocation13]  }
  0x26   :  { %s55_s22 = sshll.u32 %s7072_s21, 4  ;;  %s81_s26 = sshll.u32 %s7073_s23, 4  ;;  %s56_s22 = int_to_ptr.vmem [resolvable:$true] %s55_s22  ;;  %s82_s26 = int_to_ptr.vmem [resolvable:$true] %s81_s26 }
  0x27   :  { %s6983_s27 = scalar_lea.vmem %s56_s22, 4096  ;;  %p6988_p2 = scmp.lt.s32.totalorder %s56_s22, %s56_s22 }
  0x28   :  { %p6984_p1 = scmp.ne.s32.totalorder %s56_s22, %s6983_s27  ;;  %p6989_p3 = scmp.lt.s32.totalorder %s6983_s27, %s6983_s27 }
  0x2a   :  { %p6990_p4 = por %p6989_p3, %p6988_p2 }
  0x2c   :  { %p6991_p5 = pnand %p6990_p4, %p6984_p1 }
  0x2e   :  { %6994 = shalt.err (!%p6991_p5)
}
  0x2f   :  { %61 = dma.hbm_to_vmem [thread:$0]  %s9069_s4, 4096, %s56_s22, [#allocation9], %s7066_s24, %s7066_s24, %s7067_s25  }
  0x30   :  { %s7003_s1 = scalar_lea.vmem %s82_s26, 4096  ;;  %p7008_p7 = scmp.lt.s32.totalorder %s82_s26, %s82_s26 }
  0x31   :  { %p7004_p6 = scmp.ne.s32.totalorder %s82_s26, %s7003_s1  ;;  %p7009_p8 = scmp.lt.s32.totalorder %s7003_s1, %s7003_s1 }
  0x33   :  { %p7010_p9 = por %p7009_p8, %p7008_p7 }
  0x35   :  { %p7011_p10 = pnand %p7010_p9, %p7004_p6 }
  0x37   :  { %7014 = shalt.err (!%p7011_p10)
}
  0x38   :  { %87 = dma.hbm_to_vmem [thread:$0]  %s9072_s7, 4096, %s82_s26, [#allocation12], %s7066_s24, %s7066_s24, %s7067_s25  }
  0x39   :  { %s7074_s13 = smov [#allocation14]  }
  0x3a   :  { %s93_s14 = sshll.u32 %s7074_s13, 4  ;;  %s94_s14 = int_to_ptr.vmem [resolvable:$true] %s93_s14 }
  0x3b   :  { %s7023_s15 = scalar_lea.vmem %s94_s14, 2048  ;;  %p7028_p12 = scmp.lt.s32.totalorder %s94_s14, %s94_s14 }
  0x3c   :  { %p7024_p11 = scmp.ne.s32.totalorder %s94_s14, %s7023_s15  ;;  %p7029_p13 = scmp.lt.s32.totalorder %s7023_s15, %s7023_s15 }
  0x3e   :  { %p7030_p0 = por %p7029_p13, %p7028_p12 }
  0x40   :  { %p7031_p1 = pnand %p7030_p0, %p7024_p11 }
  0x42   :  { %7034 = shalt.err (!%p7031_p1)
}
  0x43   :  { %s7075_s4 = smov 64   ;;  %s7076_s16 = smov 4  }
  0x44   :  { %99 = dma.hbm_to_vmem [thread:$0]  %s9073_s8, 2048, %s94_s14, [#allocation15], %s7075_s4, %s7075_s4, %s7076_s16  }
  0x45   :  { %7055 = dma.done.wait [#allocation6], 8192  }
  0x46   :  { %7056 = vsyncadd [#allocation6], 4294959104 }
  0x47   :  { %7057 = dma.done.wait [#allocation9], 8192  }
  0x48   :  { %7058 = vsyncadd [#allocation9], 4294959104 }
  0x49   :  { %7059 = dma.done.wait [#allocation12], 20480  }
  0x4a   :  { %7060 = vsyncadd [#allocation12], 4294946816 }
  0x4b   :  { %7061 = dma.done.wait [#allocation15], 2048  }
  0x4c   :  { %7062 = vsyncadd [#allocation15], 4294965248  ;;  %v9078_v0 = vmov 0   ;;  %v189_v1 = vld [vmem:[#allocation5 + $0x1c0] sm:$0xff]  ;;  %v190_v3 = vld [vmem:[#allocation5 + $0x1c8] sm:$0xff]  ;;  %vm7079_vm0 = vmmov 0  }
  0x4d   :  { %679 = vmatprep.mubr.bf16.mxu0 %v9078_v0  ;;  %752 = vmatprep.mubr.bf16.mxu1 %v9078_v0  ;;  %v193_v2 = vld [vmem:[#allocation5 + $0x1e0] sm:$0xff]  ;;  %v194_v5 = vld [vmem:[#allocation5 + $0x1e8] sm:$0xff]  ;;  %v191_v62 = vld [vmem:[#allocation5 + $0x1d0] sm:$0xff] }
  0x4e   :  { %v5789_v4 = vcombine.high %v189_v1, %v193_v2  ;;  %v5788_v6 = vcombine.low %v189_v1, %v193_v2  ;;  %v181_v7 = vld [vmem:[#allocation5 + $0x180] sm:$0xff]  ;;  %v5791_v9 = vcombine.high %v190_v3, %v194_v5  ;;  %v5790_v10 = vcombine.low %v190_v3, %v194_v5  ;;  %v182_v12 = vld [vmem:[#allocation5 + $0x188] sm:$0xff]  ;;  %v195_v1 = vld [vmem:[#allocation5 + $0x1f0] sm:$0xff] }
  0x4f   :  { %v185_v8 = vld [vmem:[#allocation5 + $0x1a0] sm:$0xff]  ;;  %v186_v13 = vld [vmem:[#allocation5 + $0x1a8] sm:$0xff]  ;;  %v192_v2 = vld [vmem:[#allocation5 + $0x1d8] sm:$0xff] }
  0x50   :  { %v5781_v11 = vcombine.high %v181_v7, %v185_v8  ;;  %v173_v14 = vld [vmem:[#allocation5 + $0x140] sm:$0xff]  ;;  %647 = vmatprep.subr.bf16.mxu0 %v5789_v4  ;;  %v5783_v15 = vcombine.high %v182_v12, %v186_v13  ;;  %v174_v17 = vld [vmem:[#allocation5 + $0x148] sm:$0xff]  ;;  %720 = vmatprep.subr.bf16.mxu1 %v5791_v9  ;;  %v5780_v19 = vcombine.low %v181_v7, %v185_v8  ;;  %v196_v3 = vld [vmem:[#allocation5 + $0x1f8] sm:$0xff] }
  0x51   :  { %v177_v16 = vld [vmem:[#allocation5 + $0x160] sm:$0xff]  ;;  %v178_v18 = vld [vmem:[#allocation5 + $0x168] sm:$0xff]  ;;  %648 = vmatpush1.bf16.msra.mxu0 %v5788_v6  ;;  %721 = vmatpush1.bf16.msra.mxu1 %v5790_v10  ;;  %v5782_v20 = vcombine.low %v182_v12, %v186_v13  ;;  %v5793_v7 = vcombine.high %v191_v62, %v195_v1  ;;  %v183_v8 = vld [vmem:[#allocation5 + $0x190] sm:$0xff]  ;;  %v5795_v9 = vcombine.high %v192_v2, %v196_v3 }
  0x52   :  { %649 = vmatprep.subr.bf16.mxu0 %v5781_v11  ;;  %v5773_v21 = vcombine.high %v173_v14, %v177_v16  ;;  %722 = vmatprep.subr.bf16.mxu1 %v5783_v15  ;;  %v5775_v22 = vcombine.high %v174_v17, %v178_v18  ;;  %v165_v23 = vld [vmem:[#allocation5 + $0x100] sm:$0xff]  ;;  %v166_v25 = vld [vmem:[#allocation5 + $0x108] sm:$0xff]  ;;  %v5772_v27 = vcombine.low %v173_v14, %v177_v16  ;;  %v187_v10 = vld [vmem:[#allocation5 + $0x1b0] sm:$0xff] }
  0x53   :  { %v169_v24 = vld [vmem:[#allocation5 + $0x120] sm:$0xff]  ;;  %v170_v26 = vld [vmem:[#allocation5 + $0x128] sm:$0xff]  ;;  %v5774_v28 = vcombine.low %v174_v17, %v178_v18  ;;  %v184_v11 = vld [vmem:[#allocation5 + $0x198] sm:$0xff]  ;;  %v5792_v13 = vcombine.low %v191_v62, %v195_v1  ;;  %v5794_v14 = vcombine.low %v192_v2, %v196_v3  ;;  %v5785_v15 = vcombine.high %v183_v8, %v187_v10 }
  0x54   :  { %v5765_v29 = vcombine.high %v165_v23, %v169_v24  ;;  %v5767_v30 = vcombine.high %v166_v25, %v170_v26  ;;  %v157_v31 = vld [vmem:[#allocation5 + $0xc0] sm:$0xff]  ;;  %v158_v33 = vld [vmem:[#allocation5 + $0xc8] sm:$0xff]  ;;  %v5764_v35 = vcombine.low %v165_v23, %v169_v24  ;;  %v5766_v36 = vcombine.low %v166_v25, %v170_v26  ;;  %v188_v12 = vld [vmem:[#allocation5 + $0x1b8] sm:$0xff] }
  0x55   :  { %650 = vmatpush1.bf16.msra.mxu0 %v5780_v19  ;;  %723 = vmatpush1.bf16.msra.mxu1 %v5782_v20  ;;  %v161_v32 = vld [vmem:[#allocation5 + $0xe0] sm:$0xff]  ;;  %v162_v34 = vld [vmem:[#allocation5 + $0xe8] sm:$0xff]  ;;  %v175_v16 = vld [vmem:[#allocation5 + $0x150] sm:$0xff]  ;;  %v5787_v17 = vcombine.high %v184_v11, %v188_v12 }
  0x56   :  { %651 = vmatprep.subr.bf16.mxu0 %v5773_v21  ;;  %724 = vmatprep.subr.bf16.mxu1 %v5775_v22  ;;  %v5757_v37 = vcombine.high %v157_v31, %v161_v32  ;;  %v149_v38 = vld [vmem:[#allocation5 + $0x80] sm:$0xff]  ;;  %v5759_v39 = vcombine.high %v158_v33, %v162_v34  ;;  %v150_v41 = vld [vmem:[#allocation5 + $0x88] sm:$0xff]  ;;  %v5756_v43 = vcombine.low %v157_v31, %v161_v32  ;;  %v179_v18 = vld [vmem:[#allocation5 + $0x170] sm:$0xff] }
  0x57   :  { %v153_v40 = vld [vmem:[#allocation5 + $0xa0] sm:$0xff]  ;;  %v154_v42 = vld [vmem:[#allocation5 + $0xa8] sm:$0xff]  ;;  %v5758_v44 = vcombine.low %v158_v33, %v162_v34  ;;  %v176_v19 = vld [vmem:[#allocation5 + $0x158] sm:$0xff]  ;;  %v5784_v21 = vcombine.low %v183_v8, %v187_v10  ;;  %v5786_v22 = vcombine.low %v184_v11, %v188_v12  ;;  %v5777_v24 = vcombine.high %v175_v16, %v179_v18 }
  0x58   :  { %v5749_v45 = vcombine.high %v149_v38, %v153_v40  ;;  %v141_v46 = vld [vmem:[#allocation5 + $0x40] sm:$0xff]  ;;  %v5751_v47 = vcombine.high %v150_v41, %v154_v42  ;;  %v142_v49 = vld [vmem:[#allocation5 + $0x48] sm:$0xff]  ;;  %v5748_v51 = vcombine.low %v149_v38, %v153_v40  ;;  %v5750_v52 = vcombine.low %v150_v41, %v154_v42  ;;  %v180_v20 = vld [vmem:[#allocation5 + $0x178] sm:$0xff] }
  0x59   :  { %652 = vmatpush1.bf16.msra.mxu0 %v5772_v27  ;;  %725 = vmatpush1.bf16.msra.mxu1 %v5774_v28  ;;  %v145_v48 = vld [vmem:[#allocation5 + $0x60] sm:$0xff]  ;;  %v146_v50 = vld [vmem:[#allocation5 + $0x68] sm:$0xff]  ;;  %v167_v25 = vld [vmem:[#allocation5 + $0x110] sm:$0xff]  ;;  %v5779_v26 = vcombine.high %v176_v19, %v180_v20  ;;  %v5778_v31 = vcombine.low %v176_v19, %v180_v20 }
  0x5a   :  { %653 = vmatprep.subr.bf16.mxu0 %v5765_v29  ;;  %726 = vmatprep.subr.bf16.mxu1 %v5767_v30  ;;  %v5741_v53 = vcombine.high %v141_v46, %v145_v48  ;;  %v5743_v54 = vcombine.high %v142_v49, %v146_v50  ;;  %v133_v55 = vld [vmem:[#allocation5] sm:$0xff]  ;;  %v134_v57 = vld [vmem:[#allocation5 + $0x8] sm:$0xff]  ;;  %v5740_v59 = vcombine.low %v141_v46, %v145_v48  ;;  %v171_v27 = vld [vmem:[#allocation5 + $0x130] sm:$0xff] }
  0x5b   :  { %v137_v56 = vld [vmem:[#allocation5 + $0x20] sm:$0xff]  ;;  %v138_v58 = vld [vmem:[#allocation5 + $0x28] sm:$0xff]  ;;  %v5742_v60 = vcombine.low %v142_v49, %v146_v50  ;;  %v168_v28 = vld [vmem:[#allocation5 + $0x118] sm:$0xff]  ;;  %v5776_v30 = vcombine.low %v175_v16, %v179_v18  ;;  %v5769_v32 = vcombine.high %v167_v25, %v171_v27  ;;  %v5768_v38 = vcombine.low %v167_v25, %v171_v27 }
  0x5c   :  { %v5733_v61 = vcombine.high %v133_v55, %v137_v56  ;;  %v5735_v63 = vcombine.high %v134_v57, %v138_v58  ;;  %v5732_v4 = vcombine.low %v133_v55, %v137_v56  ;;  %v5734_v5 = vcombine.low %v134_v57, %v138_v58  ;;  %v7178_v6 = vld [vmem:[%s9065_s0] sm:$0xff]   ;;  %v7185_v23 = vld [vmem:[%s9065_s0 + $0x8] sm:$0xff]   ;;  %v172_v29 = vld [vmem:[#allocation5 + $0x138] sm:$0xff] }
  0x5d   :  { %654 = vmatpush1.bf16.msra.mxu0 %v5764_v35  ;;  %727 = vmatpush1.bf16.msra.mxu1 %v5766_v36  ;;  %v159_v33 = vld [vmem:[#allocation5 + $0xd0] sm:$0xff]  ;;  %v5771_v34 = vcombine.high %v168_v28, %v172_v29  ;;  %v160_v36 = vld [vmem:[#allocation5 + $0xd8] sm:$0xff] }
  0x5e   :  { %655 = vmatprep.subr.bf16.mxu0 %v5757_v37  ;;  %728 = vmatprep.subr.bf16.mxu1 %v5759_v39  ;;  %v163_v35 = vld [vmem:[#allocation5 + $0xf0] sm:$0xff]  ;;  %v164_v37 = vld [vmem:[#allocation5 + $0xf8] sm:$0xff]  ;;  %v5770_v39 = vcombine.low %v168_v28, %v172_v29 }
  0x5f   :  { %v7194_v40 = vld [vmem:[%s9065_s0 + $0x10] sm:$0xff]   ;;  %v5761_v41 = vcombine.high %v159_v33, %v163_v35  ;;  %v156_v46 = vld [vmem:[#allocation5 + $0xb8] sm:$0xff]  ;;  %v5762_v48 = vcombine.low %v160_v36, %v164_v37 }
  0x60   :  { %v151_v42 = vld [vmem:[#allocation5 + $0x90] sm:$0xff]  ;;  %v7203_v57 = vld [vmem:[%s9065_s0 + $0x18] sm:$0xff]  }
  0x61   :  { %656 = vmatpush1.bf16.msra.mxu0 %v5756_v43  ;;  %729 = vmatpush1.bf16.msra.mxu1 %v5758_v44  ;;  %v5763_v43 = vcombine.high %v160_v36, %v164_v37  ;;  %v155_v44 = vld [vmem:[#allocation5 + $0xb0] sm:$0xff]  ;;  %v136_v62 = vld [vmem:[#allocation5 + $0x18] sm:$0xff] }
  0x62   :  { %657 = vmatprep.subr.bf16.mxu0 %v5749_v45  ;;  %730 = vmatprep.subr.bf16.mxu1 %v5751_v47  ;;  %v152_v45 = vld [vmem:[#allocation5 + $0x98] sm:$0xff]  ;;  %v5760_v47 = vcombine.low %v159_v33, %v163_v35  ;;  %v5753_v49 = vcombine.high %v151_v42, %v155_v44  ;;  %v143_v50 = vld [vmem:[#allocation5 + $0x50] sm:$0xff]  ;;  %v5752_v55 = vcombine.low %v151_v42, %v155_v44 }
  0x63   :  { %v5754_v56 = vcombine.low %v152_v45, %v156_v46  ;;  %v7209_v8 = vld [vmem:[#allocation8 + $0xe4] ss:$16 sps:$4 sm:$0xff]   ;;  %v7215_v10 = vld [vmem:[#allocation8 + $0xe0] ss:$16 sps:$4 sm:$0xff]   ;;  %v7217_v11 = vld [vmem:[#allocation8 + $0xe8] ss:$16 sps:$4 sm:$0xff]  }
  0x64   :  { %v7220_v12 = vld [vmem:[#allocation8 + $0xc4] ss:$16 sps:$4 sm:$0xff]   ;;  %v7240_v18 = vld [vmem:[#allocation8 + $0xa0] ss:$16 sps:$4 sm:$0xff]   ;;  %v7243_v19 = vld [vmem:[#allocation8 + $0xa8] ss:$16 sps:$4 sm:$0xff]  }
  0x65   :  { %658 = vmatpush1.bf16.msra.mxu0 %v5748_v51  ;;  %731 = vmatpush1.bf16.msra.mxu1 %v5750_v52  ;;  %v5755_v51 = vcombine.high %v152_v45, %v156_v46  ;;  %v147_v52 = vld [vmem:[#allocation5 + $0x70] sm:$0xff]  ;;  %v7262_v25 = vld [vmem:[#allocation8 + $0x6c] ss:$16 sps:$4 sm:$0xff]   ;;  %v7271_v27 = vld [vmem:[#allocation8 + $0x68] ss:$16 sps:$4 sm:$0xff]  }
  0x66   :  { %659 = vmatprep.subr.bf16.mxu0 %v5741_v53  ;;  %732 = vmatprep.subr.bf16.mxu1 %v5743_v54  ;;  %v144_v53 = vld [vmem:[#allocation5 + $0x58] sm:$0xff]  ;;  %v5745_v58 = vcombine.high %v143_v50, %v147_v52  ;;  %v5744_v1 = vcombine.low %v143_v50, %v147_v52  ;;  %v7230_v16 = vld [vmem:[#allocation8 + $0xa4] ss:$16 sps:$4 sm:$0xff]   ;;  %9185 = vst [vmem:[#allocation26_spill] sm:$0xff] %v7262_v25  ;;  %9187 = vst [vmem:[#allocation28_spill] sm:$0xff] %v7271_v27 }
  0x67   :  { %v148_v54 = vld [vmem:[#allocation5 + $0x78] sm:$0xff]  ;;  %v7245_v20 = vld [vmem:[#allocation8 + $0x84] ss:$16 sps:$4 sm:$0xff]   ;;  %v7281_v29 = vld [vmem:[#allocation8 + $0x40] ss:$16 sps:$4 sm:$0xff]  }
  0x68   :  { %v5746_v2 = vcombine.low %v144_v53, %v148_v54  ;;  %v7273_v28 = vld [vmem:[#allocation8 + $0x44] ss:$16 sps:$4 sm:$0xff]   ;;  %9190 = vst [vmem:[#allocation31_spill] sm:$0xff] %v7281_v29  ;;  %v7296_v33 = vld [vmem:[#allocation8 + $0x20] ss:$16 sps:$4 sm:$0xff]  }
  0x69   :  { %660 = vmatpush1.bf16.msra.mxu0 %v5740_v59  ;;  %733 = vmatpush1.bf16.msra.mxu1 %v5742_v60  ;;  %v135_v59 = vld [vmem:[#allocation5 + $0x10] sm:$0xff]  ;;  %v5747_v60 = vcombine.high %v144_v53, %v148_v54  ;;  %9188 = vst [vmem:[#allocation29_spill] sm:$0xff] %v7273_v28  ;;  %9194 = vst [vmem:[#allocation35_spill] sm:$0xff] %v7296_v33  ;;  %v7304_v36 = vld [vmem:[#allocation8 + $0xc] ss:$16 sps:$4 sm:$0xff]  }
  0x6a   :  { %661 = vmatprep.subr.bf16.mxu0 %v5733_v61  ;;  %734 = vmatprep.subr.bf16.mxu1 %v5735_v63  ;;  %v139_v61 = vld [vmem:[#allocation5 + $0x30] sm:$0xff]  ;;  %v140_v63 = vld [vmem:[#allocation5 + $0x38] sm:$0xff]  ;;  %9197 = vst [vmem:[#allocation38_spill] sm:$0xff] %v7304_v36 }
  0x6b   :  { %v5737_v3 = vcombine.high %v135_v59, %v139_v61  ;;  %v7301_v35 = vld [vmem:[#allocation8 + $0x4] ss:$16 sps:$4 sm:$0xff]   ;;  %v7309_v37 = vld [vmem:[#allocation8] ss:$16 sps:$4 sm:$0xff]   ;;  %v7330_v42 = vld [vmem:[#allocation10 + $0xe8] ss:$16 sps:$4 sm:$0xff]  }
  0x6c   :  { %9196 = vst [vmem:[#allocation37_spill] sm:$0xff] %v7301_v35  ;;  %9198 = vst [vmem:[#allocation39_spill] sm:$0xff] %v7309_v37  ;;  %v7335_v44 = vld [vmem:[#allocation10 + $0xcc] ss:$16 sps:$4 sm:$0xff]   ;;  %v7340_v45 = vld [vmem:[#allocation10 + $0xc0] ss:$16 sps:$4 sm:$0xff]  }
  0x6d   :  { %662 = vmatpush1.bf16.msra.mxu0 %v5732_v4  ;;  %735 = vmatpush1.bf16.msra.mxu1 %v5734_v5  ;;  %v5739_v4 = vcombine.high %v136_v62, %v140_v63  ;;  %v5736_v5 = vcombine.low %v135_v59, %v139_v61  ;;  %v7344_v46 = vld [vmem:[#allocation10 + $0xc8] ss:$16 sps:$4 sm:$0xff]   ;;  %v7363_v52 = vld [vmem:[#allocation10 + $0x8c] ss:$16 sps:$4 sm:$0xff]   ;;  %v7366_v53 = vld [vmem:[#allocation10 + $0x80] ss:$16 sps:$4 sm:$0xff]  }
  0x6e   :  { %793 = vmatprep.subr.bf16.mxu0 %v5793_v7  ;;  %866 = vmatprep.subr.bf16.mxu1 %v5795_v9  ;;  %v5738_v7 = vcombine.low %v136_v62, %v140_v63  ;;  %v7212_v9 = vld [vmem:[#allocation8 + $0xec] ss:$16 sps:$4 sm:$0xff]   ;;  %v7358_v50 = vld [vmem:[#allocation10 + $0xa8] ss:$16 sps:$4 sm:$0xff]   ;;  %v7384_v59 = vld [vmem:[#allocation10 + $0x44] ss:$16 sps:$4 sm:$0xff]  }
  0x6f   :  { %v7370_v54 = vld [vmem:[#allocation10 + $0x88] ss:$16 sps:$4 sm:$0xff]   ;;  %v7390_v61 = vld [vmem:[#allocation10 + $0x40] ss:$16 sps:$4 sm:$0xff]   ;;  %v7396_v63 = vld [vmem:[#allocation10 + $0x24] ss:$16 sps:$4 sm:$0xff]  }
  0x70   :  { %680 = vmatmul.mubr.bf16.vlgmr.msra.gmra.mxu0 %v7178_v6  ;;  %753 = vmatmul.mubr.bf16.vlgmr.msra.gmra.mxu1 %v7178_v6  ;;  %v7394_v62 = vld [vmem:[#allocation10 + $0x48] ss:$16 sps:$4 sm:$0xff]  }
  0x71   :  { %794 = vmatpush1.bf16.msra.mxu0 %v5792_v13  ;;  %867 = vmatpush1.bf16.msra.mxu1 %v5794_v14  ;;  %v7223_v13 = vld [vmem:[#allocation8 + $0xcc] ss:$16 sps:$4 sm:$0xff]   ;;  %v7226_v14 = vld [vmem:[#allocation8 + $0xc0] ss:$16 sps:$4 sm:$0xff]  }
  0x72   :  { %795 = vmatprep.subr.bf16.mxu0 %v5785_v15  ;;  %868 = vmatprep.subr.bf16.mxu1 %v5787_v17  ;;  %v7228_v15 = vld [vmem:[#allocation8 + $0xc8] ss:$16 sps:$4 sm:$0xff]   ;;  %v7234_v17 = vld [vmem:[#allocation8 + $0xac] ss:$16 sps:$4 sm:$0xff]  }
  0x73   :  { %689 = vmatprep.mubr.bf16.mxu0 %v9078_v0  ;;  %762 = vmatprep.mubr.bf16.mxu1 %v9078_v0 }
  0x75   :  { %796 = vmatpush1.bf16.msra.mxu0 %v5784_v21  ;;  %869 = vmatpush1.bf16.msra.mxu1 %v5786_v22  ;;  %v7253_v21 = vld [vmem:[#allocation8 + $0x80] ss:$16 sps:$4 sm:$0xff]   ;;  %v7256_v22 = vld [vmem:[#allocation8 + $0x88] ss:$16 sps:$4 sm:$0xff]  }
  0x76   :  { %797 = vmatprep.subr.bf16.mxu0 %v5777_v24  ;;  %870 = vmatprep.subr.bf16.mxu1 %v5779_v26  ;;  %9182 = vst [vmem:[#allocation23_spill] sm:$0xff] %v7253_v21  ;;  %9183 = vst [vmem:[#allocation24_spill] sm:$0xff] %v7256_v22  ;;  %v7258_v24 = vld [vmem:[#allocation8 + $0x64] ss:$16 sps:$4 sm:$0xff]   ;;  %v7268_v26 = vld [vmem:[#allocation8 + $0x60] ss:$16 sps:$4 sm:$0xff]  }
  0x77   :  { %9184 = vst [vmem:[#allocation25_spill] sm:$0xff] %v7258_v24  ;;  %9186 = vst [vmem:[#allocation27_spill] sm:$0xff] %v7268_v26 }
  0x78   :  { %690 = vmatmul.mubr.bf16.gmra.mxu0 %v7185_v23  ;;  %763 = vmatmul.mubr.bf16.gmra.mxu1 %v7185_v23 }
  0x79   :  { %798 = vmatpush1.bf16.msra.mxu0 %v5776_v30  ;;  %871 = vmatpush1.bf16.msra.mxu1 %v5778_v31  ;;  %v7284_v30 = vld [vmem:[#allocation8 + $0x48] ss:$16 sps:$4 sm:$0xff]   ;;  %v7286_v31 = vld [vmem:[#allocation8 + $0x24] ss:$16 sps:$4 sm:$0xff]  }
  0x7a   :  { %799 = vmatprep.subr.bf16.mxu0 %v5769_v32  ;;  %872 = vmatprep.subr.bf16.mxu1 %v5771_v34  ;;  %9191 = vst [vmem:[#allocation32_spill] sm:$0xff] %v7284_v30  ;;  %9192 = vst [vmem:[#allocation33_spill] sm:$0xff] %v7286_v31  ;;  %v7290_v32 = vld [vmem:[#allocation8 + $0x2c] ss:$16 sps:$4 sm:$0xff]   ;;  %v7299_v34 = vld [vmem:[#allocation8 + $0x28] ss:$16 sps:$4 sm:$0xff]  }
  0x7b   :  { %699 = vmatprep.mubr.bf16.mxu0 %v9078_v0  ;;  %772 = vmatprep.mubr.bf16.mxu1 %v9078_v0  ;;  %9193 = vst [vmem:[#allocation34_spill] sm:$0xff] %v7290_v32  ;;  %9195 = vst [vmem:[#allocation36_spill] sm:$0xff] %v7299_v34 }
  0x7d   :  { %800 = vmatpush1.bf16.msra.mxu0 %v5768_v38  ;;  %873 = vmatpush1.bf16.msra.mxu1 %v5770_v39  ;;  %v7312_v38 = vld [vmem:[#allocation8 + $0x8] ss:$16 sps:$4 sm:$0xff]   ;;  %v7314_v39 = vld [vmem:[#allocation10 + $0xe4] ss:$16 sps:$4 sm:$0xff]  }
  0x7e   :  { %801 = vmatprep.subr.bf16.mxu0 %v5761_v41  ;;  %874 = vmatprep.subr.bf16.mxu1 %v5763_v43  ;;  %9199 = vst [vmem:[#allocation40_spill] sm:$0xff] %v7312_v38  ;;  %9200 = vst [vmem:[#allocation41_spill] sm:$0xff] %v7314_v39  ;;  %v7326_v41 = vld [vmem:[#allocation10 + $0xe0] ss:$16 sps:$4 sm:$0xff]   ;;  %v7332_v43 = vld [vmem:[#allocation10 + $0xc4] ss:$16 sps:$4 sm:$0xff]  }
  0x80   :  { %700 = vmatmul.mubr.bf16.gmra.mxu0 %v7194_v40  ;;  %773 = vmatmul.mubr.bf16.gmra.mxu1 %v7194_v40 }
  0x81   :  { %802 = vmatpush1.bf16.msra.mxu0 %v5760_v47  ;;  %875 = vmatpush1.bf16.msra.mxu1 %v5762_v48  ;;  %v7346_v47 = vld [vmem:[#allocation10 + $0xa4] ss:$16 sps:$4 sm:$0xff]   ;;  %v7349_v48 = vld [vmem:[#allocation10 + $0xac] ss:$16 sps:$4 sm:$0xff]  }
  0x82   :  { %803 = vmatprep.subr.bf16.mxu0 %v5753_v49  ;;  %876 = vmatprep.subr.bf16.mxu1 %v5755_v51  ;;  %v7354_v49 = vld [vmem:[#allocation10 + $0xa0] ss:$16 sps:$4 sm:$0xff]   ;;  %v7360_v51 = vld [vmem:[#allocation10 + $0x84] ss:$16 sps:$4 sm:$0xff]  }
  0x83   :  { %709 = vmatprep.mubr.bf16.mxu0 %v9078_v0  ;;  %782 = vmatprep.mubr.bf16.mxu1 %v9078_v0 }
  0x85   :  { %804 = vmatpush1.bf16.msra.mxu0 %v5752_v55  ;;  %877 = vmatpush1.bf16.msra.mxu1 %v5754_v56  ;;  %v7372_v55 = vld [vmem:[#allocation10 + $0x64] ss:$16 sps:$4 sm:$0xff]   ;;  %v7375_v56 = vld [vmem:[#allocation10 + $0x6c] ss:$16 sps:$4 sm:$0xff]  }
  0x86   :  { %805 = vmatprep.subr.bf16.mxu0 %v5745_v58  ;;  %878 = vmatprep.subr.bf16.mxu1 %v5747_v60  ;;  %v7382_v58 = vld [vmem:[#allocation10 + $0x68] ss:$16 sps:$4 sm:$0xff]   ;;  %v7387_v60 = vld [vmem:[#allocation10 + $0x4c] ss:$16 sps:$4 sm:$0xff]  }
  0x88   :  { %710 = vmatmul.mubr.bf16.gmra.mxu0 %v7203_v57  ;;  %783 = vmatmul.mubr.bf16.gmra.mxu1 %v7203_v57 }
  0x89   :  { %806 = vmatpush1.bf16.msra.mxu0 %v5744_v1  ;;  %879 = vmatpush1.bf16.msra.mxu1 %v5746_v2  ;;  %v7399_v1 = vld [vmem:[#allocation10 + $0x2c] ss:$16 sps:$4 sm:$0xff]   ;;  %v7402_v2 = vld [vmem:[#allocation10 + $0x20] ss:$16 sps:$4 sm:$0xff]  }
  0x8a   :  { %807 = vmatprep.subr.bf16.mxu0 %v5737_v3  ;;  %880 = vmatprep.subr.bf16.mxu1 %v5739_v4  ;;  %9202 = vst [vmem:[#allocation43_spill] sm:$0xff] %v7399_v1  ;;  %v7406_v3 = vld [vmem:[#allocation10 + $0x28] ss:$16 sps:$4 sm:$0xff]   ;;  %v7408_v4 = vld [vmem:[#allocation10 + $0x4] ss:$16 sps:$4 sm:$0xff]  }
  0x8b   :  { %825 = vmatprep.mubr.bf16.mxu0 %v9078_v0  ;;  %898 = vmatprep.mubr.bf16.mxu1 %v9078_v0 }
  0x8d   :  { %808 = vmatpush1.bf16.msra.mxu0 %v5736_v5  ;;  %881 = vmatpush1.bf16.msra.mxu1 %v5738_v7  ;;  %v7411_v5 = vld [vmem:[#allocation10 + $0xc] ss:$16 sps:$4 sm:$0xff]   ;;  %v7414_v7 = vld [vmem:[#allocation10] ss:$16 sps:$4 sm:$0xff]  }
  0x8e   :  { %1167 = vmatprep.subr.bf16.mxu0 %v7209_v8  ;;  %1208 = vmatprep.subr.bf16.mxu1 %v7212_v9 }
  0x90   :  { %826 = vmatmul.mubr.bf16.vlgmr.msra.gmra.mxu0 %v7178_v6  ;;  %899 = vmatmul.mubr.bf16.vlgmr.msra.gmra.mxu1 %v7178_v6  ;;  %v7248_v6 = vld [vmem:[#allocation8 + $0x8c] ss:$16 sps:$4 sm:$0xff]  }
  0x91   :  { %1168 = vmatpush1.bf16.msra.mxu0 %v7215_v10  ;;  %1209 = vmatpush1.bf16.msra.mxu1 %v7217_v11  ;;  %9181 = vst [vmem:[#allocation22_spill] sm:$0xff] %v7248_v6 }
  0x92   :  { %1169 = vmatprep.subr.bf16.mxu0 %v7220_v12  ;;  %1210 = vmatprep.subr.bf16.mxu1 %v7223_v13 }
  0x93   :  { %835 = vmatprep.mubr.bf16.mxu0 %v9078_v0  ;;  %908 = vmatprep.mubr.bf16.mxu1 %v9078_v0 }
  0x95   :  { %1170 = vmatpush1.bf16.msra.mxu0 %v7226_v14  ;;  %1211 = vmatpush1.bf16.msra.mxu1 %v7228_v15 }
  0x96   :  { %1171 = vmatprep.subr.bf16.mxu0 %v7230_v16  ;;  %1212 = vmatprep.subr.bf16.mxu1 %v7234_v17 }
  0x98   :  { %836 = vmatmul.mubr.bf16.gmra.mxu0 %v7185_v23  ;;  %909 = vmatmul.mubr.bf16.gmra.mxu1 %v7185_v23  ;;  %v7276_v23 = vld [vmem:[#allocation8 + $0x4c] ss:$16 sps:$4 sm:$0xff]  }
  0x99   :  { %1172 = vmatpush1.bf16.msra.mxu0 %v7240_v18  ;;  %1213 = vmatpush1.bf16.msra.mxu1 %v7243_v19  ;;  %9189 = vst [vmem:[#allocation30_spill] sm:$0xff] %v7276_v23 }
  0x9a   :  { %1173 = vmatprep.subr.bf16.mxu0 %v7245_v20  ;;  %1214 = vmatprep.subr.bf16.mxu1 %v7248_v6 }
  0x9b   :  { %845 = vmatprep.mubr.bf16.mxu0 %v9078_v0  ;;  %918 = vmatprep.mubr.bf16.mxu1 %v9078_v0 }
  0x9d   :  { %1174 = vmatpush1.bf16.msra.mxu0 %v7253_v21  ;;  %1215 = vmatpush1.bf16.msra.mxu1 %v7256_v22 }
  0x9e   :  { %1175 = vmatprep.subr.bf16.mxu0 %v7258_v24  ;;  %1216 = vmatprep.subr.bf16.mxu1 %v7262_v25 }
  0xa0   :  { %846 = vmatmul.mubr.bf16.gmra.mxu0 %v7194_v40  ;;  %919 = vmatmul.mubr.bf16.gmra.mxu1 %v7194_v40  ;;  %v7318_v40 = vld [vmem:[#allocation10 + $0xec] ss:$16 sps:$4 sm:$0xff]  }
  0xa1   :  { %1176 = vmatpush1.bf16.msra.mxu0 %v7268_v26  ;;  %1217 = vmatpush1.bf16.msra.mxu1 %v7271_v27  ;;  %9201 = vst [vmem:[#allocation42_spill] sm:$0xff] %v7318_v40 }
  0xa2   :  { %1177 = vmatprep.subr.bf16.mxu0 %v7273_v28  ;;  %1218 = vmatprep.subr.bf16.mxu1 %v7276_v23 }
  0xa3   :  { %855 = vmatprep.mubr.bf16.mxu0 %v9078_v0  ;;  %928 = vmatprep.mubr.bf16.mxu1 %v9078_v0 }
  0xa5   :  { %1178 = vmatpush1.bf16.msra.mxu0 %v7281_v29  ;;  %1219 = vmatpush1.bf16.msra.mxu1 %v7284_v30 }
  0xa6   :  { %1179 = vmatprep.subr.bf16.mxu0 %v7286_v31  ;;  %1220 = vmatprep.subr.bf16.mxu1 %v7290_v32 }
  0xa8   :  { %856 = vmatmul.mubr.bf16.gmra.mxu0 %v7203_v57  ;;  %929 = vmatmul.mubr.bf16.gmra.mxu1 %v7203_v57  ;;  %v7378_v57 = vld [vmem:[#allocation10 + $0x60] ss:$16 sps:$4 sm:$0xff]  }
  0xa9   :  { %1180 = vmatpush1.bf16.msra.mxu0 %v7296_v33  ;;  %1221 = vmatpush1.bf16.msra.mxu1 %v7299_v34 }
  0xaa   :  { %1181 = vmatprep.subr.bf16.mxu0 %v7301_v35  ;;  %1222 = vmatprep.subr.bf16.mxu1 %v7304_v36 }
  0xab   :  { %1199 = vmatprep.mubr.bf16.mxu0 %v9078_v0  ;;  %1240 = vmatprep.mubr.bf16.mxu1 %v9078_v0 }
  0xad   :  { %1182 = vmatpush1.bf16.msra.mxu0 %v7309_v37  ;;  %1223 = vmatpush1.bf16.msra.mxu1 %v7312_v38 }
  0xae   :  { %1418 = vmatprep.subr.bf16.mxu0 %v7314_v39  ;;  %1459 = vmatprep.subr.bf16.mxu1 %v7318_v40 }
  0xb0   :  { %1200 = vmatmul.mubr.bf16.vlgmr.msra.gmra.mxu0 %v9078_v0  ;;  %1241 = vmatmul.mubr.bf16.vlgmr.msra.gmra.mxu1 %v9078_v0 }
  0xb1   :  { %1419 = vmatpush1.bf16.msra.mxu0 %v7326_v41  ;;  %1460 = vmatpush1.bf16.msra.mxu1 %v7330_v42 }
  0xb2   :  { %1420 = vmatprep.subr.bf16.mxu0 %v7332_v43  ;;  %1461 = vmatprep.subr.bf16.mxu1 %v7335_v44 }
  0xb3   :  { %1450 = vmatprep.mubr.bf16.mxu0 %v9078_v0  ;;  %1491 = vmatprep.mubr.bf16.mxu1 %v9078_v0  ;;  %v7418_v0 = vld [vmem:[#allocation10 + $0x8] ss:$16 sps:$4 sm:$0xff]  }
  0xb5   :  { %1421 = vmatpush1.bf16.msra.mxu0 %v7340_v45  ;;  %1462 = vmatpush1.bf16.msra.mxu1 %v7344_v46 }
  0xb6   :  { %1422 = vmatprep.subr.bf16.mxu0 %v7346_v47  ;;  %1463 = vmatprep.subr.bf16.mxu1 %v7349_v48 }
  0xb9   :  { %1423 = vmatpush1.bf16.msra.mxu0 %v7354_v49  ;;  %1464 = vmatpush1.bf16.msra.mxu1 %v7358_v50 }
  0xba   :  { %1424 = vmatprep.subr.bf16.mxu0 %v7360_v51  ;;  %1465 = vmatprep.subr.bf16.mxu1 %v7363_v52 }
  0xbd   :  { %1425 = vmatpush1.bf16.msra.mxu0 %v7366_v53  ;;  %1466 = vmatpush1.bf16.msra.mxu1 %v7370_v54 }
  0xbe   :  { %1426 = vmatprep.subr.bf16.mxu0 %v7372_v55  ;;  %1467 = vmatprep.subr.bf16.mxu1 %v7375_v56 }
  0xc1   :  { %1427 = vmatpush1.bf16.msra.mxu0 %v7378_v57  ;;  %1468 = vmatpush1.bf16.msra.mxu1 %v7382_v58 }
  0xc2   :  { %1428 = vmatprep.subr.bf16.mxu0 %v7384_v59  ;;  %1469 = vmatprep.subr.bf16.mxu1 %v7387_v60 }
  0xc5   :  { %1429 = vmatpush1.bf16.msra.mxu0 %v7390_v61  ;;  %1470 = vmatpush1.bf16.msra.mxu1 %v7394_v62 }
  0xc6   :  { %1430 = vmatprep.subr.bf16.mxu0 %v7396_v63  ;;  %1471 = vmatprep.subr.bf16.mxu1 %v7399_v1  ;;  %v9203_v1 = vmov 0  }
  0xc9   :  { %1431 = vmatpush1.bf16.msra.mxu0 %v7402_v2  ;;  %1472 = vmatpush1.bf16.msra.mxu1 %v7406_v3 }
  0xca   :  { %1432 = vmatprep.subr.bf16.mxu0 %v7408_v4  ;;  %1473 = vmatprep.subr.bf16.mxu1 %v7411_v5 }
  0xcd   :  { %1433 = vmatpush1.bf16.msra.mxu0 %v7414_v7  ;;  %1474 = vmatpush1.bf16.msra.mxu1 %v7418_v0 }
  0xce   :  { %1561 = vmatprep.subr.bf16.mxu0 %v7209_v8  ;;  %1602 = vmatprep.subr.bf16.mxu1 %v7212_v9  ;;  %v263_v8 = vlaneseq }
  0xd0   :  { %1451 = vmatmul.mubr.bf16.vlgmr.msra.gmra.mxu0 %v9203_v1  ;;  %1492 = vmatmul.mubr.bf16.vlgmr.msra.gmra.mxu1 %v9203_v1  ;;  %v7461_v9 = vshrl.u32 %v263_v8, 7 }
  0xd1   :  { %1562 = vmatpush1.bf16.msra.mxu0 %v7215_v10  ;;  %1603 = vmatpush1.bf16.msra.mxu1 %v7217_v11 }
  0xd2   :  { %1563 = vmatprep.subr.bf16.mxu0 %v7220_v12  ;;  %1604 = vmatprep.subr.bf16.mxu1 %v7223_v13  ;;  %9204 = vst [vmem:[#allocation44_spill] sm:$0xff] %v7461_v9  ;;  %v7464_v10 = vsub.s32 2, %v7461_v9  ;;  %v7467_v11 = vsub.s32 0, %v7461_v9  ;;  %v7472_v12 = vld [vmem:[%s9067_s2] sm:$0xff] }
  0xd3   :  { %1593 = vmatprep.mubr.bf16.mxu0 %v9203_v1  ;;  %1634 = vmatprep.mubr.bf16.mxu1 %v9203_v1 }
  0xd4   :  { %9205 = vst [vmem:[#allocation45_spill] sm:$0xff] %v7464_v10  ;;  %9206 = vst [vmem:[#allocation46_spill] sm:$0xff] %v7467_v11  ;;  %v7486_v8 = vrot.slane %v7472_v12, %v7467_v11 }
  0xd5   :  { %1564 = vmatpush1.bf16.msra.mxu0 %v7226_v14  ;;  %1605 = vmatpush1.bf16.msra.mxu1 %v7228_v15  ;;  %v7480_v15 = vrot.slane %v7472_v12, %v7464_v10 }
  0xd6   :  { %1565 = vmatprep.subr.bf16.mxu0 %v7230_v16  ;;  %1606 = vmatprep.subr.bf16.mxu1 %v7234_v17 }
  0xd9   :  { %1566 = vmatpush1.bf16.msra.mxu0 %v7240_v18  ;;  %1607 = vmatpush1.bf16.msra.mxu1 %v7243_v19 }
  0xda   :  { %1567 = vmatprep.subr.bf16.mxu0 %v7245_v20  ;;  %1608 = vmatprep.subr.bf16.mxu1 %v7248_v6 }
  0xdd   :  { %1568 = vmatpush1.bf16.msra.mxu0 %v7253_v21  ;;  %1609 = vmatpush1.bf16.msra.mxu1 %v7256_v22 }
  0xde   :  { %1569 = vmatprep.subr.bf16.mxu0 %v7258_v24  ;;  %1610 = vmatprep.subr.bf16.mxu1 %v7262_v25 }
  0xe1   :  { %1570 = vmatpush1.bf16.msra.mxu0 %v7268_v26  ;;  %1611 = vmatpush1.bf16.msra.mxu1 %v7271_v27 }
  0xe2   :  { %1571 = vmatprep.subr.bf16.mxu0 %v7273_v28  ;;  %1612 = vmatprep.subr.bf16.mxu1 %v7276_v23 }
  0xe5   :  { %1572 = vmatpush1.bf16.msra.mxu0 %v7281_v29  ;;  %1613 = vmatpush1.bf16.msra.mxu1 %v7284_v30 }
  0xe6   :  { %1573 = vmatprep.subr.bf16.mxu0 %v7286_v31  ;;  %1614 = vmatprep.subr.bf16.mxu1 %v7290_v32 }
  0xe9   :  { %1574 = vmatpush1.bf16.msra.mxu0 %v7296_v33  ;;  %1615 = vmatpush1.bf16.msra.mxu1 %v7299_v34 }
  0xea   :  { %1575 = vmatprep.subr.bf16.mxu0 %v7301_v35  ;;  %1616 = vmatprep.subr.bf16.mxu1 %v7304_v36  ;;  %v7495_v35 = vsub.s32 3, %v7461_v9 }
  0xec   :  { %9208 = vst [vmem:[#allocation48_spill] sm:$0xff] %v7495_v35  ;;  %v7514_v31 = vrot.slane %v7472_v12, %v7495_v35 }
  0xed   :  { %1576 = vmatpush1.bf16.msra.mxu0 %v7309_v37  ;;  %1617 = vmatpush1.bf16.msra.mxu1 %v7312_v38  ;;  %v9097_v38 = vsub.s32 1, %v7461_v9 }
  0xee   :  { %1653 = vmatprep.subr.bf16.mxu0 %v7314_v39  ;;  %1694 = vmatprep.subr.bf16.mxu1 %v7318_v40  ;;  %9214 = vst [vmem:[#allocation54_spill] sm:$0xff] %v7514_v31 }
  0xef   :  { %v7507_v32 = vrot.slane %v7472_v12, %v9097_v38 }
  0xf1   :  { %9212 = vst [vmem:[#allocation52_spill] sm:$0xff] %v7507_v32 }
 0x130   :  { %v7474_v13 = vpop.f32.mrf.mxu0  ;;  %v7476_v14 = vpop.f32.mrf.mxu1 }
 0x132   :  { %v7482_v16 = vpop.f32.mrf.mxu0  ;;  %v7488_v40 = vpop.f32.mrf.mxu1 }
 0x134   :  { %v685_v39 = vpop.f32.mrf.mxu0  ;;  %v758_v36 = vpop.f32.mrf.mxu1 }
 0x135   :  { %v7492_v37 = vadd.f32 %v685_v39, %v7486_v8  ;;  %v7498_v10 = vadd.f32 %v758_v36, %v7480_v15 }
 0x136   :  { %v7500_v34 = vpop.f32.mrf.mxu0  ;;  %v7502_v33 = vpop.f32.mrf.mxu1 }
 0x137   :  { %9207 = vst [vmem:[#allocation47_spill] sm:$0xff] %v7492_v37  ;;  %9209 = vst [vmem:[#allocation49_spill] sm:$0xff] %v7498_v10 }
 0x138   :  { %9210 = vst [vmem:[#allocation50_spill] sm:$0xff] %v7500_v34  ;;  %9211 = vst [vmem:[#allocation51_spill] sm:$0xff] %v7502_v33  ;;  %v691_v11 = vpop.f32.mrf.mxu0  ;;  %v764_v37 = vpop.f32.mrf.mxu1 }
 0x139   :  { %v7510_v39 = vadd.f32 %v691_v11, %v7486_v8  ;;  %v7517_v36 = vadd.f32 %v764_v37, %v7480_v15 }
 0x13a   :  { %v693_v10 = vpop.f32.mrf.mxu0  ;;  %v766_v34 = vpop.f32.mrf.mxu1 }
 0x13b   :  { %9213 = vst [vmem:[#allocation53_spill] sm:$0xff] %v7510_v39  ;;  %9215 = vst [vmem:[#allocation55_spill] sm:$0xff] %v7517_v36  ;;  %v7520_v33 = vadd.f32 %v693_v10, %v7507_v32  ;;  %v7523_v30 = vadd.f32 %v766_v34, %v7514_v31 }
 0x13c   :  { %v695_v38 = vpop.f32.mrf.mxu0  ;;  %v768_v39 = vpop.f32.mrf.mxu1 }
 0x13d   :  { %9216 = vst [vmem:[#allocation56_spill] sm:$0xff] %v7520_v33  ;;  %9217 = vst [vmem:[#allocation57_spill] sm:$0xff] %v7523_v30  ;;  %v7526_v11 = vadd.f32 %v695_v38, %v7486_v8  ;;  %v7529_v29 = vadd.f32 %v768_v39, %v7480_v15 }
 0x13e   :  { %v7531_v35 = vpop.f32.mrf.mxu0  ;;  %v7533_v37 = vpop.f32.mrf.mxu1 }
 0x13f   :  { %9218 = vst [vmem:[#allocation58_spill] sm:$0xff] %v7526_v11  ;;  %9219 = vst [vmem:[#allocation59_spill] sm:$0xff] %v7529_v29 }
 0x140   :  { %9220 = vst [vmem:[#allocation60_spill] sm:$0xff] %v7531_v35  ;;  %9221 = vst [vmem:[#allocation61_spill] sm:$0xff] %v7533_v37  ;;  %v701_v36 = vpop.f32.mrf.mxu0  ;;  %v774_v33 = vpop.f32.mrf.mxu1 }
 0x141   :  { %v7536_v10 = vadd.f32 %v701_v36, %v7486_v8  ;;  %v7539_v34 = vadd.f32 %v774_v33, %v7480_v15 }
 0x142   :  { %v703_v30 = vpop.f32.mrf.mxu0  ;;  %v776_v11 = vpop.f32.mrf.mxu1 }
 0x143   :  { %9222 = vst [vmem:[#allocation62_spill] sm:$0xff] %v7536_v10  ;;  %9223 = vst [vmem:[#allocation63_spill] sm:$0xff] %v7539_v34  ;;  %v7542_v38 = vadd.f32 %v703_v30, %v7507_v32  ;;  %v7545_v39 = vadd.f32 %v776_v11, %v7514_v31  ;;  %v281_v11 = vsub.s32 4, %v7461_v9 }
 0x144   :  { %v705_v29 = vpop.f32.mrf.mxu0  ;;  %v778_v37 = vpop.f32.mrf.mxu1 }
 0x145   :  { %9224 = vst [vmem:[#allocation64_spill] sm:$0xff] %v7542_v38  ;;  %9225 = vst [vmem:[#allocation65_spill] sm:$0xff] %v7545_v39  ;;  %v7548_v35 = vadd.f32 %v705_v29, %v7486_v8  ;;  %v7551_v36 = vadd.f32 %v778_v37, %v7480_v15 }
 0x146   :  { %v7553_v10 = vpop.f32.mrf.mxu0  ;;  %v7555_v33 = vpop.f32.mrf.mxu1 }
 0x147   :  { %9226 = vst [vmem:[#allocation66_spill] sm:$0xff] %v7548_v35  ;;  %9227 = vst [vmem:[#allocation67_spill] sm:$0xff] %v7551_v36  ;;  %v289_v35 = vsub.s32 6, %v7461_v9 }
 0x148   :  { %9228 = vst [vmem:[#allocation68_spill] sm:$0xff] %v7553_v10  ;;  %9229 = vst [vmem:[#allocation69_spill] sm:$0xff] %v7555_v33  ;;  %v711_v34 = vpop.f32.mrf.mxu0  ;;  %v784_v38 = vpop.f32.mrf.mxu1  ;;  %v285_v10 = vsub.s32 5, %v7461_v9 }
 0x149   :  { %v7558_v30 = vadd.f32 %v711_v34, %v7486_v8  ;;  %v7562_v39 = vadd.f32 %v784_v38, %v7480_v15 }
 0x14a   :  { %v713_v29 = vpop.f32.mrf.mxu0  ;;  %v786_v36 = vpop.f32.mrf.mxu1 }
 0x14b   :  { %9230 = vst [vmem:[#allocation70_spill] sm:$0xff] %v7558_v30  ;;  %9231 = vst [vmem:[#allocation71_spill] sm:$0xff] %v7562_v39  ;;  %v7566_v37 = vadd.f32 %v713_v29, %v7507_v32  ;;  %v7570_v33 = vadd.f32 %v786_v36, %v7514_v31  ;;  %v293_v30 = vsub.s32 7, %v7461_v9  ;;  %v7577_v39 = vrot.slane %v7472_v12, %v281_v11 }
 0x14c   :  { %v715_v34 = vpop.f32.mrf.mxu0  ;;  %v788_v38 = vpop.f32.mrf.mxu1 }
 0x14d   :  { %9232 = vst [vmem:[#allocation72_spill] sm:$0xff] %v7566_v37  ;;  %9233 = vst [vmem:[#allocation73_spill] sm:$0xff] %v7570_v33  ;;  %v7574_v23 = vadd.f32 %v715_v34, %v7486_v8  ;;  %v7580_v28 = vadd.f32 %v788_v38, %v7480_v15  ;;  %v7585_v37 = vrot.slane %v7472_v12, %v289_v35 }
 0x14e   :  { %v7582_v29 = vpop.f32.mrf.mxu0  ;;  %v7587_v36 = vpop.f32.mrf.mxu1  ;;  %v7590_v33 = vrot.slane %v7472_v12, %v285_v10  ;;  %v7593_v34 = vrot.slane %v7472_v12, %v293_v30 }
 0x14f   :  { %9234 = vst [vmem:[#allocation74_spill] sm:$0xff] %v7574_v23  ;;  %9235 = vst [vmem:[#allocation75_spill] sm:$0xff] %v7580_v28 }
 0x150   :  { %9236 = vst [vmem:[#allocation76_spill] sm:$0xff] %v7582_v29  ;;  %9237 = vst [vmem:[#allocation77_spill] sm:$0xff] %v7587_v36  ;;  %v827_v9 = vpop.f32.mrf.mxu0  ;;  %v900_v23 = vpop.f32.mrf.mxu1 }
 0x151   :  { %9238 = vst [vmem:[#allocation78_spill] sm:$0xff] %v7590_v33  ;;  %9239 = vst [vmem:[#allocation79_spill] sm:$0xff] %v7593_v34  ;;  %v7596_v11 = vadd.f32 %v827_v9, %v7577_v39  ;;  %v7599_v38 = vadd.f32 %v900_v23, %v7585_v37 }
 0x152   :  { %v829_v28 = vpop.f32.mrf.mxu0  ;;  %v902_v29 = vpop.f32.mrf.mxu1 }
 0x153   :  { %9240 = vst [vmem:[#allocation80_spill] sm:$0xff] %v7596_v11  ;;  %9241 = vst [vmem:[#allocation81_spill] sm:$0xff] %v7599_v38  ;;  %v7602_v35 = vadd.f32 %v829_v28, %v7590_v33  ;;  %v7605_v36 = vadd.f32 %v902_v29, %v7593_v34 }
 0x154   :  { %v831_v10 = vpop.f32.mrf.mxu0  ;;  %v904_v12 = vpop.f32.mrf.mxu1 }
 0x155   :  { %9242 = vst [vmem:[#allocation82_spill] sm:$0xff] %v7602_v35  ;;  %9243 = vst [vmem:[#allocation83_spill] sm:$0xff] %v7605_v36  ;;  %v7608_v27 = vadd.f32 %v831_v10, %v7577_v39  ;;  %v7611_v9 = vadd.f32 %v904_v12, %v7585_v37 }
 0x156   :  { %v7613_v30 = vpop.f32.mrf.mxu0  ;;  %v7615_v23 = vpop.f32.mrf.mxu1 }
 0x157   :  { %9244 = vst [vmem:[#allocation84_spill] sm:$0xff] %v7608_v27  ;;  %9245 = vst [vmem:[#allocation85_spill] sm:$0xff] %v7611_v9 }
 0x158   :  { %9246 = vst [vmem:[#allocation86_spill] sm:$0xff] %v7613_v30  ;;  %9247 = vst [vmem:[#allocation87_spill] sm:$0xff] %v7615_v23  ;;  %v837_v38 = vpop.f32.mrf.mxu0  ;;  %v910_v35 = vpop.f32.mrf.mxu1 }
 0x159   :  { %v7618_v28 = vadd.f32 %v837_v38, %v7577_v39  ;;  %v7621_v29 = vadd.f32 %v910_v35, %v7585_v37 }
 0x15a   :  { %v839_v36 = vpop.f32.mrf.mxu0  ;;  %v912_v11 = vpop.f32.mrf.mxu1 }
 0x15b   :  { %9248 = vst [vmem:[#allocation88_spill] sm:$0xff] %v7618_v28  ;;  %9249 = vst [vmem:[#allocation89_spill] sm:$0xff] %v7621_v29  ;;  %v7624_v10 = vadd.f32 %v839_v36, %v7590_v33  ;;  %v7627_v12 = vadd.f32 %v912_v11, %v7593_v34 }
 0x15c   :  { %v841_v9 = vpop.f32.mrf.mxu0  ;;  %v914_v23 = vpop.f32.mrf.mxu1 }
 0x15d   :  { %9250 = vst [vmem:[#allocation90_spill] sm:$0xff] %v7624_v10  ;;  %9251 = vst [vmem:[#allocation91_spill] sm:$0xff] %v7627_v12  ;;  %v7630_v27 = vadd.f32 %v841_v9, %v7577_v39  ;;  %v7633_v38 = vadd.f32 %v914_v23, %v7585_v37 }
 0x15e   :  { %v7635_v30 = vpop.f32.mrf.mxu0  ;;  %v7637_v35 = vpop.f32.mrf.mxu1 }
 0x15f   :  { %9252 = vst [vmem:[#allocation92_spill] sm:$0xff] %v7630_v27  ;;  %9253 = vst [vmem:[#allocation93_spill] sm:$0xff] %v7633_v38 }
 0x160   :  { %9254 = vst [vmem:[#allocation94_spill] sm:$0xff] %v7635_v30  ;;  %9255 = vst [vmem:[#allocation95_spill] sm:$0xff] %v7637_v35  ;;  %v847_v29 = vpop.f32.mrf.mxu0  ;;  %v920_v10 = vpop.f32.mrf.mxu1 }
 0x161   :  { %v7640_v36 = vadd.f32 %v847_v29, %v7577_v39  ;;  %v7643_v11 = vadd.f32 %v920_v10, %v7585_v37 }
 0x162   :  { %v849_v12 = vpop.f32.mrf.mxu0  ;;  %v922_v28 = vpop.f32.mrf.mxu1 }
 0x163   :  { %9256 = vst [vmem:[#allocation96_spill] sm:$0xff] %v7640_v36  ;;  %9257 = vst [vmem:[#allocation97_spill] sm:$0xff] %v7643_v11  ;;  %v7646_v9 = vadd.f32 %v849_v12, %v7590_v33  ;;  %v7649_v23 = vadd.f32 %v922_v28, %v7593_v34 }
 0x164   :  { %v851_v38 = vpop.f32.mrf.mxu0  ;;  %v924_v35 = vpop.f32.mrf.mxu1 }
 0x165   :  { %9258 = vst [vmem:[#allocation98_spill] sm:$0xff] %v7646_v9  ;;  %9259 = vst [vmem:[#allocation99_spill] sm:$0xff] %v7649_v23  ;;  %v7652_v27 = vadd.f32 %v851_v38, %v7577_v39  ;;  %v7655_v29 = vadd.f32 %v924_v35, %v7585_v37 }
 0x166   :  { %v7657_v30 = vpop.f32.mrf.mxu0  ;;  %v7659_v10 = vpop.f32.mrf.mxu1 }
 0x167   :  { %9260 = vst [vmem:[#allocation100_spill] sm:$0xff] %v7652_v27  ;;  %9261 = vst [vmem:[#allocation101_spill] sm:$0xff] %v7655_v29 }
 0x168   :  { %9262 = vst [vmem:[#allocation102_spill] sm:$0xff] %v7657_v30  ;;  %9263 = vst [vmem:[#allocation103_spill] sm:$0xff] %v7659_v10  ;;  %v857_v11 = vpop.f32.mrf.mxu0  ;;  %v930_v9 = vpop.f32.mrf.mxu1  ;;  %v682_v10 = vadd.f32 %v7474_v13, %v7486_v8  ;;  %v755_v13 = vadd.f32 %v7476_v14, %v7480_v15 }
 0x169   :  { %v7662_v12 = vadd.f32 %v857_v11, %v7577_v39  ;;  %v7665_v28 = vadd.f32 %v930_v9, %v7585_v37  ;;  %v684_v9 = vadd.f32 %v7482_v16, %v7507_v32  ;;  %v757_v16 = vadd.f32 %v7488_v40, %v7514_v31 }
 0x16a   :  { %v859_v23 = vpop.f32.mrf.mxu0  ;;  %v932_v36 = vpop.f32.mrf.mxu1 }
 0x16b   :  { %9264 = vst [vmem:[#allocation104_spill] sm:$0xff] %v7662_v12  ;;  %9265 = vst [vmem:[#allocation105_spill] sm:$0xff] %v7665_v28  ;;  %v7668_v38 = vadd.f32 %v859_v23, %v7590_v33  ;;  %v7671_v35 = vadd.f32 %v932_v36, %v7593_v34 }
 0x16c   :  { %v861_v29 = vpop.f32.mrf.mxu0  ;;  %v934_v27 = vpop.f32.mrf.mxu1 }
 0x16d   :  { %9266 = vst [vmem:[#allocation106_spill] sm:$0xff] %v7668_v38  ;;  %9267 = vst [vmem:[#allocation107_spill] sm:$0xff] %v7671_v35 }
 0x16e   :  { %v863_v30 = vpop.f32.mrf.mxu0  ;;  %v936_v11 = vpop.f32.mrf.mxu1 }
 0x170   :  { %v1201_v12 = vpop.f32.mrf.mxu0  ;;  %v1242_v26 = vpop.f32.mrf.mxu1 }
 0x171   :  { %v1249_v28 = vadd.f32 %v1201_v12, %v682_v10  ;;  %v1251_v8 = vadd.f32 %v1242_v26, %v755_v13  ;;  %v864_v26 = vadd.f32 %v863_v30, %v7590_v33 }
 0x172   :  { %v1203_v25 = vpop.f32.mrf.mxu0  ;;  %v1244_v24 = vpop.f32.mrf.mxu1 }
 0x173   :  { %v5860_v23 = vmul.f32 -1.442695, %v1249_v28  ;;  %v1250_v38 = vadd.f32 %v1203_v25, %v684_v9  ;;  %v5862_v10 = vmul.f32 -1.442695, %v1251_v8  ;;  %v1252_v12 = vadd.f32 %v1244_v24, %v757_v16 }
 0x174   :  { %v1205_v22 = vpop.f32.mrf.mxu0  ;;  %v1246_v35 = vpop.f32.mrf.mxu1 }
 0x175   :  { %6359 = vpow2.f32 %v5860_v23  ;;  %v5861_v36 = vmul.f32 -1.442695, %v1250_v38 }
 0x176   :  { %v1206_v21 = vpop.f32.mrf.mxu0  ;;  %v1247_v6 = vpop.f32.mrf.mxu1 }
 0x177   :  { %6361 = vpow2.f32 %v5861_v36  ;;  %v862_v21 = vadd.f32 %v861_v29, %v7577_v39 }
 0x178   :  { %6363 = vpow2.f32 %v5862_v10 }
 0x179   :  { %6365 = vtanh.f32 %v1252_v12 }
 0x182   :  { %v6360_v32 = vpop.eup %6359 }
 0x183   :  { %v1513_v28 = vadd.f32 1.0, %v6360_v32 }
 0x184   :  { %v6362_v25 = vpop.eup %6361 }
 0x185   :  { %6367 = vrcp.f32 %v1513_v28  ;;  %v1514_v22 = vadd.f32 1.0, %v6362_v25  ;;  %v6364_v6 = vpop.eup %6363  ;;  %v935_v25 = vadd.f32 %v934_v27, %v7585_v37 }
 0x186   :  { %v6366_v35 = vpop.eup %6365  ;;  %v1515_v8 = vadd.f32 1.0, %v6364_v6 }
 0x187   :  { %6369 = vrcp.f32 %v1514_v22 }
 0x190   :  { %v1452_v38 = vpop.f32.mrf.mxu0  ;;  %v1493_v15 = vpop.f32.mrf.mxu1 }
 0x191   :  { %v1500_v14 = vadd.f32 %v1452_v38, %v862_v21  ;;  %v1502_v22 = vadd.f32 %v1493_v15, %v935_v25  ;;  %v937_v21 = vadd.f32 %v936_v11, %v7593_v34  ;;  %v7733_v25 = vld [vmem:[#allocation8 + $0xe4] ss:$16 sps:$4 sm:$0xff]  }
 0x192   :  { %v6368_v40 = vpop.eup %6367  ;;  %v1454_v9 = vpop.f32.mrf.mxu0 }
 0x193   :  { %v1543_v24 = vmul.f32 %v6368_v40, %v6366_v35  ;;  %v5863_v23 = vmul.f32 -1.442695, %v1500_v14  ;;  %v1501_v32 = vadd.f32 %v1454_v9, %v864_v26  ;;  %v1495_v36 = vpop.f32.mrf.mxu1  ;;  %v5865_v38 = vmul.f32 -1.442695, %v1502_v22  ;;  %v7736_v22 = vld [vmem:[#allocation8 + $0xec] ss:$16 sps:$4 sm:$0xff]  }
 0x194   :  { %v6370_v13 = vpop.eup %6369  ;;  %v1456_v16 = vpop.f32.mrf.mxu0  ;;  %v1503_v35 = vadd.f32 %v1495_v36, %v937_v21  ;;  %v7741_v21 = vld [vmem:[#allocation8 + $0xe0] ss:$16 sps:$4 sm:$0xff]  }
 0x195   :  { %v1542_v10 = vmul.f32 0.0, %v6370_v13  ;;  %6371 = vpow2.f32 %v5863_v23  ;;  %v5864_v12 = vmul.f32 -1.442695, %v1501_v32  ;;  %v1497_v39 = vpop.f32.mrf.mxu1 }
 0x196   :  { %v1457_v29 = vpop.f32.mrf.mxu0 }
 0x197   :  { %v7683_v28 = vadd.f32 %v1543_v24, %v1542_v10  ;;  %6373 = vpow2.f32 %v5864_v12  ;;  %v1498_v30 = vpop.f32.mrf.mxu1  ;;  %v9269_v10 = vld [vmem:[#allocation43_spill] sm:$0xff] }
 0x198   :  { %6375 = vrcp.f32 %v1515_v8 }
 0x199   :  { %6377 = vtanh.f32 %v7683_v28 }
 0x19a   :  { %6379 = vpow2.f32 %v5865_v38  ;;  %v7744_v38 = vld [vmem:[#allocation8 + $0xe8] ss:$16 sps:$4 sm:$0xff]  }
 0x1a2   :  { %v6372_v6 = vpop.eup %6371 }
 0x1a3   :  { %v1531_v26 = vadd.f32 1.0, %v6372_v6  ;;  %v7747_v6 = vld [vmem:[#allocation8 + $0xc4] ss:$16 sps:$4 sm:$0xff]  }
 0x1a4   :  { %v6374_v14 = vpop.eup %6373 }
 0x1a5   :  { %v6376_v40 = vpop.eup %6375  ;;  %6381 = vrcp.f32 %v1531_v26  ;;  %v1532_v9 = vadd.f32 1.0, %v6374_v14  ;;  %v7755_v26 = vld [vmem:[#allocation8 + $0xc0] ss:$16 sps:$4 sm:$0xff]   ;;  %v7758_v14 = vld [vmem:[#allocation8 + $0xc8] ss:$16 sps:$4 sm:$0xff]  }
 0x1a6   :  { %v6378_v24 = vpop.eup %6377  ;;  %6383 = vtanh.f32 %v1503_v35  ;;  %v7750_v35 = vld [vmem:[#allocation8 + $0xcc] ss:$16 sps:$4 sm:$0xff]  }
 0x1a7   :  { %6385 = vrcp.f32 %v1532_v9  ;;  %v7688_v23 = vmul.f32 %v6378_v24, %v6376_v40  ;;  %v6380_v37 = vpop.eup %6379  ;;  %v7761_v40 = vld [vmem:[#allocation8 + $0xa4] ss:$16 sps:$4 sm:$0xff]   ;;  %v9272_v9 = vld [vmem:[#allocation22_spill] sm:$0xff] }
 0x1a8   :  { %v1533_v36 = vadd.f32 1.0, %v6380_v37  ;;  %v9273_v24 = vld [vmem:[#allocation23_spill] sm:$0xff]  ;;  %v9275_v37 = vld [vmem:[#allocation25_spill] sm:$0xff] }
 0x1a9   :  { %9268 = vst [vmem:[#allocation108_spill] sm:$0xff] %v7688_v23  ;;  %v1560_v27 = vpack.c.bf16 %v7688_v23, %v7688_v23  ;;  %v9297_v23 = vld [vmem:[#allocation51_spill] sm:$0xff] }
 0x1aa   :  { %6387 = vrcp.f32 %v1533_v36  ;;  %v9283_v36 = vld [vmem:[#allocation33_spill] sm:$0xff]  ;;  %v761_v34 = vadd.f32 %v9297_v23, %v7514_v31 }
 0x1ab   :  { %1594 = vmatmul.mubr.bf16.vlgmr.msra.gmra.mxu0 %v1560_v27  ;;  %1635 = vmatmul.mubr.bf16.vlgmr.msra.gmra.mxu1 %v1560_v27  ;;  %v9274_v27 = vld [vmem:[#allocation24_spill] sm:$0xff] }
 0x1ac   :  { %1654 = vmatpush1.bf16.msra.mxu0 %v7326_v41  ;;  %1695 = vmatpush1.bf16.msra.mxu1 %v7330_v42 }
 0x1ad   :  { %1655 = vmatprep.subr.bf16.mxu0 %v7332_v43  ;;  %1696 = vmatprep.subr.bf16.mxu1 %v7335_v44 }
 0x1ae   :  { %1685 = vmatprep.mubr.bf16.mxu0 %v9203_v1  ;;  %1726 = vmatprep.mubr.bf16.mxu1 %v9203_v1 }
 0x1b0   :  { %1656 = vmatpush1.bf16.msra.mxu0 %v7340_v45  ;;  %1697 = vmatpush1.bf16.msra.mxu1 %v7344_v46 }
 0x1b1   :  { %1657 = vmatprep.subr.bf16.mxu0 %v7346_v47  ;;  %1698 = vmatprep.subr.bf16.mxu1 %v7349_v48 }
 0x1b2   :  { %v6382_v11 = vpop.eup %6381 }
 0x1b3   :  { %v6384_v15 = vpop.eup %6383 }
 0x1b4   :  { %v6386_v32 = vpop.eup %6385  ;;  %1658 = vmatpush1.bf16.msra.mxu0 %v7354_v49  ;;  %1699 = vmatpush1.bf16.msra.mxu1 %v7358_v50  ;;  %v1546_v8 = vmul.f32 %v6384_v15, %v6382_v11  ;;  %v9276_v11 = vld [vmem:[#allocation26_spill] sm:$0xff]  ;;  %v9277_v15 = vld [vmem:[#allocation27_spill] sm:$0xff] }
 0x1b5   :  { %v1545_v13 = vmul.f32 0.0, %v6386_v32  ;;  %1659 = vmatprep.subr.bf16.mxu0 %v7360_v51  ;;  %1700 = vmatprep.subr.bf16.mxu1 %v7363_v52  ;;  %v9278_v32 = vld [vmem:[#allocation28_spill] sm:$0xff] }
 0x1b7   :  { %v7706_v16 = vadd.f32 %v1546_v8, %v1545_v13  ;;  %v6388_v12 = vpop.eup %6387  ;;  %v9284_v13 = vld [vmem:[#allocation34_spill] sm:$0xff]  ;;  %v9285_v8 = vld [vmem:[#allocation35_spill] sm:$0xff] }
 0x1b8   :  { %1660 = vmatpush1.bf16.msra.mxu0 %v7366_v53  ;;  %1701 = vmatpush1.bf16.msra.mxu1 %v7370_v54 }
 0x1b9   :  { %6389 = vtanh.f32 %v7706_v16  ;;  %1661 = vmatprep.subr.bf16.mxu0 %v7372_v55  ;;  %1702 = vmatprep.subr.bf16.mxu1 %v7375_v56 }
 0x1bc   :  { %1662 = vmatpush1.bf16.msra.mxu0 %v7378_v57  ;;  %1703 = vmatpush1.bf16.msra.mxu1 %v7382_v58 }
 0x1bd   :  { %1663 = vmatprep.subr.bf16.mxu0 %v7384_v59  ;;  %1704 = vmatprep.subr.bf16.mxu1 %v7387_v60 }
 0x1c0   :  { %1664 = vmatpush1.bf16.msra.mxu0 %v7390_v61  ;;  %1705 = vmatpush1.bf16.msra.mxu1 %v7394_v62 }
 0x1c1   :  { %1665 = vmatprep.subr.bf16.mxu0 %v7396_v63  ;;  %1706 = vmatprep.subr.bf16.mxu1 %v9269_v10 }
 0x1c4   :  { %1666 = vmatpush1.bf16.msra.mxu0 %v7402_v2  ;;  %1707 = vmatpush1.bf16.msra.mxu1 %v7406_v3 }
 0x1c5   :  { %1667 = vmatprep.subr.bf16.mxu0 %v7408_v4  ;;  %1708 = vmatprep.subr.bf16.mxu1 %v7411_v5 }
 0x1c6   :  { %v6390_v39 = vpop.eup %6389 }
 0x1c7   :  { %v7725_v29 = vmul.f32 %v6390_v39, %v6388_v12  ;;  %v9286_v12 = vld [vmem:[#allocation36_spill] sm:$0xff]  ;;  %v9287_v39 = vld [vmem:[#allocation37_spill] sm:$0xff] }
 0x1c8   :  { %1668 = vmatpush1.bf16.msra.mxu0 %v7414_v7  ;;  %1709 = vmatpush1.bf16.msra.mxu1 %v7418_v0 }
 0x1c9   :  { %9270 = vst [vmem:[#allocation43_spill] sm:$0xff] %v7725_v29  ;;  %v7731_v30 = vpack.c.bf16 %v7725_v29, %v7725_v29  ;;  %1797 = vmatprep.subr.bf16.mxu0 %v7733_v25  ;;  %1838 = vmatprep.subr.bf16.mxu1 %v7736_v22 }
 0x1cb   :  { %9271 = vst [vmem:[#allocation109_spill] sm:$0xff] %v7731_v30  ;;  %1686 = vmatmul.mubr.bf16.vlgmr.msra.gmra.mxu0 %v7731_v30  ;;  %1727 = vmatmul.mubr.bf16.vlgmr.msra.gmra.mxu1 %v7731_v30 }
 0x1cc   :  { %1798 = vmatpush1.bf16.msra.mxu0 %v7741_v21  ;;  %1839 = vmatpush1.bf16.msra.mxu1 %v7744_v38 }
 0x1cd   :  { %1799 = vmatprep.subr.bf16.mxu0 %v7747_v6  ;;  %1840 = vmatprep.subr.bf16.mxu1 %v7750_v35 }
 0x1ce   :  { %1829 = vmatprep.mubr.bf16.mxu0 %v9203_v1  ;;  %1870 = vmatprep.mubr.bf16.mxu1 %v9203_v1 }
 0x1d0   :  { %1800 = vmatpush1.bf16.msra.mxu0 %v7755_v26  ;;  %1841 = vmatpush1.bf16.msra.mxu1 %v7758_v14 }
 0x1d1   :  { %1801 = vmatprep.subr.bf16.mxu0 %v7761_v40  ;;  %1842 = vmatprep.subr.bf16.mxu1 %v7234_v17  ;;  %v9279_v17 = vld [vmem:[#allocation29_spill] sm:$0xff] }
 0x1d4   :  { %1802 = vmatpush1.bf16.msra.mxu0 %v7240_v18  ;;  %1843 = vmatpush1.bf16.msra.mxu1 %v7243_v19  ;;  %v9280_v18 = vld [vmem:[#allocation30_spill] sm:$0xff]  ;;  %v9281_v19 = vld [vmem:[#allocation31_spill] sm:$0xff] }
 0x1d5   :  { %1803 = vmatprep.subr.bf16.mxu0 %v7245_v20  ;;  %1844 = vmatprep.subr.bf16.mxu1 %v9272_v9  ;;  %v9282_v20 = vld [vmem:[#allocation32_spill] sm:$0xff]  ;;  %v9288_v9 = vld [vmem:[#allocation38_spill] sm:$0xff] }
 0x1d8   :  { %1804 = vmatpush1.bf16.msra.mxu0 %v9273_v24  ;;  %1845 = vmatpush1.bf16.msra.mxu1 %v9274_v27  ;;  %v9289_v24 = vld [vmem:[#allocation39_spill] sm:$0xff]  ;;  %v9290_v27 = vld [vmem:[#allocation40_spill] sm:$0xff] }
 0x1d9   :  { %1805 = vmatprep.subr.bf16.mxu0 %v9275_v37  ;;  %1846 = vmatprep.subr.bf16.mxu1 %v9276_v11  ;;  %v9291_v37 = vld [vmem:[#allocation41_spill] sm:$0xff]  ;;  %v9292_v11 = vld [vmem:[#allocation42_spill] sm:$0xff] }
 0x1dc   :  { %1806 = vmatpush1.bf16.msra.mxu0 %v9277_v15  ;;  %1847 = vmatpush1.bf16.msra.mxu1 %v9278_v32 }
 0x1dd   :  { %1807 = vmatprep.subr.bf16.mxu0 %v9279_v17  ;;  %1848 = vmatprep.subr.bf16.mxu1 %v9280_v18  ;;  %v9293_v17 = vld [vmem:[#allocation52_spill] sm:$0xff]  ;;  %v9294_v18 = vld [vmem:[#allocation50_spill] sm:$0xff] }
 0x1e0   :  { %1808 = vmatpush1.bf16.msra.mxu0 %v9281_v19  ;;  %1849 = vmatpush1.bf16.msra.mxu1 %v9282_v20  ;;  %v688_v19 = vadd.f32 %v9294_v18, %v9293_v17  ;;  %v9295_v20 = vld [vmem:[#allocation47_spill] sm:$0xff] }
 0x1e1   :  { %1809 = vmatprep.subr.bf16.mxu0 %v9283_v36  ;;  %1850 = vmatprep.subr.bf16.mxu1 %v9284_v13 }
 0x1e4   :  { %1810 = vmatpush1.bf16.msra.mxu0 %v9285_v8  ;;  %1851 = vmatpush1.bf16.msra.mxu1 %v9286_v12 }
 0x1e5   :  { %1811 = vmatprep.subr.bf16.mxu0 %v9287_v39  ;;  %1852 = vmatprep.subr.bf16.mxu1 %v9288_v9 }
 0x1e8   :  { %1812 = vmatpush1.bf16.msra.mxu0 %v9289_v24  ;;  %1853 = vmatpush1.bf16.msra.mxu1 %v9290_v27 }
 0x1e9   :  { %1889 = vmatprep.subr.bf16.mxu0 %v9291_v37  ;;  %1930 = vmatprep.subr.bf16.mxu1 %v9292_v11  ;;  %v9296_v37 = vld [vmem:[#allocation49_spill] sm:$0xff] }
 0x26b   :  { %v1595_v15 = vpop.f32.mrf.mxu0  ;;  %v1636_v32 = vpop.f32.mrf.mxu1 }
 0x26c   :  { %v1643_v36 = vadd.f32 %v1595_v15, %v9295_v20  ;;  %v1645_v11 = vadd.f32 %v1636_v32, %v9296_v37 }
 0x26d   :  { %v1597_v13 = vpop.f32.mrf.mxu0  ;;  %v1638_v8 = vpop.f32.mrf.mxu1 }
 0x26e   :  { %v5866_v12 = vmul.f32 -1.442695, %v1643_v36  ;;  %v1644_v39 = vadd.f32 %v1597_v13, %v688_v19  ;;  %v5868_v33 = vmul.f32 -1.442695, %v1645_v11  ;;  %v1646_v18 = vadd.f32 %v1638_v8, %v761_v34  ;;  %v9299_v34 = vld [vmem:[#allocation106_spill] sm:$0xff] }
 0x26f   :  { %v1599_v9 = vpop.f32.mrf.mxu0  ;;  %v1640_v30 = vpop.f32.mrf.mxu1 }
 0x270   :  { %6391 = vpow2.f32 %v5866_v12  ;;  %v5867_v24 = vmul.f32 -1.442695, %v1644_v39  ;;  %v9298_v12 = vld [vmem:[#allocation104_spill] sm:$0xff] }
 0x271   :  { %v1600_v27 = vpop.f32.mrf.mxu0  ;;  %v1641_v29 = vpop.f32.mrf.mxu1 }
 0x272   :  { %6393 = vpow2.f32 %v5867_v24 }
 0x273   :  { %6395 = vpow2.f32 %v5868_v33 }
 0x274   :  { %6397 = vtanh.f32 %v1646_v18 }
 0x27d   :  { %v6392_v17 = vpop.eup %6391 }
 0x27e   :  { %v1748_v15 = vadd.f32 1.0, %v6392_v17 }
 0x27f   :  { %v6394_v20 = vpop.eup %6393 }
 0x280   :  { %6399 = vrcp.f32 %v1748_v15  ;;  %v1749_v19 = vadd.f32 1.0, %v6394_v20  ;;  %v6396_v30 = vpop.eup %6395 }
 0x281   :  { %v6398_v29 = vpop.eup %6397  ;;  %v1750_v33 = vadd.f32 1.0, %v6396_v30 }
 0x282   :  { %6401 = vrcp.f32 %v1749_v19 }
 0x28b   :  { %v1687_v36 = vpop.f32.mrf.mxu0  ;;  %v1728_v13 = vpop.f32.mrf.mxu1 }
 0x28c   :  { %v1735_v39 = vadd.f32 %v1687_v36, %v9298_v12  ;;  %v9300_v36 = vld [vmem:[#allocation105_spill] sm:$0xff] }
 0x28d   :  { %v6400_v32 = vpop.eup %6399  ;;  %v1689_v9 = vpop.f32.mrf.mxu0 }
 0x28e   :  { %v1730_v24 = vpop.f32.mrf.mxu1  ;;  %v1778_v23 = vmul.f32 %v6400_v32, %v6398_v29  ;;  %v5869_v27 = vmul.f32 -1.442695, %v1735_v39  ;;  %v1736_v8 = vadd.f32 %v1689_v9, %v9299_v34  ;;  %v1737_v29 = vadd.f32 %v1728_v13, %v9300_v36  ;;  %v9301_v39 = vld [vmem:[#allocation107_spill] sm:$0xff] }
 0x28f   :  { %v6402_v17 = vpop.eup %6401  ;;  %v1691_v37 = vpop.f32.mrf.mxu0  ;;  %v1738_v32 = vadd.f32 %v1730_v24, %v9301_v39 }
 0x290   :  { %v1732_v11 = vpop.f32.mrf.mxu1  ;;  %v1777_v18 = vmul.f32 %v6402_v17, %v7683_v28  ;;  %6403 = vpow2.f32 %v5869_v27  ;;  %v5870_v15 = vmul.f32 -1.442695, %v1736_v8  ;;  %v5871_v12 = vmul.f32 -1.442695, %v1737_v29  ;;  %v7924_v37 = vld [vmem:[#allocation8 + $0x8] ss:$16 sps:$4 sm:$0xff]  }
 0x291   :  { %v1692_v20 = vpop.f32.mrf.mxu0  ;;  %9319 = vst [vmem:[#allocation39_spill] sm:$0xff] %v7924_v37  ;;  %v7927_v11 = vld [vmem:[#allocation10 + $0xe4] ss:$16 sps:$4 sm:$0xff]  }
 0x292   :  { %v1733_v19 = vpop.f32.mrf.mxu1  ;;  %v7798_v31 = vadd.f32 %v1778_v23, %v1777_v18  ;;  %6405 = vpow2.f32 %v5870_v15  ;;  %9320 = vst [vmem:[#allocation40_spill] sm:$0xff] %v7927_v11  ;;  %v7930_v18 = vld [vmem:[#allocation10 + $0xec] ss:$16 sps:$4 sm:$0xff]  }
 0x293   :  { %6407 = vrcp.f32 %v1750_v33  ;;  %9321 = vst [vmem:[#allocation41_spill] sm:$0xff] %v7930_v18  ;;  %v9322_v19 = vld [vmem:[#allocation53_spill] sm:$0xff] }
 0x294   :  { %6409 = vtanh.f32 %v7798_v31 }
 0x295   :  { %6411 = vpow2.f32 %v5871_v12 }
 0x296   :  { %6413 = vtanh.f32 %v1738_v32  ;;  %v9323_v32 = vld [vmem:[#allocation56_spill] sm:$0xff] }
 0x29d   :  { %v6404_v30 = vpop.eup %6403 }
 0x29e   :  { %v1766_v9 = vadd.f32 1.0, %v6404_v30 }
 0x29f   :  { %v6406_v34 = vpop.eup %6405 }
 0x2a0   :  { %v6408_v28 = vpop.eup %6407  ;;  %6415 = vrcp.f32 %v1766_v9  ;;  %v1767_v27 = vadd.f32 1.0, %v6406_v34 }
 0x2a1   :  { %v6410_v8 = vpop.eup %6409 }
 0x2a2   :  { %6417 = vrcp.f32 %v1767_v27  ;;  %v7803_v23 = vmul.f32 %v6410_v8, %v6408_v28  ;;  %v6412_v13 = vpop.eup %6411 }
 0x2a3   :  { %v6414_v24 = vpop.eup %6413 }
 0x2a4   :  { %9302 = vst [vmem:[#allocation22_spill] sm:$0xff] %v7803_v23  ;;  %v1796_v17 = vpack.c.bf16 %v7803_v23, %v7803_v23  ;;  %v8029_v23 = vld [vmem:[#allocation10 + $0x20] ss:$16 sps:$4 sm:$0xff]  }
 0x2a5   :  { %9338 = vst [vmem:[#allocation106_spill] sm:$0xff] %v8029_v23 }
 0x2a6   :  { %1830 = vmatmul.mubr.bf16.vlgmr.msra.gmra.mxu0 %v1796_v17  ;;  %1871 = vmatmul.mubr.bf16.vlgmr.msra.gmra.mxu1 %v1796_v17  ;;  %v9324_v17 = vld [vmem:[#allocation55_spill] sm:$0xff] }
 0x2a7   :  { %1890 = vmatpush1.bf16.msra.mxu0 %v7326_v41  ;;  %1931 = vmatpush1.bf16.msra.mxu1 %v7330_v42 }
 0x2a8   :  { %1891 = vmatprep.subr.bf16.mxu0 %v7332_v43  ;;  %1932 = vmatprep.subr.bf16.mxu1 %v7335_v44  ;;  %v1768_v43 = vadd.f32 1.0, %v6412_v13 }
 0x2a9   :  { %1921 = vmatprep.mubr.bf16.mxu0 %v9203_v1  ;;  %1962 = vmatprep.mubr.bf16.mxu1 %v9203_v1 }
 0x2aa   :  { %6419 = vrcp.f32 %v1768_v43 }
 0x2ab   :  { %1892 = vmatpush1.bf16.msra.mxu0 %v7340_v45  ;;  %1933 = vmatpush1.bf16.msra.mxu1 %v7344_v46 }
 0x2ac   :  { %1893 = vmatprep.subr.bf16.mxu0 %v7346_v47  ;;  %1934 = vmatprep.subr.bf16.mxu1 %v7349_v48 }
 0x2ad   :  { %v6416_v41 = vpop.eup %6415 }
 0x2ae   :  { %v1781_v42 = vmul.f32 %v6416_v41, %v6414_v24  ;;  %v9325_v41 = vld [vmem:[#allocation57_spill] sm:$0xff] }
 0x2af   :  { %v6418_v33 = vpop.eup %6417  ;;  %1894 = vmatpush1.bf16.msra.mxu0 %v7354_v49  ;;  %1935 = vmatpush1.bf16.msra.mxu1 %v7358_v50  ;;  %v7861_v50 = vld [vmem:[#allocation8 + $0xa0] ss:$16 sps:$4 sm:$0xff]  }
 0x2b0   :  { %v1780_v44 = vmul.f32 %v6418_v33, %v7706_v16  ;;  %1895 = vmatprep.subr.bf16.mxu0 %v7360_v51  ;;  %1936 = vmatprep.subr.bf16.mxu1 %v7363_v52  ;;  %v7864_v51 = vld [vmem:[#allocation8 + $0xa8] ss:$16 sps:$4 sm:$0xff]   ;;  %v7867_v52 = vld [vmem:[#allocation8 + $0x84] ss:$16 sps:$4 sm:$0xff]   ;;  %v7918_v16 = vld [vmem:[#allocation8 + $0xc] ss:$16 sps:$4 sm:$0xff]  }
 0x2b1   :  { %9317 = vst [vmem:[#allocation37_spill] sm:$0xff] %v7918_v16 }
 0x2b2   :  { %v7822_v45 = vadd.f32 %v1781_v42, %v1780_v44 }
 0x2b3   :  { %1896 = vmatpush1.bf16.msra.mxu0 %v7366_v53  ;;  %1937 = vmatpush1.bf16.msra.mxu1 %v7370_v54  ;;  %v7870_v53 = vld [vmem:[#allocation8 + $0x8c] ss:$16 sps:$4 sm:$0xff]   ;;  %v7873_v54 = vld [vmem:[#allocation8 + $0x80] ss:$16 sps:$4 sm:$0xff]  }
 0x2b4   :  { %6421 = vtanh.f32 %v7822_v45  ;;  %1897 = vmatprep.subr.bf16.mxu0 %v7372_v55  ;;  %1938 = vmatprep.subr.bf16.mxu1 %v7375_v56  ;;  %v7876_v55 = vld [vmem:[#allocation8 + $0x88] ss:$16 sps:$4 sm:$0xff]   ;;  %v7879_v56 = vld [vmem:[#allocation8 + $0x64] ss:$16 sps:$4 sm:$0xff]  }
 0x2b5   :  { %9304 = vst [vmem:[#allocation24_spill] sm:$0xff] %v7879_v56 }
 0x2b7   :  { %1898 = vmatpush1.bf16.msra.mxu0 %v7378_v57  ;;  %1939 = vmatpush1.bf16.msra.mxu1 %v7382_v58  ;;  %v6420_v46 = vpop.eup %6419  ;;  %v7882_v57 = vld [vmem:[#allocation8 + $0x6c] ss:$16 sps:$4 sm:$0xff]   ;;  %v7885_v58 = vld [vmem:[#allocation8 + $0x60] ss:$16 sps:$4 sm:$0xff]  }
 0x2b8   :  { %1899 = vmatprep.subr.bf16.mxu0 %v7384_v59  ;;  %1940 = vmatprep.subr.bf16.mxu1 %v7387_v60  ;;  %9305 = vst [vmem:[#allocation25_spill] sm:$0xff] %v7882_v57  ;;  %9306 = vst [vmem:[#allocation26_spill] sm:$0xff] %v7885_v58  ;;  %v7888_v59 = vld [vmem:[#allocation8 + $0x68] ss:$16 sps:$4 sm:$0xff]   ;;  %v7891_v60 = vld [vmem:[#allocation8 + $0x44] ss:$16 sps:$4 sm:$0xff]  }
 0x2b9   :  { %9307 = vst [vmem:[#allocation27_spill] sm:$0xff] %v7888_v59  ;;  %9308 = vst [vmem:[#allocation28_spill] sm:$0xff] %v7891_v60 }
 0x2bb   :  { %1900 = vmatpush1.bf16.msra.mxu0 %v7390_v61  ;;  %1941 = vmatpush1.bf16.msra.mxu1 %v7394_v62  ;;  %v7894_v61 = vld [vmem:[#allocation8 + $0x4c] ss:$16 sps:$4 sm:$0xff]   ;;  %v7897_v62 = vld [vmem:[#allocation8 + $0x40] ss:$16 sps:$4 sm:$0xff]  }
 0x2bc   :  { %1901 = vmatprep.subr.bf16.mxu0 %v7396_v63  ;;  %1942 = vmatprep.subr.bf16.mxu1 %v9269_v10  ;;  %9309 = vst [vmem:[#allocation29_spill] sm:$0xff] %v7894_v61  ;;  %9310 = vst [vmem:[#allocation30_spill] sm:$0xff] %v7897_v62  ;;  %v7900_v63 = vld [vmem:[#allocation8 + $0x48] ss:$16 sps:$4 sm:$0xff]   ;;  %v7921_v10 = vld [vmem:[#allocation8] ss:$16 sps:$4 sm:$0xff]  }
 0x2bd   :  { %9311 = vst [vmem:[#allocation31_spill] sm:$0xff] %v7900_v63  ;;  %9318 = vst [vmem:[#allocation38_spill] sm:$0xff] %v7921_v10 }
 0x2bf   :  { %1902 = vmatpush1.bf16.msra.mxu0 %v7402_v2  ;;  %1943 = vmatpush1.bf16.msra.mxu1 %v7406_v3  ;;  %v7903_v2 = vld [vmem:[#allocation8 + $0x24] ss:$16 sps:$4 sm:$0xff]   ;;  %v7906_v3 = vld [vmem:[#allocation8 + $0x2c] ss:$16 sps:$4 sm:$0xff]  }
 0x2c0   :  { %1903 = vmatprep.subr.bf16.mxu0 %v7408_v4  ;;  %1944 = vmatprep.subr.bf16.mxu1 %v7411_v5  ;;  %9312 = vst [vmem:[#allocation32_spill] sm:$0xff] %v7903_v2  ;;  %9313 = vst [vmem:[#allocation33_spill] sm:$0xff] %v7906_v3  ;;  %v7909_v4 = vld [vmem:[#allocation8 + $0x20] ss:$16 sps:$4 sm:$0xff]   ;;  %v7912_v5 = vld [vmem:[#allocation8 + $0x28] ss:$16 sps:$4 sm:$0xff]  }
 0x2c1   :  { %v6422_v47 = vpop.eup %6421  ;;  %9314 = vst [vmem:[#allocation34_spill] sm:$0xff] %v7909_v4  ;;  %9315 = vst [vmem:[#allocation35_spill] sm:$0xff] %v7912_v5 }
 0x2c2   :  { %v7841_v48 = vmul.f32 %v6422_v47, %v6420_v46 }
 0x2c3   :  { %1904 = vmatpush1.bf16.msra.mxu0 %v7414_v7  ;;  %1945 = vmatpush1.bf16.msra.mxu1 %v7418_v0  ;;  %v7858_v0 = vld [vmem:[#allocation8 + $0xac] ss:$16 sps:$4 sm:$0xff]   ;;  %v7915_v7 = vld [vmem:[#allocation8 + $0x4] ss:$16 sps:$4 sm:$0xff]  }
 0x2c4   :  { %9303 = vst [vmem:[#allocation23_spill] sm:$0xff] %v7841_v48  ;;  %v1888_v49 = vpack.c.bf16 %v7841_v48, %v7841_v48  ;;  %2033 = vmatprep.subr.bf16.mxu0 %v7733_v25  ;;  %2074 = vmatprep.subr.bf16.mxu1 %v7736_v22  ;;  %9316 = vst [vmem:[#allocation36_spill] sm:$0xff] %v7915_v7  ;;  %v8023_v48 = vld [vmem:[#allocation10 + $0x24] ss:$16 sps:$4 sm:$0xff]  }
 0x2c5   :  { %9336 = vst [vmem:[#allocation51_spill] sm:$0xff] %v8023_v48 }
 0x2c6   :  { %1922 = vmatmul.mubr.bf16.vlgmr.msra.gmra.mxu0 %v1888_v49  ;;  %1963 = vmatmul.mubr.bf16.vlgmr.msra.gmra.mxu1 %v1888_v49 }
 0x2c7   :  { %2034 = vmatpush1.bf16.msra.mxu0 %v7741_v21  ;;  %2075 = vmatpush1.bf16.msra.mxu1 %v7744_v38 }
 0x2c8   :  { %2035 = vmatprep.subr.bf16.mxu0 %v7747_v6  ;;  %2076 = vmatprep.subr.bf16.mxu1 %v7750_v35 }
 0x2c9   :  { %2065 = vmatprep.mubr.bf16.mxu0 %v9203_v1  ;;  %2106 = vmatprep.mubr.bf16.mxu1 %v9203_v1 }
 0x2cb   :  { %2036 = vmatpush1.bf16.msra.mxu0 %v7755_v26  ;;  %2077 = vmatpush1.bf16.msra.mxu1 %v7758_v14 }
 0x2cc   :  { %2037 = vmatprep.subr.bf16.mxu0 %v7761_v40  ;;  %2078 = vmatprep.subr.bf16.mxu1 %v7858_v0 }
 0x2cf   :  { %2038 = vmatpush1.bf16.msra.mxu0 %v7861_v50  ;;  %2079 = vmatpush1.bf16.msra.mxu1 %v7864_v51 }
 0x2d0   :  { %2039 = vmatprep.subr.bf16.mxu0 %v7867_v52  ;;  %2080 = vmatprep.subr.bf16.mxu1 %v7870_v53 }
 0x2d3   :  { %2040 = vmatpush1.bf16.msra.mxu0 %v7873_v54  ;;  %2081 = vmatpush1.bf16.msra.mxu1 %v7876_v55 }
 0x2d4   :  { %2041 = vmatprep.subr.bf16.mxu0 %v7879_v56  ;;  %2082 = vmatprep.subr.bf16.mxu1 %v7882_v57 }
 0x2d7   :  { %2042 = vmatpush1.bf16.msra.mxu0 %v7885_v58  ;;  %2083 = vmatpush1.bf16.msra.mxu1 %v7888_v59 }
 0x2d8   :  { %2043 = vmatprep.subr.bf16.mxu0 %v7891_v60  ;;  %2084 = vmatprep.subr.bf16.mxu1 %v7894_v61 }
 0x2db   :  { %2044 = vmatpush1.bf16.msra.mxu0 %v7897_v62  ;;  %2085 = vmatpush1.bf16.msra.mxu1 %v7900_v63 }
 0x2dc   :  { %2045 = vmatprep.subr.bf16.mxu0 %v7903_v2  ;;  %2086 = vmatprep.subr.bf16.mxu1 %v7906_v3 }
 0x2df   :  { %2046 = vmatpush1.bf16.msra.mxu0 %v7909_v4  ;;  %2087 = vmatpush1.bf16.msra.mxu1 %v7912_v5 }
 0x2e0   :  { %2047 = vmatprep.subr.bf16.mxu0 %v7915_v7  ;;  %2088 = vmatprep.subr.bf16.mxu1 %v7918_v16 }
 0x2e3   :  { %2048 = vmatpush1.bf16.msra.mxu0 %v7921_v10  ;;  %2089 = vmatpush1.bf16.msra.mxu1 %v7924_v37 }
 0x2e4   :  { %2125 = vmatprep.subr.bf16.mxu0 %v7927_v11  ;;  %2166 = vmatprep.subr.bf16.mxu1 %v7930_v18 }
 0x366   :  { %v1831_v15 = vpop.f32.mrf.mxu0  ;;  %v1872_v20 = vpop.f32.mrf.mxu1 }
 0x367   :  { %v1879_v36 = vadd.f32 %v1831_v15, %v9322_v19  ;;  %v1881_v13 = vadd.f32 %v1872_v20, %v9324_v17 }
 0x368   :  { %v1833_v29 = vpop.f32.mrf.mxu0  ;;  %v1874_v12 = vpop.f32.mrf.mxu1 }
 0x369   :  { %v5872_v39 = vmul.f32 -1.442695, %v1879_v36  ;;  %v1880_v30 = vadd.f32 %v1833_v29, %v9323_v32  ;;  %v5874_v24 = vmul.f32 -1.442695, %v1881_v13  ;;  %v1882_v42 = vadd.f32 %v1874_v12, %v9325_v41  ;;  %v9326_v36 = vld [vmem:[#allocation78_spill] sm:$0xff]  ;;  %v9328_v32 = vld [vmem:[#allocation100_spill] sm:$0xff] }
 0x36a   :  { %v1835_v9 = vpop.f32.mrf.mxu0  ;;  %v1876_v34 = vpop.f32.mrf.mxu1  ;;  %v9327_v29 = vld [vmem:[#allocation102_spill] sm:$0xff] }
 0x36b   :  { %6423 = vpow2.f32 %v5872_v39  ;;  %v5873_v28 = vmul.f32 -1.442695, %v1880_v30  ;;  %v854_v39 = vadd.f32 %v9327_v29, %v9326_v36  ;;  %v9331_v29 = vld [vmem:[#allocation103_spill] sm:$0xff] }
 0x36c   :  { %v1836_v27 = vpop.f32.mrf.mxu0  ;;  %v1877_v8 = vpop.f32.mrf.mxu1 }
 0x36d   :  { %6425 = vpow2.f32 %v5873_v28 }
 0x36e   :  { %6427 = vpow2.f32 %v5874_v24 }
 0x36f   :  { %6429 = vtanh.f32 %v1882_v42 }
 0x378   :  { %v6424_v33 = vpop.eup %6423 }
 0x379   :  { %v1984_v43 = vadd.f32 1.0, %v6424_v33 }
 0x37a   :  { %v6426_v44 = vpop.eup %6425 }
 0x37b   :  { %6431 = vrcp.f32 %v1984_v43  ;;  %v1985_v46 = vadd.f32 1.0, %v6426_v44  ;;  %v6428_v47 = vpop.eup %6427 }
 0x37c   :  { %v6430_v19 = vpop.eup %6429  ;;  %v1986_v17 = vadd.f32 1.0, %v6428_v47 }
 0x37d   :  { %6433 = vrcp.f32 %v1985_v46  ;;  %v9329_v46 = vld [vmem:[#allocation101_spill] sm:$0xff] }
 0x386   :  { %v1923_v49 = vpop.f32.mrf.mxu0  ;;  %v1964_v15 = vpop.f32.mrf.mxu1 }
 0x387   :  { %v1971_v20 = vadd.f32 %v1923_v49, %v9328_v32  ;;  %v1973_v49 = vadd.f32 %v1964_v15, %v9329_v46  ;;  %v7974_v46 = vld [vmem:[#allocation10 + $0xac] ss:$16 sps:$4 sm:$0xff]  }
 0x388   :  { %v6432_v30 = vpop.eup %6431  ;;  %v1925_v9 = vpop.f32.mrf.mxu0 }
 0x389   :  { %v1966_v12 = vpop.f32.mrf.mxu1  ;;  %v2014_v34 = vmul.f32 %v6432_v30, %v6430_v19  ;;  %v5875_v28 = vmul.f32 -1.442695, %v1971_v20  ;;  %v1972_v27 = vadd.f32 %v1925_v9, %v854_v39  ;;  %v9330_v19 = vld [vmem:[#allocation79_spill] sm:$0xff]  ;;  %v5877_v47 = vmul.f32 -1.442695, %v1973_v49 }
 0x38a   :  { %v6434_v8 = vpop.eup %6433  ;;  %v1927_v13 = vpop.f32.mrf.mxu0  ;;  %v927_v39 = vadd.f32 %v9331_v29, %v9330_v19  ;;  %v8032_v19 = vld [vmem:[#allocation10 + $0x28] ss:$16 sps:$4 sm:$0xff]  }
 0x38b   :  { %v1968_v24 = vpop.f32.mrf.mxu1  ;;  %v2013_v41 = vmul.f32 %v6434_v8, %v7798_v31  ;;  %6435 = vpow2.f32 %v5875_v28  ;;  %v5876_v42 = vmul.f32 -1.442695, %v1972_v27  ;;  %v7951_v8 = vld [vmem:[#allocation10 + $0xe0] ss:$16 sps:$4 sm:$0xff]   ;;  %v7960_v13 = vld [vmem:[#allocation10 + $0xcc] ss:$16 sps:$4 sm:$0xff]  }
 0x38c   :  { %v1928_v33 = vpop.f32.mrf.mxu0  ;;  %v1974_v32 = vadd.f32 %v1966_v12, %v927_v39  ;;  %v7954_v12 = vld [vmem:[#allocation10 + $0xe8] ss:$16 sps:$4 sm:$0xff]   ;;  %9339 = vst [vmem:[#allocation105_spill] sm:$0xff] %v8032_v19 }
 0x38d   :  { %v1969_v43 = vpop.f32.mrf.mxu1  ;;  %v7941_v44 = vadd.f32 %v2014_v34, %v2013_v41  ;;  %6437 = vpow2.f32 %v5876_v42  ;;  %v7965_v41 = vld [vmem:[#allocation10 + $0xc0] ss:$16 sps:$4 sm:$0xff]   ;;  %v7968_v42 = vld [vmem:[#allocation10 + $0xc8] ss:$16 sps:$4 sm:$0xff]  }
 0x38e   :  { %6439 = vrcp.f32 %v1986_v17  ;;  %v7957_v17 = vld [vmem:[#allocation10 + $0xc4] ss:$16 sps:$4 sm:$0xff]  }
 0x38f   :  { %6441 = vtanh.f32 %v7941_v44  ;;  %v7971_v43 = vld [vmem:[#allocation10 + $0xa4] ss:$16 sps:$4 sm:$0xff]  }
 0x390   :  { %6443 = vpow2.f32 %v5877_v47 }
 0x391   :  { %6445 = vtanh.f32 %v1974_v32  ;;  %v7977_v32 = vld [vmem:[#allocation10 + $0xa0] ss:$16 sps:$4 sm:$0xff]  }
 0x398   :  { %v6436_v20 = vpop.eup %6435 }
 0x399   :  { %v2002_v30 = vadd.f32 1.0, %v6436_v20  ;;  %v7980_v20 = vld [vmem:[#allocation10 + $0xa8] ss:$16 sps:$4 sm:$0xff]  }
 0x39a   :  { %v6438_v31 = vpop.eup %6437 }
 0x39b   :  { %v6440_v9 = vpop.eup %6439  ;;  %6447 = vrcp.f32 %v2002_v30  ;;  %v2003_v34 = vadd.f32 1.0, %v6438_v31  ;;  %v7984_v31 = vld [vmem:[#allocation10 + $0x84] ss:$16 sps:$4 sm:$0xff]  }
 0x39c   :  { %v6442_v28 = vpop.eup %6441 }
 0x39d   :  { %6449 = vrcp.f32 %v2003_v34  ;;  %v7947_v27 = vmul.f32 %v6442_v28, %v6440_v9  ;;  %v6444_v24 = vpop.eup %6443  ;;  %v7987_v9 = vld [vmem:[#allocation10 + $0x8c] ss:$16 sps:$4 sm:$0xff]   ;;  %v7992_v28 = vld [vmem:[#allocation10 + $0x80] ss:$16 sps:$4 sm:$0xff]  }
 0x39e   :  { %v6446_v33 = vpop.eup %6445  ;;  %v2004_v47 = vadd.f32 1.0, %v6444_v24  ;;  %v8002_v24 = vld [vmem:[#allocation10 + $0x6c] ss:$16 sps:$4 sm:$0xff]  }
 0x39f   :  { %9332 = vst [vmem:[#allocation42_spill] sm:$0xff] %v7947_v27  ;;  %v2032_v15 = vpack.c.bf16 %v7947_v27, %v7947_v27  ;;  %v8026_v27 = vld [vmem:[#allocation10 + $0x2c] ss:$16 sps:$4 sm:$0xff]  }
 0x3a0   :  { %6451 = vrcp.f32 %v2004_v47  ;;  %v8017_v47 = vld [vmem:[#allocation10 + $0x40] ss:$16 sps:$4 sm:$0xff]   ;;  %9337 = vst [vmem:[#allocation104_spill] sm:$0xff] %v8026_v27 }
 0x3a1   :  { %2066 = vmatmul.mubr.bf16.vlgmr.msra.gmra.mxu0 %v2032_v15  ;;  %2107 = vmatmul.mubr.bf16.vlgmr.msra.gmra.mxu1 %v2032_v15  ;;  %v7995_v15 = vld [vmem:[#allocation10 + $0x88] ss:$16 sps:$4 sm:$0xff]   ;;  %9334 = vst [vmem:[#allocation47_spill] sm:$0xff] %v8017_v47 }
 0x3a2   :  { %2126 = vmatpush1.bf16.msra.mxu0 %v7951_v8  ;;  %2167 = vmatpush1.bf16.msra.mxu1 %v7954_v12 }
 0x3a3   :  { %2127 = vmatprep.subr.bf16.mxu0 %v7957_v17  ;;  %2168 = vmatprep.subr.bf16.mxu1 %v7960_v13 }
 0x3a4   :  { %2157 = vmatprep.mubr.bf16.mxu0 %v9203_v1  ;;  %2198 = vmatprep.mubr.bf16.mxu1 %v9203_v1 }
 0x3a6   :  { %2128 = vmatpush1.bf16.msra.mxu0 %v7965_v41  ;;  %2169 = vmatpush1.bf16.msra.mxu1 %v7968_v42 }
 0x3a7   :  { %2129 = vmatprep.subr.bf16.mxu0 %v7971_v43  ;;  %2170 = vmatprep.subr.bf16.mxu1 %v7974_v46 }
 0x3a8   :  { %v6448_v49 = vpop.eup %6447 }
 0x3a9   :  { %v2017_v29 = vmul.f32 %v6448_v49, %v6446_v33  ;;  %v8005_v33 = vld [vmem:[#allocation10 + $0x60] ss:$16 sps:$4 sm:$0xff]   ;;  %v8008_v49 = vld [vmem:[#allocation10 + $0x68] ss:$16 sps:$4 sm:$0xff]  }
 0x3aa   :  { %v6450_v39 = vpop.eup %6449  ;;  %2130 = vmatpush1.bf16.msra.mxu0 %v7977_v32  ;;  %2171 = vmatpush1.bf16.msra.mxu1 %v7980_v20 }
 0x3ab   :  { %v2016_v30 = vmul.f32 %v6450_v39, %v7822_v45  ;;  %2131 = vmatprep.subr.bf16.mxu0 %v7984_v31  ;;  %2172 = vmatprep.subr.bf16.mxu1 %v7987_v9  ;;  %v7999_v45 = vld [vmem:[#allocation10 + $0x64] ss:$16 sps:$4 sm:$0xff]   ;;  %v8014_v39 = vld [vmem:[#allocation10 + $0x4c] ss:$16 sps:$4 sm:$0xff]  }
 0x3ac   :  { %9333 = vst [vmem:[#allocation50_spill] sm:$0xff] %v8014_v39 }
 0x3ad   :  { %v7990_v34 = vadd.f32 %v2017_v29, %v2016_v30  ;;  %v8011_v29 = vld [vmem:[#allocation10 + $0x44] ss:$16 sps:$4 sm:$0xff]   ;;  %v8020_v30 = vld [vmem:[#allocation10 + $0x48] ss:$16 sps:$4 sm:$0xff]   ;;  %v6452_v36 = vpop.eup %6451 }
 0x3ae   :  { %2132 = vmatpush1.bf16.msra.mxu0 %v7992_v28  ;;  %2173 = vmatpush1.bf16.msra.mxu1 %v7995_v15  ;;  %9335 = vst [vmem:[#allocation49_spill] sm:$0xff] %v8020_v30 }
 0x3af   :  { %6453 = vtanh.f32 %v7990_v34  ;;  %2133 = vmatprep.subr.bf16.mxu0 %v7999_v45  ;;  %2174 = vmatprep.subr.bf16.mxu1 %v8002_v24 }
 0x3b2   :  { %2134 = vmatpush1.bf16.msra.mxu0 %v8005_v33  ;;  %2175 = vmatpush1.bf16.msra.mxu1 %v8008_v49 }
 0x3b3   :  { %2135 = vmatprep.subr.bf16.mxu0 %v8011_v29  ;;  %2176 = vmatprep.subr.bf16.mxu1 %v8014_v39 }
 0x3b6   :  { %2136 = vmatpush1.bf16.msra.mxu0 %v8017_v47  ;;  %2177 = vmatpush1.bf16.msra.mxu1 %v8020_v30  ;;  %v8035_v47 = vld [vmem:[#allocation10 + $0x4] ss:$16 sps:$4 sm:$0xff]   ;;  %v8038_v30 = vld [vmem:[#allocation10 + $0xc] ss:$16 sps:$4 sm:$0xff]  }
 0x3b7   :  { %2137 = vmatprep.subr.bf16.mxu0 %v8023_v48  ;;  %2178 = vmatprep.subr.bf16.mxu1 %v8026_v27  ;;  %v8043_v27 = vld [vmem:[#allocation10] ss:$16 sps:$4 sm:$0xff]  }
 0x3ba   :  { %2138 = vmatpush1.bf16.msra.mxu0 %v8029_v23  ;;  %2179 = vmatpush1.bf16.msra.mxu1 %v8032_v19  ;;  %v8046_v23 = vld [vmem:[#allocation10 + $0x8] ss:$16 sps:$4 sm:$0xff]  }
 0x3bb   :  { %2139 = vmatprep.subr.bf16.mxu0 %v8035_v47  ;;  %2180 = vmatprep.subr.bf16.mxu1 %v8038_v30 }
 0x3bc   :  { %v6454_v48 = vpop.eup %6453 }
 0x3bd   :  { %v8041_v39 = vmul.f32 %v6454_v48, %v6452_v36 }
 0x3be   :  { %2140 = vmatpush1.bf16.msra.mxu0 %v8043_v27  ;;  %2181 = vmatpush1.bf16.msra.mxu1 %v8046_v23 }
 0x3bf   :  { %9340 = vst [vmem:[#allocation107_spill] sm:$0xff] %v8041_v39  ;;  %v2124_v19 = vpack.c.bf16 %v8041_v39, %v8041_v39  ;;  %2268 = vmatprep.subr.bf16.mxu0 %v7733_v25  ;;  %2309 = vmatprep.subr.bf16.mxu1 %v7736_v22  ;;  %v9342_v39 = vld [vmem:[#allocation60_spill] sm:$0xff] }
 0x3c1   :  { %2158 = vmatmul.mubr.bf16.vlgmr.msra.gmra.mxu0 %v2124_v19  ;;  %2199 = vmatmul.mubr.bf16.vlgmr.msra.gmra.mxu1 %v2124_v19  ;;  %v9341_v19 = vld [vmem:[#allocation52_spill] sm:$0xff] }
 0x3c2   :  { %2269 = vmatpush1.bf16.msra.mxu0 %v7741_v21  ;;  %2310 = vmatpush1.bf16.msra.mxu1 %v7744_v38 }
 0x3c3   :  { %2270 = vmatprep.subr.bf16.mxu0 %v7747_v6  ;;  %2311 = vmatprep.subr.bf16.mxu1 %v7750_v35 }
 0x3c4   :  { %2300 = vmatprep.mubr.bf16.mxu0 %v9203_v1  ;;  %2341 = vmatprep.mubr.bf16.mxu1 %v9203_v1 }
 0x3c6   :  { %2271 = vmatpush1.bf16.msra.mxu0 %v7755_v26  ;;  %2312 = vmatpush1.bf16.msra.mxu1 %v7758_v14 }
 0x3c7   :  { %2272 = vmatprep.subr.bf16.mxu0 %v7761_v40  ;;  %2313 = vmatprep.subr.bf16.mxu1 %v7858_v0 }
 0x3ca   :  { %2273 = vmatpush1.bf16.msra.mxu0 %v7861_v50  ;;  %2314 = vmatpush1.bf16.msra.mxu1 %v7864_v51 }
 0x3cb   :  { %2274 = vmatprep.subr.bf16.mxu0 %v7867_v52  ;;  %2315 = vmatprep.subr.bf16.mxu1 %v7870_v53 }
 0x3ce   :  { %2275 = vmatpush1.bf16.msra.mxu0 %v7873_v54  ;;  %2316 = vmatpush1.bf16.msra.mxu1 %v7876_v55 }
 0x3cf   :  { %2276 = vmatprep.subr.bf16.mxu0 %v7879_v56  ;;  %2317 = vmatprep.subr.bf16.mxu1 %v7882_v57 }
 0x3d2   :  { %2277 = vmatpush1.bf16.msra.mxu0 %v7885_v58  ;;  %2318 = vmatpush1.bf16.msra.mxu1 %v7888_v59  ;;  %v9345_v59 = vld [vmem:[#allocation54_spill] sm:$0xff]  ;;  %v9346_v58 = vld [vmem:[#allocation61_spill] sm:$0xff] }
 0x3d3   :  { %2278 = vmatprep.subr.bf16.mxu0 %v7891_v60  ;;  %2319 = vmatprep.subr.bf16.mxu1 %v7894_v61  ;;  %v771_v57 = vadd.f32 %v9346_v58, %v9345_v59 }
 0x3d6   :  { %2279 = vmatpush1.bf16.msra.mxu0 %v7897_v62  ;;  %2320 = vmatpush1.bf16.msra.mxu1 %v7900_v63 }
 0x3d7   :  { %2280 = vmatprep.subr.bf16.mxu0 %v7903_v2  ;;  %2321 = vmatprep.subr.bf16.mxu1 %v7906_v3  ;;  %v698_v3 = vadd.f32 %v9342_v39, %v9341_v19 }
 0x3da   :  { %2281 = vmatpush1.bf16.msra.mxu0 %v7909_v4  ;;  %2322 = vmatpush1.bf16.msra.mxu1 %v7912_v5  ;;  %v9343_v4 = vld [vmem:[#allocation58_spill] sm:$0xff] }
 0x3db   :  { %2282 = vmatprep.subr.bf16.mxu0 %v7915_v7  ;;  %2323 = vmatprep.subr.bf16.mxu1 %v7918_v16 }
 0x3de   :  { %2283 = vmatpush1.bf16.msra.mxu0 %v7921_v10  ;;  %2324 = vmatpush1.bf16.msra.mxu1 %v7924_v37 }
 0x3df   :  { %2359 = vmatprep.subr.bf16.mxu0 %v7927_v11  ;;  %2400 = vmatprep.subr.bf16.mxu1 %v7930_v18  ;;  %v9344_v11 = vld [vmem:[#allocation59_spill] sm:$0xff] }
 0x461   :  { %v2067_v48 = vpop.f32.mrf.mxu0  ;;  %v2108_v36 = vpop.f32.mrf.mxu1 }
 0x462   :  { %v2115_v2 = vadd.f32 %v2067_v48, %v9343_v4  ;;  %v2117_v18 = vadd.f32 %v2108_v36, %v9344_v11 }
 0x463   :  { %v2069_v5 = vpop.f32.mrf.mxu0  ;;  %v2110_v63 = vpop.f32.mrf.mxu1 }
 0x464   :  { %v5878_v7 = vmul.f32 -1.442695, %v2115_v2  ;;  %v2116_v62 = vadd.f32 %v2069_v5, %v698_v3  ;;  %v5880_v56 = vmul.f32 -1.442695, %v2117_v18  ;;  %v2118_v39 = vadd.f32 %v2110_v63, %v771_v57  ;;  %v9347_v5 = vld [vmem:[#allocation96_spill] sm:$0xff]  ;;  %v9348_v57 = vld [vmem:[#allocation98_spill] sm:$0xff] }
 0x465   :  { %v2071_v16 = vpop.f32.mrf.mxu0  ;;  %v2112_v61 = vpop.f32.mrf.mxu1 }
 0x466   :  { %6455 = vpow2.f32 %v5878_v7  ;;  %v5879_v10 = vmul.f32 -1.442695, %v2116_v62 }
 0x467   :  { %v2072_v37 = vpop.f32.mrf.mxu0  ;;  %v2113_v60 = vpop.f32.mrf.mxu1 }
 0x468   :  { %6457 = vpow2.f32 %v5879_v10 }
 0x469   :  { %6459 = vpow2.f32 %v5880_v56 }
 0x46a   :  { %6461 = vtanh.f32 %v2118_v39 }
 0x473   :  { %v6456_v19 = vpop.eup %6455 }
 0x474   :  { %v2220_v4 = vadd.f32 1.0, %v6456_v19 }
 0x475   :  { %v6458_v48 = vpop.eup %6457 }
 0x476   :  { %6463 = vrcp.f32 %v2220_v4  ;;  %v2221_v2 = vadd.f32 1.0, %v6458_v48  ;;  %v6460_v61 = vpop.eup %6459 }
 0x477   :  { %v6462_v60 = vpop.eup %6461  ;;  %v2222_v56 = vadd.f32 1.0, %v6460_v61 }
 0x478   :  { %6465 = vrcp.f32 %v2221_v2 }
 0x481   :  { %v2159_v62 = vpop.f32.mrf.mxu0  ;;  %v2200_v3 = vpop.f32.mrf.mxu1 }
 0x482   :  { %v2207_v7 = vadd.f32 %v2159_v62, %v9347_v5  ;;  %v9349_v62 = vld [vmem:[#allocation97_spill] sm:$0xff] }
 0x483   :  { %v6464_v16 = vpop.eup %6463  ;;  %v2161_v10 = vpop.f32.mrf.mxu0 }
 0x484   :  { %v2202_v37 = vpop.f32.mrf.mxu1  ;;  %v2250_v58 = vmul.f32 %v6464_v16, %v6462_v60  ;;  %v5881_v11 = vmul.f32 -1.442695, %v2207_v7  ;;  %v2208_v63 = vadd.f32 %v2161_v10, %v9348_v57  ;;  %v2209_v60 = vadd.f32 %v2200_v3, %v9349_v62  ;;  %v9350_v7 = vld [vmem:[#allocation99_spill] sm:$0xff]  ;;  %v9354_v62 = vld [vmem:[#allocation49_spill] sm:$0xff] }
 0x485   :  { %v6466_v18 = vpop.eup %6465  ;;  %v2163_v36 = vpop.f32.mrf.mxu0  ;;  %v2210_v16 = vadd.f32 %v2202_v37, %v9350_v7  ;;  %v9357_v7 = vld [vmem:[#allocation106_spill] sm:$0xff] }
 0x486   :  { %v2204_v19 = vpop.f32.mrf.mxu1  ;;  %v2249_v39 = vmul.f32 %v6466_v18, %v7941_v44  ;;  %6467 = vpow2.f32 %v5881_v11  ;;  %v5882_v4 = vmul.f32 -1.442695, %v2208_v63  ;;  %v5883_v5 = vmul.f32 -1.442695, %v2209_v60  ;;  %v9355_v60 = vld [vmem:[#allocation51_spill] sm:$0xff] }
 0x487   :  { %v2164_v48 = vpop.f32.mrf.mxu0 }
 0x488   :  { %v2205_v2 = vpop.f32.mrf.mxu1  ;;  %v8096_v59 = vadd.f32 %v2250_v58, %v2249_v39  ;;  %6469 = vpow2.f32 %v5882_v4 }
 0x489   :  { %6471 = vrcp.f32 %v2222_v56  ;;  %v9353_v2 = vld [vmem:[#allocation47_spill] sm:$0xff] }
 0x48a   :  { %6473 = vtanh.f32 %v8096_v59 }
 0x48b   :  { %6475 = vpow2.f32 %v5883_v5  ;;  %v9356_v5 = vld [vmem:[#allocation104_spill] sm:$0xff] }
 0x48c   :  { %6477 = vtanh.f32 %v2210_v16  ;;  %v9358_v16 = vld [vmem:[#allocation105_spill] sm:$0xff] }
 0x493   :  { %v6468_v61 = vpop.eup %6467 }
 0x494   :  { %v2238_v10 = vadd.f32 1.0, %v6468_v61 }
 0x495   :  { %v6470_v57 = vpop.eup %6469 }
 0x496   :  { %v6472_v44 = vpop.eup %6471  ;;  %6479 = vrcp.f32 %v2238_v10  ;;  %v2239_v11 = vadd.f32 1.0, %v6470_v57 }
 0x497   :  { %v6474_v63 = vpop.eup %6473 }
 0x498   :  { %6481 = vrcp.f32 %v2239_v11  ;;  %v8101_v58 = vmul.f32 %v6474_v63, %v6472_v44  ;;  %v6476_v3 = vpop.eup %6475  ;;  %v9369_v11 = vld [vmem:[#allocation33_spill] sm:$0xff]  ;;  %v9370_v63 = vld [vmem:[#allocation34_spill] sm:$0xff] }
 0x499   :  { %v6478_v37 = vpop.eup %6477  ;;  %v2240_v39 = vadd.f32 1.0, %v6476_v3  ;;  %v9372_v3 = vld [vmem:[#allocation36_spill] sm:$0xff] }
 0x49a   :  { %9351 = vst [vmem:[#allocation53_spill] sm:$0xff] %v8101_v58  ;;  %v2267_v18 = vpack.c.bf16 %v8101_v58, %v8101_v58 }
 0x49b   :  { %6483 = vrcp.f32 %v2240_v39  ;;  %v9377_v39 = vld [vmem:[#allocation41_spill] sm:$0xff] }
 0x49c   :  { %2301 = vmatmul.mubr.bf16.vlgmr.msra.gmra.mxu0 %v2267_v18  ;;  %2342 = vmatmul.mubr.bf16.vlgmr.msra.gmra.mxu1 %v2267_v18  ;;  %v9371_v18 = vld [vmem:[#allocation35_spill] sm:$0xff] }
 0x49d   :  { %2360 = vmatpush1.bf16.msra.mxu0 %v7951_v8  ;;  %2401 = vmatpush1.bf16.msra.mxu1 %v7954_v12 }
 0x49e   :  { %2361 = vmatprep.subr.bf16.mxu0 %v7957_v17  ;;  %2402 = vmatprep.subr.bf16.mxu1 %v7960_v13 }
 0x49f   :  { %2391 = vmatprep.mubr.bf16.mxu0 %v9203_v1  ;;  %2432 = vmatprep.mubr.bf16.mxu1 %v9203_v1 }
 0x4a1   :  { %2362 = vmatpush1.bf16.msra.mxu0 %v7965_v41  ;;  %2403 = vmatpush1.bf16.msra.mxu1 %v7968_v42 }
 0x4a2   :  { %2363 = vmatprep.subr.bf16.mxu0 %v7971_v43  ;;  %2404 = vmatprep.subr.bf16.mxu1 %v7974_v46 }
 0x4a3   :  { %v6480_v56 = vpop.eup %6479 }
 0x4a4   :  { %v2253_v36 = vmul.f32 %v6480_v56, %v6478_v37  ;;  %v9373_v37 = vld [vmem:[#allocation37_spill] sm:$0xff]  ;;  %v9374_v56 = vld [vmem:[#allocation38_spill] sm:$0xff] }
 0x4a5   :  { %v6482_v19 = vpop.eup %6481  ;;  %2364 = vmatpush1.bf16.msra.mxu0 %v7977_v32  ;;  %2405 = vmatpush1.bf16.msra.mxu1 %v7980_v20 }
 0x4a6   :  { %v2252_v4 = vmul.f32 %v6482_v19, %v7990_v34  ;;  %2365 = vmatprep.subr.bf16.mxu0 %v7984_v31  ;;  %2406 = vmatprep.subr.bf16.mxu1 %v7987_v9  ;;  %v9352_v34 = vld [vmem:[#allocation50_spill] sm:$0xff]  ;;  %v9376_v19 = vld [vmem:[#allocation40_spill] sm:$0xff] }
 0x4a8   :  { %v8120_v48 = vadd.f32 %v2253_v36, %v2252_v4  ;;  %v6484_v61 = vpop.eup %6483  ;;  %v9375_v36 = vld [vmem:[#allocation39_spill] sm:$0xff] }
 0x4a9   :  { %2366 = vmatpush1.bf16.msra.mxu0 %v7992_v28  ;;  %2407 = vmatpush1.bf16.msra.mxu1 %v7995_v15 }
 0x4aa   :  { %6485 = vtanh.f32 %v8120_v48  ;;  %2367 = vmatprep.subr.bf16.mxu0 %v7999_v45  ;;  %2408 = vmatprep.subr.bf16.mxu1 %v8002_v24 }
 0x4ad   :  { %2368 = vmatpush1.bf16.msra.mxu0 %v8005_v33  ;;  %2409 = vmatpush1.bf16.msra.mxu1 %v8008_v49 }
 0x4ae   :  { %2369 = vmatprep.subr.bf16.mxu0 %v8011_v29  ;;  %2410 = vmatprep.subr.bf16.mxu1 %v9352_v34 }
 0x4b1   :  { %2370 = vmatpush1.bf16.msra.mxu0 %v9353_v2  ;;  %2411 = vmatpush1.bf16.msra.mxu1 %v9354_v62 }
 0x4b2   :  { %2371 = vmatprep.subr.bf16.mxu0 %v9355_v60  ;;  %2412 = vmatprep.subr.bf16.mxu1 %v9356_v5 }
 0x4b5   :  { %2372 = vmatpush1.bf16.msra.mxu0 %v9357_v7  ;;  %2413 = vmatpush1.bf16.msra.mxu1 %v9358_v16 }
 0x4b6   :  { %2373 = vmatprep.subr.bf16.mxu0 %v8035_v47  ;;  %2414 = vmatprep.subr.bf16.mxu1 %v8038_v30 }
 0x4b7   :  { %v6486_v10 = vpop.eup %6485 }
 0x4b8   :  { %v8139_v57 = vmul.f32 %v6486_v10, %v6484_v61  ;;  %v9378_v10 = vld [vmem:[#allocation62_spill] sm:$0xff] }
 0x4b9   :  { %2374 = vmatpush1.bf16.msra.mxu0 %v8043_v27  ;;  %2415 = vmatpush1.bf16.msra.mxu1 %v8046_v23 }
 0x4ba   :  { %9359 = vst [vmem:[#allocation56_spill] sm:$0xff] %v8139_v57  ;;  %v2358_v44 = vpack.c.bf16 %v8139_v57, %v8139_v57  ;;  %2500 = vmatprep.subr.bf16.mxu0 %v7733_v25  ;;  %2541 = vmatprep.subr.bf16.mxu1 %v7736_v22  ;;  %v9360_v25 = vld [vmem:[#allocation24_spill] sm:$0xff]  ;;  %v9361_v22 = vld [vmem:[#allocation25_spill] sm:$0xff] }
 0x4bc   :  { %2392 = vmatmul.mubr.bf16.vlgmr.msra.gmra.mxu0 %v2358_v44  ;;  %2433 = vmatmul.mubr.bf16.vlgmr.msra.gmra.mxu1 %v2358_v44 }
 0x4bd   :  { %2501 = vmatpush1.bf16.msra.mxu0 %v7741_v21  ;;  %2542 = vmatpush1.bf16.msra.mxu1 %v7744_v38  ;;  %v9362_v21 = vld [vmem:[#allocation26_spill] sm:$0xff]  ;;  %v9363_v38 = vld [vmem:[#allocation27_spill] sm:$0xff] }
 0x4be   :  { %2502 = vmatprep.subr.bf16.mxu0 %v7747_v6  ;;  %2543 = vmatprep.subr.bf16.mxu1 %v7750_v35  ;;  %v9364_v6 = vld [vmem:[#allocation28_spill] sm:$0xff]  ;;  %v9365_v35 = vld [vmem:[#allocation29_spill] sm:$0xff] }
 0x4bf   :  { %2532 = vmatprep.mubr.bf16.mxu0 %v9203_v1  ;;  %2573 = vmatprep.mubr.bf16.mxu1 %v9203_v1 }
 0x4c1   :  { %2503 = vmatpush1.bf16.msra.mxu0 %v7755_v26  ;;  %2544 = vmatpush1.bf16.msra.mxu1 %v7758_v14  ;;  %v9366_v26 = vld [vmem:[#allocation30_spill] sm:$0xff]  ;;  %v9367_v14 = vld [vmem:[#allocation31_spill] sm:$0xff] }
 0x4c2   :  { %2504 = vmatprep.subr.bf16.mxu0 %v7761_v40  ;;  %2545 = vmatprep.subr.bf16.mxu1 %v7858_v0  ;;  %v9368_v40 = vld [vmem:[#allocation32_spill] sm:$0xff] }
 0x4c5   :  { %2505 = vmatpush1.bf16.msra.mxu0 %v7861_v50  ;;  %2546 = vmatpush1.bf16.msra.mxu1 %v7864_v51 }
 0x4c6   :  { %2506 = vmatprep.subr.bf16.mxu0 %v7867_v52  ;;  %2547 = vmatprep.subr.bf16.mxu1 %v7870_v53 }
 0x4c9   :  { %2507 = vmatpush1.bf16.msra.mxu0 %v7873_v54  ;;  %2548 = vmatpush1.bf16.msra.mxu1 %v7876_v55 }
 0x4ca   :  { %2508 = vmatprep.subr.bf16.mxu0 %v9360_v25  ;;  %2549 = vmatprep.subr.bf16.mxu1 %v9361_v22 }
 0x4cd   :  { %2509 = vmatpush1.bf16.msra.mxu0 %v9362_v21  ;;  %2550 = vmatpush1.bf16.msra.mxu1 %v9363_v38 }
 0x4ce   :  { %2510 = vmatprep.subr.bf16.mxu0 %v9364_v6  ;;  %2551 = vmatprep.subr.bf16.mxu1 %v9365_v35 }
 0x4d1   :  { %2511 = vmatpush1.bf16.msra.mxu0 %v9366_v26  ;;  %2552 = vmatpush1.bf16.msra.mxu1 %v9367_v14 }
 0x4d2   :  { %2512 = vmatprep.subr.bf16.mxu0 %v9368_v40  ;;  %2553 = vmatprep.subr.bf16.mxu1 %v9369_v11 }
 0x4d5   :  { %2513 = vmatpush1.bf16.msra.mxu0 %v9370_v63  ;;  %2554 = vmatpush1.bf16.msra.mxu1 %v9371_v18  ;;  %v9379_v18 = vld [vmem:[#allocation64_spill] sm:$0xff] }
 0x4d6   :  { %2514 = vmatprep.subr.bf16.mxu0 %v9372_v3  ;;  %2555 = vmatprep.subr.bf16.mxu1 %v9373_v37 }
 0x4d9   :  { %2515 = vmatpush1.bf16.msra.mxu0 %v9374_v56  ;;  %2556 = vmatpush1.bf16.msra.mxu1 %v9375_v36  ;;  %v9380_v36 = vld [vmem:[#allocation63_spill] sm:$0xff] }
 0x4da   :  { %2591 = vmatprep.subr.bf16.mxu0 %v9376_v19  ;;  %2632 = vmatprep.subr.bf16.mxu1 %v9377_v39  ;;  %v9381_v39 = vld [vmem:[#allocation65_spill] sm:$0xff] }
 0x55c   :  { %v2302_v4 = vpop.f32.mrf.mxu0  ;;  %v2343_v61 = vpop.f32.mrf.mxu1 }
 0x55d   :  { %v2350_v44 = vadd.f32 %v2302_v4, %v9378_v10  ;;  %v2352_v19 = vadd.f32 %v2343_v61, %v9380_v36 }
 0x55e   :  { %v2304_v57 = vpop.f32.mrf.mxu0  ;;  %v2345_v58 = vpop.f32.mrf.mxu1 }
 0x55f   :  { %v5884_v63 = vmul.f32 -1.442695, %v2350_v44  ;;  %v2351_v11 = vadd.f32 %v2304_v57, %v9379_v18  ;;  %v5886_v26 = vmul.f32 -1.442695, %v2352_v19  ;;  %v2353_v35 = vadd.f32 %v2345_v58, %v9381_v39  ;;  %v9382_v18 = vld [vmem:[#allocation78_spill] sm:$0xff] }
 0x560   :  { %v2306_v3 = vpop.f32.mrf.mxu0  ;;  %v2347_v40 = vpop.f32.mrf.mxu1 }
 0x561   :  { %6487 = vpow2.f32 %v5884_v63  ;;  %v5885_v37 = vmul.f32 -1.442695, %v2351_v11 }
 0x562   :  { %v2307_v56 = vpop.f32.mrf.mxu0  ;;  %v2348_v14 = vpop.f32.mrf.mxu1 }
 0x563   :  { %6489 = vpow2.f32 %v5885_v37  ;;  %v9383_v14 = vld [vmem:[#allocation94_spill] sm:$0xff]  ;;  %v9384_v37 = vld [vmem:[#allocation92_spill] sm:$0xff] }
 0x564   :  { %6491 = vpow2.f32 %v5886_v26  ;;  %v844_v3 = vadd.f32 %v9383_v14, %v9382_v18  ;;  %v9386_v14 = vld [vmem:[#allocation79_spill] sm:$0xff] }
 0x565   :  { %6493 = vtanh.f32 %v2353_v35 }
 0x56e   :  { %v6488_v6 = vpop.eup %6487 }
 0x56f   :  { %v2454_v38 = vadd.f32 1.0, %v6488_v6 }
 0x570   :  { %v6490_v4 = vpop.eup %6489 }
 0x571   :  { %6495 = vrcp.f32 %v2454_v38  ;;  %v2455_v10 = vadd.f32 1.0, %v6490_v4  ;;  %v6492_v57 = vpop.eup %6491 }
 0x572   :  { %v6494_v11 = vpop.eup %6493  ;;  %v2456_v35 = vadd.f32 1.0, %v6492_v57 }
 0x573   :  { %6497 = vrcp.f32 %v2455_v10 }
 0x57c   :  { %v2393_v40 = vpop.f32.mrf.mxu0  ;;  %v2434_v63 = vpop.f32.mrf.mxu1 }
 0x57d   :  { %v2441_v56 = vadd.f32 %v2393_v40, %v9384_v37  ;;  %v9385_v40 = vld [vmem:[#allocation93_spill] sm:$0xff] }
 0x57e   :  { %v6496_v36 = vpop.eup %6495  ;;  %v2395_v19 = vpop.f32.mrf.mxu0 }
 0x57f   :  { %v2436_v58 = vpop.f32.mrf.mxu1  ;;  %v2484_v39 = vmul.f32 %v6496_v36, %v6494_v11  ;;  %v5887_v6 = vmul.f32 -1.442695, %v2441_v56  ;;  %v2442_v26 = vadd.f32 %v2395_v19, %v844_v3  ;;  %v2443_v11 = vadd.f32 %v2434_v63, %v9385_v40  ;;  %v9387_v3 = vld [vmem:[#allocation95_spill] sm:$0xff] }
 0x580   :  { %v6498_v61 = vpop.eup %6497  ;;  %v2397_v38 = vpop.f32.mrf.mxu0  ;;  %v917_v37 = vadd.f32 %v9387_v3, %v9386_v14 }
 0x581   :  { %v2438_v44 = vpop.f32.mrf.mxu1  ;;  %v2483_v4 = vmul.f32 %v6498_v61, %v8096_v59  ;;  %6499 = vpow2.f32 %v5887_v6  ;;  %v5888_v10 = vmul.f32 -1.442695, %v2442_v26  ;;  %v5889_v57 = vmul.f32 -1.442695, %v2443_v11 }
 0x582   :  { %v2398_v21 = vpop.f32.mrf.mxu0  ;;  %v2444_v56 = vadd.f32 %v2436_v58, %v917_v37  ;;  %v8239_v37 = vld [vmem:[#allocation8 + $0xe4] ss:$16 sps:$4 sm:$0xff]  }
 0x583   :  { %v2439_v22 = vpop.f32.mrf.mxu1  ;;  %v8189_v25 = vadd.f32 %v2484_v39, %v2483_v4  ;;  %6501 = vpow2.f32 %v5888_v10 }
 0x584   :  { %6503 = vrcp.f32 %v2456_v35 }
 0x585   :  { %6505 = vtanh.f32 %v8189_v25 }
 0x586   :  { %6507 = vpow2.f32 %v5889_v57  ;;  %v8242_v57 = vld [vmem:[#allocation8 + $0xec] ss:$16 sps:$4 sm:$0xff]  }
 0x587   :  { %6509 = vtanh.f32 %v2444_v56  ;;  %v8245_v56 = vld [vmem:[#allocation8 + $0xe0] ss:$16 sps:$4 sm:$0xff]  }
 0x58e   :  { %v6500_v36 = vpop.eup %6499 }
 0x58f   :  { %v2472_v19 = vadd.f32 1.0, %v6500_v36  ;;  %v8248_v36 = vld [vmem:[#allocation8 + $0xe8] ss:$16 sps:$4 sm:$0xff]  }
 0x590   :  { %v6502_v59 = vpop.eup %6501 }
 0x591   :  { %v6504_v21 = vpop.eup %6503  ;;  %6511 = vrcp.f32 %v2472_v19  ;;  %v2473_v22 = vadd.f32 1.0, %v6502_v59  ;;  %v8251_v19 = vld [vmem:[#allocation8 + $0xc4] ss:$16 sps:$4 sm:$0xff]   ;;  %v8254_v59 = vld [vmem:[#allocation8 + $0xcc] ss:$16 sps:$4 sm:$0xff]  }
 0x592   :  { %v6506_v39 = vpop.eup %6505 }
 0x593   :  { %6513 = vrcp.f32 %v2473_v22  ;;  %v8195_v6 = vmul.f32 %v6506_v39, %v6504_v21  ;;  %v6508_v58 = vpop.eup %6507  ;;  %v8259_v21 = vld [vmem:[#allocation8 + $0xc0] ss:$16 sps:$4 sm:$0xff]   ;;  %v8262_v22 = vld [vmem:[#allocation8 + $0xc8] ss:$16 sps:$4 sm:$0xff]   ;;  %v8265_v39 = vld [vmem:[#allocation8 + $0xa4] ss:$16 sps:$4 sm:$0xff]  }
 0x594   :  { %v6510_v26 = vpop.eup %6509  ;;  %v2474_v44 = vadd.f32 1.0, %v6508_v58  ;;  %v9391_v58 = vld [vmem:[#allocation25_spill] sm:$0xff] }
 0x595   :  { %9388 = vst [vmem:[#allocation55_spill] sm:$0xff] %v8195_v6  ;;  %v2499_v63 = vpack.c.bf16 %v8195_v6, %v8195_v6  ;;  %v9412_v6 = vld [vmem:[#allocation54_spill] sm:$0xff] }
 0x596   :  { %6515 = vrcp.f32 %v2474_v44  ;;  %v9403_v44 = vld [vmem:[#allocation37_spill] sm:$0xff] }
 0x597   :  { %2533 = vmatmul.mubr.bf16.vlgmr.msra.gmra.mxu0 %v2499_v63  ;;  %2574 = vmatmul.mubr.bf16.vlgmr.msra.gmra.mxu1 %v2499_v63  ;;  %v9390_v63 = vld [vmem:[#allocation24_spill] sm:$0xff] }
 0x598   :  { %2592 = vmatpush1.bf16.msra.mxu0 %v7951_v8  ;;  %2633 = vmatpush1.bf16.msra.mxu1 %v7954_v12 }
 0x599   :  { %2593 = vmatprep.subr.bf16.mxu0 %v7957_v17  ;;  %2634 = vmatprep.subr.bf16.mxu1 %v7960_v13 }
 0x59a   :  { %2623 = vmatprep.mubr.bf16.mxu0 %v9203_v1  ;;  %2664 = vmatprep.mubr.bf16.mxu1 %v9203_v1 }
 0x59c   :  { %2594 = vmatpush1.bf16.msra.mxu0 %v7965_v41  ;;  %2635 = vmatpush1.bf16.msra.mxu1 %v7968_v42 }
 0x59d   :  { %2595 = vmatprep.subr.bf16.mxu0 %v7971_v43  ;;  %2636 = vmatprep.subr.bf16.mxu1 %v7974_v46 }
 0x59e   :  { %v6512_v61 = vpop.eup %6511 }
 0x59f   :  { %v2487_v35 = vmul.f32 %v6512_v61, %v6510_v26  ;;  %v9392_v26 = vld [vmem:[#allocation26_spill] sm:$0xff]  ;;  %v9393_v61 = vld [vmem:[#allocation27_spill] sm:$0xff] }
 0x5a0   :  { %v6514_v38 = vpop.eup %6513  ;;  %2596 = vmatpush1.bf16.msra.mxu0 %v7977_v32  ;;  %2637 = vmatpush1.bf16.msra.mxu1 %v7980_v20 }
 0x5a1   :  { %v2486_v4 = vmul.f32 %v6514_v38, %v8120_v48  ;;  %2597 = vmatprep.subr.bf16.mxu0 %v7984_v31  ;;  %2638 = vmatprep.subr.bf16.mxu1 %v7987_v9  ;;  %v9402_v38 = vld [vmem:[#allocation36_spill] sm:$0xff] }
 0x5a3   :  { %v8214_v10 = vadd.f32 %v2487_v35, %v2486_v4  ;;  %v6516_v48 = vpop.eup %6515  ;;  %v9401_v35 = vld [vmem:[#allocation35_spill] sm:$0xff]  ;;  %v9404_v4 = vld [vmem:[#allocation38_spill] sm:$0xff] }
 0x5a4   :  { %2598 = vmatpush1.bf16.msra.mxu0 %v7992_v28  ;;  %2639 = vmatpush1.bf16.msra.mxu1 %v7995_v15 }
 0x5a5   :  { %6517 = vtanh.f32 %v8214_v10  ;;  %2599 = vmatprep.subr.bf16.mxu0 %v7999_v45  ;;  %2640 = vmatprep.subr.bf16.mxu1 %v8002_v24 }
 0x5a8   :  { %2600 = vmatpush1.bf16.msra.mxu0 %v8005_v33  ;;  %2641 = vmatpush1.bf16.msra.mxu1 %v8008_v49 }
 0x5a9   :  { %2601 = vmatprep.subr.bf16.mxu0 %v8011_v29  ;;  %2642 = vmatprep.subr.bf16.mxu1 %v9352_v34 }
 0x5ac   :  { %2602 = vmatpush1.bf16.msra.mxu0 %v9353_v2  ;;  %2643 = vmatpush1.bf16.msra.mxu1 %v9354_v62 }
 0x5ad   :  { %2603 = vmatprep.subr.bf16.mxu0 %v9355_v60  ;;  %2644 = vmatprep.subr.bf16.mxu1 %v9356_v5 }
 0x5b0   :  { %2604 = vmatpush1.bf16.msra.mxu0 %v9357_v7  ;;  %2645 = vmatpush1.bf16.msra.mxu1 %v9358_v16 }
 0x5b1   :  { %2605 = vmatprep.subr.bf16.mxu0 %v8035_v47  ;;  %2646 = vmatprep.subr.bf16.mxu1 %v8038_v30 }
 0x5b2   :  { %v6518_v40 = vpop.eup %6517 }
 0x5b3   :  { %v8233_v11 = vmul.f32 %v6518_v40, %v6516_v48  ;;  %v9405_v48 = vld [vmem:[#allocation39_spill] sm:$0xff]  ;;  %v9406_v40 = vld [vmem:[#allocation40_spill] sm:$0xff] }
 0x5b4   :  { %2606 = vmatpush1.bf16.msra.mxu0 %v8043_v27  ;;  %2647 = vmatpush1.bf16.msra.mxu1 %v8046_v23 }
 0x5b5   :  { %9389 = vst [vmem:[#allocation57_spill] sm:$0xff] %v8233_v11  ;;  %v2590_v3 = vpack.c.bf16 %v8233_v11, %v8233_v11  ;;  %2732 = vmatprep.subr.bf16.mxu0 %v8239_v37  ;;  %2773 = vmatprep.subr.bf16.mxu1 %v8242_v57  ;;  %v9413_v11 = vld [vmem:[#allocation69_spill] sm:$0xff] }
 0x5b6   :  { %v781_v14 = vadd.f32 %v9413_v11, %v9412_v6 }
 0x5b7   :  { %2624 = vmatmul.mubr.bf16.vlgmr.msra.gmra.mxu0 %v2590_v3  ;;  %2665 = vmatmul.mubr.bf16.vlgmr.msra.gmra.mxu1 %v2590_v3  ;;  %v9407_v3 = vld [vmem:[#allocation41_spill] sm:$0xff] }
 0x5b8   :  { %2733 = vmatpush1.bf16.msra.mxu0 %v8245_v56  ;;  %2774 = vmatpush1.bf16.msra.mxu1 %v8248_v36 }
 0x5b9   :  { %2734 = vmatprep.subr.bf16.mxu0 %v8251_v19  ;;  %2775 = vmatprep.subr.bf16.mxu1 %v8254_v59 }
 0x5ba   :  { %2764 = vmatprep.mubr.bf16.mxu0 %v9203_v1  ;;  %2805 = vmatprep.mubr.bf16.mxu1 %v9203_v1 }
 0x5bc   :  { %2735 = vmatpush1.bf16.msra.mxu0 %v8259_v21  ;;  %2776 = vmatpush1.bf16.msra.mxu1 %v8262_v22 }
 0x5bd   :  { %2736 = vmatprep.subr.bf16.mxu0 %v8265_v39  ;;  %2777 = vmatprep.subr.bf16.mxu1 %v7858_v0  ;;  %v9394_v0 = vld [vmem:[#allocation28_spill] sm:$0xff] }
 0x5c0   :  { %2737 = vmatpush1.bf16.msra.mxu0 %v7861_v50  ;;  %2778 = vmatpush1.bf16.msra.mxu1 %v7864_v51  ;;  %v9395_v50 = vld [vmem:[#allocation29_spill] sm:$0xff]  ;;  %v9396_v51 = vld [vmem:[#allocation30_spill] sm:$0xff] }
 0x5c1   :  { %2738 = vmatprep.subr.bf16.mxu0 %v7867_v52  ;;  %2779 = vmatprep.subr.bf16.mxu1 %v7870_v53  ;;  %v9397_v52 = vld [vmem:[#allocation31_spill] sm:$0xff]  ;;  %v9398_v53 = vld [vmem:[#allocation32_spill] sm:$0xff] }
 0x5c4   :  { %2739 = vmatpush1.bf16.msra.mxu0 %v7873_v54  ;;  %2780 = vmatpush1.bf16.msra.mxu1 %v7876_v55  ;;  %v9399_v54 = vld [vmem:[#allocation33_spill] sm:$0xff]  ;;  %v9400_v55 = vld [vmem:[#allocation34_spill] sm:$0xff] }
 0x5c5   :  { %2740 = vmatprep.subr.bf16.mxu0 %v9390_v63  ;;  %2781 = vmatprep.subr.bf16.mxu1 %v9391_v58 }
 0x5c8   :  { %2741 = vmatpush1.bf16.msra.mxu0 %v9392_v26  ;;  %2782 = vmatpush1.bf16.msra.mxu1 %v9393_v61  ;;  %v9408_v26 = vld [vmem:[#allocation52_spill] sm:$0xff] }
 0x5c9   :  { %2742 = vmatprep.subr.bf16.mxu0 %v9394_v0  ;;  %2783 = vmatprep.subr.bf16.mxu1 %v9395_v50  ;;  %v9409_v61 = vld [vmem:[#allocation68_spill] sm:$0xff]  ;;  %v9410_v50 = vld [vmem:[#allocation66_spill] sm:$0xff] }
 0x5ca   :  { %v708_v0 = vadd.f32 %v9409_v61, %v9408_v26 }
 0x5cc   :  { %2743 = vmatpush1.bf16.msra.mxu0 %v9396_v51  ;;  %2784 = vmatpush1.bf16.msra.mxu1 %v9397_v52 }
 0x5cd   :  { %2744 = vmatprep.subr.bf16.mxu0 %v9398_v53  ;;  %2785 = vmatprep.subr.bf16.mxu1 %v9399_v54 }
 0x5d0   :  { %2745 = vmatpush1.bf16.msra.mxu0 %v9400_v55  ;;  %2786 = vmatpush1.bf16.msra.mxu1 %v9401_v35 }
 0x5d1   :  { %2746 = vmatprep.subr.bf16.mxu0 %v9402_v38  ;;  %2787 = vmatprep.subr.bf16.mxu1 %v9403_v44 }
 0x5d4   :  { %2747 = vmatpush1.bf16.msra.mxu0 %v9404_v4  ;;  %2788 = vmatpush1.bf16.msra.mxu1 %v9405_v48 }
 0x5d5   :  { %2823 = vmatprep.subr.bf16.mxu0 %v9406_v40  ;;  %2864 = vmatprep.subr.bf16.mxu1 %v9407_v3  ;;  %v9411_v40 = vld [vmem:[#allocation67_spill] sm:$0xff] }
 0x657   :  { %v2534_v63 = vpop.f32.mrf.mxu0  ;;  %v2575_v58 = vpop.f32.mrf.mxu1 }
 0x658   :  { %v2582_v51 = vadd.f32 %v2534_v63, %v9410_v50  ;;  %v2584_v3 = vadd.f32 %v2575_v58, %v9411_v40 }
 0x659   :  { %v2536_v52 = vpop.f32.mrf.mxu0  ;;  %v2577_v53 = vpop.f32.mrf.mxu1 }
 0x65a   :  { %v5890_v54 = vmul.f32 -1.442695, %v2582_v51  ;;  %v2583_v55 = vadd.f32 %v2536_v52, %v708_v0  ;;  %v5892_v18 = vmul.f32 -1.442695, %v2584_v3  ;;  %v2585_v61 = vadd.f32 %v2577_v53, %v781_v14  ;;  %v9415_v14 = vld [vmem:[#allocation90_spill] sm:$0xff] }
 0x65b   :  { %v2538_v35 = vpop.f32.mrf.mxu0  ;;  %v2579_v38 = vpop.f32.mrf.mxu1 }
 0x65c   :  { %6519 = vpow2.f32 %v5890_v54  ;;  %v5891_v44 = vmul.f32 -1.442695, %v2583_v55  ;;  %v9414_v35 = vld [vmem:[#allocation88_spill] sm:$0xff] }
 0x65d   :  { %v2539_v4 = vpop.f32.mrf.mxu0  ;;  %v2580_v48 = vpop.f32.mrf.mxu1 }
 0x65e   :  { %6521 = vpow2.f32 %v5891_v44 }
 0x65f   :  { %6523 = vpow2.f32 %v5892_v18 }
 0x660   :  { %6525 = vtanh.f32 %v2585_v61 }
 0x669   :  { %v6520_v26 = vpop.eup %6519 }
 0x66a   :  { %v2686_v63 = vadd.f32 1.0, %v6520_v26 }
 0x66b   :  { %v6522_v50 = vpop.eup %6521 }
 0x66c   :  { %6527 = vrcp.f32 %v2686_v63  ;;  %v2687_v0 = vadd.f32 1.0, %v6522_v50  ;;  %v6524_v51 = vpop.eup %6523 }
 0x66d   :  { %v6526_v55 = vpop.eup %6525  ;;  %v2688_v18 = vadd.f32 1.0, %v6524_v51 }
 0x66e   :  { %6529 = vrcp.f32 %v2687_v0 }
 0x677   :  { %v2625_v52 = vpop.f32.mrf.mxu0  ;;  %v2666_v54 = vpop.f32.mrf.mxu1 }
 0x678   :  { %v2673_v38 = vadd.f32 %v2625_v52, %v9414_v35  ;;  %v9416_v52 = vld [vmem:[#allocation89_spill] sm:$0xff] }
 0x679   :  { %v6528_v58 = vpop.eup %6527  ;;  %v2627_v44 = vpop.f32.mrf.mxu0 }
 0x67a   :  { %v2668_v4 = vpop.f32.mrf.mxu1  ;;  %v2716_v11 = vmul.f32 %v6528_v58, %v6526_v55  ;;  %v5893_v48 = vmul.f32 -1.442695, %v2673_v38  ;;  %v2674_v53 = vadd.f32 %v2627_v44, %v9415_v14  ;;  %v2675_v55 = vadd.f32 %v2666_v54, %v9416_v52  ;;  %v9417_v38 = vld [vmem:[#allocation91_spill] sm:$0xff] }
 0x67b   :  { %v6530_v26 = vpop.eup %6529  ;;  %v2629_v40 = vpop.f32.mrf.mxu0  ;;  %v2676_v58 = vadd.f32 %v2668_v4, %v9417_v38 }
 0x67c   :  { %v2670_v3 = vpop.f32.mrf.mxu1  ;;  %v2715_v61 = vmul.f32 %v6530_v26, %v8189_v25  ;;  %6531 = vpow2.f32 %v5893_v48  ;;  %v5894_v63 = vmul.f32 -1.442695, %v2674_v53  ;;  %v5895_v35 = vmul.f32 -1.442695, %v2675_v55 }
 0x67d   :  { %v2630_v50 = vpop.f32.mrf.mxu0  ;;  %v9419_v3 = vld [vmem:[#allocation72_spill] sm:$0xff] }
 0x67e   :  { %v2671_v0 = vpop.f32.mrf.mxu1  ;;  %v8302_v6 = vadd.f32 %v2716_v11, %v2715_v61  ;;  %6533 = vpow2.f32 %v5894_v63 }
 0x67f   :  { %6535 = vrcp.f32 %v2688_v18 }
 0x680   :  { %6537 = vtanh.f32 %v8302_v6 }
 0x681   :  { %6539 = vpow2.f32 %v5895_v35  ;;  %v9420_v35 = vld [vmem:[#allocation71_spill] sm:$0xff] }
 0x682   :  { %6541 = vtanh.f32 %v2676_v58 }
 0x689   :  { %v6532_v51 = vpop.eup %6531 }
 0x68a   :  { %v2704_v44 = vadd.f32 1.0, %v6532_v51  ;;  %v9421_v51 = vld [vmem:[#allocation73_spill] sm:$0xff] }
 0x68b   :  { %v6534_v14 = vpop.eup %6533 }
 0x68c   :  { %v6536_v25 = vpop.eup %6535  ;;  %6543 = vrcp.f32 %v2704_v44  ;;  %v2705_v48 = vadd.f32 1.0, %v6534_v14 }
 0x68d   :  { %v6538_v53 = vpop.eup %6537 }
 0x68e   :  { %6545 = vrcp.f32 %v2705_v48  ;;  %v8307_v11 = vmul.f32 %v6538_v53, %v6536_v25  ;;  %v6540_v54 = vpop.eup %6539 }
 0x68f   :  { %v6542_v4 = vpop.eup %6541 }
 0x690   :  { %v2731_v26 = vpack.c.bf16 %v8307_v11, %v8307_v11 }
 0x692   :  { %2765 = vmatmul.mubr.bf16.vlgmr.msra.gmra.mxu0 %v2731_v26  ;;  %2806 = vmatmul.mubr.bf16.vlgmr.msra.gmra.mxu1 %v2731_v26 }
 0x693   :  { %2824 = vmatpush1.bf16.msra.mxu0 %v7951_v8  ;;  %2865 = vmatpush1.bf16.msra.mxu1 %v7954_v12 }
 0x694   :  { %2825 = vmatprep.subr.bf16.mxu0 %v7957_v17  ;;  %2866 = vmatprep.subr.bf16.mxu1 %v7960_v13  ;;  %v2706_v17 = vadd.f32 1.0, %v6540_v54 }
 0x695   :  { %2855 = vmatprep.mubr.bf16.mxu0 %v9203_v1  ;;  %2896 = vmatprep.mubr.bf16.mxu1 %v9203_v1 }
 0x696   :  { %6547 = vrcp.f32 %v2706_v17 }
 0x697   :  { %2826 = vmatpush1.bf16.msra.mxu0 %v7965_v41  ;;  %2867 = vmatpush1.bf16.msra.mxu1 %v7968_v42 }
 0x698   :  { %2827 = vmatprep.subr.bf16.mxu0 %v7971_v43  ;;  %2868 = vmatprep.subr.bf16.mxu1 %v7974_v46 }
 0x699   :  { %v6544_v8 = vpop.eup %6543 }
 0x69a   :  { %v2719_v12 = vmul.f32 %v6544_v8, %v6542_v4 }
 0x69b   :  { %v6546_v18 = vpop.eup %6545  ;;  %2828 = vmatpush1.bf16.msra.mxu0 %v7977_v32  ;;  %2869 = vmatpush1.bf16.msra.mxu1 %v7980_v20  ;;  %v6830_v20 = vld [vmem:[#allocation8 + $0xa8] ss:$16 sps:$4 sm:$0xff]  }
 0x69c   :  { %v2718_v13 = vmul.f32 %v6546_v18, %v8214_v10  ;;  %2829 = vmatprep.subr.bf16.mxu0 %v7984_v31  ;;  %2870 = vmatprep.subr.bf16.mxu1 %v7987_v9  ;;  %v6831_v31 = vld [vmem:[#allocation8 + $0x84] ss:$16 sps:$4 sm:$0xff]   ;;  %v6832_v9 = vld [vmem:[#allocation8 + $0x8c] ss:$16 sps:$4 sm:$0xff]   ;;  %v6849_v10 = vld [vmem:[#allocation8] ss:$16 sps:$4 sm:$0xff]  }
 0x69d   :  { %v9423_v18 = vld [vmem:[#allocation86_spill] sm:$0xff] }
 0x69e   :  { %v8326_v41 = vadd.f32 %v2719_v12, %v2718_v13  ;;  %v9422_v12 = vld [vmem:[#allocation78_spill] sm:$0xff]  ;;  %v9424_v13 = vld [vmem:[#allocation84_spill] sm:$0xff] }
 0x69f   :  { %2830 = vmatpush1.bf16.msra.mxu0 %v7992_v28  ;;  %2871 = vmatpush1.bf16.msra.mxu1 %v7995_v15  ;;  %v6833_v28 = vld [vmem:[#allocation8 + $0x80] ss:$16 sps:$4 sm:$0xff]   ;;  %v6834_v15 = vld [vmem:[#allocation8 + $0x88] ss:$16 sps:$4 sm:$0xff]   ;;  %v834_v17 = vadd.f32 %v9423_v18, %v9422_v12  ;;  %v6871_v12 = vld [vmem:[#allocation10 + $0x44] ss:$16 sps:$4 sm:$0xff]  }
 0x6a0   :  { %6549 = vtanh.f32 %v8326_v41  ;;  %2831 = vmatprep.subr.bf16.mxu0 %v7999_v45  ;;  %2872 = vmatprep.subr.bf16.mxu1 %v8002_v24  ;;  %v6835_v45 = vld [vmem:[#allocation8 + $0x64] ss:$16 sps:$4 sm:$0xff]   ;;  %v6836_v24 = vld [vmem:[#allocation8 + $0x6c] ss:$16 sps:$4 sm:$0xff]  }
 0x6a1   :  { %v6872_v18 = vld [vmem:[#allocation10 + $0x4c] ss:$16 sps:$4 sm:$0xff]  }
 0x6a3   :  { %2832 = vmatpush1.bf16.msra.mxu0 %v8005_v33  ;;  %2873 = vmatpush1.bf16.msra.mxu1 %v8008_v49  ;;  %v6548_v42 = vpop.eup %6547  ;;  %v6837_v33 = vld [vmem:[#allocation8 + $0x60] ss:$16 sps:$4 sm:$0xff]   ;;  %v6838_v49 = vld [vmem:[#allocation8 + $0x68] ss:$16 sps:$4 sm:$0xff]  }
 0x6a4   :  { %2833 = vmatprep.subr.bf16.mxu0 %v8011_v29  ;;  %2874 = vmatprep.subr.bf16.mxu1 %v9352_v34  ;;  %v6839_v29 = vld [vmem:[#allocation8 + $0x44] ss:$16 sps:$4 sm:$0xff]   ;;  %v6842_v34 = vld [vmem:[#allocation8 + $0x48] ss:$16 sps:$4 sm:$0xff]  }
 0x6a7   :  { %2834 = vmatpush1.bf16.msra.mxu0 %v9353_v2  ;;  %2875 = vmatpush1.bf16.msra.mxu1 %v9354_v62  ;;  %v6843_v2 = vld [vmem:[#allocation8 + $0x24] ss:$16 sps:$4 sm:$0xff]   ;;  %v6844_v62 = vld [vmem:[#allocation8 + $0x2c] ss:$16 sps:$4 sm:$0xff]  }
 0x6a8   :  { %2835 = vmatprep.subr.bf16.mxu0 %v9355_v60  ;;  %2876 = vmatprep.subr.bf16.mxu1 %v9356_v5  ;;  %v6845_v60 = vld [vmem:[#allocation8 + $0x20] ss:$16 sps:$4 sm:$0xff]   ;;  %v6846_v5 = vld [vmem:[#allocation8 + $0x28] ss:$16 sps:$4 sm:$0xff]  }
 0x6ab   :  { %2836 = vmatpush1.bf16.msra.mxu0 %v9357_v7  ;;  %2877 = vmatpush1.bf16.msra.mxu1 %v9358_v16  ;;  %v6847_v7 = vld [vmem:[#allocation8 + $0x4] ss:$16 sps:$4 sm:$0xff]   ;;  %v6848_v16 = vld [vmem:[#allocation8 + $0xc] ss:$16 sps:$4 sm:$0xff]  }
 0x6ac   :  { %2837 = vmatprep.subr.bf16.mxu0 %v8035_v47  ;;  %2878 = vmatprep.subr.bf16.mxu1 %v8038_v30  ;;  %v6840_v47 = vld [vmem:[#allocation8 + $0x4c] ss:$16 sps:$4 sm:$0xff]   ;;  %v6841_v30 = vld [vmem:[#allocation8 + $0x40] ss:$16 sps:$4 sm:$0xff]  }
 0x6ad   :  { %v6550_v43 = vpop.eup %6549 }
 0x6ae   :  { %v8345_v46 = vmul.f32 %v6550_v43, %v6548_v42 }
 0x6af   :  { %2838 = vmatpush1.bf16.msra.mxu0 %v8043_v27  ;;  %2879 = vmatpush1.bf16.msra.mxu1 %v8046_v23  ;;  %v6828_v23 = vld [vmem:[#allocation8 + $0xac] ss:$16 sps:$4 sm:$0xff]   ;;  %v6829_v27 = vld [vmem:[#allocation8 + $0xa0] ss:$16 sps:$4 sm:$0xff]  }
 0x6b0   :  { %v2822_v32 = vpack.c.bf16 %v8345_v46, %v8345_v46  ;;  %2964 = vmatprep.subr.bf16.mxu0 %v8239_v37  ;;  %3005 = vmatprep.subr.bf16.mxu1 %v8242_v57  ;;  %v6850_v37 = vld [vmem:[#allocation8 + $0x8] ss:$16 sps:$4 sm:$0xff]   ;;  %v6851_v57 = vld [vmem:[#allocation10 + $0xe4] ss:$16 sps:$4 sm:$0xff]  }
 0x6b2   :  { %2856 = vmatmul.mubr.bf16.vlgmr.msra.gmra.mxu0 %v2822_v32  ;;  %2897 = vmatmul.mubr.bf16.vlgmr.msra.gmra.mxu1 %v2822_v32 }
 0x6b3   :  { %2965 = vmatpush1.bf16.msra.mxu0 %v8245_v56  ;;  %3006 = vmatpush1.bf16.msra.mxu1 %v8248_v36  ;;  %v6852_v56 = vld [vmem:[#allocation10 + $0xec] ss:$16 sps:$4 sm:$0xff]  }
 0x6b4   :  { %2966 = vmatprep.subr.bf16.mxu0 %v8251_v19  ;;  %3007 = vmatprep.subr.bf16.mxu1 %v8254_v59  ;;  %v9418_v59 = vld [vmem:[#allocation70_spill] sm:$0xff] }
 0x6b5   :  { %2996 = vmatprep.mubr.bf16.mxu0 %v9203_v1  ;;  %3037 = vmatprep.mubr.bf16.mxu1 %v9203_v1 }
 0x6b7   :  { %2967 = vmatpush1.bf16.msra.mxu0 %v8259_v21  ;;  %3008 = vmatpush1.bf16.msra.mxu1 %v8262_v22 }
 0x6b8   :  { %2968 = vmatprep.subr.bf16.mxu0 %v8265_v39  ;;  %3009 = vmatprep.subr.bf16.mxu1 %v6828_v23 }
 0x6bb   :  { %2969 = vmatpush1.bf16.msra.mxu0 %v6829_v27  ;;  %3010 = vmatpush1.bf16.msra.mxu1 %v6830_v20 }
 0x6bc   :  { %2970 = vmatprep.subr.bf16.mxu0 %v6831_v31  ;;  %3011 = vmatprep.subr.bf16.mxu1 %v6832_v9 }
 0x6bf   :  { %2971 = vmatpush1.bf16.msra.mxu0 %v6833_v28  ;;  %3012 = vmatpush1.bf16.msra.mxu1 %v6834_v15 }
 0x6c0   :  { %2972 = vmatprep.subr.bf16.mxu0 %v6835_v45  ;;  %3013 = vmatprep.subr.bf16.mxu1 %v6836_v24 }
 0x6c3   :  { %2973 = vmatpush1.bf16.msra.mxu0 %v6837_v33  ;;  %3014 = vmatpush1.bf16.msra.mxu1 %v6838_v49 }
 0x6c4   :  { %2974 = vmatprep.subr.bf16.mxu0 %v6839_v29  ;;  %3015 = vmatprep.subr.bf16.mxu1 %v6840_v47 }
 0x6c7   :  { %2975 = vmatpush1.bf16.msra.mxu0 %v6841_v30  ;;  %3016 = vmatpush1.bf16.msra.mxu1 %v6842_v34  ;;  %v9425_v30 = vld [vmem:[#allocation85_spill] sm:$0xff] }
 0x6c8   :  { %2976 = vmatprep.subr.bf16.mxu0 %v6843_v2  ;;  %3017 = vmatprep.subr.bf16.mxu1 %v6844_v62  ;;  %v9426_v2 = vld [vmem:[#allocation79_spill] sm:$0xff] }
 0x6c9   :  { %v9427_v62 = vld [vmem:[#allocation87_spill] sm:$0xff] }
 0x6cb   :  { %2977 = vmatpush1.bf16.msra.mxu0 %v6845_v60  ;;  %3018 = vmatpush1.bf16.msra.mxu1 %v6846_v5  ;;  %v907_v60 = vadd.f32 %v9427_v62, %v9426_v2 }
 0x6cc   :  { %2978 = vmatprep.subr.bf16.mxu0 %v6847_v7  ;;  %3019 = vmatprep.subr.bf16.mxu1 %v6848_v16 }
 0x6cf   :  { %2979 = vmatpush1.bf16.msra.mxu0 %v6849_v10  ;;  %3020 = vmatpush1.bf16.msra.mxu1 %v6850_v37 }
 0x6d0   :  { %3055 = vmatprep.subr.bf16.mxu0 %v6851_v57  ;;  %3096 = vmatprep.subr.bf16.mxu1 %v6852_v56 }
 0x752   :  { %v2766_v36 = vpop.f32.mrf.mxu0  ;;  %v2807_v19 = vpop.f32.mrf.mxu1 }
 0x753   :  { %v2814_v21 = vadd.f32 %v2766_v36, %v9418_v59  ;;  %v2816_v38 = vadd.f32 %v2807_v19, %v9420_v35  ;;  %v6853_v59 = vld [vmem:[#allocation10 + $0xe0] ss:$16 sps:$4 sm:$0xff]  }
 0x754   :  { %v2768_v22 = vpop.f32.mrf.mxu0  ;;  %v2809_v39 = vpop.f32.mrf.mxu1 }
 0x755   :  { %v5896_v40 = vmul.f32 -1.442695, %v2814_v21  ;;  %v2815_v61 = vadd.f32 %v2768_v22, %v9419_v3  ;;  %v5898_v58 = vmul.f32 -1.442695, %v2816_v38  ;;  %v2817_v44 = vadd.f32 %v2809_v39, %v9421_v51  ;;  %v6854_v21 = vld [vmem:[#allocation10 + $0xe8] ss:$16 sps:$4 sm:$0xff]  }
 0x756   :  { %v2770_v63 = vpop.f32.mrf.mxu0  ;;  %v2811_v50 = vpop.f32.mrf.mxu1  ;;  %v6855_v22 = vld [vmem:[#allocation10 + $0xc4] ss:$16 sps:$4 sm:$0xff]   ;;  %v6856_v39 = vld [vmem:[#allocation10 + $0xcc] ss:$16 sps:$4 sm:$0xff]   ;;  %v6857_v3 = vld [vmem:[#allocation10 + $0xc0] ss:$16 sps:$4 sm:$0xff]  }
 0x757   :  { %6551 = vpow2.f32 %v5896_v40  ;;  %v5897_v0 = vmul.f32 -1.442695, %v2815_v61  ;;  %v6858_v61 = vld [vmem:[#allocation10 + $0xc8] ss:$16 sps:$4 sm:$0xff]   ;;  %v6859_v50 = vld [vmem:[#allocation10 + $0xa4] ss:$16 sps:$4 sm:$0xff]  }
 0x758   :  { %v2771_v52 = vpop.f32.mrf.mxu0  ;;  %v2812_v55 = vpop.f32.mrf.mxu1  ;;  %v6862_v51 = vld [vmem:[#allocation10 + $0xa8] ss:$16 sps:$4 sm:$0xff]  }
 0x759   :  { %6553 = vpow2.f32 %v5897_v0  ;;  %v6860_v0 = vld [vmem:[#allocation10 + $0xac] ss:$16 sps:$4 sm:$0xff]  }
 0x75a   :  { %6555 = vpow2.f32 %v5898_v58  ;;  %v6861_v58 = vld [vmem:[#allocation10 + $0xa0] ss:$16 sps:$4 sm:$0xff]  }
 0x75b   :  { %6557 = vtanh.f32 %v2817_v44 }
 0x764   :  { %v6552_v14 = vpop.eup %6551 }
 0x765   :  { %v2918_v25 = vadd.f32 1.0, %v6552_v14  ;;  %v6863_v14 = vld [vmem:[#allocation10 + $0x84] ss:$16 sps:$4 sm:$0xff]  }
 0x766   :  { %v6554_v48 = vpop.eup %6553 }
 0x767   :  { %6559 = vrcp.f32 %v2918_v25  ;;  %v2919_v53 = vadd.f32 1.0, %v6554_v48  ;;  %v6556_v26 = vpop.eup %6555  ;;  %v6864_v25 = vld [vmem:[#allocation10 + $0x8c] ss:$16 sps:$4 sm:$0xff]  }
 0x768   :  { %v6558_v8 = vpop.eup %6557  ;;  %v2920_v28 = vadd.f32 1.0, %v6556_v26  ;;  %v6866_v26 = vld [vmem:[#allocation10 + $0x88] ss:$16 sps:$4 sm:$0xff]  }
 0x769   :  { %6561 = vrcp.f32 %v2919_v53  ;;  %v6865_v53 = vld [vmem:[#allocation10 + $0x80] ss:$16 sps:$4 sm:$0xff]  }
 0x772   :  { %v2857_v54 = vpop.f32.mrf.mxu0  ;;  %v2898_v4 = vpop.f32.mrf.mxu1 }
 0x773   :  { %v2905_v42 = vadd.f32 %v2857_v54, %v9424_v13  ;;  %v2907_v34 = vadd.f32 %v2898_v4, %v9425_v30  ;;  %v6867_v54 = vld [vmem:[#allocation10 + $0x64] ss:$16 sps:$4 sm:$0xff]   ;;  %v6868_v4 = vld [vmem:[#allocation10 + $0x6c] ss:$16 sps:$4 sm:$0xff]   ;;  %v6874_v13 = vld [vmem:[#allocation10 + $0x48] ss:$16 sps:$4 sm:$0xff]  }
 0x774   :  { %v6560_v43 = vpop.eup %6559  ;;  %v2859_v32 = vpop.f32.mrf.mxu0 }
 0x775   :  { %v2900_v23 = vpop.f32.mrf.mxu1  ;;  %v2948_v27 = vmul.f32 %v6560_v43, %v6558_v8  ;;  %v5899_v20 = vmul.f32 -1.442695, %v2905_v42  ;;  %v2906_v31 = vadd.f32 %v2859_v32, %v834_v17  ;;  %v5901_v5 = vmul.f32 -1.442695, %v2907_v34  ;;  %v6869_v8 = vld [vmem:[#allocation10 + $0x60] ss:$16 sps:$4 sm:$0xff]  }
 0x776   :  { %v6562_v9 = vpop.eup %6561  ;;  %v2861_v15 = vpop.f32.mrf.mxu0  ;;  %v2908_v7 = vadd.f32 %v2900_v23, %v907_v60  ;;  %v6873_v17 = vld [vmem:[#allocation10 + $0x40] ss:$16 sps:$4 sm:$0xff]   ;;  %v6875_v42 = vld [vmem:[#allocation10 + $0x24] ss:$16 sps:$4 sm:$0xff]   ;;  %v6876_v43 = vld [vmem:[#allocation10 + $0x2c] ss:$16 sps:$4 sm:$0xff]  }
 0x777   :  { %v2902_v45 = vpop.f32.mrf.mxu1  ;;  %v2947_v24 = vmul.f32 %v6562_v9, %v8302_v6  ;;  %6563 = vpow2.f32 %v5899_v20  ;;  %v5900_v33 = vmul.f32 -1.442695, %v2906_v31  ;;  %v6877_v32 = vld [vmem:[#allocation10 + $0x20] ss:$16 sps:$4 sm:$0xff]   ;;  %v6878_v23 = vld [vmem:[#allocation10 + $0x28] ss:$16 sps:$4 sm:$0xff]  }
 0x778   :  { %v2862_v49 = vpop.f32.mrf.mxu0  ;;  %v6879_v20 = vld [vmem:[#allocation10 + $0x4] ss:$16 sps:$4 sm:$0xff]   ;;  %v6880_v31 = vld [vmem:[#allocation10 + $0xc] ss:$16 sps:$4 sm:$0xff]   ;;  %v6881_v15 = vld [vmem:[#allocation10] ss:$16 sps:$4 sm:$0xff]  }
 0x779   :  { %v2903_v29 = vpop.f32.mrf.mxu1  ;;  %v8370_v47 = vadd.f32 %v2948_v27, %v2947_v24  ;;  %6565 = vpow2.f32 %v5900_v33  ;;  %v6882_v45 = vld [vmem:[#allocation10 + $0x8] ss:$16 sps:$4 sm:$0xff]   ;;  %v3243_v33 = vld [vmem:[#allocation11 + $0x1c0] sm:$0xff] }
 0x77a   :  { %6567 = vrcp.f32 %v2920_v28  ;;  %v3245_v49 = vld [vmem:[#allocation11 + $0x1e0] sm:$0xff]  ;;  %v3244_v29 = vld [vmem:[#allocation11 + $0x1c8] sm:$0xff] }
 0x77b   :  { %6569 = vtanh.f32 %v8370_v47  ;;  %v5937_v30 = vcombine.high %v3243_v33, %v3245_v49  ;;  %v3246_v34 = vld [vmem:[#allocation11 + $0x1e8] sm:$0xff]  ;;  %v5936_v2 = vcombine.low %v3243_v33, %v3245_v49  ;;  %v3217_v33 = vld [vmem:[#allocation11 + $0x20] sm:$0xff] }
 0x77c   :  { %6571 = vpow2.f32 %v5901_v5  ;;  %v5938_v62 = vcombine.low %v3244_v29, %v3246_v34  ;;  %v5939_v60 = vcombine.high %v3244_v29, %v3246_v34  ;;  %v3239_v5 = vld [vmem:[#allocation11 + $0x180] sm:$0xff]  ;;  %v3216_v49 = vld [vmem:[#allocation11 + $0x8] sm:$0xff] }
 0x77d   :  { %6573 = vtanh.f32 %v2908_v7  ;;  %v3241_v7 = vld [vmem:[#allocation11 + $0x1a0] sm:$0xff] }
 0x784   :  { %v6564_v16 = vpop.eup %6563 }
 0x785   :  { %v2936_v10 = vadd.f32 1.0, %v6564_v16  ;;  %v3240_v16 = vld [vmem:[#allocation11 + $0x188] sm:$0xff] }
 0x786   :  { %v6566_v6 = vpop.eup %6565 }
 0x787   :  { %v6568_v37 = vpop.eup %6567  ;;  %6575 = vrcp.f32 %v2936_v10  ;;  %v2937_v57 = vadd.f32 1.0, %v6566_v6  ;;  %v5933_v10 = vcombine.high %v3239_v5, %v3241_v7  ;;  %v3242_v6 = vld [vmem:[#allocation11 + $0x1a8] sm:$0xff] }
 0x788   :  { %v6570_v56 = vpop.eup %6569 }
 0x789   :  { %6577 = vrcp.f32 %v2937_v57  ;;  %v8376_v36 = vmul.f32 %v6570_v56, %v6568_v37  ;;  %v6572_v40 = vpop.eup %6571  ;;  %v5932_v37 = vcombine.low %v3239_v5, %v3241_v7  ;;  %v5934_v57 = vcombine.low %v3240_v16, %v3242_v6  ;;  %v3277_v5 = vld [vmem:[#allocation11 + $0x3e0] sm:$0xff]  ;;  %v3276_v7 = vld [vmem:[#allocation11 + $0x3c8] sm:$0xff] }
 0x78a   :  { %v6574_v63 = vpop.eup %6573  ;;  %v2938_v38 = vadd.f32 1.0, %v6572_v40  ;;  %v5935_v56 = vcombine.high %v3240_v16, %v3242_v6 }
 0x78b   :  { %v2963_v19 = vpack.c.bf16 %v8376_v36, %v8376_v36 }
 0x78c   :  { %6579 = vrcp.f32 %v2938_v38 }
 0x78d   :  { %2997 = vmatmul.mubr.bf16.vlgmr.msra.gmra.mxu0 %v2963_v19  ;;  %3038 = vmatmul.mubr.bf16.vlgmr.msra.gmra.mxu1 %v2963_v19  ;;  %v3235_v19 = vld [vmem:[#allocation11 + $0x140] sm:$0xff] }
 0x78e   :  { %3056 = vmatpush1.bf16.msra.mxu0 %v6853_v59  ;;  %3097 = vmatpush1.bf16.msra.mxu1 %v6854_v21  ;;  %v3237_v59 = vld [vmem:[#allocation11 + $0x160] sm:$0xff]  ;;  %v3236_v21 = vld [vmem:[#allocation11 + $0x148] sm:$0xff] }
 0x78f   :  { %3057 = vmatprep.subr.bf16.mxu0 %v6855_v22  ;;  %3098 = vmatprep.subr.bf16.mxu1 %v6856_v39  ;;  %v5929_v22 = vcombine.high %v3235_v19, %v3237_v59  ;;  %v3238_v39 = vld [vmem:[#allocation11 + $0x168] sm:$0xff]  ;;  %v5928_v40 = vcombine.low %v3235_v19, %v3237_v59  ;;  %v3273_v19 = vld [vmem:[#allocation11 + $0x3a0] sm:$0xff] }
 0x790   :  { %3087 = vmatprep.mubr.bf16.mxu0 %v9203_v1  ;;  %3128 = vmatprep.mubr.bf16.mxu1 %v9203_v1  ;;  %v3272_v59 = vld [vmem:[#allocation11 + $0x388] sm:$0xff] }
 0x792   :  { %3058 = vmatpush1.bf16.msra.mxu0 %v6857_v3  ;;  %3099 = vmatpush1.bf16.msra.mxu1 %v6858_v61  ;;  %v5930_v3 = vcombine.low %v3236_v21, %v3238_v39  ;;  %v5931_v61 = vcombine.high %v3236_v21, %v3238_v39 }
 0x793   :  { %3059 = vmatprep.subr.bf16.mxu0 %v6859_v50  ;;  %3100 = vmatprep.subr.bf16.mxu1 %v6860_v0  ;;  %v3233_v50 = vld [vmem:[#allocation11 + $0x120] sm:$0xff]  ;;  %v3232_v0 = vld [vmem:[#allocation11 + $0x108] sm:$0xff] }
 0x794   :  { %v6576_v52 = vpop.eup %6575 }
 0x795   :  { %v2951_v55 = vmul.f32 %v6576_v52, %v6574_v63  ;;  %v3231_v63 = vld [vmem:[#allocation11 + $0x100] sm:$0xff] }
 0x796   :  { %v6578_v35 = vpop.eup %6577  ;;  %3060 = vmatpush1.bf16.msra.mxu0 %v6861_v58  ;;  %3101 = vmatpush1.bf16.msra.mxu1 %v6862_v51  ;;  %v5925_v52 = vcombine.high %v3231_v63, %v3233_v50  ;;  %v3227_v51 = vld [vmem:[#allocation11 + $0xc0] sm:$0xff] }
 0x797   :  { %v2950_v44 = vmul.f32 %v6578_v35, %v8326_v41  ;;  %3061 = vmatprep.subr.bf16.mxu0 %v6863_v14  ;;  %3102 = vmatprep.subr.bf16.mxu1 %v6864_v25  ;;  %v6870_v41 = vld [vmem:[#allocation10 + $0x68] ss:$16 sps:$4 sm:$0xff]   ;;  %v5924_v35 = vcombine.low %v3231_v63, %v3233_v50  ;;  %v3269_v63 = vld [vmem:[#allocation11 + $0x360] sm:$0xff] }
 0x798   :  { %v3228_v14 = vld [vmem:[#allocation11 + $0xc8] sm:$0xff] }
 0x799   :  { %v8383_v48 = vadd.f32 %v2951_v55, %v2950_v44  ;;  %v6580_v27 = vpop.eup %6579  ;;  %v3234_v55 = vld [vmem:[#allocation11 + $0x128] sm:$0xff]  ;;  %v3229_v44 = vld [vmem:[#allocation11 + $0xe0] sm:$0xff] }
 0x79a   :  { %3062 = vmatpush1.bf16.msra.mxu0 %v6865_v53  ;;  %3103 = vmatpush1.bf16.msra.mxu1 %v6866_v26  ;;  %v5926_v38 = vcombine.low %v3232_v0, %v3234_v55  ;;  %v5927_v58 = vcombine.high %v3232_v0, %v3234_v55  ;;  %v5921_v25 = vcombine.high %v3227_v51, %v3229_v44  ;;  %v3230_v53 = vld [vmem:[#allocation11 + $0xe8] sm:$0xff] }
 0x79b   :  { %6581 = vtanh.f32 %v8383_v48  ;;  %3063 = vmatprep.subr.bf16.mxu0 %v6867_v54  ;;  %3104 = vmatprep.subr.bf16.mxu1 %v6868_v4  ;;  %v5920_v26 = vcombine.low %v3227_v51, %v3229_v44  ;;  %v5922_v54 = vcombine.low %v3228_v14, %v3230_v53  ;;  %v5923_v4 = vcombine.high %v3228_v14, %v3230_v53  ;;  %v3268_v50 = vld [vmem:[#allocation11 + $0x348] sm:$0xff]  ;;  %v3265_v51 = vld [vmem:[#allocation11 + $0x320] sm:$0xff] }
 0x79c   :  { %v3264_v44 = vld [vmem:[#allocation11 + $0x308] sm:$0xff] }
 0x79e   :  { %3064 = vmatpush1.bf16.msra.mxu0 %v6869_v8  ;;  %3105 = vmatpush1.bf16.msra.mxu1 %v6870_v41  ;;  %v3223_v8 = vld [vmem:[#allocation11 + $0x80] sm:$0xff] }
 0x79f   :  { %3065 = vmatprep.subr.bf16.mxu0 %v6871_v12  ;;  %3106 = vmatprep.subr.bf16.mxu1 %v6872_v18  ;;  %v3225_v41 = vld [vmem:[#allocation11 + $0xa0] sm:$0xff]  ;;  %v3224_v12 = vld [vmem:[#allocation11 + $0x88] sm:$0xff] }
 0x7a0   :  { %v5917_v18 = vcombine.high %v3223_v8, %v3225_v41 }
 0x7a2   :  { %3066 = vmatpush1.bf16.msra.mxu0 %v6873_v17  ;;  %3107 = vmatpush1.bf16.msra.mxu1 %v6874_v13  ;;  %v3226_v17 = vld [vmem:[#allocation11 + $0xa8] sm:$0xff]  ;;  %v5916_v13 = vcombine.low %v3223_v8, %v3225_v41  ;;  %v3261_v8 = vld [vmem:[#allocation11 + $0x2e0] sm:$0xff] }
 0x7a3   :  { %3067 = vmatprep.subr.bf16.mxu0 %v6875_v42  ;;  %3108 = vmatprep.subr.bf16.mxu1 %v6876_v43  ;;  %v5918_v42 = vcombine.low %v3224_v12, %v3226_v17  ;;  %v5919_v43 = vcombine.high %v3224_v12, %v3226_v17  ;;  %v3260_v41 = vld [vmem:[#allocation11 + $0x2c8] sm:$0xff]  ;;  %v3255_v17 = vld [vmem:[#allocation11 + $0x280] sm:$0xff] }
 0x7a6   :  { %3068 = vmatpush1.bf16.msra.mxu0 %v6877_v32  ;;  %3109 = vmatpush1.bf16.msra.mxu1 %v6878_v23  ;;  %v3219_v32 = vld [vmem:[#allocation11 + $0x40] sm:$0xff] }
 0x7a7   :  { %3069 = vmatprep.subr.bf16.mxu0 %v6879_v20  ;;  %3110 = vmatprep.subr.bf16.mxu1 %v6880_v31  ;;  %v3221_v23 = vld [vmem:[#allocation11 + $0x60] sm:$0xff]  ;;  %v3222_v31 = vld [vmem:[#allocation11 + $0x68] sm:$0xff] }
 0x7a8   :  { %v6582_v9 = vpop.eup %6581  ;;  %v5913_v20 = vcombine.high %v3219_v32, %v3221_v23 }
 0x7a9   :  { %v8386_v28 = vmul.f32 %v6582_v9, %v6580_v27  ;;  %v3220_v27 = vld [vmem:[#allocation11 + $0x48] sm:$0xff]  ;;  %v5912_v9 = vcombine.low %v3219_v32, %v3221_v23 }
 0x7aa   :  { %3070 = vmatpush1.bf16.msra.mxu0 %v6881_v15  ;;  %3111 = vmatpush1.bf16.msra.mxu1 %v6882_v45  ;;  %v5914_v15 = vcombine.low %v3220_v27, %v3222_v31  ;;  %v5915_v45 = vcombine.high %v3220_v27, %v3222_v31  ;;  %v3256_v32 = vld [vmem:[#allocation11 + $0x288] sm:$0xff] }
 0x7ab   :  { %v3054_v24 = vpack.c.bf16 %v8386_v28, %v8386_v28  ;;  %3621 = vmatprep.subr.bf16.mxu0 %v5937_v30  ;;  %3694 = vmatprep.subr.bf16.mxu1 %v5939_v60  ;;  %v3218_v30 = vld [vmem:[#allocation11 + $0x28] sm:$0xff]  ;;  %v3275_v60 = vld [vmem:[#allocation11 + $0x3c0] sm:$0xff] }
 0x7ac   :  { %v5969_v16 = vcombine.high %v3275_v60, %v3277_v5  ;;  %v5968_v6 = vcombine.low %v3275_v60, %v3277_v5  ;;  %v3258_v23 = vld [vmem:[#allocation11 + $0x2a8] sm:$0xff] }
 0x7ad   :  { %3088 = vmatmul.mubr.bf16.vlgmr.msra.gmra.mxu0 %v3054_v24  ;;  %3129 = vmatmul.mubr.bf16.vlgmr.msra.gmra.mxu1 %v3054_v24  ;;  %v3215_v24 = vld [vmem:[#allocation11] sm:$0xff]  ;;  %v5951_v31 = vcombine.high %v3256_v32, %v3258_v23  ;;  %v3250_v60 = vld [vmem:[#allocation11 + $0x228] sm:$0xff] }
 0x7ae   :  { %3622 = vmatpush1.bf16.msra.mxu0 %v5936_v2  ;;  %3695 = vmatpush1.bf16.msra.mxu1 %v5938_v62  ;;  %v5909_v29 = vcombine.high %v3215_v24, %v3217_v33  ;;  %v5908_v34 = vcombine.low %v3215_v24, %v3217_v33  ;;  %v5910_v2 = vcombine.low %v3216_v49, %v3218_v30  ;;  %v3254_v24 = vld [vmem:[#allocation11 + $0x268] sm:$0xff] }
 0x7af   :  { %3623 = vmatprep.subr.bf16.mxu0 %v5933_v10  ;;  %3696 = vmatprep.subr.bf16.mxu1 %v5935_v56  ;;  %v5911_v62 = vcombine.high %v3216_v49, %v3218_v30  ;;  %v3278_v10 = vld [vmem:[#allocation11 + $0x3e8] sm:$0xff]  ;;  %v3271_v56 = vld [vmem:[#allocation11 + $0x380] sm:$0xff]  ;;  %v5950_v49 = vcombine.low %v3256_v32, %v3258_v23 }
 0x7b0   :  { %v5965_v21 = vcombine.high %v3271_v56, %v3273_v19  ;;  %v5964_v39 = vcombine.low %v3271_v56, %v3273_v19  ;;  %v8392_v56 = vld [vmem:[#allocation11 + $0x1f0] sm:$0xff]  ;;  %v8394_v19 = vld [vmem:[#allocation11 + $0x1d8] sm:$0xff] }
 0x7b2   :  { %3624 = vmatpush1.bf16.msra.mxu0 %v5932_v37  ;;  %3697 = vmatpush1.bf16.msra.mxu1 %v5934_v57  ;;  %v5970_v37 = vcombine.low %v3276_v7, %v3278_v10  ;;  %v5971_v57 = vcombine.high %v3276_v7, %v3278_v10 }
 0x7b3   :  { %3625 = vmatprep.subr.bf16.mxu0 %v5929_v22  ;;  %3698 = vmatprep.subr.bf16.mxu1 %v5931_v61  ;;  %v3274_v22 = vld [vmem:[#allocation11 + $0x3a8] sm:$0xff]  ;;  %v3267_v61 = vld [vmem:[#allocation11 + $0x340] sm:$0xff] }
 0x7b4   :  { %v5961_v0 = vcombine.high %v3267_v61, %v3269_v63  ;;  %v5960_v55 = vcombine.low %v3267_v61, %v3269_v63  ;;  %v9428_v63 = vld [vmem:[#allocation52_spill] sm:$0xff] }
 0x7b6   :  { %3626 = vmatpush1.bf16.msra.mxu0 %v5928_v40  ;;  %3699 = vmatpush1.bf16.msra.mxu1 %v5930_v3  ;;  %v5966_v40 = vcombine.low %v3272_v59, %v3274_v22  ;;  %v5967_v3 = vcombine.high %v3272_v59, %v3274_v22  ;;  %v8400_v22 = vld [vmem:[#allocation11 + $0x1f8] sm:$0xff] }
 0x7b7   :  { %3627 = vmatprep.subr.bf16.mxu0 %v5925_v52  ;;  %3700 = vmatprep.subr.bf16.mxu1 %v5927_v58  ;;  %v3270_v52 = vld [vmem:[#allocation11 + $0x368] sm:$0xff]  ;;  %v3263_v58 = vld [vmem:[#allocation11 + $0x300] sm:$0xff] }
 0x7b8   :  { %v5957_v14 = vcombine.high %v3263_v58, %v3265_v51  ;;  %v5956_v53 = vcombine.low %v3263_v58, %v3265_v51  ;;  %v9433_v51 = vld [vmem:[#allocation75_spill] sm:$0xff] }
 0x7ba   :  { %3628 = vmatpush1.bf16.msra.mxu0 %v5924_v35  ;;  %3701 = vmatpush1.bf16.msra.mxu1 %v5926_v38  ;;  %v5962_v35 = vcombine.low %v3268_v50, %v3270_v52  ;;  %v5963_v38 = vcombine.high %v3268_v50, %v3270_v52  ;;  %v9429_v50 = vld [vmem:[#allocation76_spill] sm:$0xff]  ;;  %v9430_v52 = vld [vmem:[#allocation54_spill] sm:$0xff] }
 0x7bb   :  { %3629 = vmatprep.subr.bf16.mxu0 %v5921_v25  ;;  %3702 = vmatprep.subr.bf16.mxu1 %v5923_v4  ;;  %v3266_v25 = vld [vmem:[#allocation11 + $0x328] sm:$0xff]  ;;  %v3259_v4 = vld [vmem:[#allocation11 + $0x2c0] sm:$0xff] }
 0x7bc   :  { %v5953_v12 = vcombine.high %v3259_v4, %v3261_v8 }
 0x7be   :  { %3630 = vmatpush1.bf16.msra.mxu0 %v5920_v26  ;;  %3703 = vmatpush1.bf16.msra.mxu1 %v5922_v54  ;;  %v5958_v26 = vcombine.low %v3264_v44, %v3266_v25  ;;  %v5959_v54 = vcombine.high %v3264_v44, %v3266_v25 }
 0x7bf   :  { %3631 = vmatprep.subr.bf16.mxu0 %v5917_v18  ;;  %3704 = vmatprep.subr.bf16.mxu1 %v5919_v43  ;;  %v3262_v18 = vld [vmem:[#allocation11 + $0x2e8] sm:$0xff] }
 0x7c0   :  { %v5955_v43 = vcombine.high %v3260_v41, %v3262_v18  ;;  %v5954_v27 = vcombine.low %v3260_v41, %v3262_v18 }
 0x7c2   :  { %3632 = vmatpush1.bf16.msra.mxu0 %v5916_v13  ;;  %3705 = vmatpush1.bf16.msra.mxu1 %v5918_v42  ;;  %v3257_v13 = vld [vmem:[#allocation11 + $0x2a0] sm:$0xff]  ;;  %v5952_v42 = vcombine.low %v3259_v4, %v3261_v8 }
 0x7c3   :  { %3633 = vmatprep.subr.bf16.mxu0 %v5913_v20  ;;  %3706 = vmatprep.subr.bf16.mxu1 %v5915_v45  ;;  %v5949_v20 = vcombine.high %v3255_v17, %v3257_v13  ;;  %v3252_v45 = vld [vmem:[#allocation11 + $0x248] sm:$0xff]  ;;  %v5948_v33 = vcombine.low %v3255_v17, %v3257_v13 }
 0x7c4   :  { %v5947_v30 = vcombine.high %v3252_v45, %v3254_v24  ;;  %v5946_v7 = vcombine.low %v3252_v45, %v3254_v24 }
 0x7c6   :  { %3634 = vmatpush1.bf16.msra.mxu0 %v5912_v9  ;;  %3707 = vmatpush1.bf16.msra.mxu1 %v5914_v15  ;;  %v3251_v9 = vld [vmem:[#allocation11 + $0x240] sm:$0xff] }
 0x7c7   :  { %3635 = vmatprep.subr.bf16.mxu0 %v5909_v29  ;;  %3708 = vmatprep.subr.bf16.mxu1 %v5911_v62  ;;  %v3253_v15 = vld [vmem:[#allocation11 + $0x260] sm:$0xff]  ;;  %v3248_v62 = vld [vmem:[#allocation11 + $0x208] sm:$0xff] }
 0x7c8   :  { %v5945_v29 = vcombine.high %v3251_v9, %v3253_v15  ;;  %v5944_v5 = vcombine.low %v3251_v9, %v3253_v15  ;;  %v5943_v10 = vcombine.high %v3248_v62, %v3250_v60  ;;  %v9434_v9 = vld [vmem:[#allocation80_spill] sm:$0xff] }
 0x7ca   :  { %3636 = vmatpush1.bf16.msra.mxu0 %v5908_v34  ;;  %3709 = vmatpush1.bf16.msra.mxu1 %v5910_v2  ;;  %v3247_v34 = vld [vmem:[#allocation11 + $0x200] sm:$0xff] }
 0x7cb   :  { %3637 = vmatprep.subr.bf16.mxu0 %v5969_v16  ;;  %3710 = vmatprep.subr.bf16.mxu1 %v5971_v57  ;;  %v3249_v2 = vld [vmem:[#allocation11 + $0x220] sm:$0xff]  ;;  %v8390_v57 = vld [vmem:[#allocation11 + $0x1d0] sm:$0xff] }
 0x7cc   :  { %v5941_v16 = vcombine.high %v3247_v34, %v3249_v2  ;;  %v6000_v59 = vcombine.low %v8390_v57, %v8392_v56 }
 0x7ce   :  { %3638 = vmatpush2.bf16.msra.mxu0 %v5968_v6  ;;  %3711 = vmatpush2.bf16.msra.mxu1 %v5970_v37  ;;  %v5940_v6 = vcombine.low %v3247_v34, %v3249_v2  ;;  %v5942_v37 = vcombine.low %v3248_v62, %v3250_v60 }
 0x7cf   :  { %3639 = vmatprep.subr.bf16.mxu0 %v5965_v21  ;;  %3712 = vmatprep.subr.bf16.mxu1 %v5967_v3  ;;  %v6001_v21 = vcombine.high %v8390_v57, %v8392_v56 }
 0x7d2   :  { %3640 = vmatpush2.bf16.msra.mxu0 %v5964_v39  ;;  %3713 = vmatpush2.bf16.msra.mxu1 %v5966_v40  ;;  %v6002_v39 = vcombine.low %v8394_v19, %v8400_v22  ;;  %v6003_v40 = vcombine.high %v8394_v19, %v8400_v22  ;;  %v9441_v19 = vld [vmem:[#allocation42_spill] sm:$0xff] }
 0x7d3   :  { %3641 = vmatprep.subr.bf16.mxu0 %v5961_v0  ;;  %3714 = vmatprep.subr.bf16.mxu1 %v5963_v38  ;;  %v718_v0 = vadd.f32 %v9429_v50, %v9428_v63  ;;  %v9432_v38 = vld [vmem:[#allocation74_spill] sm:$0xff] }
 0x7d6   :  { %3642 = vmatpush2.bf16.msra.mxu0 %v5960_v55  ;;  %3715 = vmatpush2.bf16.msra.mxu1 %v5962_v35  ;;  %v9431_v55 = vld [vmem:[#allocation77_spill] sm:$0xff] }
 0x7d7   :  { %3643 = vmatprep.subr.bf16.mxu0 %v5957_v14  ;;  %3716 = vmatprep.subr.bf16.mxu1 %v5959_v54  ;;  %v791_v35 = vadd.f32 %v9431_v55, %v9430_v52 }
 0x7da   :  { %3644 = vmatpush2.bf16.msra.mxu0 %v5956_v53  ;;  %3717 = vmatpush2.bf16.msra.mxu1 %v5958_v26 }
 0x7db   :  { %3645 = vmatprep.subr.bf16.mxu0 %v5953_v12  ;;  %3718 = vmatprep.subr.bf16.mxu1 %v5955_v43 }
 0x7de   :  { %3646 = vmatpush2.bf16.msra.mxu0 %v5952_v42  ;;  %3719 = vmatpush2.bf16.msra.mxu1 %v5954_v27 }
 0x7df   :  { %3647 = vmatprep.subr.bf16.mxu0 %v5949_v20  ;;  %3720 = vmatprep.subr.bf16.mxu1 %v5951_v31 }
 0x7e2   :  { %3648 = vmatpush2.bf16.msra.mxu0 %v5948_v33  ;;  %3721 = vmatpush2.bf16.msra.mxu1 %v5950_v49 }
 0x7e3   :  { %3649 = vmatprep.subr.bf16.mxu0 %v5945_v29  ;;  %3722 = vmatprep.subr.bf16.mxu1 %v5947_v30  ;;  %v9435_v30 = vld [vmem:[#allocation82_spill] sm:$0xff] }
 0x7e6   :  { %3650 = vmatpush2.bf16.msra.mxu0 %v5944_v5  ;;  %3723 = vmatpush2.bf16.msra.mxu1 %v5946_v7 }
 0x7e7   :  { %3651 = vmatprep.subr.bf16.mxu0 %v5941_v16  ;;  %3724 = vmatprep.subr.bf16.mxu1 %v5943_v10 }
 0x7ea   :  { %3652 = vmatpush2.bf16.msra.mxu0 %v5940_v6  ;;  %3725 = vmatpush2.bf16.msra.mxu1 %v5942_v37 }
 0x7eb   :  { %4204 = vmatprep.subr.bf16.mxu0 %v6001_v21  ;;  %4244 = vmatprep.subr.bf16.mxu1 %v6003_v40  ;;  %v9436_v21 = vld [vmem:[#allocation81_spill] sm:$0xff] }
 0x84d   :  { %v2998_v3 = vpop.f32.mrf.mxu0  ;;  %v3039_v61 = vpop.f32.mrf.mxu1 }
 0x84e   :  { %v3046_v58 = vadd.f32 %v2998_v3, %v9432_v38  ;;  %v3048_v44 = vadd.f32 %v3039_v61, %v9433_v51  ;;  %v9437_v61 = vld [vmem:[#allocation83_spill] sm:$0xff] }
 0x84f   :  { %v3000_v14 = vpop.f32.mrf.mxu0  ;;  %v3041_v25 = vpop.f32.mrf.mxu1 }
 0x850   :  { %v5902_v53 = vmul.f32 -1.442695, %v3046_v58  ;;  %v3047_v26 = vadd.f32 %v3000_v14, %v718_v0  ;;  %v3049_v54 = vadd.f32 %v3041_v25, %v791_v35  ;;  %v5904_v17 = vmul.f32 -1.442695, %v3048_v44 }
 0x851   :  { %v3002_v4 = vpop.f32.mrf.mxu0  ;;  %v3043_v8 = vpop.f32.mrf.mxu1 }
 0x852   :  { %6583 = vpow2.f32 %v5902_v53  ;;  %v5903_v41 = vmul.f32 -1.442695, %v3047_v26 }
 0x853   :  { %v3003_v12 = vpop.f32.mrf.mxu0  ;;  %v3044_v18 = vpop.f32.mrf.mxu1 }
 0x854   :  { %6585 = vpow2.f32 %v5903_v41  ;;  %v3827_v12 = vld [vmem:[#allocation11 + $0x190] sm:$0xff] }
 0x855   :  { %6587 = vpow2.f32 %v5904_v17  ;;  %v3829_v18 = vld [vmem:[#allocation11 + $0x1b0] sm:$0xff]  ;;  %v3828_v17 = vld [vmem:[#allocation11 + $0x198] sm:$0xff] }
 0x856   :  { %6589 = vtanh.f32 %v3049_v54 }
 0x85f   :  { %v6584_v13 = vpop.eup %6583 }
 0x860   :  { %v3150_v42 = vadd.f32 1.0, %v6584_v13  ;;  %v3830_v13 = vld [vmem:[#allocation11 + $0x1b8] sm:$0xff] }
 0x861   :  { %v6586_v43 = vpop.eup %6585 }
 0x862   :  { %6591 = vrcp.f32 %v3150_v42  ;;  %v3151_v32 = vadd.f32 1.0, %v6586_v43  ;;  %v6588_v23 = vpop.eup %6587  ;;  %v9438_v43 = vld [vmem:[#allocation108_spill] sm:$0xff] }
 0x863   :  { %v6590_v31 = vpop.eup %6589  ;;  %v3152_v62 = vadd.f32 1.0, %v6588_v23 }
 0x864   :  { %6593 = vrcp.f32 %v3151_v32  ;;  %v9439_v32 = vld [vmem:[#allocation22_spill] sm:$0xff] }
 0x865   :  { %v3207_v23 = vpack.c.bf16 %v9439_v32, %v9438_v43  ;;  %v3806_v43 = vld [vmem:[#allocation11 + $0x38] sm:$0xff] }
 0x86d   :  { %v3089_v27 = vpop.f32.mrf.mxu0  ;;  %v3130_v20 = vpop.f32.mrf.mxu1 }
 0x86e   :  { %v3137_v15 = vadd.f32 %v3089_v27, %v9434_v9  ;;  %v3139_v40 = vadd.f32 %v3130_v20, %v9436_v21  ;;  %v3823_v27 = vld [vmem:[#allocation11 + $0x150] sm:$0xff]  ;;  %v5997_v20 = vcombine.high %v3827_v12, %v3829_v18  ;;  %v3824_v9 = vld [vmem:[#allocation11 + $0x158] sm:$0xff] }
 0x86f   :  { %v6592_v45 = vpop.eup %6591  ;;  %v3091_v24 = vpop.f32.mrf.mxu0 }
 0x870   :  { %v3132_v33 = vpop.f32.mrf.mxu1  ;;  %v3180_v49 = vmul.f32 %v6592_v45, %v6590_v31  ;;  %v5905_v29 = vmul.f32 -1.442695, %v3137_v15  ;;  %v3138_v34 = vadd.f32 %v3091_v24, %v9435_v30  ;;  %v5907_v3 = vmul.f32 -1.442695, %v3139_v40  ;;  %v3825_v31 = vld [vmem:[#allocation11 + $0x170] sm:$0xff]  ;;  %v3826_v15 = vld [vmem:[#allocation11 + $0x178] sm:$0xff] }
 0x871   :  { %v6594_v2 = vpop.eup %6593  ;;  %v3093_v60 = vpop.f32.mrf.mxu0  ;;  %v3140_v63 = vadd.f32 %v3132_v33, %v9437_v61  ;;  %v9440_v45 = vld [vmem:[#allocation57_spill] sm:$0xff]  ;;  %v5998_v33 = vcombine.low %v3828_v17, %v3830_v13  ;;  %v3819_v30 = vld [vmem:[#allocation11 + $0x110] sm:$0xff]  ;;  %v5992_v57 = vcombine.low %v3823_v27, %v3825_v31  ;;  %v5994_v56 = vcombine.low %v3824_v9, %v3826_v15 }
 0x872   :  { %v3134_v5 = vpop.f32.mrf.mxu1  ;;  %v3179_v7 = vmul.f32 %v6594_v2, %v8370_v47  ;;  %6595 = vpow2.f32 %v5905_v29  ;;  %v5906_v16 = vmul.f32 -1.442695, %v3138_v34  ;;  %v3210_v24 = vpack.c.bf16 %v9440_v45, %v8345_v46  ;;  %v3821_v34 = vld [vmem:[#allocation11 + $0x130] sm:$0xff]  ;;  %v3820_v2 = vld [vmem:[#allocation11 + $0x118] sm:$0xff] }
 0x873   :  { %v3094_v10 = vpop.f32.mrf.mxu0  ;;  %v5995_v29 = vcombine.high %v3824_v9, %v3826_v15  ;;  %v3822_v46 = vld [vmem:[#allocation11 + $0x138] sm:$0xff]  ;;  %v3817_v5 = vld [vmem:[#allocation11 + $0xf0] sm:$0xff]  ;;  %v5988_v21 = vcombine.low %v3819_v30, %v3821_v34 }
 0x874   :  { %v3135_v6 = vpop.f32.mrf.mxu1  ;;  %v3181_v37 = vadd.f32 %v3180_v49, %v3179_v7  ;;  %6597 = vpow2.f32 %v5906_v16  ;;  %v5993_v49 = vcombine.high %v3823_v27, %v3825_v31  ;;  %v5991_v60 = vcombine.high %v3820_v2, %v3822_v46  ;;  %v3816_v7 = vld [vmem:[#allocation11 + $0xd8] sm:$0xff]  ;;  %v3865_v9 = vld [vmem:[#allocation11 + $0x3f0] sm:$0xff] }
 0x875   :  { %6599 = vrcp.f32 %v3152_v62  ;;  %v5989_v62 = vcombine.high %v3819_v30, %v3821_v34  ;;  %v3818_v16 = vld [vmem:[#allocation11 + $0xf8] sm:$0xff]  ;;  %v9444_v6 = vld [vmem:[#allocation107_spill] sm:$0xff]  ;;  %v5990_v40 = vcombine.low %v3820_v2, %v3822_v46 }
 0x876   :  { %6601 = vtanh.f32 %v3181_v37  ;;  %v9443_v10 = vld [vmem:[#allocation56_spill] sm:$0xff]  ;;  %v5987_v61 = vcombine.high %v3816_v7, %v3818_v16  ;;  %v3859_v30 = vld [vmem:[#allocation11 + $0x390] sm:$0xff] }
 0x877   :  { %6603 = vpow2.f32 %v5907_v3  ;;  %v3212_v37 = vpack.c.bf16 %v9444_v6, %v9443_v10  ;;  %v3864_v15 = vld [vmem:[#allocation11 + $0x3d8] sm:$0xff]  ;;  %v3851_v10 = vld [vmem:[#allocation11 + $0x310] sm:$0xff] }
 0x878   :  { %6605 = vtanh.f32 %v3140_v63  ;;  %v3811_v63 = vld [vmem:[#allocation11 + $0x90] sm:$0xff]  ;;  %v3866_v45 = vld [vmem:[#allocation11 + $0x3f8] sm:$0xff] }
 0x879   :  { %v3860_v34 = vld [vmem:[#allocation11 + $0x398] sm:$0xff]  ;;  %v3853_v6 = vld [vmem:[#allocation11 + $0x330] sm:$0xff] }
 0x87a   :  { %v3862_v2 = vld [vmem:[#allocation11 + $0x3b8] sm:$0xff] }
 0x87f   :  { %v6596_v50 = vpop.eup %6595 }
 0x880   :  { %v3168_v0 = vadd.f32 1.0, %v6596_v50  ;;  %v3813_v50 = vld [vmem:[#allocation11 + $0xb0] sm:$0xff] }
 0x881   :  { %v6598_v52 = vpop.eup %6597 }
 0x882   :  { %v6600_v55 = vpop.eup %6599  ;;  %6607 = vrcp.f32 %v3168_v0  ;;  %v3169_v47 = vadd.f32 1.0, %v6598_v52  ;;  %v3812_v0 = vld [vmem:[#allocation11 + $0x98] sm:$0xff] }
 0x883   :  { %v6602_v35 = vpop.eup %6601  ;;  %v3814_v52 = vld [vmem:[#allocation11 + $0xb8] sm:$0xff] }
 0x884   :  { %6609 = vrcp.f32 %v3169_v47  ;;  %v8417_v38 = vmul.f32 %v6602_v35, %v6600_v55  ;;  %v6604_v58 = vpop.eup %6603  ;;  %v5986_v47 = vcombine.low %v3816_v7, %v3818_v16  ;;  %v9445_v35 = vld [vmem:[#allocation55_spill] sm:$0xff] }
 0x885   :  { %v6606_v51 = vpop.eup %6605  ;;  %v3170_v53 = vadd.f32 1.0, %v6604_v58  ;;  %v3211_v58 = vpack.c.bf16 %v8307_v11, %v9445_v35  ;;  %v3803_v11 = vld [vmem:[#allocation11 + $0x10] sm:$0xff] }
 0x886   :  { %v3213_v27 = vpack.c.bf16 %v8417_v38, %v8376_v36  ;;  %v3861_v36 = vld [vmem:[#allocation11 + $0x3b0] sm:$0xff] }
 0x887   :  { %6611 = vrcp.f32 %v3170_v53  ;;  %v3808_v53 = vld [vmem:[#allocation11 + $0x58] sm:$0xff] }
 0x88f   :  { %v6608_v44 = vpop.eup %6607 }
 0x890   :  { %v3183_v14 = vmul.f32 %v6608_v44, %v6606_v51  ;;  %v3807_v51 = vld [vmem:[#allocation11 + $0x50] sm:$0xff]  ;;  %v5981_v44 = vcombine.high %v3811_v63, %v3813_v50 }
 0x891   :  { %v6610_v25 = vpop.eup %6609 }
 0x892   :  { %v3182_v26 = vmul.f32 %v6610_v25, %v8383_v48  ;;  %v5999_v48 = vcombine.high %v3828_v17, %v3830_v13  ;;  %v3809_v25 = vld [vmem:[#allocation11 + $0x70] sm:$0xff] }
 0x893   :  { %v3805_v13 = vld [vmem:[#allocation11 + $0x30] sm:$0xff]  ;;  %v5976_v32 = vcombine.low %v3807_v51, %v3809_v25 }
 0x894   :  { %v3184_v54 = vadd.f32 %v3183_v14, %v3182_v26  ;;  %v6612_v4 = vpop.eup %6611  ;;  %v5983_v14 = vcombine.high %v3812_v0, %v3814_v52  ;;  %v3810_v26 = vld [vmem:[#allocation11 + $0x78] sm:$0xff] }
 0x895   :  { %v5979_v17 = vcombine.high %v3808_v53, %v3810_v26 }
 0x896   :  { %6613 = vtanh.f32 %v3184_v54  ;;  %v9446_v54 = vld [vmem:[#allocation23_spill] sm:$0xff] }
 0x8a3   :  { %v6614_v8 = vpop.eup %6613 }
 0x8a4   :  { %v3188_v41 = vmul.f32 %v6614_v8, %v6612_v4  ;;  %v9447_v4 = vld [vmem:[#allocation43_spill] sm:$0xff] }
 0x8a5   :  { %v3214_v8 = vpack.c.bf16 %v9447_v4, %v9446_v54 }
 0x8a6   :  { %v3208_v42 = vpack.c.bf16 %v8386_v28, %v3188_v41  ;;  %v5996_v28 = vcombine.low %v3827_v12, %v3829_v18  ;;  %v5980_v41 = vcombine.low %v3811_v63, %v3813_v50  ;;  %v5982_v12 = vcombine.low %v3812_v0, %v3814_v52  ;;  %v3847_v50 = vld [vmem:[#allocation11 + $0x2d0] sm:$0xff]  ;;  %v3848_v52 = vld [vmem:[#allocation11 + $0x2d8] sm:$0xff] }
 0x8a7   :  { %v5977_v18 = vcombine.high %v3807_v51, %v3809_v25  ;;  %v3849_v0 = vld [vmem:[#allocation11 + $0x2f0] sm:$0xff]  ;;  %v3844_v25 = vld [vmem:[#allocation11 + $0x298] sm:$0xff] }
 0x8a8   :  { %3653 = vmatprep.mubr.bf16.mxu0 %v3208_v42  ;;  %3726 = vmatprep.mubr.bf16.mxu1 %v3208_v42  ;;  %v3804_v42 = vld [vmem:[#allocation11 + $0x18] sm:$0xff] }
 0x8a9   :  { %3654 = vmatmul.mubr.bf16.vlgmr.msra.gmra.mxu0 %v3207_v23  ;;  %3727 = vmatmul.mubr.bf16.vlgmr.msra.gmra.mxu1 %v3207_v23  ;;  %v5978_v23 = vcombine.low %v3808_v53, %v3810_v26  ;;  %v5975_v31 = vcombine.high %v3804_v42, %v3806_v43  ;;  %v3846_v53 = vld [vmem:[#allocation11 + $0x2b8] sm:$0xff]  ;;  %v6016_v26 = vcombine.low %v3847_v50, %v3849_v0 }
 0x8aa   :  { %4205 = vmatpush1.bf16.msra.mxu0 %v6000_v59  ;;  %4245 = vmatpush1.bf16.msra.mxu1 %v6002_v39  ;;  %v9442_v59 = vld [vmem:[#allocation53_spill] sm:$0xff]  ;;  %v3815_v39 = vld [vmem:[#allocation11 + $0xd0] sm:$0xff] }
 0x8ab   :  { %3663 = vmatprep.mubr.bf16.mxu0 %v3210_v24  ;;  %3736 = vmatprep.mubr.bf16.mxu1 %v3210_v24  ;;  %v3209_v22 = vpack.c.bf16 %v9442_v59, %v9441_v19  ;;  %v5985_v3 = vcombine.high %v3815_v39, %v3817_v5  ;;  %v5984_v55 = vcombine.low %v3815_v39, %v3817_v5  ;;  %v3855_v59 = vld [vmem:[#allocation11 + $0x350] sm:$0xff]  ;;  %v3856_v39 = vld [vmem:[#allocation11 + $0x358] sm:$0xff] }
 0x8ac   :  { %4206 = vmatprep.subr.bf16.mxu0 %v5997_v20  ;;  %4246 = vmatprep.subr.bf16.mxu1 %v5999_v48  ;;  %v3863_v20 = vld [vmem:[#allocation11 + $0x3d0] sm:$0xff]  ;;  %v5973_v48 = vcombine.high %v3803_v11, %v3805_v13  ;;  %v5972_v24 = vcombine.low %v3803_v11, %v3805_v13  ;;  %v6031_v19 = vcombine.high %v3860_v34, %v3862_v2 }
 0x8ad   :  { %v6032_v46 = vcombine.low %v3863_v20, %v3865_v9  ;;  %v6030_v5 = vcombine.low %v3860_v34, %v3862_v2  ;;  %v6014_v13 = vcombine.low %v3844_v25, %v3846_v53  ;;  %v8457_v34 = vld [vmem:[#allocation13 + $0xcc] ss:$16 sps:$4 sm:$0xff]   ;;  %v8461_v2 = vld [vmem:[#allocation13 + $0xc0] ss:$16 sps:$4 sm:$0xff]  }
 0x8ae   :  { %4207 = vmatpush1.bf16.msra.mxu0 %v5996_v28  ;;  %4247 = vmatpush1.bf16.msra.mxu1 %v5998_v33  ;;  %v5974_v28 = vcombine.low %v3804_v42, %v3806_v43  ;;  %v9448_v33 = vld [vmem:[#allocation109_spill] sm:$0xff] }
 0x8af   :  { %4208 = vmatprep.subr.bf16.mxu0 %v5993_v49  ;;  %4248 = vmatprep.subr.bf16.mxu1 %v5995_v29  ;;  %v6033_v49 = vcombine.high %v3863_v20, %v3865_v9  ;;  %v6035_v29 = vcombine.high %v3864_v15, %v3866_v45  ;;  %v3838_v20 = vld [vmem:[#allocation11 + $0x238] sm:$0xff] }
 0x8b1   :  { %3664 = vmatmul.mubr.bf16.gmra.mxu0 %v3209_v22  ;;  %3737 = vmatmul.mubr.bf16.gmra.mxu1 %v3209_v22  ;;  %v3857_v22 = vld [vmem:[#allocation11 + $0x370] sm:$0xff] }
 0x8b2   :  { %4209 = vmatpush1.bf16.msra.mxu0 %v5992_v57  ;;  %4249 = vmatpush1.bf16.msra.mxu1 %v5994_v56  ;;  %v6034_v57 = vcombine.low %v3864_v15, %v3866_v45  ;;  %v6029_v56 = vcombine.high %v3859_v30, %v3861_v36  ;;  %v6025_v7 = vcombine.high %v3855_v59, %v3857_v22 }
 0x8b3   :  { %3673 = vmatprep.mubr.bf16.mxu0 %v3212_v37  ;;  %3746 = vmatprep.mubr.bf16.mxu1 %v3212_v37  ;;  %v3852_v37 = vld [vmem:[#allocation11 + $0x318] sm:$0xff] }
 0x8b4   :  { %4210 = vmatprep.subr.bf16.mxu0 %v5989_v62  ;;  %4250 = vmatprep.subr.bf16.mxu1 %v5991_v60  ;;  %v3858_v62 = vld [vmem:[#allocation11 + $0x378] sm:$0xff]  ;;  %v6028_v60 = vcombine.low %v3859_v30, %v3861_v36  ;;  %v3801_v30 = vpack.c.bf16 %v8417_v38, %v8417_v38  ;;  %v8455_v36 = vld [vmem:[#allocation13 + $0xc4] ss:$16 sps:$4 sm:$0xff]  }
 0x8b5   :  { %v6027_v16 = vcombine.high %v3856_v39, %v3858_v62  ;;  %v8467_v38 = vld [vmem:[#allocation13 + $0xa4] ss:$16 sps:$4 sm:$0xff]  }
 0x8b6   :  { %4211 = vmatpush1.bf16.msra.mxu0 %v5988_v21  ;;  %4251 = vmatpush1.bf16.msra.mxu1 %v5990_v40  ;;  %v3854_v21 = vld [vmem:[#allocation11 + $0x338] sm:$0xff]  ;;  %v6024_v40 = vcombine.low %v3855_v59, %v3857_v22  ;;  %v8481_v59 = vld [vmem:[#allocation13 + $0x84] ss:$16 sps:$4 sm:$0xff]  }
 0x8b7   :  { %4212 = vmatprep.subr.bf16.mxu0 %v5985_v3  ;;  %4252 = vmatprep.subr.bf16.mxu1 %v5987_v61  ;;  %v6026_v3 = vcombine.low %v3856_v39, %v3858_v62  ;;  %v6021_v61 = vcombine.high %v3851_v10, %v3853_v6  ;;  %v6023_v63 = vcombine.high %v3852_v37, %v3854_v21  ;;  %v8483_v22 = vld [vmem:[#allocation13 + $0x8c] ss:$16 sps:$4 sm:$0xff]   ;;  %v8487_v39 = vld [vmem:[#allocation13 + $0x80] ss:$16 sps:$4 sm:$0xff]   ;;  %v8489_v62 = vld [vmem:[#allocation13 + $0x88] ss:$16 sps:$4 sm:$0xff]  }
 0x8b8   :  { %v6022_v35 = vcombine.low %v3852_v37, %v3854_v21  ;;  %v8511_v37 = vld [vmem:[#allocation13 + $0x40] ss:$16 sps:$4 sm:$0xff]   ;;  %v8513_v21 = vld [vmem:[#allocation13 + $0x48] ss:$16 sps:$4 sm:$0xff]  }
 0x8b9   :  { %3674 = vmatmul.mubr.bf16.gmra.mxu0 %v3211_v58  ;;  %3747 = vmatmul.mubr.bf16.gmra.mxu1 %v3211_v58  ;;  %v6017_v58 = vcombine.high %v3847_v50, %v3849_v0  ;;  %v8529_v50 = vld [vmem:[#allocation13 + $0x4] ss:$16 sps:$4 sm:$0xff]   ;;  %v8531_v0 = vld [vmem:[#allocation13 + $0xc] ss:$16 sps:$4 sm:$0xff]  }
 0x8ba   :  { %4213 = vmatpush1.bf16.msra.mxu0 %v5984_v55  ;;  %4253 = vmatpush1.bf16.msra.mxu1 %v5986_v47  ;;  %v3850_v55 = vld [vmem:[#allocation11 + $0x2f8] sm:$0xff]  ;;  %v6020_v47 = vcombine.low %v3851_v10, %v3853_v6  ;;  %v8505_v10 = vld [vmem:[#allocation13 + $0x44] ss:$16 sps:$4 sm:$0xff]  }
 0x8bb   :  { %3683 = vmatprep.mubr.bf16.mxu0 %v3214_v8  ;;  %3756 = vmatprep.mubr.bf16.mxu1 %v3214_v8  ;;  %v6019_v51 = vcombine.high %v3848_v52, %v3850_v55  ;;  %v6018_v54 = vcombine.low %v3848_v52, %v3850_v55  ;;  %v6015_v8 = vcombine.high %v3844_v25, %v3846_v53  ;;  %v8507_v6 = vld [vmem:[#allocation13 + $0x4c] ss:$16 sps:$4 sm:$0xff]   ;;  %v8535_v52 = vld [vmem:[#allocation13] ss:$16 sps:$4 sm:$0xff]   ;;  %v8537_v55 = vld [vmem:[#allocation13 + $0x8] ss:$16 sps:$4 sm:$0xff]  }
 0x8bc   :  { %4214 = vmatprep.subr.bf16.mxu0 %v5981_v44  ;;  %4254 = vmatprep.subr.bf16.mxu1 %v5983_v14  ;;  %v3843_v44 = vld [vmem:[#allocation11 + $0x290] sm:$0xff]  ;;  %v9450_v53 = vld [vmem:[#allocation45_spill] sm:$0xff] }
 0x8bd   :  { %v3845_v14 = vld [vmem:[#allocation11 + $0x2b0] sm:$0xff] }
 0x8be   :  { %4215 = vmatpush1.bf16.msra.mxu0 %v5980_v41  ;;  %4255 = vmatpush1.bf16.msra.mxu1 %v5982_v12  ;;  %v6013_v4 = vcombine.high %v3843_v44, %v3845_v14  ;;  %v3839_v41 = vld [vmem:[#allocation11 + $0x250] sm:$0xff]  ;;  %v6012_v11 = vcombine.low %v3843_v44, %v3845_v14  ;;  %v9449_v14 = vld [vmem:[#allocation46_spill] sm:$0xff] }
 0x8bf   :  { %4216 = vmatprep.subr.bf16.mxu0 %v5977_v18  ;;  %4256 = vmatprep.subr.bf16.mxu1 %v5979_v17  ;;  %v3841_v12 = vld [vmem:[#allocation11 + $0x270] sm:$0xff]  ;;  %v3840_v18 = vld [vmem:[#allocation11 + $0x258] sm:$0xff] }
 0x8c0   :  { %v3842_v17 = vld [vmem:[#allocation11 + $0x278] sm:$0xff]  ;;  %v6009_v42 = vcombine.high %v3839_v41, %v3841_v12 }
 0x8c1   :  { %3684 = vmatmul.mubr.bf16.gmra.mxu0 %v3213_v27  ;;  %3757 = vmatmul.mubr.bf16.gmra.mxu1 %v3213_v27  ;;  %v6011_v43 = vcombine.high %v3840_v18, %v3842_v17  ;;  %v3836_v27 = vld [vmem:[#allocation11 + $0x218] sm:$0xff] }
 0x8c2   :  { %4217 = vmatpush1.bf16.msra.mxu0 %v5976_v32  ;;  %4257 = vmatpush1.bf16.msra.mxu1 %v5978_v23  ;;  %v3835_v32 = vld [vmem:[#allocation11 + $0x210] sm:$0xff]  ;;  %v6007_v15 = vcombine.high %v3836_v27, %v3838_v20 }
 0x8c3   :  { %4236 = vmatprep.mubr.bf16.mxu0 %v9448_v33  ;;  %4276 = vmatprep.mubr.bf16.mxu1 %v9448_v33  ;;  %v3837_v23 = vld [vmem:[#allocation11 + $0x230] sm:$0xff]  ;;  %v8445_v33 = vld [vmem:[#allocation13 + $0xec] ss:$16 sps:$4 sm:$0xff]  }
 0x8c4   :  { %4218 = vmatprep.subr.bf16.mxu0 %v5973_v48  ;;  %4258 = vmatprep.subr.bf16.mxu1 %v5975_v31  ;;  %v6008_v48 = vcombine.low %v3839_v41, %v3841_v12  ;;  %v6010_v31 = vcombine.low %v3840_v18, %v3842_v17  ;;  %v6005_v9 = vcombine.high %v3835_v32, %v3837_v23  ;;  %v9453_v18 = vld [vmem:[#allocation48_spill] sm:$0xff] }
 0x8c5   :  { %v6004_v45 = vcombine.low %v3835_v32, %v3837_v23 }
 0x8c6   :  { %4219 = vmatpush1.bf16.msra.mxu0 %v5972_v24  ;;  %4259 = vmatpush1.bf16.msra.mxu1 %v5974_v28  ;;  %v6006_v24 = vcombine.low %v3836_v27, %v3838_v20  ;;  %v8443_v28 = vld [vmem:[#allocation13 + $0xe4] ss:$16 sps:$4 sm:$0xff]  }
 0x8c7   :  { %4220 = vmatprep.subr.bf16.mxu0 %v6033_v49  ;;  %4260 = vmatprep.subr.bf16.mxu1 %v6035_v29  ;;  %v8447_v49 = vld [vmem:[#allocation13 + $0xe0] ss:$16 sps:$4 sm:$0xff]   ;;  %v8449_v29 = vld [vmem:[#allocation13 + $0xe8] ss:$16 sps:$4 sm:$0xff]  }
 0x8ca   :  { %4221 = vmatpush2.bf16.msra.mxu0 %v6032_v46  ;;  %4261 = vmatpush2.bf16.msra.mxu1 %v6034_v57  ;;  %v8463_v46 = vld [vmem:[#allocation13 + $0xc8] ss:$16 sps:$4 sm:$0xff]   ;;  %v8469_v57 = vld [vmem:[#allocation13 + $0xac] ss:$16 sps:$4 sm:$0xff]  }
 0x8cb   :  { %4222 = vmatprep.subr.bf16.mxu0 %v6029_v56  ;;  %4262 = vmatprep.subr.bf16.mxu1 %v6031_v19  ;;  %v8475_v56 = vld [vmem:[#allocation13 + $0xa0] ss:$16 sps:$4 sm:$0xff]   ;;  %v8477_v19 = vld [vmem:[#allocation13 + $0xa8] ss:$16 sps:$4 sm:$0xff]  }
 0x8ce   :  { %4223 = vmatpush2.bf16.msra.mxu0 %v6028_v60  ;;  %4263 = vmatpush2.bf16.msra.mxu1 %v6030_v5  ;;  %v8493_v60 = vld [vmem:[#allocation13 + $0x64] ss:$16 sps:$4 sm:$0xff]   ;;  %v8495_v5 = vld [vmem:[#allocation13 + $0x6c] ss:$16 sps:$4 sm:$0xff]  }
 0x8cf   :  { %4224 = vmatprep.subr.bf16.mxu0 %v6025_v7  ;;  %4264 = vmatprep.subr.bf16.mxu1 %v6027_v16  ;;  %v8499_v7 = vld [vmem:[#allocation13 + $0x60] ss:$16 sps:$4 sm:$0xff]   ;;  %v8501_v16 = vld [vmem:[#allocation13 + $0x68] ss:$16 sps:$4 sm:$0xff]  }
 0x8d2   :  { %4225 = vmatpush2.bf16.msra.mxu0 %v6024_v40  ;;  %4265 = vmatpush2.bf16.msra.mxu1 %v6026_v3  ;;  %v8517_v40 = vld [vmem:[#allocation13 + $0x24] ss:$16 sps:$4 sm:$0xff]   ;;  %v8519_v3 = vld [vmem:[#allocation13 + $0x2c] ss:$16 sps:$4 sm:$0xff]  }
 0x8d3   :  { %4226 = vmatprep.subr.bf16.mxu0 %v6021_v61  ;;  %4266 = vmatprep.subr.bf16.mxu1 %v6023_v63  ;;  %v8523_v61 = vld [vmem:[#allocation13 + $0x20] ss:$16 sps:$4 sm:$0xff]   ;;  %v8525_v63 = vld [vmem:[#allocation13 + $0x28] ss:$16 sps:$4 sm:$0xff]  }
 0x8d6   :  { %4227 = vmatpush2.bf16.msra.mxu0 %v6020_v47  ;;  %4267 = vmatpush2.bf16.msra.mxu1 %v6022_v35  ;;  %v3279_v47 = vld [vmem:[%s9071_s6] sm:$0xf] }
 0x8d7   :  { %4228 = vmatprep.subr.bf16.mxu0 %v6017_v58  ;;  %4268 = vmatprep.subr.bf16.mxu1 %v6019_v51  ;;  %v8593_v25 = vrot.slane %v3279_v47, %v9449_v14  ;;  %v8603_v17 = vrot.slane %v3279_v47, %v9453_v18 }
 0x8da   :  { %4229 = vmatpush2.bf16.msra.mxu0 %v6016_v26  ;;  %4269 = vmatpush2.bf16.msra.mxu1 %v6018_v54  ;;  %v8596_v26 = vrot.slane %v3279_v47, %v9450_v53 }
 0x8db   :  { %4230 = vmatprep.subr.bf16.mxu0 %v6013_v4  ;;  %4270 = vmatprep.subr.bf16.mxu1 %v6015_v8  ;;  %v9451_v8 = vld [vmem:[#allocation44_spill] sm:$0xff] }
 0x8dc   :  { %v9452_v41 = vsub.s32 1, %v9451_v8 }
 0x8de   :  { %4231 = vmatpush2.bf16.msra.mxu0 %v6012_v11  ;;  %4271 = vmatpush2.bf16.msra.mxu1 %v6014_v13  ;;  %v8600_v12 = vrot.slane %v3279_v47, %v9452_v41 }
 0x8df   :  { %4232 = vmatprep.subr.bf16.mxu0 %v6009_v42  ;;  %4272 = vmatprep.subr.bf16.mxu1 %v6011_v43 }
 0x8e2   :  { %4233 = vmatpush2.bf16.msra.mxu0 %v6008_v48  ;;  %4273 = vmatpush2.bf16.msra.mxu1 %v6010_v31 }
 0x8e3   :  { %4234 = vmatprep.subr.bf16.mxu0 %v6005_v9  ;;  %4274 = vmatprep.subr.bf16.mxu1 %v6007_v15 }
 0x8e6   :  { %4235 = vmatpush2.bf16.msra.mxu0 %v6004_v45  ;;  %4275 = vmatpush2.bf16.msra.mxu1 %v6006_v24 }
 0x8e7   :  { %4481 = vmatprep.subr.bf16.mxu0 %v8443_v28  ;;  %4522 = vmatprep.subr.bf16.mxu1 %v8445_v33 }
 0x8e9   :  { %4237 = vmatmul.mubr.bf16.vlgmr.msra.gmra.mxu0 %v3801_v30  ;;  %4277 = vmatmul.mubr.bf16.vlgmr.msra.gmra.mxu1 %v3801_v30 }
 0x8ea   :  { %4482 = vmatpush1.bf16.msra.mxu0 %v8447_v49  ;;  %4523 = vmatpush1.bf16.msra.mxu1 %v8449_v29 }
 0x8eb   :  { %4483 = vmatprep.subr.bf16.mxu0 %v8455_v36  ;;  %4524 = vmatprep.subr.bf16.mxu1 %v8457_v34 }
 0x8ec   :  { %4513 = vmatprep.mubr.bf16.mxu0 %v9203_v1  ;;  %4554 = vmatprep.mubr.bf16.mxu1 %v9203_v1 }
 0x8ee   :  { %4484 = vmatpush1.bf16.msra.mxu0 %v8461_v2  ;;  %4525 = vmatpush1.bf16.msra.mxu1 %v8463_v46 }
 0x8ef   :  { %4485 = vmatprep.subr.bf16.mxu0 %v8467_v38  ;;  %4526 = vmatprep.subr.bf16.mxu1 %v8469_v57 }
 0x8f2   :  { %4486 = vmatpush1.bf16.msra.mxu0 %v8475_v56  ;;  %4527 = vmatpush1.bf16.msra.mxu1 %v8477_v19 }
 0x8f3   :  { %4487 = vmatprep.subr.bf16.mxu0 %v8481_v59  ;;  %4528 = vmatprep.subr.bf16.mxu1 %v8483_v22 }
 0x8f6   :  { %4488 = vmatpush1.bf16.msra.mxu0 %v8487_v39  ;;  %4529 = vmatpush1.bf16.msra.mxu1 %v8489_v62 }
 0x8f7   :  { %4489 = vmatprep.subr.bf16.mxu0 %v8493_v60  ;;  %4530 = vmatprep.subr.bf16.mxu1 %v8495_v5 }
 0x8fa   :  { %4490 = vmatpush1.bf16.msra.mxu0 %v8499_v7  ;;  %4531 = vmatpush1.bf16.msra.mxu1 %v8501_v16 }
 0x8fb   :  { %4491 = vmatprep.subr.bf16.mxu0 %v8505_v10  ;;  %4532 = vmatprep.subr.bf16.mxu1 %v8507_v6 }
 0x8fe   :  { %4492 = vmatpush1.bf16.msra.mxu0 %v8511_v37  ;;  %4533 = vmatpush1.bf16.msra.mxu1 %v8513_v21 }
 0x8ff   :  { %4493 = vmatprep.subr.bf16.mxu0 %v8517_v40  ;;  %4534 = vmatprep.subr.bf16.mxu1 %v8519_v3 }
 0x902   :  { %4494 = vmatpush1.bf16.msra.mxu0 %v8523_v61  ;;  %4535 = vmatpush1.bf16.msra.mxu1 %v8525_v63 }
 0x903   :  { %4495 = vmatprep.subr.bf16.mxu0 %v8529_v50  ;;  %4536 = vmatprep.subr.bf16.mxu1 %v8531_v0 }
 0x906   :  { %4496 = vmatpush1.bf16.msra.mxu0 %v8535_v52  ;;  %4537 = vmatpush1.bf16.msra.mxu1 %v8537_v55 }
 0x907   :  { %4597 = vmatprep.subr.bf16.mxu0 %v8443_v28  ;;  %4638 = vmatprep.subr.bf16.mxu1 %v8445_v33 }
 0x909   :  { %4514 = vmatmul.mubr.bf16.vlgmr.msra.gmra.mxu0 %v9203_v1  ;;  %4555 = vmatmul.mubr.bf16.vlgmr.msra.gmra.mxu1 %v9203_v1 }
 0x90a   :  { %4598 = vmatpush1.bf16.msra.mxu0 %v8447_v49  ;;  %4639 = vmatpush1.bf16.msra.mxu1 %v8449_v29 }
 0x90b   :  { %4599 = vmatprep.subr.bf16.mxu0 %v8455_v36  ;;  %4640 = vmatprep.subr.bf16.mxu1 %v8457_v34 }
 0x90c   :  { %4629 = vmatprep.mubr.bf16.mxu0 %v9203_v1  ;;  %4670 = vmatprep.mubr.bf16.mxu1 %v9203_v1 }
 0x90e   :  { %4600 = vmatpush1.bf16.msra.mxu0 %v8461_v2  ;;  %4641 = vmatpush1.bf16.msra.mxu1 %v8463_v46 }
 0x90f   :  { %4601 = vmatprep.subr.bf16.mxu0 %v8467_v38  ;;  %4642 = vmatprep.subr.bf16.mxu1 %v8469_v57 }
 0x912   :  { %4602 = vmatpush1.bf16.msra.mxu0 %v8475_v56  ;;  %4643 = vmatpush1.bf16.msra.mxu1 %v8477_v19 }
 0x913   :  { %4603 = vmatprep.subr.bf16.mxu0 %v8481_v59  ;;  %4644 = vmatprep.subr.bf16.mxu1 %v8483_v22 }
 0x916   :  { %4604 = vmatpush1.bf16.msra.mxu0 %v8487_v39  ;;  %4645 = vmatpush1.bf16.msra.mxu1 %v8489_v62 }
 0x917   :  { %4605 = vmatprep.subr.bf16.mxu0 %v8493_v60  ;;  %4646 = vmatprep.subr.bf16.mxu1 %v8495_v5 }
 0x91a   :  { %4606 = vmatpush1.bf16.msra.mxu0 %v8499_v7  ;;  %4647 = vmatpush1.bf16.msra.mxu1 %v8501_v16 }
 0x91b   :  { %4607 = vmatprep.subr.bf16.mxu0 %v8505_v10  ;;  %4648 = vmatprep.subr.bf16.mxu1 %v8507_v6 }
 0x91e   :  { %4608 = vmatpush1.bf16.msra.mxu0 %v8511_v37  ;;  %4649 = vmatpush1.bf16.msra.mxu1 %v8513_v21 }
 0x91f   :  { %4609 = vmatprep.subr.bf16.mxu0 %v8517_v40  ;;  %4650 = vmatprep.subr.bf16.mxu1 %v8519_v3 }
 0x922   :  { %4610 = vmatpush1.bf16.msra.mxu0 %v8523_v61  ;;  %4651 = vmatpush1.bf16.msra.mxu1 %v8525_v63 }
 0x923   :  { %4611 = vmatprep.subr.bf16.mxu0 %v8529_v50  ;;  %4652 = vmatprep.subr.bf16.mxu1 %v8531_v0 }
 0x926   :  { %4612 = vmatpush1.bf16.msra.mxu0 %v8535_v52  ;;  %4653 = vmatpush1.bf16.msra.mxu1 %v8537_v55 }
 0x927   :  { %4713 = vmatprep.subr.bf16.mxu0 %v8443_v28  ;;  %4754 = vmatprep.subr.bf16.mxu1 %v8445_v33 }
 0x969   :  { %v8584_v35 = vpop.f32.mrf.mxu0  ;;  %v8586_v58 = vpop.f32.mrf.mxu1 }
 0x96b   :  { %v8588_v51 = vpop.f32.mrf.mxu0  ;;  %v8590_v44 = vpop.f32.mrf.mxu1 }
 0x96d   :  { %v3659_v54 = vpop.f32.mrf.mxu0  ;;  %v3732_v4 = vpop.f32.mrf.mxu1 }
 0x96e   :  { %v8606_v11 = vadd.f32 %v3659_v54, %v8593_v25  ;;  %v8609_v13 = vadd.f32 %v3732_v4, %v8596_v26 }
 0x96f   :  { %v3661_v42 = vpop.f32.mrf.mxu0  ;;  %v3734_v43 = vpop.f32.mrf.mxu1 }
 0x970   :  { %9454 = vst [vmem:[#allocation102_spill] sm:$0xff] %v8609_v13  ;;  %v8612_v32 = vadd.f32 %v3661_v42, %v8600_v12  ;;  %v8615_v23 = vadd.f32 %v3734_v43, %v8603_v17 }
 0x971   :  { %v3665_v27 = vpop.f32.mrf.mxu0  ;;  %v3738_v20 = vpop.f32.mrf.mxu1 }
 0x972   :  { %9455 = vst [vmem:[#allocation100_spill] sm:$0xff] %v8615_v23  ;;  %v8618_v48 = vadd.f32 %v3665_v27, %v8593_v25  ;;  %v8621_v31 = vadd.f32 %v3738_v20, %v8596_v26 }
 0x973   :  { %v3667_v9 = vpop.f32.mrf.mxu0  ;;  %v3740_v15 = vpop.f32.mrf.mxu1 }
 0x974   :  { %9456 = vst [vmem:[#allocation101_spill] sm:$0xff] %v8618_v48  ;;  %9457 = vst [vmem:[#allocation103_spill] sm:$0xff] %v8621_v31  ;;  %v8624_v45 = vadd.f32 %v3667_v9, %v8600_v12  ;;  %v8627_v24 = vadd.f32 %v3740_v15, %v8603_v17 }
 0x975   :  { %v3669_v30 = vpop.f32.mrf.mxu0  ;;  %v3742_v47 = vpop.f32.mrf.mxu1 }
 0x976   :  { %9458 = vst [vmem:[#allocation60_spill] sm:$0xff] %v8624_v45  ;;  %9459 = vst [vmem:[#allocation58_spill] sm:$0xff] %v8627_v24  ;;  %v8630_v54 = vadd.f32 %v3669_v30, %v8593_v25  ;;  %v8633_v4 = vadd.f32 %v3742_v47, %v8596_v26 }
 0x977   :  { %v3671_v8 = vpop.f32.mrf.mxu0  ;;  %v3744_v41 = vpop.f32.mrf.mxu1 }
 0x978   :  { %9460 = vst [vmem:[#allocation59_spill] sm:$0xff] %v8630_v54  ;;  %9461 = vst [vmem:[#allocation61_spill] sm:$0xff] %v8633_v4  ;;  %v8636_v42 = vadd.f32 %v3671_v8, %v8600_v12  ;;  %v8639_v43 = vadd.f32 %v3744_v41, %v8603_v17 }
 0x979   :  { %v3675_v27 = vpop.f32.mrf.mxu0  ;;  %v3748_v20 = vpop.f32.mrf.mxu1 }
 0x97a   :  { %9462 = vst [vmem:[#allocation96_spill] sm:$0xff] %v8636_v42  ;;  %9463 = vst [vmem:[#allocation98_spill] sm:$0xff] %v8639_v43  ;;  %v8642_v9 = vadd.f32 %v3675_v27, %v8593_v25  ;;  %v8645_v15 = vadd.f32 %v3748_v20, %v8596_v26 }
 0x97b   :  { %v3677_v30 = vpop.f32.mrf.mxu0  ;;  %v3750_v54 = vpop.f32.mrf.mxu1 }
 0x97c   :  { %9464 = vst [vmem:[#allocation97_spill] sm:$0xff] %v8642_v9  ;;  %9465 = vst [vmem:[#allocation99_spill] sm:$0xff] %v8645_v15  ;;  %v8648_v47 = vadd.f32 %v3677_v30, %v8600_v12  ;;  %v8651_v4 = vadd.f32 %v3750_v54, %v8603_v17 }
 0x97d   :  { %v3679_v8 = vpop.f32.mrf.mxu0  ;;  %v3752_v42 = vpop.f32.mrf.mxu1 }
 0x97e   :  { %9466 = vst [vmem:[#allocation50_spill] sm:$0xff] %v8648_v47  ;;  %9467 = vst [vmem:[#allocation47_spill] sm:$0xff] %v8651_v4  ;;  %v8654_v41 = vadd.f32 %v3679_v8, %v8593_v25  ;;  %v8657_v43 = vadd.f32 %v3752_v42, %v8596_v26 }
 0x97f   :  { %v3681_v27 = vpop.f32.mrf.mxu0  ;;  %v3754_v9 = vpop.f32.mrf.mxu1 }
 0x980   :  { %9468 = vst [vmem:[#allocation49_spill] sm:$0xff] %v8654_v41  ;;  %9469 = vst [vmem:[#allocation51_spill] sm:$0xff] %v8657_v43  ;;  %v8660_v20 = vadd.f32 %v3681_v27, %v8600_v12  ;;  %v8663_v15 = vadd.f32 %v3754_v9, %v8603_v17 }
 0x981   :  { %v3685_v30 = vpop.f32.mrf.mxu0  ;;  %v3758_v47 = vpop.f32.mrf.mxu1 }
 0x982   :  { %9470 = vst [vmem:[#allocation104_spill] sm:$0xff] %v8660_v20  ;;  %9471 = vst [vmem:[#allocation106_spill] sm:$0xff] %v8663_v15  ;;  %v8666_v54 = vadd.f32 %v3685_v30, %v8593_v25  ;;  %v8669_v4 = vadd.f32 %v3758_v47, %v8596_v26 }
 0x983   :  { %v3687_v8 = vpop.f32.mrf.mxu0  ;;  %v3760_v41 = vpop.f32.mrf.mxu1 }
 0x984   :  { %9472 = vst [vmem:[#allocation105_spill] sm:$0xff] %v8666_v54  ;;  %9473 = vst [vmem:[#allocation62_spill] sm:$0xff] %v8669_v4  ;;  %v8672_v42 = vadd.f32 %v3687_v8, %v8600_v12  ;;  %v8675_v43 = vadd.f32 %v3760_v41, %v8603_v17  ;;  %v3867_v41 = vld [vmem:[%s9071_s6 + $0x4] sm:$0xf] }
 0x985   :  { %v3689_v27 = vpop.f32.mrf.mxu0  ;;  %v3762_v20 = vpop.f32.mrf.mxu1  ;;  %v3872_v8 = vrot.slane %v3867_v41, %v9449_v14  ;;  %v3876_v24 = vrot.slane %v3867_v41, %v9450_v53  ;;  %v3880_v48 = vrot.slane %v3867_v41, %v9453_v18 }
 0x986   :  { %9474 = vst [vmem:[#allocation64_spill] sm:$0xff] %v8672_v42  ;;  %9475 = vst [vmem:[#allocation63_spill] sm:$0xff] %v8675_v43  ;;  %v8678_v9 = vadd.f32 %v3689_v27, %v8593_v25  ;;  %v8681_v15 = vadd.f32 %v3762_v20, %v8596_v26 }
 0x987   :  { %v3691_v30 = vpop.f32.mrf.mxu0  ;;  %v3764_v54 = vpop.f32.mrf.mxu1 }
 0x988   :  { %9476 = vst [vmem:[#allocation65_spill] sm:$0xff] %v8678_v9  ;;  %9477 = vst [vmem:[#allocation94_spill] sm:$0xff] %v8681_v15  ;;  %v8684_v47 = vadd.f32 %v3691_v30, %v8600_v12  ;;  %v8687_v4 = vadd.f32 %v3764_v54, %v8603_v17 }
 0x98a   :  { %9478 = vst [vmem:[#allocation92_spill] sm:$0xff] %v8684_v47  ;;  %9479 = vst [vmem:[#allocation93_spill] sm:$0xff] %v8687_v4 }
 0x9a9   :  { %v4238_v43 = vpop.f32.mrf.mxu0  ;;  %v4278_v27 = vpop.f32.mrf.mxu1 }
 0x9aa   :  { %v4239_v9 = vadd.f32 %v4238_v43, %v3872_v8  ;;  %v4279_v4 = vadd.f32 %v4278_v27, %v3876_v24  ;;  %v3658_v24 = vadd.f32 %v8588_v51, %v8600_v12  ;;  %v3731_v12 = vadd.f32 %v8590_v44, %v8603_v17 }
 0x9ab   :  { %v4240_v42 = vpop.f32.mrf.mxu0  ;;  %v4280_v20 = vpop.f32.mrf.mxu1 }
 0x9ac   :  { %v6092_v15 = vmul.f32 -1.442695, %v4239_v9  ;;  %v6093_v45 = vmul.f32 -1.442695, %v4279_v4  ;;  %v4281_v23 = vadd.f32 %v4280_v20, %v3880_v48  ;;  %v3656_v42 = vadd.f32 %v8584_v35, %v8593_v25 }
 0x9ad   :  { %v4241_v31 = vpop.f32.mrf.mxu0  ;;  %v4282_v30 = vpop.f32.mrf.mxu1  ;;  %v3729_v20 = vadd.f32 %v8586_v58, %v8596_v26 }
 0x9ae   :  { %6615 = vpow2.f32 %v6092_v15 }
 0x9af   :  { %v4242_v47 = vpop.f32.mrf.mxu0  ;;  %v4283_v54 = vpop.f32.mrf.mxu1  ;;  %6617 = vpow2.f32 %v6093_v45 }
 0x9b0   :  { %6619 = vtanh.f32 %v4281_v23 }
 0x9bb   :  { %v6616_v14 = vpop.eup %6615 }
 0x9bc   :  { %v5409_v13 = vadd.f32 1.0, %v6616_v14  ;;  %v6618_v43 = vpop.eup %6617 }
 0x9bd   :  { %v5410_v53 = vadd.f32 1.0, %v6618_v43  ;;  %v6620_v15 = vpop.eup %6619 }
 0x9be   :  { %6621 = vrcp.f32 %v5409_v13 }
 0x9bf   :  { %6623 = vrcp.f32 %v5410_v53 }
 0x9c9   :  { %v4515_v31 = vpop.f32.mrf.mxu0  ;;  %v4556_v9 = vpop.f32.mrf.mxu1 }
 0x9ca   :  { %v4563_v4 = vadd.f32 %v4515_v31, %v3656_v42  ;;  %v4565_v51 = vadd.f32 %v4556_v9, %v3729_v20 }
 0x9cb   :  { %v6622_v47 = vpop.eup %6621  ;;  %v4517_v18 = vpop.f32.mrf.mxu0 }
 0x9cc   :  { %v4558_v45 = vpop.f32.mrf.mxu1  ;;  %v5416_v48 = vmul.f32 %v6622_v47, %v6620_v15  ;;  %v6068_v41 = vmul.f32 -1.442695, %v4563_v4  ;;  %v4564_v8 = vadd.f32 %v4517_v18, %v3658_v24  ;;  %v6070_v30 = vmul.f32 -1.442695, %v4565_v51  ;;  %v6624_v54 = vpop.eup %6623 }
 0x9cd   :  { %v4519_v13 = vpop.f32.mrf.mxu0  ;;  %v4566_v14 = vadd.f32 %v4558_v45, %v3731_v12 }
 0x9ce   :  { %v4560_v23 = vpop.f32.mrf.mxu1  ;;  %6625 = vtanh.f32 %v5416_v48  ;;  %v6069_v27 = vmul.f32 -1.442695, %v4564_v8 }
 0x9cf   :  { %6627 = vpow2.f32 %v6068_v41  ;;  %v4520_v35 = vpop.f32.mrf.mxu0 }
 0x9d0   :  { %v4561_v25 = vpop.f32.mrf.mxu1  ;;  %6629 = vpow2.f32 %v6069_v27 }
 0x9d1   :  { %6631 = vpow2.f32 %v6070_v30 }
 0x9d2   :  { %6633 = vtanh.f32 %v4566_v14 }
 0x9db   :  { %v6626_v43 = vpop.eup %6625 }
 0x9dc   :  { %v6628_v42 = vpop.eup %6627  ;;  %v8703_v53 = vmul.f32 %v6626_v43, %v6624_v54 }
 0x9dd   :  { %v4576_v31 = vadd.f32 1.0, %v6628_v42  ;;  %v6630_v15 = vpop.eup %6629  ;;  %v9480_v42 = vld [vmem:[#allocation102_spill] sm:$0xff] }
 0x9de   :  { %v4577_v24 = vadd.f32 1.0, %v6630_v15  ;;  %v6632_v4 = vpop.eup %6631 }
 0x9df   :  { %6635 = vrcp.f32 %v4576_v31  ;;  %v6634_v58 = vpop.eup %6633  ;;  %v4578_v44 = vadd.f32 1.0, %v6632_v4 }
 0x9e0   :  { %6637 = vrcp.f32 %v4577_v24  ;;  %v9481_v24 = vld [vmem:[#allocation100_spill] sm:$0xff] }
 0x9e1   :  { %6639 = vrcp.f32 %v4578_v44 }
 0x9ec   :  { %v6636_v26 = vpop.eup %6635 }
 0x9ed   :  { %v4587_v9 = vmul.f32 %v6636_v26, %v6634_v58  ;;  %v6638_v47 = vpop.eup %6637 }
 0x9ee   :  { %v4586_v17 = vmul.f32 0.0, %v6638_v47  ;;  %v6640_v45 = vpop.eup %6639 }
 0x9f0   :  { %v8705_v18 = vadd.f32 %v4587_v9, %v4586_v17 }
 0x9f2   :  { %6641 = vtanh.f32 %v8705_v18 }
 0x9ff   :  { %v6642_v48 = vpop.eup %6641 }
 0xa00   :  { %v4590_v41 = vmul.f32 %v6642_v48, %v6640_v45 }
 0xa02   :  { %v4596_v8 = vpack.c.bf16 %v4590_v41, %v4590_v41 }
 0xa04   :  { %4630 = vmatmul.mubr.bf16.vlgmr.msra.gmra.mxu0 %v4596_v8  ;;  %4671 = vmatmul.mubr.bf16.vlgmr.msra.gmra.mxu1 %v4596_v8 }
 0xa05   :  { %4714 = vmatpush1.bf16.msra.mxu0 %v8447_v49  ;;  %4755 = vmatpush1.bf16.msra.mxu1 %v8449_v29 }
 0xa06   :  { %4715 = vmatprep.subr.bf16.mxu0 %v8455_v36  ;;  %4756 = vmatprep.subr.bf16.mxu1 %v8457_v34 }
 0xa07   :  { %4745 = vmatprep.mubr.bf16.mxu0 %v9203_v1  ;;  %4786 = vmatprep.mubr.bf16.mxu1 %v9203_v1 }
 0xa09   :  { %4716 = vmatpush1.bf16.msra.mxu0 %v8461_v2  ;;  %4757 = vmatpush1.bf16.msra.mxu1 %v8463_v46 }
 0xa0a   :  { %4717 = vmatprep.subr.bf16.mxu0 %v8467_v38  ;;  %4758 = vmatprep.subr.bf16.mxu1 %v8469_v57 }
 0xa0d   :  { %4718 = vmatpush1.bf16.msra.mxu0 %v8475_v56  ;;  %4759 = vmatpush1.bf16.msra.mxu1 %v8477_v19 }
 0xa0e   :  { %4719 = vmatprep.subr.bf16.mxu0 %v8481_v59  ;;  %4760 = vmatprep.subr.bf16.mxu1 %v8483_v22 }
 0xa11   :  { %4720 = vmatpush1.bf16.msra.mxu0 %v8487_v39  ;;  %4761 = vmatpush1.bf16.msra.mxu1 %v8489_v62 }
 0xa12   :  { %4721 = vmatprep.subr.bf16.mxu0 %v8493_v60  ;;  %4762 = vmatprep.subr.bf16.mxu1 %v8495_v5 }
 0xa15   :  { %4722 = vmatpush1.bf16.msra.mxu0 %v8499_v7  ;;  %4763 = vmatpush1.bf16.msra.mxu1 %v8501_v16 }
 0xa16   :  { %4723 = vmatprep.subr.bf16.mxu0 %v8505_v10  ;;  %4764 = vmatprep.subr.bf16.mxu1 %v8507_v6 }
 0xa19   :  { %4724 = vmatpush1.bf16.msra.mxu0 %v8511_v37  ;;  %4765 = vmatpush1.bf16.msra.mxu1 %v8513_v21 }
 0xa1a   :  { %4725 = vmatprep.subr.bf16.mxu0 %v8517_v40  ;;  %4766 = vmatprep.subr.bf16.mxu1 %v8519_v3 }
 0xa1d   :  { %4726 = vmatpush1.bf16.msra.mxu0 %v8523_v61  ;;  %4767 = vmatpush1.bf16.msra.mxu1 %v8525_v63 }
 0xa1e   :  { %4727 = vmatprep.subr.bf16.mxu0 %v8529_v50  ;;  %4768 = vmatprep.subr.bf16.mxu1 %v8531_v0 }
 0xa21   :  { %4728 = vmatpush1.bf16.msra.mxu0 %v8535_v52  ;;  %4769 = vmatpush1.bf16.msra.mxu1 %v8537_v55 }
 0xa22   :  { %4829 = vmatprep.subr.bf16.mxu0 %v8443_v28  ;;  %4870 = vmatprep.subr.bf16.mxu1 %v8445_v33 }
 0xac4   :  { %v4631_v13 = vpop.f32.mrf.mxu0  ;;  %v4672_v23 = vpop.f32.mrf.mxu1 }
 0xac5   :  { %v4679_v27 = vadd.f32 %v4631_v13, %v8606_v11  ;;  %v4681_v31 = vadd.f32 %v4672_v23, %v9480_v42 }
 0xac6   :  { %v4633_v35 = vpop.f32.mrf.mxu0  ;;  %v4674_v25 = vpop.f32.mrf.mxu1 }
 0xac7   :  { %v6071_v20 = vmul.f32 -1.442695, %v4679_v27  ;;  %v4680_v51 = vadd.f32 %v4633_v35, %v8612_v32  ;;  %v6073_v15 = vmul.f32 -1.442695, %v4681_v31  ;;  %v4682_v4 = vadd.f32 %v4674_v25, %v9481_v24 }
 0xac8   :  { %v4635_v12 = vpop.f32.mrf.mxu0  ;;  %v4676_v30 = vpop.f32.mrf.mxu1 }
 0xac9   :  { %6643 = vpow2.f32 %v6071_v20  ;;  %v6072_v54 = vmul.f32 -1.442695, %v4680_v51  ;;  %v9482_v20 = vld [vmem:[#allocation101_spill] sm:$0xff] }
 0xaca   :  { %v4636_v14 = vpop.f32.mrf.mxu0  ;;  %v4677_v43 = vpop.f32.mrf.mxu1 }
 0xacb   :  { %6645 = vpow2.f32 %v6072_v54  ;;  %v9483_v14 = vld [vmem:[#allocation60_spill] sm:$0xff] }
 0xacc   :  { %6647 = vpow2.f32 %v6073_v15 }
 0xacd   :  { %6649 = vtanh.f32 %v4682_v4 }
 0xad6   :  { %v6644_v58 = vpop.eup %6643 }
 0xad7   :  { %v4692_v26 = vadd.f32 1.0, %v6644_v58  ;;  %v9484_v58 = vld [vmem:[#allocation103_spill] sm:$0xff] }
 0xad8   :  { %v6646_v11 = vpop.eup %6645 }
 0xad9   :  { %6651 = vrcp.f32 %v4692_v26  ;;  %v4693_v9 = vadd.f32 1.0, %v6646_v11  ;;  %v6648_v32 = vpop.eup %6647 }
 0xada   :  { %v6650_v47 = vpop.eup %6649  ;;  %v4694_v48 = vadd.f32 1.0, %v6648_v32 }
 0xadb   :  { %6653 = vrcp.f32 %v4693_v9  ;;  %v9485_v9 = vld [vmem:[#allocation58_spill] sm:$0xff] }
 0xadc   :  { %6655 = vrcp.f32 %v4694_v48 }
 0xae6   :  { %v6652_v44 = vpop.eup %6651 }
 0xae7   :  { %v4703_v17 = vmul.f32 %v6652_v44, %v6650_v47 }
 0xae8   :  { %v6654_v45 = vpop.eup %6653 }
 0xae9   :  { %v4702_v41 = vmul.f32 %v6654_v45, %v8705_v18  ;;  %v6656_v13 = vpop.eup %6655 }
 0xaeb   :  { %v8747_v8 = vadd.f32 %v4703_v17, %v4702_v41 }
 0xaed   :  { %6657 = vtanh.f32 %v8747_v8 }
 0xafa   :  { %v6658_v23 = vpop.eup %6657 }
 0xafb   :  { %v4706_v27 = vmul.f32 %v6658_v23, %v6656_v13 }
 0xafd   :  { %v4712_v35 = vpack.c.bf16 %v4706_v27, %v4706_v27 }
 0xaff   :  { %4746 = vmatmul.mubr.bf16.vlgmr.msra.gmra.mxu0 %v4712_v35  ;;  %4787 = vmatmul.mubr.bf16.vlgmr.msra.gmra.mxu1 %v4712_v35 }
 0xb00   :  { %4830 = vmatpush1.bf16.msra.mxu0 %v8447_v49  ;;  %4871 = vmatpush1.bf16.msra.mxu1 %v8449_v29 }
 0xb01   :  { %4831 = vmatprep.subr.bf16.mxu0 %v8455_v36  ;;  %4872 = vmatprep.subr.bf16.mxu1 %v8457_v34 }
 0xb02   :  { %4861 = vmatprep.mubr.bf16.mxu0 %v9203_v1  ;;  %4902 = vmatprep.mubr.bf16.mxu1 %v9203_v1 }
 0xb04   :  { %4832 = vmatpush1.bf16.msra.mxu0 %v8461_v2  ;;  %4873 = vmatpush1.bf16.msra.mxu1 %v8463_v46 }
 0xb05   :  { %4833 = vmatprep.subr.bf16.mxu0 %v8467_v38  ;;  %4874 = vmatprep.subr.bf16.mxu1 %v8469_v57 }
 0xb08   :  { %4834 = vmatpush1.bf16.msra.mxu0 %v8475_v56  ;;  %4875 = vmatpush1.bf16.msra.mxu1 %v8477_v19 }
 0xb09   :  { %4835 = vmatprep.subr.bf16.mxu0 %v8481_v59  ;;  %4876 = vmatprep.subr.bf16.mxu1 %v8483_v22 }
 0xb0c   :  { %4836 = vmatpush1.bf16.msra.mxu0 %v8487_v39  ;;  %4877 = vmatpush1.bf16.msra.mxu1 %v8489_v62 }
 0xb0d   :  { %4837 = vmatprep.subr.bf16.mxu0 %v8493_v60  ;;  %4878 = vmatprep.subr.bf16.mxu1 %v8495_v5 }
 0xb10   :  { %4838 = vmatpush1.bf16.msra.mxu0 %v8499_v7  ;;  %4879 = vmatpush1.bf16.msra.mxu1 %v8501_v16 }
 0xb11   :  { %4839 = vmatprep.subr.bf16.mxu0 %v8505_v10  ;;  %4880 = vmatprep.subr.bf16.mxu1 %v8507_v6 }
 0xb14   :  { %4840 = vmatpush1.bf16.msra.mxu0 %v8511_v37  ;;  %4881 = vmatpush1.bf16.msra.mxu1 %v8513_v21 }
 0xb15   :  { %4841 = vmatprep.subr.bf16.mxu0 %v8517_v40  ;;  %4882 = vmatprep.subr.bf16.mxu1 %v8519_v3 }
 0xb18   :  { %4842 = vmatpush1.bf16.msra.mxu0 %v8523_v61  ;;  %4883 = vmatpush1.bf16.msra.mxu1 %v8525_v63 }
 0xb19   :  { %4843 = vmatprep.subr.bf16.mxu0 %v8529_v50  ;;  %4884 = vmatprep.subr.bf16.mxu1 %v8531_v0 }
 0xb1c   :  { %4844 = vmatpush1.bf16.msra.mxu0 %v8535_v52  ;;  %4885 = vmatpush1.bf16.msra.mxu1 %v8537_v55 }
 0xb1d   :  { %4945 = vmatprep.subr.bf16.mxu0 %v8443_v28  ;;  %4986 = vmatprep.subr.bf16.mxu1 %v8445_v33 }
 0xbbf   :  { %v4747_v18 = vpop.f32.mrf.mxu0  ;;  %v4788_v25 = vpop.f32.mrf.mxu1 }
 0xbc0   :  { %v4795_v51 = vadd.f32 %v4747_v18, %v9482_v20  ;;  %v4797_v26 = vadd.f32 %v4788_v25, %v9484_v58 }
 0xbc1   :  { %v4749_v12 = vpop.f32.mrf.mxu0  ;;  %v4790_v30 = vpop.f32.mrf.mxu1 }
 0xbc2   :  { %v6074_v54 = vmul.f32 -1.442695, %v4795_v51  ;;  %v4796_v43 = vadd.f32 %v4749_v12, %v9483_v14  ;;  %v6076_v11 = vmul.f32 -1.442695, %v4797_v26  ;;  %v4798_v32 = vadd.f32 %v4790_v30, %v9485_v9  ;;  %v9486_v14 = vld [vmem:[#allocation59_spill] sm:$0xff] }
 0xbc3   :  { %v4751_v42 = vpop.f32.mrf.mxu0  ;;  %v4792_v31 = vpop.f32.mrf.mxu1 }
 0xbc4   :  { %6659 = vpow2.f32 %v6074_v54  ;;  %v6075_v15 = vmul.f32 -1.442695, %v4796_v43 }
 0xbc5   :  { %v4752_v24 = vpop.f32.mrf.mxu0  ;;  %v4793_v4 = vpop.f32.mrf.mxu1 }
 0xbc6   :  { %6661 = vpow2.f32 %v6075_v15  ;;  %v9487_v24 = vld [vmem:[#allocation96_spill] sm:$0xff] }
 0xbc7   :  { %6663 = vpow2.f32 %v6076_v11 }
 0xbc8   :  { %6665 = vtanh.f32 %v4798_v32 }
 0xbd1   :  { %v6660_v47 = vpop.eup %6659 }
 0xbd2   :  { %v4808_v44 = vadd.f32 1.0, %v6660_v47  ;;  %v9488_v47 = vld [vmem:[#allocation61_spill] sm:$0xff] }
 0xbd3   :  { %v6662_v17 = vpop.eup %6661 }
 0xbd4   :  { %6667 = vrcp.f32 %v4808_v44  ;;  %v4809_v45 = vadd.f32 1.0, %v6662_v17  ;;  %v6664_v48 = vpop.eup %6663 }
 0xbd5   :  { %v6666_v41 = vpop.eup %6665  ;;  %v4810_v35 = vadd.f32 1.0, %v6664_v48 }
 0xbd6   :  { %6669 = vrcp.f32 %v4809_v45  ;;  %v9489_v45 = vld [vmem:[#allocation98_spill] sm:$0xff] }
 0xbd7   :  { %6671 = vrcp.f32 %v4810_v35 }
 0xbe1   :  { %v6668_v13 = vpop.eup %6667 }
 0xbe2   :  { %v4819_v23 = vmul.f32 %v6668_v13, %v6666_v41 }
 0xbe3   :  { %v6670_v27 = vpop.eup %6669 }
 0xbe4   :  { %v4818_v18 = vmul.f32 %v6670_v27, %v8747_v8  ;;  %v6672_v20 = vpop.eup %6671 }
 0xbe6   :  { %v8789_v25 = vadd.f32 %v4819_v23, %v4818_v18 }
 0xbe8   :  { %6673 = vtanh.f32 %v8789_v25 }
 0xbf5   :  { %v6674_v51 = vpop.eup %6673 }
 0xbf6   :  { %v4822_v12 = vmul.f32 %v6674_v51, %v6672_v20 }
 0xbf8   :  { %v4828_v30 = vpack.c.bf16 %v4822_v12, %v4822_v12 }
 0xbfa   :  { %4862 = vmatmul.mubr.bf16.vlgmr.msra.gmra.mxu0 %v4828_v30  ;;  %4903 = vmatmul.mubr.bf16.vlgmr.msra.gmra.mxu1 %v4828_v30 }
 0xbfb   :  { %4946 = vmatpush1.bf16.msra.mxu0 %v8447_v49  ;;  %4987 = vmatpush1.bf16.msra.mxu1 %v8449_v29 }
 0xbfc   :  { %4947 = vmatprep.subr.bf16.mxu0 %v8455_v36  ;;  %4988 = vmatprep.subr.bf16.mxu1 %v8457_v34 }
 0xbfd   :  { %4977 = vmatprep.mubr.bf16.mxu0 %v9203_v1  ;;  %5018 = vmatprep.mubr.bf16.mxu1 %v9203_v1 }
 0xbff   :  { %4948 = vmatpush1.bf16.msra.mxu0 %v8461_v2  ;;  %4989 = vmatpush1.bf16.msra.mxu1 %v8463_v46 }
 0xc00   :  { %4949 = vmatprep.subr.bf16.mxu0 %v8467_v38  ;;  %4990 = vmatprep.subr.bf16.mxu1 %v8469_v57 }
 0xc03   :  { %4950 = vmatpush1.bf16.msra.mxu0 %v8475_v56  ;;  %4991 = vmatpush1.bf16.msra.mxu1 %v8477_v19 }
 0xc04   :  { %4951 = vmatprep.subr.bf16.mxu0 %v8481_v59  ;;  %4992 = vmatprep.subr.bf16.mxu1 %v8483_v22 }
 0xc07   :  { %4952 = vmatpush1.bf16.msra.mxu0 %v8487_v39  ;;  %4993 = vmatpush1.bf16.msra.mxu1 %v8489_v62 }
 0xc08   :  { %4953 = vmatprep.subr.bf16.mxu0 %v8493_v60  ;;  %4994 = vmatprep.subr.bf16.mxu1 %v8495_v5 }
 0xc0b   :  { %4954 = vmatpush1.bf16.msra.mxu0 %v8499_v7  ;;  %4995 = vmatpush1.bf16.msra.mxu1 %v8501_v16 }
 0xc0c   :  { %4955 = vmatprep.subr.bf16.mxu0 %v8505_v10  ;;  %4996 = vmatprep.subr.bf16.mxu1 %v8507_v6 }
 0xc0f   :  { %4956 = vmatpush1.bf16.msra.mxu0 %v8511_v37  ;;  %4997 = vmatpush1.bf16.msra.mxu1 %v8513_v21 }
 0xc10   :  { %4957 = vmatprep.subr.bf16.mxu0 %v8517_v40  ;;  %4998 = vmatprep.subr.bf16.mxu1 %v8519_v3 }
 0xc13   :  { %4958 = vmatpush1.bf16.msra.mxu0 %v8523_v61  ;;  %4999 = vmatpush1.bf16.msra.mxu1 %v8525_v63 }
 0xc14   :  { %4959 = vmatprep.subr.bf16.mxu0 %v8529_v50  ;;  %5000 = vmatprep.subr.bf16.mxu1 %v8531_v0 }
 0xc17   :  { %4960 = vmatpush1.bf16.msra.mxu0 %v8535_v52  ;;  %5001 = vmatpush1.bf16.msra.mxu1 %v8537_v55 }
 0xc18   :  { %5061 = vmatprep.subr.bf16.mxu0 %v8443_v28  ;;  %5102 = vmatprep.subr.bf16.mxu1 %v8445_v33 }
 0xcba   :  { %v4863_v8 = vpop.f32.mrf.mxu0  ;;  %v4904_v54 = vpop.f32.mrf.mxu1 }
 0xcbb   :  { %v4911_v43 = vadd.f32 %v4863_v8, %v9486_v14  ;;  %v4913_v44 = vadd.f32 %v4904_v54, %v9488_v47  ;;  %v8896_v47 = vld [vmem:[#allocation13 + $0xa4] ss:$16 sps:$4 sm:$0xff]  }
 0xcbc   :  { %v4865_v42 = vpop.f32.mrf.mxu0  ;;  %v4906_v31 = vpop.f32.mrf.mxu1 }
 0xcbd   :  { %v6077_v15 = vmul.f32 -1.442695, %v4911_v43  ;;  %v4912_v4 = vadd.f32 %v4865_v42, %v9487_v24  ;;  %v6079_v17 = vmul.f32 -1.442695, %v4913_v44  ;;  %v4914_v48 = vadd.f32 %v4906_v31, %v9489_v45  ;;  %v8899_v44 = vld [vmem:[#allocation13 + $0xac] ss:$16 sps:$4 sm:$0xff]  }
 0xcbe   :  { %v4867_v58 = vpop.f32.mrf.mxu0  ;;  %v4908_v26 = vpop.f32.mrf.mxu1  ;;  %v8905_v45 = vld [vmem:[#allocation13 + $0xa8] ss:$16 sps:$4 sm:$0xff]  }
 0xcbf   :  { %6675 = vpow2.f32 %v6077_v15  ;;  %v6078_v11 = vmul.f32 -1.442695, %v4912_v4  ;;  %v8876_v4 = vld [vmem:[#allocation13 + $0xe0] ss:$16 sps:$4 sm:$0xff]   ;;  %v8879_v58 = vld [vmem:[#allocation13 + $0xe8] ss:$16 sps:$4 sm:$0xff]  }
 0xcc0   :  { %v4868_v9 = vpop.f32.mrf.mxu0  ;;  %v4909_v32 = vpop.f32.mrf.mxu1  ;;  %v8882_v26 = vld [vmem:[#allocation13 + $0xc4] ss:$16 sps:$4 sm:$0xff]  }
 0xcc1   :  { %6677 = vpow2.f32 %v6078_v11  ;;  %v8885_v11 = vld [vmem:[#allocation13 + $0xcc] ss:$16 sps:$4 sm:$0xff]   ;;  %v8890_v9 = vld [vmem:[#allocation13 + $0xc0] ss:$16 sps:$4 sm:$0xff]   ;;  %v8893_v32 = vld [vmem:[#allocation13 + $0xc8] ss:$16 sps:$4 sm:$0xff]  }
 0xcc2   :  { %6679 = vpow2.f32 %v6079_v17  ;;  %v8902_v17 = vld [vmem:[#allocation13 + $0xa0] ss:$16 sps:$4 sm:$0xff]  }
 0xcc3   :  { %6681 = vtanh.f32 %v4914_v48  ;;  %v8908_v48 = vld [vmem:[#allocation13 + $0x84] ss:$16 sps:$4 sm:$0xff]  }
 0xccc   :  { %v6676_v41 = vpop.eup %6675 }
 0xccd   :  { %v4924_v13 = vadd.f32 1.0, %v6676_v41  ;;  %v8911_v41 = vld [vmem:[#allocation13 + $0x8c] ss:$16 sps:$4 sm:$0xff]  }
 0xcce   :  { %v6678_v23 = vpop.eup %6677 }
 0xccf   :  { %6683 = vrcp.f32 %v4924_v13  ;;  %v4925_v27 = vadd.f32 1.0, %v6678_v23  ;;  %v6680_v35 = vpop.eup %6679  ;;  %v8914_v13 = vld [vmem:[#allocation13 + $0x80] ss:$16 sps:$4 sm:$0xff]   ;;  %v8917_v23 = vld [vmem:[#allocation13 + $0x88] ss:$16 sps:$4 sm:$0xff]  }
 0xcd0   :  { %v6682_v18 = vpop.eup %6681  ;;  %v4926_v30 = vadd.f32 1.0, %v6680_v35  ;;  %v8923_v35 = vld [vmem:[#allocation13 + $0x6c] ss:$16 sps:$4 sm:$0xff]  }
 0xcd1   :  { %6685 = vrcp.f32 %v4925_v27  ;;  %v8920_v27 = vld [vmem:[#allocation13 + $0x64] ss:$16 sps:$4 sm:$0xff]  }
 0xcd2   :  { %6687 = vrcp.f32 %v4926_v30  ;;  %v8938_v30 = vld [vmem:[#allocation13 + $0x40] ss:$16 sps:$4 sm:$0xff]  }
 0xcdc   :  { %v6684_v20 = vpop.eup %6683 }
 0xcdd   :  { %v4935_v51 = vmul.f32 %v6684_v20, %v6682_v18  ;;  %v8926_v18 = vld [vmem:[#allocation13 + $0x60] ss:$16 sps:$4 sm:$0xff]   ;;  %v8929_v20 = vld [vmem:[#allocation13 + $0x68] ss:$16 sps:$4 sm:$0xff]  }
 0xcde   :  { %v6686_v12 = vpop.eup %6685 }
 0xcdf   :  { %v4934_v8 = vmul.f32 %v6686_v12, %v8789_v25  ;;  %v6688_v14 = vpop.eup %6687  ;;  %v8935_v12 = vld [vmem:[#allocation13 + $0x4c] ss:$16 sps:$4 sm:$0xff]  }
 0xce1   :  { %v8831_v54 = vadd.f32 %v4935_v51, %v4934_v8  ;;  %v8932_v51 = vld [vmem:[#allocation13 + $0x44] ss:$16 sps:$4 sm:$0xff]   ;;  %v8941_v8 = vld [vmem:[#allocation13 + $0x48] ss:$16 sps:$4 sm:$0xff]  }
 0xce3   :  { %6689 = vtanh.f32 %v8831_v54 }
 0xcf0   :  { %v6690_v43 = vpop.eup %6689 }
 0xcf1   :  { %v4938_v42 = vmul.f32 %v6690_v43, %v6688_v14  ;;  %v8947_v14 = vld [vmem:[#allocation13 + $0x2c] ss:$16 sps:$4 sm:$0xff]   ;;  %v8950_v43 = vld [vmem:[#allocation13 + $0x20] ss:$16 sps:$4 sm:$0xff]  }
 0xcf3   :  { %v4944_v31 = vpack.c.bf16 %v4938_v42, %v4938_v42  ;;  %v8953_v42 = vld [vmem:[#allocation13 + $0x28] ss:$16 sps:$4 sm:$0xff]  }
 0xcf5   :  { %4978 = vmatmul.mubr.bf16.vlgmr.msra.gmra.mxu0 %v4944_v31  ;;  %5019 = vmatmul.mubr.bf16.vlgmr.msra.gmra.mxu1 %v4944_v31  ;;  %v8956_v31 = vld [vmem:[#allocation13 + $0x4] ss:$16 sps:$4 sm:$0xff]  }
 0xcf6   :  { %5062 = vmatpush1.bf16.msra.mxu0 %v8447_v49  ;;  %5103 = vmatpush1.bf16.msra.mxu1 %v8449_v29 }
 0xcf7   :  { %5063 = vmatprep.subr.bf16.mxu0 %v8455_v36  ;;  %5104 = vmatprep.subr.bf16.mxu1 %v8457_v34  ;;  %v9490_v36 = vld [vmem:[#allocation97_spill] sm:$0xff] }
 0xcf8   :  { %5093 = vmatprep.mubr.bf16.mxu0 %v9203_v1  ;;  %5134 = vmatprep.mubr.bf16.mxu1 %v9203_v1 }
 0xcfa   :  { %5064 = vmatpush1.bf16.msra.mxu0 %v8461_v2  ;;  %5105 = vmatpush1.bf16.msra.mxu1 %v8463_v46 }
 0xcfb   :  { %5065 = vmatprep.subr.bf16.mxu0 %v8467_v38  ;;  %5106 = vmatprep.subr.bf16.mxu1 %v8469_v57  ;;  %v9491_v57 = vld [vmem:[#allocation50_spill] sm:$0xff] }
 0xcfe   :  { %5066 = vmatpush1.bf16.msra.mxu0 %v8475_v56  ;;  %5107 = vmatpush1.bf16.msra.mxu1 %v8477_v19 }
 0xcff   :  { %5067 = vmatprep.subr.bf16.mxu0 %v8481_v59  ;;  %5108 = vmatprep.subr.bf16.mxu1 %v8483_v22 }
 0xd02   :  { %5068 = vmatpush1.bf16.msra.mxu0 %v8487_v39  ;;  %5109 = vmatpush1.bf16.msra.mxu1 %v8489_v62 }
 0xd03   :  { %5069 = vmatprep.subr.bf16.mxu0 %v8493_v60  ;;  %5110 = vmatprep.subr.bf16.mxu1 %v8495_v5  ;;  %v9492_v60 = vld [vmem:[#allocation99_spill] sm:$0xff] }
 0xd06   :  { %5070 = vmatpush1.bf16.msra.mxu0 %v8499_v7  ;;  %5111 = vmatpush1.bf16.msra.mxu1 %v8501_v16 }
 0xd07   :  { %5071 = vmatprep.subr.bf16.mxu0 %v8505_v10  ;;  %5112 = vmatprep.subr.bf16.mxu1 %v8507_v6 }
 0xd0a   :  { %5072 = vmatpush1.bf16.msra.mxu0 %v8511_v37  ;;  %5113 = vmatpush1.bf16.msra.mxu1 %v8513_v21 }
 0xd0b   :  { %5073 = vmatprep.subr.bf16.mxu0 %v8517_v40  ;;  %5114 = vmatprep.subr.bf16.mxu1 %v8519_v3 }
 0xd0e   :  { %5074 = vmatpush1.bf16.msra.mxu0 %v8523_v61  ;;  %5115 = vmatpush1.bf16.msra.mxu1 %v8525_v63 }
 0xd0f   :  { %5075 = vmatprep.subr.bf16.mxu0 %v8529_v50  ;;  %5116 = vmatprep.subr.bf16.mxu1 %v8531_v0 }
 0xd12   :  { %5076 = vmatpush1.bf16.msra.mxu0 %v8535_v52  ;;  %5117 = vmatpush1.bf16.msra.mxu1 %v8537_v55 }
 0xd13   :  { %5177 = vmatprep.subr.bf16.mxu0 %v8443_v28  ;;  %5218 = vmatprep.subr.bf16.mxu1 %v8445_v33  ;;  %v9493_v33 = vld [vmem:[#allocation47_spill] sm:$0xff] }
 0xdb5   :  { %v4979_v49 = vpop.f32.mrf.mxu0  ;;  %v5020_v29 = vpop.f32.mrf.mxu1 }
 0xdb6   :  { %v5027_v34 = vadd.f32 %v4979_v49, %v9490_v36  ;;  %v5029_v28 = vadd.f32 %v5020_v29, %v9492_v60  ;;  %v8959_v49 = vld [vmem:[#allocation13 + $0xc] ss:$16 sps:$4 sm:$0xff]   ;;  %v8962_v29 = vld [vmem:[#allocation13] ss:$16 sps:$4 sm:$0xff]   ;;  %v8965_v36 = vld [vmem:[#allocation13 + $0x8] ss:$16 sps:$4 sm:$0xff]  }
 0xdb7   :  { %v4981_v2 = vpop.f32.mrf.mxu0  ;;  %v5022_v46 = vpop.f32.mrf.mxu1 }
 0xdb8   :  { %v6080_v38 = vmul.f32 -1.442695, %v5027_v34  ;;  %v5028_v56 = vadd.f32 %v4981_v2, %v9491_v57  ;;  %v6082_v5 = vmul.f32 -1.442695, %v5029_v28  ;;  %v5030_v7 = vadd.f32 %v5022_v46, %v9493_v33  ;;  %v6913_v34 = vld [vmem:[#allocation13 + $0xe4] ss:$16 sps:$4 sm:$0xff]  }
 0xdb9   :  { %v4983_v19 = vpop.f32.mrf.mxu0  ;;  %v5024_v59 = vpop.f32.mrf.mxu1  ;;  %v6914_v2 = vld [vmem:[#allocation13 + $0xec] ss:$16 sps:$4 sm:$0xff]   ;;  %v9494_v57 = vld [vmem:[#allocation49_spill] sm:$0xff] }
 0xdba   :  { %6691 = vpow2.f32 %v6080_v38  ;;  %v6081_v22 = vmul.f32 -1.442695, %v5028_v56 }
 0xdbb   :  { %v4984_v39 = vpop.f32.mrf.mxu0  ;;  %v5025_v62 = vpop.f32.mrf.mxu1 }
 0xdbc   :  { %6693 = vpow2.f32 %v6081_v22  ;;  %v9495_v39 = vld [vmem:[#allocation104_spill] sm:$0xff] }
 0xdbd   :  { %6695 = vpow2.f32 %v6082_v5 }
 0xdbe   :  { %6697 = vtanh.f32 %v5030_v7 }
 0xdc7   :  { %v6692_v16 = vpop.eup %6691 }
 0xdc8   :  { %v5040_v10 = vadd.f32 1.0, %v6692_v16  ;;  %v9496_v16 = vld [vmem:[#allocation51_spill] sm:$0xff] }
 0xdc9   :  { %v6694_v6 = vpop.eup %6693 }
 0xdca   :  { %6699 = vrcp.f32 %v5040_v10  ;;  %v5041_v37 = vadd.f32 1.0, %v6694_v6  ;;  %v6696_v21 = vpop.eup %6695 }
 0xdcb   :  { %v6698_v40 = vpop.eup %6697  ;;  %v5042_v50 = vadd.f32 1.0, %v6696_v21 }
 0xdcc   :  { %6701 = vrcp.f32 %v5041_v37  ;;  %v9497_v37 = vld [vmem:[#allocation106_spill] sm:$0xff] }
 0xdcd   :  { %6703 = vrcp.f32 %v5042_v50 }
 0xdd7   :  { %v6700_v3 = vpop.eup %6699 }
 0xdd8   :  { %v5051_v61 = vmul.f32 %v6700_v3, %v6698_v40 }
 0xdd9   :  { %v6702_v63 = vpop.eup %6701 }
 0xdda   :  { %v5050_v0 = vmul.f32 %v6702_v63, %v8831_v54  ;;  %v6704_v55 = vpop.eup %6703  ;;  %v8944_v54 = vld [vmem:[#allocation13 + $0x24] ss:$16 sps:$4 sm:$0xff]  }
 0xddc   :  { %v8873_v52 = vadd.f32 %v5051_v61, %v5050_v0 }
 0xdde   :  { %6705 = vtanh.f32 %v8873_v52 }
 0xdeb   :  { %v6706_v25 = vpop.eup %6705 }
 0xdec   :  { %v5054_v15 = vmul.f32 %v6706_v25, %v6704_v55 }
 0xdee   :  { %v5060_v24 = vpack.c.bf16 %v5054_v15, %v5054_v15 }
 0xdf0   :  { %5094 = vmatmul.mubr.bf16.vlgmr.msra.gmra.mxu0 %v5060_v24  ;;  %5135 = vmatmul.mubr.bf16.vlgmr.msra.gmra.mxu1 %v5060_v24 }
 0xdf1   :  { %5178 = vmatpush1.bf16.msra.mxu0 %v8876_v4  ;;  %5219 = vmatpush1.bf16.msra.mxu1 %v8879_v58 }
 0xdf2   :  { %5179 = vmatprep.subr.bf16.mxu0 %v8882_v26  ;;  %5220 = vmatprep.subr.bf16.mxu1 %v8885_v11 }
 0xdf3   :  { %5209 = vmatprep.mubr.bf16.mxu0 %v9203_v1  ;;  %5250 = vmatprep.mubr.bf16.mxu1 %v9203_v1 }
 0xdf5   :  { %5180 = vmatpush1.bf16.msra.mxu0 %v8890_v9  ;;  %5221 = vmatpush1.bf16.msra.mxu1 %v8893_v32 }
 0xdf6   :  { %5181 = vmatprep.subr.bf16.mxu0 %v8896_v47  ;;  %5222 = vmatprep.subr.bf16.mxu1 %v8899_v44 }
 0xdf9   :  { %5182 = vmatpush1.bf16.msra.mxu0 %v8902_v17  ;;  %5223 = vmatpush1.bf16.msra.mxu1 %v8905_v45 }
 0xdfa   :  { %5183 = vmatprep.subr.bf16.mxu0 %v8908_v48  ;;  %5224 = vmatprep.subr.bf16.mxu1 %v8911_v41 }
 0xdfd   :  { %5184 = vmatpush1.bf16.msra.mxu0 %v8914_v13  ;;  %5225 = vmatpush1.bf16.msra.mxu1 %v8917_v23 }
 0xdfe   :  { %5185 = vmatprep.subr.bf16.mxu0 %v8920_v27  ;;  %5226 = vmatprep.subr.bf16.mxu1 %v8923_v35 }
 0xe01   :  { %5186 = vmatpush1.bf16.msra.mxu0 %v8926_v18  ;;  %5227 = vmatpush1.bf16.msra.mxu1 %v8929_v20 }
 0xe02   :  { %5187 = vmatprep.subr.bf16.mxu0 %v8932_v51  ;;  %5228 = vmatprep.subr.bf16.mxu1 %v8935_v12 }
 0xe05   :  { %5188 = vmatpush1.bf16.msra.mxu0 %v8938_v30  ;;  %5229 = vmatpush1.bf16.msra.mxu1 %v8941_v8 }
 0xe06   :  { %5189 = vmatprep.subr.bf16.mxu0 %v8944_v54  ;;  %5230 = vmatprep.subr.bf16.mxu1 %v8947_v14 }
 0xe09   :  { %5190 = vmatpush1.bf16.msra.mxu0 %v8950_v43  ;;  %5231 = vmatpush1.bf16.msra.mxu1 %v8953_v42 }
 0xe0a   :  { %5191 = vmatprep.subr.bf16.mxu0 %v8956_v31  ;;  %5232 = vmatprep.subr.bf16.mxu1 %v8959_v49 }
 0xe0d   :  { %5192 = vmatpush1.bf16.msra.mxu0 %v8962_v29  ;;  %5233 = vmatpush1.bf16.msra.mxu1 %v8965_v36 }
 0xe0e   :  { %5293 = vmatprep.subr.bf16.mxu0 %v6913_v34  ;;  %5334 = vmatprep.subr.bf16.mxu1 %v6914_v2 }
 0xeb0   :  { %v5095_v46 = vpop.f32.mrf.mxu0  ;;  %v5136_v38 = vpop.f32.mrf.mxu1 }
 0xeb1   :  { %v5143_v56 = vadd.f32 %v5095_v46, %v9494_v57  ;;  %v5145_v10 = vadd.f32 %v5136_v38, %v9496_v16  ;;  %v6341_v16 = vld [vmem:[#allocation14 + $0x60] sm:$0xff]  }
 0xeb2   :  { %v5097_v19 = vpop.f32.mrf.mxu0  ;;  %v5138_v59 = vpop.f32.mrf.mxu1 }
 0xeb3   :  { %v6083_v22 = vmul.f32 -1.442695, %v5143_v56  ;;  %v5144_v62 = vadd.f32 %v5097_v19, %v9495_v39  ;;  %v6085_v6 = vmul.f32 -1.442695, %v5145_v10  ;;  %v5146_v21 = vadd.f32 %v5138_v59, %v9497_v37  ;;  %v6342_v10 = vld [vmem:[#allocation14 + $0x20] sm:$0xff]   ;;  %v6345_v37 = vld [vmem:[#allocation14 + $0x50] sm:$0xff]  }
 0xeb4   :  { %v5099_v60 = vpop.f32.mrf.mxu0  ;;  %v5140_v28 = vpop.f32.mrf.mxu1  ;;  %v5420_v39 = vpack.c.bf16 %v8703_v53, %v8703_v53  ;;  %v6344_v53 = vld [vmem:[#allocation14 + $0x18] sm:$0xff]  }
 0xeb5   :  { %6707 = vpow2.f32 %v6083_v22  ;;  %v6084_v5 = vmul.f32 -1.442695, %v5144_v62  ;;  %v6335_v62 = vld [vmem:[#allocation14 + $0x78] sm:$0xff]   ;;  %v6337_v28 = vld [vmem:[#allocation14 + $0x70] sm:$0xff]  }
 0xeb6   :  { %v5100_v33 = vpop.f32.mrf.mxu0  ;;  %v5141_v7 = vpop.f32.mrf.mxu1  ;;  %v6336_v60 = vld [vmem:[#allocation14 + $0x38] sm:$0xff]  }
 0xeb7   :  { %6709 = vpow2.f32 %v6084_v5  ;;  %v6338_v5 = vld [vmem:[#allocation14 + $0x30] sm:$0xff]   ;;  %v6339_v33 = vld [vmem:[#allocation14 + $0x68] sm:$0xff]  }
 0xeb8   :  { %6711 = vpow2.f32 %v6085_v6  ;;  %v6340_v7 = vld [vmem:[#allocation14 + $0x28] sm:$0xff]   ;;  %v6343_v6 = vld [vmem:[#allocation14 + $0x58] sm:$0xff]  }
 0xeb9   :  { %6713 = vtanh.f32 %v5146_v21  ;;  %v6346_v21 = vld [vmem:[#allocation14 + $0x10] sm:$0xff]  }
 0xec2   :  { %v6708_v40 = vpop.eup %6707 }
 0xec3   :  { %v5156_v3 = vadd.f32 1.0, %v6708_v40  ;;  %v6347_v40 = vld [vmem:[#allocation14 + $0x48] sm:$0xff]  }
 0xec4   :  { %v6710_v61 = vpop.eup %6709 }
 0xec5   :  { %6715 = vrcp.f32 %v5156_v3  ;;  %v5157_v63 = vadd.f32 1.0, %v6710_v61  ;;  %v6712_v50 = vpop.eup %6711  ;;  %v6348_v3 = vld [vmem:[#allocation14 + $0x8] sm:$0xff]   ;;  %v6349_v61 = vld [vmem:[#allocation14 + $0x40] sm:$0xff]  }
 0xec6   :  { %v6714_v0 = vpop.eup %6713  ;;  %v5158_v24 = vadd.f32 1.0, %v6712_v50  ;;  %v6351_v50 = vld [vmem:[%s9075_s10 + $0x38] sm:$0xff]  }
 0xec7   :  { %6717 = vrcp.f32 %v5157_v63  ;;  %v6350_v63 = vld [vmem:[#allocation14] sm:$0xff]  }
 0xec8   :  { %6719 = vrcp.f32 %v5158_v24  ;;  %v6355_v24 = vld [vmem:[%s9075_s10 + $0x18] sm:$0xff]  }
 0xed2   :  { %v6716_v55 = vpop.eup %6715 }
 0xed3   :  { %v5167_v25 = vmul.f32 %v6716_v55, %v6714_v0  ;;  %v7078_v0 = vmov 0.0   ;;  %v6352_v55 = vld [vmem:[%s9075_s10 + $0x30] sm:$0xff]  }
 0xed4   :  { %v6718_v15 = vpop.eup %6717 }
 0xed5   :  { %v5166_v34 = vmul.f32 %v6718_v15, %v8873_v52  ;;  %v6720_v46 = vpop.eup %6719  ;;  %v6354_v15 = vld [vmem:[%s9075_s10 + $0x20] sm:$0xff]  }
 0xed7   :  { %v8973_v2 = vadd.f32 %v5167_v25, %v5166_v34  ;;  %v6353_v25 = vld [vmem:[%s9075_s10 + $0x28] sm:$0xff]  }
 0xed9   :  { %6721 = vtanh.f32 %v8973_v2 }
 0xee6   :  { %v6722_v38 = vpop.eup %6721 }
 0xee7   :  { %v5170_v57 = vmul.f32 %v6722_v38, %v6720_v46  ;;  %v9502_v46 = vld [vmem:[#allocation65_spill] sm:$0xff] }
 0xee9   :  { %v5176_v56 = vpack.c.bf16 %v5170_v57, %v5170_v57 }
 0xeeb   :  { %5210 = vmatmul.mubr.bf16.vlgmr.msra.gmra.mxu0 %v5176_v56  ;;  %5251 = vmatmul.mubr.bf16.vlgmr.msra.gmra.mxu1 %v5176_v56 }
 0xeec   :  { %5294 = vmatpush1.bf16.msra.mxu0 %v8876_v4  ;;  %5335 = vmatpush1.bf16.msra.mxu1 %v8879_v58  ;;  %v9498_v4 = vld [vmem:[#allocation105_spill] sm:$0xff] }
 0xeed   :  { %5295 = vmatprep.subr.bf16.mxu0 %v8882_v26  ;;  %5336 = vmatprep.subr.bf16.mxu1 %v8885_v11 }
 0xeee   :  { %5325 = vmatprep.mubr.bf16.mxu0 %v9203_v1  ;;  %5366 = vmatprep.mubr.bf16.mxu1 %v9203_v1 }
 0xef0   :  { %5296 = vmatpush1.bf16.msra.mxu0 %v8890_v9  ;;  %5337 = vmatpush1.bf16.msra.mxu1 %v8893_v32  ;;  %v9499_v32 = vld [vmem:[#allocation64_spill] sm:$0xff] }
 0xef1   :  { %5297 = vmatprep.subr.bf16.mxu0 %v8896_v47  ;;  %5338 = vmatprep.subr.bf16.mxu1 %v8899_v44 }
 0xef4   :  { %5298 = vmatpush1.bf16.msra.mxu0 %v8902_v17  ;;  %5339 = vmatpush1.bf16.msra.mxu1 %v8905_v45 }
 0xef5   :  { %5299 = vmatprep.subr.bf16.mxu0 %v8908_v48  ;;  %5340 = vmatprep.subr.bf16.mxu1 %v8911_v41 }
 0xef8   :  { %5300 = vmatpush1.bf16.msra.mxu0 %v8914_v13  ;;  %5341 = vmatpush1.bf16.msra.mxu1 %v8917_v23  ;;  %v9500_v13 = vld [vmem:[#allocation62_spill] sm:$0xff] }
 0xef9   :  { %5301 = vmatprep.subr.bf16.mxu0 %v8920_v27  ;;  %5342 = vmatprep.subr.bf16.mxu1 %v8923_v35  ;;  %v9501_v35 = vld [vmem:[#allocation63_spill] sm:$0xff] }
 0xefc   :  { %5302 = vmatpush1.bf16.msra.mxu0 %v8926_v18  ;;  %5343 = vmatpush1.bf16.msra.mxu1 %v8929_v20 }
 0xefd   :  { %5303 = vmatprep.subr.bf16.mxu0 %v8932_v51  ;;  %5344 = vmatprep.subr.bf16.mxu1 %v8935_v12 }
 0xf00   :  { %5304 = vmatpush1.bf16.msra.mxu0 %v8938_v30  ;;  %5345 = vmatpush1.bf16.msra.mxu1 %v8941_v8 }
 0xf01   :  { %5305 = vmatprep.subr.bf16.mxu0 %v8944_v54  ;;  %5346 = vmatprep.subr.bf16.mxu1 %v8947_v14 }
 0xf04   :  { %5306 = vmatpush1.bf16.msra.mxu0 %v8950_v43  ;;  %5347 = vmatpush1.bf16.msra.mxu1 %v8953_v42 }
 0xf05   :  { %5307 = vmatprep.subr.bf16.mxu0 %v8956_v31  ;;  %5348 = vmatprep.subr.bf16.mxu1 %v8959_v49 }
 0xf08   :  { %5308 = vmatpush1.bf16.msra.mxu0 %v8962_v29  ;;  %5349 = vmatpush1.bf16.msra.mxu1 %v8965_v36 }
 0xf09   :  { %6120 = vmatprep.subr.bf16.mxu0 %v6335_v62  ;;  %6151 = vmatprep.subr.bf16.mxu1 %v7078_v0 }
 0xfab   :  { %v5211_v1 = vpop.f32.mrf.mxu0  ;;  %v5252_v52 = vpop.f32.mrf.mxu1 }
 0xfac   :  { %v5259_v58 = vadd.f32 %v5211_v1, %v9498_v4  ;;  %v5261_v23 = vadd.f32 %v5252_v52, %v9500_v13  ;;  %v9503_v52 = vld [vmem:[#allocation92_spill] sm:$0xff] }
 0xfad   :  { %v5213_v26 = vpop.f32.mrf.mxu0  ;;  %v5254_v11 = vpop.f32.mrf.mxu1 }
 0xfae   :  { %v6086_v9 = vmul.f32 -1.442695, %v5259_v58  ;;  %v5260_v47 = vadd.f32 %v5213_v26, %v9499_v32  ;;  %v6088_v27 = vmul.f32 -1.442695, %v5261_v23  ;;  %v5262_v18 = vadd.f32 %v5254_v11, %v9501_v35 }
 0xfaf   :  { %v5215_v44 = vpop.f32.mrf.mxu0  ;;  %v5256_v17 = vpop.f32.mrf.mxu1 }
 0xfb0   :  { %6723 = vpow2.f32 %v6086_v9  ;;  %v6087_v45 = vmul.f32 -1.442695, %v5260_v47  ;;  %v9504_v47 = vld [vmem:[#allocation94_spill] sm:$0xff] }
 0xfb1   :  { %v5216_v48 = vpop.f32.mrf.mxu0  ;;  %v5257_v41 = vpop.f32.mrf.mxu1 }
 0xfb2   :  { %6725 = vpow2.f32 %v6087_v45  ;;  %v9505_v45 = vld [vmem:[#allocation93_spill] sm:$0xff] }
 0xfb3   :  { %6727 = vpow2.f32 %v6088_v27 }
 0xfb4   :  { %6729 = vtanh.f32 %v5262_v18 }
 0xfbd   :  { %v6724_v20 = vpop.eup %6723 }
 0xfbe   :  { %v5272_v51 = vadd.f32 1.0, %v6724_v20 }
 0xfbf   :  { %v6726_v12 = vpop.eup %6725 }
 0xfc0   :  { %6731 = vrcp.f32 %v5272_v51  ;;  %v5273_v30 = vadd.f32 1.0, %v6726_v12  ;;  %v6728_v8 = vpop.eup %6727 }
 0xfc1   :  { %v6730_v54 = vpop.eup %6729  ;;  %v5274_v31 = vadd.f32 1.0, %v6728_v8 }
 0xfc2   :  { %6733 = vrcp.f32 %v5273_v30 }
 0xfc3   :  { %6735 = vrcp.f32 %v5274_v31 }
 0xfcd   :  { %v6732_v14 = vpop.eup %6731 }
 0xfce   :  { %v5283_v43 = vmul.f32 %v6732_v14, %v6730_v54 }
 0xfcf   :  { %v6734_v42 = vpop.eup %6733 }
 0xfd0   :  { %v5282_v49 = vmul.f32 %v6734_v42, %v8973_v2  ;;  %v6736_v36 = vpop.eup %6735 }
 0xfd2   :  { %v9013_v29 = vadd.f32 %v5283_v43, %v5282_v49  ;;  %v6356_v49 = vld [vmem:[%s9075_s10 + $0x10] sm:$0xff]  }
 0xfd4   :  { %6737 = vtanh.f32 %v9013_v29 }
 0xfe1   :  { %v6738_v19 = vpop.eup %6737 }
 0xfe2   :  { %v5286_v59 = vmul.f32 %v6738_v19, %v6736_v36  ;;  %v6357_v36 = vld [vmem:[%s9075_s10 + $0x8] sm:$0xff]  }
 0xfe4   :  { %v5292_v22 = vpack.c.bf16 %v5286_v59, %v5286_v59  ;;  %v6094_v59 = vld [vmem:[%s9074_s9] ss:$0 sm:$0xff] }
 0xfe6   :  { %5326 = vmatmul.mubr.bf16.vlgmr.msra.gmra.mxu0 %v5292_v22  ;;  %5367 = vmatmul.mubr.bf16.vlgmr.msra.gmra.mxu1 %v5292_v22 }
 0xfe7   :  { %5588 = vmatprep.mubr.bf16.mxu0 %v5420_v39  ;;  %6121 = vmatpush3.bf16.msra.mxu0 %v6336_v60 }
 0xfe8   :  { %6122 = vmatprep.subr.bf16.mxu0 %v6337_v28  ;;  %6152 = vmatpush3.bf16.msra.mxu1 %v6351_v50 }
 0xfe9   :  { %6153 = vmatprep.subr.bf16.mxu1 %v7078_v0  ;;  %6167 = vmatprep.mubr.msk.bf16.mxu1 %vm7079_vm0, %v7078_v0 }
 0xfeb   :  { %6123 = vmatpush3.bf16.msra.mxu0 %v6338_v5 }
 0xfec   :  { %6124 = vmatprep.subr.bf16.mxu0 %v6339_v33  ;;  %6154 = vmatpush3.bf16.msra.mxu1 %v6352_v55 }
 0xfed   :  { %6155 = vmatprep.subr.bf16.mxu1 %v7078_v0 }
 0xfef   :  { %6125 = vmatpush3.bf16.msra.mxu0 %v6340_v7  ;;  %v6111_v7 = vld [vmem:[%s9076_s11] ss:$0 sm:$0xff] }
 0xff0   :  { %6126 = vmatprep.subr.bf16.mxu0 %v6341_v16  ;;  %6156 = vmatpush3.bf16.msra.mxu1 %v6353_v25 }
 0xff1   :  { %6157 = vmatprep.subr.bf16.mxu1 %v7078_v0 }
 0xff3   :  { %6127 = vmatpush3.bf16.msra.mxu0 %v6342_v10 }
 0xff4   :  { %6128 = vmatprep.subr.bf16.mxu0 %v6343_v6  ;;  %6158 = vmatpush3.bf16.msra.mxu1 %v6354_v15 }
 0xff5   :  { %6159 = vmatprep.subr.bf16.mxu1 %v7078_v0 }
 0xff7   :  { %6129 = vmatpush3.bf16.msra.mxu0 %v6344_v53 }
 0xff8   :  { %6130 = vmatprep.subr.bf16.mxu0 %v6345_v37  ;;  %6160 = vmatpush3.bf16.msra.mxu1 %v6355_v24 }
 0xff9   :  { %6161 = vmatprep.subr.bf16.mxu1 %v7078_v0 }
 0xffb   :  { %6131 = vmatpush3.bf16.msra.mxu0 %v6346_v21 }
 0xffc   :  { %6132 = vmatprep.subr.bf16.mxu0 %v6347_v40  ;;  %6162 = vmatpush3.bf16.msra.mxu1 %v6356_v49 }
 0xffd   :  { %6163 = vmatprep.subr.bf16.mxu1 %v7078_v0 }
 0xfff   :  { %6133 = vmatpush3.bf16.msra.mxu0 %v6348_v3 }
0x1000   :  { %6134 = vmatprep.subr.bf16.mxu0 %v6349_v61  ;;  %6164 = vmatpush3.bf16.msra.mxu1 %v6357_v36 }
0x1001   :  { %6165 = vmatprep.subr.bf16.mxu1 %v7078_v0 }
0x1003   :  { %6135 = vmatpush3.bf16.msra.mxu0 %v6350_v63 }
0x10a6   :  { %v5327_v34 = vpop.f32.mrf.mxu0  ;;  %v5368_v2 = vpop.f32.mrf.mxu1 }
0x10a7   :  { %v5375_v38 = vadd.f32 %v5327_v34, %v9502_v46  ;;  %v5377_v44 = vadd.f32 %v5368_v2, %v9504_v47 }
0x10a8   :  { %v5329_v57 = vpop.f32.mrf.mxu0  ;;  %v5370_v56 = vpop.f32.mrf.mxu1 }
0x10a9   :  { %v6089_v1 = vmul.f32 -1.442695, %v5375_v38  ;;  %v5376_v4 = vadd.f32 %v5329_v57, %v9503_v52  ;;  %v6091_v17 = vmul.f32 -1.442695, %v5377_v44  ;;  %v5378_v48 = vadd.f32 %v5370_v56, %v9505_v45 }
0x10aa   :  { %v5331_v58 = vpop.f32.mrf.mxu0  ;;  %v5372_v26 = vpop.f32.mrf.mxu1 }
0x10ab   :  { %6739 = vpow2.f32 %v6089_v1  ;;  %v6090_v11 = vmul.f32 -1.442695, %v5376_v4 }
0x10ac   :  { %v5332_v9 = vpop.f32.mrf.mxu0  ;;  %v5373_v32 = vpop.f32.mrf.mxu1 }
0x10ad   :  { %6741 = vpow2.f32 %v6090_v11 }
0x10ae   :  { %6743 = vpow2.f32 %v6091_v17 }
0x10af   :  { %6745 = vtanh.f32 %v5378_v48 }
0x10b8   :  { %v6740_v41 = vpop.eup %6739 }
0x10b9   :  { %v5388_v13 = vadd.f32 1.0, %v6740_v41 }
0x10ba   :  { %v6742_v23 = vpop.eup %6741 }
0x10bb   :  { %6747 = vrcp.f32 %v5388_v13  ;;  %v5389_v27 = vadd.f32 1.0, %v6742_v23  ;;  %v6744_v35 = vpop.eup %6743 }
0x10bc   :  { %v6746_v18 = vpop.eup %6745  ;;  %v5390_v30 = vadd.f32 1.0, %v6744_v35 }
0x10bd   :  { %6749 = vrcp.f32 %v5389_v27 }
0x10be   :  { %6751 = vrcp.f32 %v5390_v30 }
0x10c8   :  { %v6748_v20 = vpop.eup %6747 }
0x10c9   :  { %v5399_v51 = vmul.f32 %v6748_v20, %v6746_v18 }
0x10ca   :  { %v6750_v12 = vpop.eup %6749 }
0x10cb   :  { %v5398_v8 = vmul.f32 %v6750_v12, %v9013_v29  ;;  %v6752_v14 = vpop.eup %6751  ;;  %v6358_v29 = vld [vmem:[%s9075_s10] sm:$0xff]   ;;  %s7080_s10 = smov [#allocation16]  }
0x10cc   :  { %6166 = vmatpush3.bf16.msra.mxu1 %v6358_v29  ;;  %s5716_s21 = sshll.u32 %s7080_s10, 4  ;;  %s5717_s21 = int_to_ptr.vmem [resolvable:$true] %s5716_s21 }
0x10cd   :  { %v5400_v54 = vadd.f32 %v5399_v51, %v5398_v8  ;;  %s7035_s9 = scalar_lea.vmem %s5717_s21, 128  ;;  %p7040_p3 = scmp.lt.s32.totalorder %s5717_s21, %s5717_s21 }
0x10ce   :  { %p7036_p2 = scmp.ne.s32.totalorder %s5717_s21, %s7035_s9  ;;  %p7041_p4 = scmp.lt.s32.totalorder %s7035_s9, %s7035_s9 }
0x10cf   :  { %6753 = vtanh.f32 %v5400_v54 }
0x10d0   :  { %p7042_p5 = por %p7041_p4, %p7040_p3 }
0x10d2   :  { %p7043_p6 = pnand %p7042_p5, %p7036_p2 }
0x10dc   :  { %v6754_v43 = vpop.eup %6753 }
0x10dd   :  { %v5402_v42 = vmul.f32 %v6754_v43, %v6752_v14 }
0x10df   :  { %v5419_v31 = vpack.c.bf16 %v5402_v42, %v5402_v42 }
0x10e1   :  { %5589 = vmatmul.mubr.bf16.vlgmr.msra.gmra.mxu0 %v5419_v31 }
0x11a1   :  { %v6136_v19 = vpop.f32.mrf.mxu0 }
0x11a3   :  { %v6137_v22 = vpop.f32.mrf.mxu0 }
0x11a4   :  { %v6138_v39 = vadd.f32 %v6137_v22, %v6136_v19 }
0x11a5   :  { %v6139_v62 = vpop.f32.mrf.mxu0 }
0x11a6   :  { %v5591_v60 = vadd.f32 %v6138_v39, %v6094_v59 }
0x11a7   :  { %v6140_v28 = vpop.f32.mrf.mxu0 }
0x11a8   :  { %v5596_v5 = vmax.f32 %v5591_v60, 0.0 }
0x11aa   :  { %v5597_v33 = vpack.c.bf16 %v5596_v5, %v5596_v5 }
0x11ac   :  { %6168 = vmatmul.mubr.bf16.vlgmr.msra.gmra.mxu1 %v5597_v33 }
0x126c   :  { %v5703_v16 = vpop.f32.mrf.mxu1 }
0x126d   :  { %v5704_v10 = vadd.f32 %v6111_v7, %v5703_v16 }
0x126e   :  { %v6169_v6 = vpop.f32.mrf.mxu1 }
0x126f   :  { %5709 = vst [vmem:[#allocation16] sm:$0xff] %v5704_v10 }
0x1270   :  { %v5706_v53 = vpop.f32.mrf.mxu1 }
0x1271   :  { %7046 = shalt.err (!%p7043_p6)
}
0x1272   :  { %5719 = dma.vmem_to_hbm [thread:$0]  %s5717_s21, 128, %s9077_s12, [#allocation7]   ;;  %v6170_v37 = vpop.f32.mrf.mxu1 }
0x1273   :  { %7063 = dma.done.wait [#allocation7], 128  }
0x1274   :  { %7064 = vsyncadd [#allocation7], 4294967168 }
0x1275   :  { %5723 = vsyncpa [#allocation6], 1 }
0x1276   :  { %5724 = vsyncpa [#allocation9], 1 }
0x1277   :  { %5725 = vsyncpa [#allocation12], 1 }
0x1278   :  { %5726 = vsyncpa [#allocation15], 1 }
0x1279   :  { %5727 = vsyncpa [#allocation7], 1 }

</bundles_post_ra>
